<compile_context>
chip_gen: v6e
topology: v6e:2x2x1
jax: 0.10.0
libtpu: 0.0.40
codegen_flags: <defaults>
</compile_context>

<pallas_src>
import functools

import numpy as np
import jax
import jax.numpy as jnp
from jax import lax
from jax.experimental import pallas as pl
from jax.experimental.pallas import tpu as pltpu

# ---------------------------------------------------------------------------
# Model hyper-parameters (small, but consistent with a CLIP-style model)
# ---------------------------------------------------------------------------
B = 2            # image batch
IMG = 32         # input resolution
PATCH = 8        # patch size -> 4x4 = 16 patches
V_WIDTH = 128    # vision transformer width
V_LAYERS = 2
V_HEADS = 4
T_WIDTH = 128    # text transformer width
T_LAYERS = 2
T_HEADS = 4
EMBED = 64       # logical joint embedding dim
EMBED_PAD = 128  # zero-padded embedding dim (lane-dense; norms/logits unchanged)
N_CLS = 4        # number of classes
N_CTX = 4        # number of learnable context tokens
CTX_LEN = 16     # text context length (power of two -> cheap block-diag mask)
DTYPE = jnp.float32      # activations / LN / softmax math
WDTYPE = jnp.bfloat16    # MXU operand dtype (weights + casted activations)

N_PATCHES = (IMG // PATCH) ** 2     # 16
V_SEQ = 1 + N_PATCHES               # 17 (cls + patches)
V_SEQ_PAD = 24                      # padded to a multiple of 8 sublanes
CLS_Q_ROWS = 8                      # last vision layer: queries/MLP only for this slab

_BLK_KEYS = ("ln1_g", "ln1_b", "w_qkv", "b_q", "w_o", "b_o",
             "ln2_g", "ln2_b", "mlp_w1", "mlp_b1", "mlp_w2", "mlp_b2")


# ---------------------------------------------------------------------------
# In-kernel math helpers
# ---------------------------------------------------------------------------
def _ln(x, g, b):
    """LayerNorm with f32 statistics; g/b are (1, D)."""
    x = x.astype(jnp.float32)
    mu = jnp.mean(x, axis=-1, keepdims=True)
    xc = x - mu
    var = jnp.mean(xc * xc, axis=-1, keepdims=True)
    return xc * lax.rsqrt(var + 1e-5) * g + b


def _mm(a, w):
    """MXU matmul: bf16 operands, f32 accumulation (w is already bf16)."""
    return jnp.dot(a.astype(WDTYPE), w, preferred_element_type=jnp.float32)


def _softmax(s):
    s = s - jnp.max(s, axis=-1, keepdims=True)
    p = jnp.exp(s)
    return p * pl.reciprocal(jnp.sum(p, axis=-1, keepdims=True), approx=True)


def _resblocks(x, blk, n_layers, n_heads, mask, last_q_rows=None):
    """CLIP ResidualAttentionBlock stack, fully inside one kernel invocation.

    blk entries are VMEM refs stacked over layers; weights bf16, biases/LN f32.
    The QKV projection is one fused (D, 3D) matmul per layer; the per-head loop
    only holds the (small, unavoidable) Dh=32 score / PV matmuls; head outputs
    are lane-concatenated and hit one full-K (D, D) out-projection matmul.
    If last_q_rows is set, the final layer computes queries + MLP only for the
    leading row-slab (keys/values still use all rows) -- exact for those rows.
    """
    (ln1_g, ln1_b, w_qkv, b_q, w_o, b_o, ln2_g, ln2_b, w1, b1, w2, b2) = blk
    S, D = x.shape
    dh = D // n_heads
    for l in range(n_layers):
        rq = S if (last_q_rows is None or l < n_layers - 1) else last_q_rows
        # ---- multi-head self-attention (fused QKV, fused out-proj) ----
        xa = _ln(x, ln1_g[l], ln1_b[l]).astype(WDTYPE)        # cast once per layer
        qkv = jnp.dot(xa, w_qkv[l], preferred_element_type=jnp.float32)   # (S, 3D)
        q = (qkv[:rq, 0:D] + b_q[l]).astype(WDTYPE)   # 1/sqrt(Dh) pre-folded at init
        k = qkv[:, D:2 * D].astype(WDTYPE)            # b_k dropped: softmax no-op
        v = qkv[:, 2 * D:3 * D].astype(WDTYPE)        # b_v pre-folded into b_o
        heads = []
        for h in range(n_heads):
            hs = slice(h * dh, (h + 1) * dh)
            s = lax.dot_general(q[:, hs], k[:, hs], (((1,), (1,)), ((), ())),
                                preferred_element_type=jnp.float32)       # (rq, S)
            p = _softmax(s + mask[:rq])
            heads.append(jnp.dot(p.astype(WDTYPE), v[:, hs],
                                 preferred_element_type=jnp.float32))     # (rq, dh)
        o = jnp.concatenate(heads, axis=-1).astype(WDTYPE)                # (rq, D)
        x = x[:rq] + jnp.dot(o, w_o[l], preferred_element_type=jnp.float32) + b_o[l]
        # ---- MLP with QuickGELU (OpenAI CLIP) ----
        xm = _ln(x, ln2_g[l], ln2_b[l]).astype(WDTYPE)
        hdn = jnp.dot(xm, w1[l], preferred_element_type=jnp.float32) + b1[l]
        hdn = hdn * jax.nn.sigmoid(1.702 * hdn)
        x = x + jnp.dot(hdn.astype(WDTYPE), w2[l], preferred_element_type=jnp.float32) + b2[l]
    return x


# ---------------------------------------------------------------------------
# Pallas kernels
# ---------------------------------------------------------------------------
def _vision_kernel(patch_ref, conv_w_ref, base_ref, lnpre_g_ref, lnpre_b_ref,
                   *rest, n_layers, n_heads, seq_valid, last_q_rows):
    blk = rest[:12]
    lnpost_g_ref, lnpost_b_ref, vproj_ref, o_ref = rest[12:]
    S_pad = base_ref.shape[0]
    # conv1 (stride==kernel, bias-free) as a matmul; base holds cls+pos (pad rows 0).
    x = _mm(patch_ref[0], conv_w_ref[...]) + base_ref[...]
    x = _ln(x, lnpre_g_ref[...], lnpre_b_ref[...])
    # key-padding mask generated in-kernel (padded key rows >= seq_valid excluded)
    col = lax.broadcasted_iota(jnp.int32, (S_pad, S_pad), 1)
    mask = jnp.where(col < seq_valid, 0.0, -1e9).astype(jnp.float32)
    x = _resblocks(x, blk, n_layers, n_heads, mask, last_q_rows=last_q_rows)
    # fused head: ln_post + visual projection + L2-normalize the CLS token
    cls = x[0:1, :]
    feat = _mm(_ln(cls, lnpost_g_ref[...], lnpost_b_ref[...]), vproj_ref[...])
    feat = feat * lax.rsqrt(jnp.sum(feat * feat, axis=-1, keepdims=True))
    o_ref[0] = feat.astype(o_ref.dtype)


def _text_head_kernel(x_ref, sel_ref, img_ref, scale_ref, *rest,
                      n_layers, n_heads, seq_len):
    blk = rest[:12]
    lnf_g_ref, lnf_b_ref, tproj_ref, o_ref = rest[12:]
    M, D = x_ref.shape                       # M = N_CLS * CTX_LEN (classes stacked on M)
    x = x_ref[...].astype(jnp.float32)
    # block-diagonal causal mask built in-kernel: col in [row & -seq_len, row]
    # (seq_len is a power of two, so the sequence start is one bitwise-and)
    row = lax.broadcasted_iota(jnp.int32, (M, M), 0)
    col = lax.broadcasted_iota(jnp.int32, (M, M), 1)
    seq_start = jnp.bitwise_and(row, -seq_len)
    mask = jnp.where((col <= row) & (col >= seq_start), 0.0, -1e9).astype(jnp.float32)
    x = _resblocks(x, blk, n_layers, n_heads, mask)
    # EOT-row selection as one exact one-hot matmul (no JAX-level gather)
    C = sel_ref.shape[0]
    pos = lax.broadcasted_iota(jnp.int32, (C, M), 1)
    sel = (pos == sel_ref[...]).astype(jnp.float32)                       # (C, M)
    eot = jnp.dot(sel, x, preferred_element_type=jnp.float32)             # (C, D)
    # fused head: ln_final + text projection + L2-normalize + scaled logits
    t = _mm(_ln(eot, lnf_g_ref[...], lnf_b_ref[...]), tproj_ref[...])
    t = t * lax.rsqrt(jnp.sum(t * t, axis=-1, keepdims=True))
    img = img_ref[...].reshape(img_ref.shape[0], img_ref.shape[2])        # (B, E) normalized
    logits = lax.dot_general(img, t, (((1,), (1,)), ((), ())),
                             preferred_element_type=jnp.float32)          # (B, C)
    o_ref[...] = (scale_ref[0] * logits).astype(o_ref.dtype)


# ---------------------------------------------------------------------------
# pallas_call wrappers
# ---------------------------------------------------------------------------
def _const_spec(a):
    """Full-array block, identical for every grid step (weights / biases)."""
    zeros = (0,) * a.ndim
    return pl.BlockSpec(a.shape, lambda i: zeros)


def vision_encoder(patches_padded, p):
    Bx, S_pad, PD = patches_padded.shape
    blk = [p["v_blocks"][k] for k in _BLK_KEYS]
    args = [patches_padded, p["conv_w"], p["v_embed_base"],
            p["v_ln_pre_g"], p["v_ln_pre_b"], *blk,
            p["v_ln_post_g"], p["v_ln_post_b"], p["v_proj"]]
    in_specs = [pl.BlockSpec((1, S_pad, PD), lambda i: (i, 0, 0))]
    in_specs += [_const_spec(a) for a in args[1:]]
    kernel = functools.partial(_vision_kernel, n_layers=V_LAYERS, n_heads=V_HEADS,
                               seq_valid=V_SEQ, last_q_rows=CLS_Q_ROWS)
    return pl.pallas_call(
        kernel,
        out_shape=jax.ShapeDtypeStruct((Bx, 1, EMBED_PAD), DTYPE),
        grid=(Bx,),
        in_specs=in_specs,
        out_specs=pl.BlockSpec((1, 1, EMBED_PAD), lambda i: (i, 0, 0)),
        compiler_params=pltpu.CompilerParams(dimension_semantics=("parallel",)),
    )(*args)                                        # (B, 1, EMBED_PAD) normalized


def text_head(x0, sel_idx, img_feats, scale_exp, p):
    blk = [p["t_blocks"][k] for k in _BLK_KEYS]
    args = [x0, sel_idx, img_feats, scale_exp, *blk,
            p["t_ln_final_g"], p["t_ln_final_b"], p["text_projection"]]
    in_specs = [_const_spec(x0), _const_spec(sel_idx), _const_spec(img_feats),
                pl.BlockSpec(memory_space=pltpu.MemorySpace.SMEM)]
    in_specs += [_const_spec(a) for a in args[4:]]
    kernel = functools.partial(_text_head_kernel, n_layers=T_LAYERS, n_heads=T_HEADS,
                               seq_len=CTX_LEN)
    return pl.pallas_call(
        kernel,
        out_shape=jax.ShapeDtypeStruct((img_feats.shape[0], N_CLS), DTYPE),
        grid=(1,),
        in_specs=in_specs,
        out_specs=pl.BlockSpec((img_feats.shape[0], N_CLS), lambda i: (0, 0)),
    )(*args)                                        # (B, N_CLS) logits


# ---------------------------------------------------------------------------
# CustomCLIP forward (plain-JAX glue around the two kernels)
# ---------------------------------------------------------------------------
def patchify_padded(img, patch, s_pad):
    # NCHW -> (B, n_patches, C*ph*pw) in torch Conv2d weight order; pad the sequence
    # axis: row 0 is the cls slot (zeros -> contributes 0 to the matmul) and the tail
    # pads the sequence to a multiple of 8 sublanes.
    Bi, C, H, W = img.shape
    hp, wp = H // patch, W // patch
    x = img.reshape(Bi, C, hp, patch, wp, patch)
    x = x.transpose(0, 2, 4, 1, 3, 5).reshape(Bi, hp * wp, C * patch * patch)
    return jnp.pad(x, ((0, 0), (1, s_pad - 1 - hp * wp), (0, 0)))


def prompt_learner(p):
    # class_token_position == 'end':  [prefix(SOS) | ctx | suffix(class, ., EOS, pad)]
    ctx = jnp.broadcast_to(p["ctx"][None], (N_CLS, N_CTX, T_WIDTH))
    return jnp.concatenate([p["token_prefix"], ctx, p["token_suffix"]], axis=1)


def custom_clip_forward(image, params):
    patches = patchify_padded(image.astype(DTYPE), PATCH, V_SEQ_PAD)    # (B, 24, 192)
    img_feats = vision_encoder(patches, params)                         # (B, 1, 128), L2-normed
    prompts = prompt_learner(params)                                    # (N_CLS, 16, 128)
    # prompts + positional embedding, classes stacked along the M axis (fuses into
    # the prompt-assembly XLA op; independent of the vision kernel's critical path)
    x0 = (prompts + params["t_pos"][None]).reshape(N_CLS * CTX_LEN, T_WIDTH)
    eot = jnp.argmax(params["tokenized_prompts"], axis=-1).astype(jnp.int32)
    sel_idx = (jnp.arange(N_CLS, dtype=jnp.int32) * CTX_LEN + eot).reshape(N_CLS, 1)
    scale_exp = jnp.exp(params["logit_scale"]).reshape(1).astype(jnp.float32)
    return text_head(x0, sel_idx, img_feats, scale_exp, params)         # (B, N_CLS)


# ---------------------------------------------------------------------------
# Deterministic parameter initialization (with the exact algebraic folds applied)
# ---------------------------------------------------------------------------
def init_params(key):
    keys = list(jax.random.split(key, 64))
    it = iter(keys)

    def nrm(shape, std=0.02):
        return (std * jax.random.normal(next(it), shape)).astype(DTYPE)

    def make_blocks(width, n_layers, n_heads):
        dh = width // n_heads
        scale = float(dh) ** -0.5
        w_q = nrm((n_layers, width, width))
        w_k = nrm((n_layers, width, width))
        w_v = nrm((n_layers, width, width))
        w_o = nrm((n_layers, width, width))
        b_q = nrm((n_layers, 1, width), 0.01)
        # b_k is omitted: q @ b_k is constant along the softmax axis -> exact no-op.
        b_v = nrm((n_layers, 1, width), 0.01)
        b_o = nrm((n_layers, 1, width), 0.01)
        return dict(
            ln1_g=jnp.ones((n_layers, 1, width), DTYPE),
            ln1_b=jnp.zeros((n_layers, 1, width), DTYPE),
            # fused QKV with the 1/sqrt(Dh) attention scale folded into the Q part
            w_qkv=jnp.concatenate([w_q * scale, w_k, w_v], axis=-1).astype(WDTYPE),
            b_q=(b_q * scale).astype(DTYPE),
            w_o=w_o.astype(WDTYPE),
            # b_v folded into b_o (attention rows sum to 1): b_o' = b_o + b_v @ W_o
            b_o=(b_o + jnp.einsum('lxd,lde->lxe', b_v, w_o)).astype(DTYPE),
            ln2_g=jnp.ones((n_layers, 1, width), DTYPE),
            ln2_b=jnp.zeros((n_layers, 1, width), DTYPE),
            mlp_w1=nrm((n_layers, width, 4 * width)).astype(WDTYPE),
            mlp_b1=nrm((n_layers, 1, 4 * width), 0.01),
            mlp_w2=nrm((n_layers, 4 * width, width)).astype(WDTYPE),
            mlp_b2=nrm((n_layers, 1, width), 0.01),
        )

    # vision embedding base: row 0 = class_embedding + pos[0], rows 1..16 = pos[1:17],
    # rows 17..23 = 0 (sequence padded 17 -> 24; padded keys masked inside the kernel)
    class_embedding = nrm((V_WIDTH,))
    v_pos = nrm((V_SEQ, V_WIDTH))
    v_base = jnp.zeros((V_SEQ_PAD, V_WIDTH), DTYPE).at[:V_SEQ].set(v_pos)
    v_base = v_base.at[0].add(class_embedding)

    # joint-embedding projections zero-padded EMBED(64) -> 128 columns (lane-dense
    # projections / logit matmul; zero columns leave norms & logits unchanged)
    v_proj = jnp.zeros((V_WIDTH, EMBED_PAD), DTYPE).at[:, :EMBED].set(nrm((V_WIDTH, EMBED)))
    t_proj = jnp.zeros((T_WIDTH, EMBED_PAD), DTYPE).at[:, :EMBED].set(nrm((T_WIDTH, EMBED)))

    # synthetic tokenized prompts: SOS, ctx tokens, class tokens, EOT (= max id -> argmax)
    tok = np.zeros((N_CLS, CTX_LEN), dtype=np.int32)
    tok[:, 0] = 49406
    for c in range(N_CLS):
        name_len = 1 + c
        eot_pos = 1 + N_CTX + name_len
        tok[c, 1:eot_pos] = 400 + c
        tok[c, eot_pos] = 49407

    return dict(
        # visual encoder
        conv_w=nrm((3 * PATCH * PATCH, V_WIDTH)).astype(WDTYPE),   # conv1 (bias-free)
        v_embed_base=v_base,
        v_ln_pre_g=jnp.ones((1, V_WIDTH), DTYPE),
        v_ln_pre_b=jnp.zeros((1, V_WIDTH), DTYPE),
        v_blocks=make_blocks(V_WIDTH, V_LAYERS, V_HEADS),
        v_ln_post_g=jnp.ones((1, V_WIDTH), DTYPE),
        v_ln_post_b=jnp.zeros((1, V_WIDTH), DTYPE),
        v_proj=v_proj.astype(WDTYPE),
        # text encoder
        t_pos=nrm((CTX_LEN, T_WIDTH)),
        t_blocks=make_blocks(T_WIDTH, T_LAYERS, T_HEADS),
        t_ln_final_g=jnp.ones((1, T_WIDTH), DTYPE),
        t_ln_final_b=jnp.zeros((1, T_WIDTH), DTYPE),
        text_projection=t_proj.astype(WDTYPE),
        # prompt learner (synthetic token embeddings for SOS prefix / class+EOS suffix)
        ctx=nrm((N_CTX, T_WIDTH)),
        token_prefix=nrm((N_CLS, 1, T_WIDTH)),
        token_suffix=nrm((N_CLS, CTX_LEN - 1 - N_CTX, T_WIDTH)),
        tokenized_prompts=jnp.asarray(tok),
        # logit scale
        logit_scale=jnp.asarray(np.log(1.0 / 0.07), DTYPE),
    )


# ---------------------------------------------------------------------------
if __name__ == "__main__":
    assert CTX_LEN & (CTX_LEN - 1) == 0, "CTX_LEN must be a power of two"
    key = jax.random.PRNGKey(0)
    pkey, ikey = jax.random.split(key)
    params = init_params(pkey)
    image = jax.random.normal(ikey, (B, 3, IMG, IMG), DTYPE)   # NCHW like PyTorch

    logits = jax.jit(custom_clip_forward)(image, params)
    logits = jax.block_until_ready(logits)

    assert logits.shape == (B, N_CLS), logits.shape
    assert bool(jnp.all(jnp.isfinite(logits)))
    print("KERNEL_OK")
</pallas_src>

<mosaic_0001>
module attributes {stable_mosaic.version = 11 : i64} {
  func.func @_vision_kernel(%arg0: i32, %arg1: memref<1x24x192xf32, #tpu.memory_space<vmem>>, %arg2: memref<192x128xbf16, #tpu.memory_space<vmem>>, %arg3: memref<24x128xf32, #tpu.memory_space<vmem>>, %arg4: memref<1x128xf32, #tpu.memory_space<vmem>>, %arg5: memref<1x128xf32, #tpu.memory_space<vmem>>, %arg6: memref<2x1x128xf32, #tpu.memory_space<vmem>>, %arg7: memref<2x1x128xf32, #tpu.memory_space<vmem>>, %arg8: memref<2x128x384xbf16, #tpu.memory_space<vmem>>, %arg9: memref<2x1x128xf32, #tpu.memory_space<vmem>>, %arg10: memref<2x128x128xbf16, #tpu.memory_space<vmem>>, %arg11: memref<2x1x128xf32, #tpu.memory_space<vmem>>, %arg12: memref<2x1x128xf32, #tpu.memory_space<vmem>>, %arg13: memref<2x1x128xf32, #tpu.memory_space<vmem>>, %arg14: memref<2x128x512xbf16, #tpu.memory_space<vmem>>, %arg15: memref<2x1x512xf32, #tpu.memory_space<vmem>>, %arg16: memref<2x512x128xbf16, #tpu.memory_space<vmem>>, %arg17: memref<2x1x128xf32, #tpu.memory_space<vmem>>, %arg18: memref<1x128xf32, #tpu.memory_space<vmem>>, %arg19: memref<1x128xf32, #tpu.memory_space<vmem>>, %arg20: memref<128x128xbf16, #tpu.memory_space<vmem>>, %arg21: memref<1x1x128xf32, #tpu.memory_space<vmem>>) attributes {dimension_semantics = [#tpu.dimension_semantics<parallel>], iteration_bounds = array<i64: 2>, scalar_prefetch = 0 : i64, scratch_operands = 0 : i64, tpu.core_type = #tpu.core_type<tc>, window_params = [{transform_indices = @transform_0, window_bounds = array<i64: 1, 24, 192>}, {pipeline_mode = #tpu.pipeline_mode<synchronous>, transform_indices = @transform_1, window_bounds = array<i64: 192, 128>}, {pipeline_mode = #tpu.pipeline_mode<synchronous>, transform_indices = @transform_2, window_bounds = array<i64: 24, 128>}, {pipeline_mode = #tpu.pipeline_mode<synchronous>, transform_indices = @transform_3, window_bounds = array<i64: 1, 128>}, {pipeline_mode = #tpu.pipeline_mode<synchronous>, transform_indices = @transform_4, window_bounds = array<i64: 1, 128>}, {pipeline_mode = #tpu.pipeline_mode<synchronous>, transform_indices = @transform_5, window_bounds = array<i64: 2, 1, 128>}, {pipeline_mode = #tpu.pipeline_mode<synchronous>, transform_indices = @transform_6, window_bounds = array<i64: 2, 1, 128>}, {pipeline_mode = #tpu.pipeline_mode<synchronous>, transform_indices = @transform_7, window_bounds = array<i64: 2, 128, 384>}, {pipeline_mode = #tpu.pipeline_mode<synchronous>, transform_indices = @transform_8, window_bounds = array<i64: 2, 1, 128>}, {pipeline_mode = #tpu.pipeline_mode<synchronous>, transform_indices = @transform_9, window_bounds = array<i64: 2, 128, 128>}, {pipeline_mode = #tpu.pipeline_mode<synchronous>, transform_indices = @transform_10, window_bounds = array<i64: 2, 1, 128>}, {pipeline_mode = #tpu.pipeline_mode<synchronous>, transform_indices = @transform_11, window_bounds = array<i64: 2, 1, 128>}, {pipeline_mode = #tpu.pipeline_mode<synchronous>, transform_indices = @transform_12, window_bounds = array<i64: 2, 1, 128>}, {pipeline_mode = #tpu.pipeline_mode<synchronous>, transform_indices = @transform_13, window_bounds = array<i64: 2, 128, 512>}, {pipeline_mode = #tpu.pipeline_mode<synchronous>, transform_indices = @transform_14, window_bounds = array<i64: 2, 1, 512>}, {pipeline_mode = #tpu.pipeline_mode<synchronous>, transform_indices = @transform_15, window_bounds = array<i64: 2, 512, 128>}, {pipeline_mode = #tpu.pipeline_mode<synchronous>, transform_indices = @transform_16, window_bounds = array<i64: 2, 1, 128>}, {pipeline_mode = #tpu.pipeline_mode<synchronous>, transform_indices = @transform_17, window_bounds = array<i64: 1, 128>}, {pipeline_mode = #tpu.pipeline_mode<synchronous>, transform_indices = @transform_18, window_bounds = array<i64: 1, 128>}, {pipeline_mode = #tpu.pipeline_mode<synchronous>, transform_indices = @transform_19, window_bounds = array<i64: 128, 128>}, {transform_indices = @transform_20, window_bounds = array<i64: 1, 1, 128>}]} {
    %c0 = arith.constant 0 : index
    %c0_0 = arith.constant 0 : index
    %c0_1 = arith.constant 0 : index
    %0 = vector.load %arg1[%c0, %c0_0, %c0_1] : memref<1x24x192xf32, #tpu.memory_space<vmem>>, vector<1x24x192xf32>
    %1 = vector.shape_cast %0 : vector<1x24x192xf32> to vector<24x192xf32>
    %c0_2 = arith.constant 0 : index
    %c0_3 = arith.constant 0 : index
    %2 = vector.load %arg2[%c0_2, %c0_3] : memref<192x128xbf16, #tpu.memory_space<vmem>>, vector<192x128xbf16>
    %3 = arith.truncf %1 : vector<24x192xf32> to vector<24x192xbf16>
    %cst = arith.constant dense<0.000000e+00> : vector<24x128xf32>
    %4 = tpu.matmul %3, %2, %cst {dimension_numbers = #tpu.dot_dimension_numbers<[1], [0], [0], [1], [0, 0, 1, 1], [], []>} : vector<24x192xbf16>, vector<192x128xbf16>, vector<24x128xf32> -> vector<24x128xf32>
    %c0_4 = arith.constant 0 : index
    %c0_5 = arith.constant 0 : index
    %5 = vector.load %arg3[%c0_4, %c0_5] : memref<24x128xf32, #tpu.memory_space<vmem>>, vector<24x128xf32>
    %6 = arith.addf %4, %5 : vector<24x128xf32>
    %c0_6 = arith.constant 0 : index
    %c0_7 = arith.constant 0 : index
    %7 = vector.load %arg4[%c0_6, %c0_7] : memref<1x128xf32, #tpu.memory_space<vmem>>, vector<1x128xf32>
    %c0_8 = arith.constant 0 : index
    %c0_9 = arith.constant 0 : index
    %8 = vector.load %arg5[%c0_8, %c0_9] : memref<1x128xf32, #tpu.memory_space<vmem>>, vector<1x128xf32>
    %cst_10 = arith.constant dense<0.000000e+00> : vector<24xf32>
    %9 = vector.multi_reduction <add>, %6, %cst_10 [1] : vector<24x128xf32> to vector<24xf32>
    %10 = vector.shape_cast %9 : vector<24xf32> to vector<24x1xf32>
    %cst_11 = arith.constant 1.280000e+02 : f32
    %11 = vector.broadcast %cst_11 : f32 to vector<24x1xf32>
    %12 = arith.divf %10, %11 : vector<24x1xf32>
    %13 = vector.broadcast %12 : vector<24x1xf32> to vector<24x128xf32>
    %14 = arith.subf %6, %13 : vector<24x128xf32>
    %15 = arith.mulf %14, %14 : vector<24x128xf32>
    %cst_12 = arith.constant dense<0.000000e+00> : vector<24xf32>
    %16 = vector.multi_reduction <add>, %15, %cst_12 [1] : vector<24x128xf32> to vector<24xf32>
    %17 = vector.shape_cast %16 : vector<24xf32> to vector<24x1xf32>
    %cst_13 = arith.constant 1.280000e+02 : f32
    %18 = vector.broadcast %cst_13 : f32 to vector<24x1xf32>
    %19 = arith.divf %17, %18 : vector<24x1xf32>
    %cst_14 = arith.constant 9.99999974E-6 : f32
    %20 = vector.broadcast %cst_14 : f32 to vector<24x1xf32>
    %21 = arith.addf %19, %20 : vector<24x1xf32>
    %22 = math.rsqrt %21 : vector<24x1xf32>
    %23 = vector.broadcast %22 : vector<24x1xf32> to vector<24x128xf32>
    %24 = arith.mulf %14, %23 : vector<24x128xf32>
    %25 = vector.broadcast %7 : vector<1x128xf32> to vector<24x128xf32>
    %26 = arith.mulf %24, %25 : vector<24x128xf32>
    %27 = vector.broadcast %8 : vector<1x128xf32> to vector<24x128xf32>
    %28 = arith.addf %26, %27 : vector<24x128xf32>
    %29 = tpu.iota {dimensions = array<i32: 1>} : vector<24x24xi32>
    %c17_i32 = arith.constant 17 : i32
    %30 = vector.broadcast %c17_i32 : i32 to vector<24x24xi32>
    %31 = arith.cmpi slt, %29, %30 : vector<24x24xi32>
    %cst_15 = arith.constant 0.000000e+00 : f32
    %cst_16 = arith.constant -1.000000e+09 : f32
    %32 = vector.broadcast %cst_15 : f32 to vector<24x24xf32>
    %33 = vector.broadcast %cst_16 : f32 to vector<24x24xf32>
    %34 = arith.select %31, %32, %33 : vector<24x24xi1>, vector<24x24xf32>
    %c0_17 = arith.constant 0 : index
    %c0_18 = arith.constant 0 : index
    %c0_19 = arith.constant 0 : index
    %35 = vector.load %arg6[%c0_17, %c0_18, %c0_19] : memref<2x1x128xf32, #tpu.memory_space<vmem>>, vector<1x1x128xf32>
    %36 = vector.shape_cast %35 : vector<1x1x128xf32> to vector<1x128xf32>
    %c0_20 = arith.constant 0 : index
    %c0_21 = arith.constant 0 : index
    %c0_22 = arith.constant 0 : index
    %37 = vector.load %arg7[%c0_20, %c0_21, %c0_22] : memref<2x1x128xf32, #tpu.memory_space<vmem>>, vector<1x1x128xf32>
    %38 = vector.shape_cast %37 : vector<1x1x128xf32> to vector<1x128xf32>
    %cst_23 = arith.constant dense<0.000000e+00> : vector<24xf32>
    %39 = vector.multi_reduction <add>, %28, %cst_23 [1] : vector<24x128xf32> to vector<24xf32>
    %40 = vector.shape_cast %39 : vector<24xf32> to vector<24x1xf32>
    %cst_24 = arith.constant 1.280000e+02 : f32
    %41 = vector.broadcast %cst_24 : f32 to vector<24x1xf32>
    %42 = arith.divf %40, %41 : vector<24x1xf32>
    %43 = vector.broadcast %42 : vector<24x1xf32> to vector<24x128xf32>
    %44 = arith.subf %28, %43 : vector<24x128xf32>
    %45 = arith.mulf %44, %44 : vector<24x128xf32>
    %cst_25 = arith.constant dense<0.000000e+00> : vector<24xf32>
    %46 = vector.multi_reduction <add>, %45, %cst_25 [1] : vector<24x128xf32> to vector<24xf32>
    %47 = vector.shape_cast %46 : vector<24xf32> to vector<24x1xf32>
    %cst_26 = arith.constant 1.280000e+02 : f32
    %48 = vector.broadcast %cst_26 : f32 to vector<24x1xf32>
    %49 = arith.divf %47, %48 : vector<24x1xf32>
    %cst_27 = arith.constant 9.99999974E-6 : f32
    %50 = vector.broadcast %cst_27 : f32 to vector<24x1xf32>
    %51 = arith.addf %49, %50 : vector<24x1xf32>
    %52 = math.rsqrt %51 : vector<24x1xf32>
    %53 = vector.broadcast %52 : vector<24x1xf32> to vector<24x128xf32>
    %54 = arith.mulf %44, %53 : vector<24x128xf32>
    %55 = vector.broadcast %36 : vector<1x128xf32> to vector<24x128xf32>
    %56 = arith.mulf %54, %55 : vector<24x128xf32>
    %57 = vector.broadcast %38 : vector<1x128xf32> to vector<24x128xf32>
    %58 = arith.addf %56, %57 : vector<24x128xf32>
    %59 = arith.truncf %58 : vector<24x128xf32> to vector<24x128xbf16>
    %c0_28 = arith.constant 0 : index
    %c0_29 = arith.constant 0 : index
    %c0_30 = arith.constant 0 : index
    %60 = vector.load %arg8[%c0_28, %c0_29, %c0_30] : memref<2x128x384xbf16, #tpu.memory_space<vmem>>, vector<1x128x384xbf16>
    %61 = vector.shape_cast %60 : vector<1x128x384xbf16> to vector<128x384xbf16>
    %cst_31 = arith.constant dense<0.000000e+00> : vector<24x384xf32>
    %62 = tpu.matmul %59, %61, %cst_31 {dimension_numbers = #tpu.dot_dimension_numbers<[1], [0], [0], [1], [0, 0, 1, 1], [], []>} : vector<24x128xbf16>, vector<128x384xbf16>, vector<24x384xf32> -> vector<24x384xf32>
    %63 = vector.extract_strided_slice %62 {offsets = [0, 0], sizes = [24, 128], strides = [1, 1]} : vector<24x384xf32> to vector<24x128xf32>
    %c0_32 = arith.constant 0 : index
    %c0_33 = arith.constant 0 : index
    %c0_34 = arith.constant 0 : index
    %64 = vector.load %arg9[%c0_32, %c0_33, %c0_34] : memref<2x1x128xf32, #tpu.memory_space<vmem>>, vector<1x1x128xf32>
    %65 = vector.shape_cast %64 : vector<1x1x128xf32> to vector<1x128xf32>
    %66 = vector.broadcast %65 : vector<1x128xf32> to vector<24x128xf32>
    %67 = arith.addf %63, %66 : vector<24x128xf32>
    %68 = arith.truncf %67 : vector<24x128xf32> to vector<24x128xbf16>
    %69 = vector.extract_strided_slice %62 {offsets = [0, 128], sizes = [24, 128], strides = [1, 1]} : vector<24x384xf32> to vector<24x128xf32>
    %70 = arith.truncf %69 : vector<24x128xf32> to vector<24x128xbf16>
    %71 = vector.extract_strided_slice %62 {offsets = [0, 256], sizes = [24, 128], strides = [1, 1]} : vector<24x384xf32> to vector<24x128xf32>
    %72 = arith.truncf %71 : vector<24x128xf32> to vector<24x128xbf16>
    %73 = vector.extract_strided_slice %68 {offsets = [0, 0], sizes = [24, 32], strides = [1, 1]} : vector<24x128xbf16> to vector<24x32xbf16>
    %74 = vector.extract_strided_slice %70 {offsets = [0, 0], sizes = [24, 32], strides = [1, 1]} : vector<24x128xbf16> to vector<24x32xbf16>
    %cst_35 = arith.constant dense<0.000000e+00> : vector<24x24xf32>
    %75 = tpu.matmul %73, %74, %cst_35 {dimension_numbers = #tpu.dot_dimension_numbers<[1], [1], [0], [0], [0, 0, 1, 0], [], []>} : vector<24x32xbf16>, vector<24x32xbf16>, vector<24x24xf32> -> vector<24x24xf32>
    %76 = arith.addf %75, %34 : vector<24x24xf32>
    %cst_36 = arith.constant dense<0xFF800000> : vector<24xf32>
    %77 = vector.multi_reduction <maximumf>, %76, %cst_36 [1] : vector<24x24xf32> to vector<24xf32>
    %78 = vector.shape_cast %77 : vector<24xf32> to vector<24x1xf32>
    %79 = vector.broadcast %78 : vector<24x1xf32> to vector<24x24xf32>
    %80 = arith.subf %76, %79 : vector<24x24xf32>
    %81 = math.exp %80 : vector<24x24xf32>
    %cst_37 = arith.constant dense<0.000000e+00> : vector<24xf32>
    %82 = vector.multi_reduction <add>, %81, %cst_37 [1] : vector<24x24xf32> to vector<24xf32>
    %83 = vector.shape_cast %82 : vector<24xf32> to vector<24x1xf32>
    %84 = tpu.reciprocal %83 {approx = true} : vector<24x1xf32> -> vector<24x1xf32>
    %85 = vector.broadcast %84 : vector<24x1xf32> to vector<24x24xf32>
    %86 = arith.mulf %81, %85 : vector<24x24xf32>
    %87 = arith.truncf %86 : vector<24x24xf32> to vector<24x24xbf16>
    %88 = vector.extract_strided_slice %72 {offsets = [0, 0], sizes = [24, 32], strides = [1, 1]} : vector<24x128xbf16> to vector<24x32xbf16>
    %cst_38 = arith.constant dense<0.000000e+00> : vector<24x32xf32>
    %89 = tpu.matmul %87, %88, %cst_38 {dimension_numbers = #tpu.dot_dimension_numbers<[1], [0], [0], [1], [0, 0, 1, 1], [], []>} : vector<24x24xbf16>, vector<24x32xbf16>, vector<24x32xf32> -> vector<24x32xf32>
    %90 = vector.extract_strided_slice %68 {offsets = [0, 32], sizes = [24, 32], strides = [1, 1]} : vector<24x128xbf16> to vector<24x32xbf16>
    %91 = vector.extract_strided_slice %70 {offsets = [0, 32], sizes = [24, 32], strides = [1, 1]} : vector<24x128xbf16> to vector<24x32xbf16>
    %cst_39 = arith.constant dense<0.000000e+00> : vector<24x24xf32>
    %92 = tpu.matmul %90, %91, %cst_39 {dimension_numbers = #tpu.dot_dimension_numbers<[1], [1], [0], [0], [0, 0, 1, 0], [], []>} : vector<24x32xbf16>, vector<24x32xbf16>, vector<24x24xf32> -> vector<24x24xf32>
    %93 = arith.addf %92, %34 : vector<24x24xf32>
    %cst_40 = arith.constant dense<0xFF800000> : vector<24xf32>
    %94 = vector.multi_reduction <maximumf>, %93, %cst_40 [1] : vector<24x24xf32> to vector<24xf32>
    %95 = vector.shape_cast %94 : vector<24xf32> to vector<24x1xf32>
    %96 = vector.broadcast %95 : vector<24x1xf32> to vector<24x24xf32>
    %97 = arith.subf %93, %96 : vector<24x24xf32>
    %98 = math.exp %97 : vector<24x24xf32>
    %cst_41 = arith.constant dense<0.000000e+00> : vector<24xf32>
    %99 = vector.multi_reduction <add>, %98, %cst_41 [1] : vector<24x24xf32> to vector<24xf32>
    %100 = vector.shape_cast %99 : vector<24xf32> to vector<24x1xf32>
    %101 = tpu.reciprocal %100 {approx = true} : vector<24x1xf32> -> vector<24x1xf32>
    %102 = vector.broadcast %101 : vector<24x1xf32> to vector<24x24xf32>
    %103 = arith.mulf %98, %102 : vector<24x24xf32>
    %104 = arith.truncf %103 : vector<24x24xf32> to vector<24x24xbf16>
    %105 = vector.extract_strided_slice %72 {offsets = [0, 32], sizes = [24, 32], strides = [1, 1]} : vector<24x128xbf16> to vector<24x32xbf16>
    %cst_42 = arith.constant dense<0.000000e+00> : vector<24x32xf32>
    %106 = tpu.matmul %104, %105, %cst_42 {dimension_numbers = #tpu.dot_dimension_numbers<[1], [0], [0], [1], [0, 0, 1, 1], [], []>} : vector<24x24xbf16>, vector<24x32xbf16>, vector<24x32xf32> -> vector<24x32xf32>
    %107 = vector.extract_strided_slice %68 {offsets = [0, 64], sizes = [24, 32], strides = [1, 1]} : vector<24x128xbf16> to vector<24x32xbf16>
    %108 = vector.extract_strided_slice %70 {offsets = [0, 64], sizes = [24, 32], strides = [1, 1]} : vector<24x128xbf16> to vector<24x32xbf16>
    %cst_43 = arith.constant dense<0.000000e+00> : vector<24x24xf32>
    %109 = tpu.matmul %107, %108, %cst_43 {dimension_numbers = #tpu.dot_dimension_numbers<[1], [1], [0], [0], [0, 0, 1, 0], [], []>} : vector<24x32xbf16>, vector<24x32xbf16>, vector<24x24xf32> -> vector<24x24xf32>
    %110 = arith.addf %109, %34 : vector<24x24xf32>
    %cst_44 = arith.constant dense<0xFF800000> : vector<24xf32>
    %111 = vector.multi_reduction <maximumf>, %110, %cst_44 [1] : vector<24x24xf32> to vector<24xf32>
    %112 = vector.shape_cast %111 : vector<24xf32> to vector<24x1xf32>
    %113 = vector.broadcast %112 : vector<24x1xf32> to vector<24x24xf32>
    %114 = arith.subf %110, %113 : vector<24x24xf32>
    %115 = math.exp %114 : vector<24x24xf32>
    %cst_45 = arith.constant dense<0.000000e+00> : vector<24xf32>
    %116 = vector.multi_reduction <add>, %115, %cst_45 [1] : vector<24x24xf32> to vector<24xf32>
    %117 = vector.shape_cast %116 : vector<24xf32> to vector<24x1xf32>
    %118 = tpu.reciprocal %117 {approx = true} : vector<24x1xf32> -> vector<24x1xf32>
    %119 = vector.broadcast %118 : vector<24x1xf32> to vector<24x24xf32>
    %120 = arith.mulf %115, %119 : vector<24x24xf32>
    %121 = arith.truncf %120 : vector<24x24xf32> to vector<24x24xbf16>
    %122 = vector.extract_strided_slice %72 {offsets = [0, 64], sizes = [24, 32], strides = [1, 1]} : vector<24x128xbf16> to vector<24x32xbf16>
    %cst_46 = arith.constant dense<0.000000e+00> : vector<24x32xf32>
    %123 = tpu.matmul %121, %122, %cst_46 {dimension_numbers = #tpu.dot_dimension_numbers<[1], [0], [0], [1], [0, 0, 1, 1], [], []>} : vector<24x24xbf16>, vector<24x32xbf16>, vector<24x32xf32> -> vector<24x32xf32>
    %124 = vector.extract_strided_slice %68 {offsets = [0, 96], sizes = [24, 32], strides = [1, 1]} : vector<24x128xbf16> to vector<24x32xbf16>
    %125 = vector.extract_strided_slice %70 {offsets = [0, 96], sizes = [24, 32], strides = [1, 1]} : vector<24x128xbf16> to vector<24x32xbf16>
    %cst_47 = arith.constant dense<0.000000e+00> : vector<24x24xf32>
    %126 = tpu.matmul %124, %125, %cst_47 {dimension_numbers = #tpu.dot_dimension_numbers<[1], [1], [0], [0], [0, 0, 1, 0], [], []>} : vector<24x32xbf16>, vector<24x32xbf16>, vector<24x24xf32> -> vector<24x24xf32>
    %127 = arith.addf %126, %34 : vector<24x24xf32>
    %cst_48 = arith.constant dense<0xFF800000> : vector<24xf32>
    %128 = vector.multi_reduction <maximumf>, %127, %cst_48 [1] : vector<24x24xf32> to vector<24xf32>
    %129 = vector.shape_cast %128 : vector<24xf32> to vector<24x1xf32>
    %130 = vector.broadcast %129 : vector<24x1xf32> to vector<24x24xf32>
    %131 = arith.subf %127, %130 : vector<24x24xf32>
    %132 = math.exp %131 : vector<24x24xf32>
    %cst_49 = arith.constant dense<0.000000e+00> : vector<24xf32>
    %133 = vector.multi_reduction <add>, %132, %cst_49 [1] : vector<24x24xf32> to vector<24xf32>
    %134 = vector.shape_cast %133 : vector<24xf32> to vector<24x1xf32>
    %135 = tpu.reciprocal %134 {approx = true} : vector<24x1xf32> -> vector<24x1xf32>
    %136 = vector.broadcast %135 : vector<24x1xf32> to vector<24x24xf32>
    %137 = arith.mulf %132, %136 : vector<24x24xf32>
    %138 = arith.truncf %137 : vector<24x24xf32> to vector<24x24xbf16>
    %139 = vector.extract_strided_slice %72 {offsets = [0, 96], sizes = [24, 32], strides = [1, 1]} : vector<24x128xbf16> to vector<24x32xbf16>
    %cst_50 = arith.constant dense<0.000000e+00> : vector<24x32xf32>
    %140 = tpu.matmul %138, %139, %cst_50 {dimension_numbers = #tpu.dot_dimension_numbers<[1], [0], [0], [1], [0, 0, 1, 1], [], []>} : vector<24x24xbf16>, vector<24x32xbf16>, vector<24x32xf32> -> vector<24x32xf32>
    %141 = tpu.concatenate %89, %106, %123, %140 in 1 : vector<24x32xf32>, vector<24x32xf32>, vector<24x32xf32>, vector<24x32xf32> -> vector<24x128xf32>
    %142 = arith.truncf %141 : vector<24x128xf32> to vector<24x128xbf16>
    %c0_51 = arith.constant 0 : index
    %c0_52 = arith.constant 0 : index
    %c0_53 = arith.constant 0 : index
    %143 = vector.load %arg10[%c0_51, %c0_52, %c0_53] : memref<2x128x128xbf16, #tpu.memory_space<vmem>>, vector<1x128x128xbf16>
    %144 = vector.shape_cast %143 : vector<1x128x128xbf16> to vector<128x128xbf16>
    %cst_54 = arith.constant dense<0.000000e+00> : vector<24x128xf32>
    %145 = tpu.matmul %142, %144, %cst_54 {dimension_numbers = #tpu.dot_dimension_numbers<[1], [0], [0], [1], [0, 0, 1, 1], [], []>} : vector<24x128xbf16>, vector<128x128xbf16>, vector<24x128xf32> -> vector<24x128xf32>
    %146 = arith.addf %28, %145 : vector<24x128xf32>
    %c0_55 = arith.constant 0 : index
    %c0_56 = arith.constant 0 : index
    %c0_57 = arith.constant 0 : index
    %147 = vector.load %arg11[%c0_55, %c0_56, %c0_57] : memref<2x1x128xf32, #tpu.memory_space<vmem>>, vector<1x1x128xf32>
    %148 = vector.shape_cast %147 : vector<1x1x128xf32> to vector<1x128xf32>
    %149 = vector.broadcast %148 : vector<1x128xf32> to vector<24x128xf32>
    %150 = arith.addf %146, %149 : vector<24x128xf32>
    %c0_58 = arith.constant 0 : index
    %c0_59 = arith.constant 0 : index
    %c0_60 = arith.constant 0 : index
    %151 = vector.load %arg12[%c0_58, %c0_59, %c0_60] : memref<2x1x128xf32, #tpu.memory_space<vmem>>, vector<1x1x128xf32>
    %152 = vector.shape_cast %151 : vector<1x1x128xf32> to vector<1x128xf32>
    %c0_61 = arith.constant 0 : index
    %c0_62 = arith.constant 0 : index
    %c0_63 = arith.constant 0 : index
    %153 = vector.load %arg13[%c0_61, %c0_62, %c0_63] : memref<2x1x128xf32, #tpu.memory_space<vmem>>, vector<1x1x128xf32>
    %154 = vector.shape_cast %153 : vector<1x1x128xf32> to vector<1x128xf32>
    %cst_64 = arith.constant dense<0.000000e+00> : vector<24xf32>
    %155 = vector.multi_reduction <add>, %150, %cst_64 [1] : vector<24x128xf32> to vector<24xf32>
    %156 = vector.shape_cast %155 : vector<24xf32> to vector<24x1xf32>
    %cst_65 = arith.constant 1.280000e+02 : f32
    %157 = vector.broadcast %cst_65 : f32 to vector<24x1xf32>
    %158 = arith.divf %156, %157 : vector<24x1xf32>
    %159 = vector.broadcast %158 : vector<24x1xf32> to vector<24x128xf32>
    %160 = arith.subf %150, %159 : vector<24x128xf32>
    %161 = arith.mulf %160, %160 : vector<24x128xf32>
    %cst_66 = arith.constant dense<0.000000e+00> : vector<24xf32>
    %162 = vector.multi_reduction <add>, %161, %cst_66 [1] : vector<24x128xf32> to vector<24xf32>
    %163 = vector.shape_cast %162 : vector<24xf32> to vector<24x1xf32>
    %cst_67 = arith.constant 1.280000e+02 : f32
    %164 = vector.broadcast %cst_67 : f32 to vector<24x1xf32>
    %165 = arith.divf %163, %164 : vector<24x1xf32>
    %cst_68 = arith.constant 9.99999974E-6 : f32
    %166 = vector.broadcast %cst_68 : f32 to vector<24x1xf32>
    %167 = arith.addf %165, %166 : vector<24x1xf32>
    %168 = math.rsqrt %167 : vector<24x1xf32>
    %169 = vector.broadcast %168 : vector<24x1xf32> to vector<24x128xf32>
    %170 = arith.mulf %160, %169 : vector<24x128xf32>
    %171 = vector.broadcast %152 : vector<1x128xf32> to vector<24x128xf32>
    %172 = arith.mulf %170, %171 : vector<24x128xf32>
    %173 = vector.broadcast %154 : vector<1x128xf32> to vector<24x128xf32>
    %174 = arith.addf %172, %173 : vector<24x128xf32>
    %175 = arith.truncf %174 : vector<24x128xf32> to vector<24x128xbf16>
    %c0_69 = arith.constant 0 : index
    %c0_70 = arith.constant 0 : index
    %c0_71 = arith.constant 0 : index
    %176 = vector.load %arg14[%c0_69, %c0_70, %c0_71] : memref<2x128x512xbf16, #tpu.memory_space<vmem>>, vector<1x128x512xbf16>
    %177 = vector.shape_cast %176 : vector<1x128x512xbf16> to vector<128x512xbf16>
    %cst_72 = arith.constant dense<0.000000e+00> : vector<24x512xf32>
    %178 = tpu.matmul %175, %177, %cst_72 {dimension_numbers = #tpu.dot_dimension_numbers<[1], [0], [0], [1], [0, 0, 1, 1], [], []>} : vector<24x128xbf16>, vector<128x512xbf16>, vector<24x512xf32> -> vector<24x512xf32>
    %c0_73 = arith.constant 0 : index
    %c0_74 = arith.constant 0 : index
    %c0_75 = arith.constant 0 : index
    %179 = vector.load %arg15[%c0_73, %c0_74, %c0_75] : memref<2x1x512xf32, #tpu.memory_space<vmem>>, vector<1x1x512xf32>
    %180 = vector.shape_cast %179 : vector<1x1x512xf32> to vector<1x512xf32>
    %181 = vector.broadcast %180 : vector<1x512xf32> to vector<24x512xf32>
    %182 = arith.addf %178, %181 : vector<24x512xf32>
    %cst_76 = arith.constant 1.702000e+00 : f32
    %183 = vector.broadcast %cst_76 : f32 to vector<24x512xf32>
    %184 = arith.mulf %183, %182 : vector<24x512xf32>
    %185 = arith.negf %184 : vector<24x512xf32>
    %186 = math.exp %185 : vector<24x512xf32>
    %cst_77 = arith.constant 1.000000e+00 : f32
    %187 = vector.broadcast %cst_77 : f32 to vector<24x512xf32>
    %188 = arith.addf %187, %186 : vector<24x512xf32>
    %189 = arith.divf %187, %188 : vector<24x512xf32>
    %190 = arith.mulf %182, %189 : vector<24x512xf32>
    %191 = arith.truncf %190 : vector<24x512xf32> to vector<24x512xbf16>
    %c0_78 = arith.constant 0 : index
    %c0_79 = arith.constant 0 : index
    %c0_80 = arith.constant 0 : index
    %192 = vector.load %arg16[%c0_78, %c0_79, %c0_80] : memref<2x512x128xbf16, #tpu.memory_space<vmem>>, vector<1x512x128xbf16>
    %193 = vector.shape_cast %192 : vector<1x512x128xbf16> to vector<512x128xbf16>
    %cst_81 = arith.constant dense<0.000000e+00> : vector<24x128xf32>
    %194 = tpu.matmul %191, %193, %cst_81 {dimension_numbers = #tpu.dot_dimension_numbers<[1], [0], [0], [1], [0, 0, 1, 1], [], []>} : vector<24x512xbf16>, vector<512x128xbf16>, vector<24x128xf32> -> vector<24x128xf32>
    %195 = arith.addf %150, %194 : vector<24x128xf32>
    %c0_82 = arith.constant 0 : index
    %c0_83 = arith.constant 0 : index
    %c0_84 = arith.constant 0 : index
    %196 = vector.load %arg17[%c0_82, %c0_83, %c0_84] : memref<2x1x128xf32, #tpu.memory_space<vmem>>, vector<1x1x128xf32>
    %197 = vector.shape_cast %196 : vector<1x1x128xf32> to vector<1x128xf32>
    %198 = vector.broadcast %197 : vector<1x128xf32> to vector<24x128xf32>
    %199 = arith.addf %195, %198 : vector<24x128xf32>
    %c1 = arith.constant 1 : index
    %c0_85 = arith.constant 0 : index
    %c0_86 = arith.constant 0 : index
    %200 = vector.load %arg6[%c1, %c0_85, %c0_86] : memref<2x1x128xf32, #tpu.memory_space<vmem>>, vector<1x1x128xf32>
    %201 = vector.shape_cast %200 : vector<1x1x128xf32> to vector<1x128xf32>
    %c1_87 = arith.constant 1 : index
    %c0_88 = arith.constant 0 : index
    %c0_89 = arith.constant 0 : index
    %202 = vector.load %arg7[%c1_87, %c0_88, %c0_89] : memref<2x1x128xf32, #tpu.memory_space<vmem>>, vector<1x1x128xf32>
    %203 = vector.shape_cast %202 : vector<1x1x128xf32> to vector<1x128xf32>
    %cst_90 = arith.constant dense<0.000000e+00> : vector<24xf32>
    %204 = vector.multi_reduction <add>, %199, %cst_90 [1] : vector<24x128xf32> to vector<24xf32>
    %205 = vector.shape_cast %204 : vector<24xf32> to vector<24x1xf32>
    %cst_91 = arith.constant 1.280000e+02 : f32
    %206 = vector.broadcast %cst_91 : f32 to vector<24x1xf32>
    %207 = arith.divf %205, %206 : vector<24x1xf32>
    %208 = vector.broadcast %207 : vector<24x1xf32> to vector<24x128xf32>
    %209 = arith.subf %199, %208 : vector<24x128xf32>
    %210 = arith.mulf %209, %209 : vector<24x128xf32>
    %cst_92 = arith.constant dense<0.000000e+00> : vector<24xf32>
    %211 = vector.multi_reduction <add>, %210, %cst_92 [1] : vector<24x128xf32> to vector<24xf32>
    %212 = vector.shape_cast %211 : vector<24xf32> to vector<24x1xf32>
    %cst_93 = arith.constant 1.280000e+02 : f32
    %213 = vector.broadcast %cst_93 : f32 to vector<24x1xf32>
    %214 = arith.divf %212, %213 : vector<24x1xf32>
    %cst_94 = arith.constant 9.99999974E-6 : f32
    %215 = vector.broadcast %cst_94 : f32 to vector<24x1xf32>
    %216 = arith.addf %214, %215 : vector<24x1xf32>
    %217 = math.rsqrt %216 : vector<24x1xf32>
    %218 = vector.broadcast %217 : vector<24x1xf32> to vector<24x128xf32>
    %219 = arith.mulf %209, %218 : vector<24x128xf32>
    %220 = vector.broadcast %201 : vector<1x128xf32> to vector<24x128xf32>
    %221 = arith.mulf %219, %220 : vector<24x128xf32>
    %222 = vector.broadcast %203 : vector<1x128xf32> to vector<24x128xf32>
    %223 = arith.addf %221, %222 : vector<24x128xf32>
    %224 = arith.truncf %223 : vector<24x128xf32> to vector<24x128xbf16>
    %c1_95 = arith.constant 1 : index
    %c0_96 = arith.constant 0 : index
    %c0_97 = arith.constant 0 : index
    %225 = vector.load %arg8[%c1_95, %c0_96, %c0_97] : memref<2x128x384xbf16, #tpu.memory_space<vmem>>, vector<1x128x384xbf16>
    %226 = vector.shape_cast %225 : vector<1x128x384xbf16> to vector<128x384xbf16>
    %cst_98 = arith.constant dense<0.000000e+00> : vector<24x384xf32>
    %227 = tpu.matmul %224, %226, %cst_98 {dimension_numbers = #tpu.dot_dimension_numbers<[1], [0], [0], [1], [0, 0, 1, 1], [], []>} : vector<24x128xbf16>, vector<128x384xbf16>, vector<24x384xf32> -> vector<24x384xf32>
    %228 = vector.extract_strided_slice %227 {offsets = [0, 0], sizes = [8, 128], strides = [1, 1]} : vector<24x384xf32> to vector<8x128xf32>
    %c1_99 = arith.constant 1 : index
    %c0_100 = arith.constant 0 : index
    %c0_101 = arith.constant 0 : index
    %229 = vector.load %arg9[%c1_99, %c0_100, %c0_101] : memref<2x1x128xf32, #tpu.memory_space<vmem>>, vector<1x1x128xf32>
    %230 = vector.shape_cast %229 : vector<1x1x128xf32> to vector<1x128xf32>
    %231 = vector.broadcast %230 : vector<1x128xf32> to vector<8x128xf32>
    %232 = arith.addf %228, %231 : vector<8x128xf32>
    %233 = arith.truncf %232 : vector<8x128xf32> to vector<8x128xbf16>
    %234 = vector.extract_strided_slice %227 {offsets = [0, 128], sizes = [24, 128], strides = [1, 1]} : vector<24x384xf32> to vector<24x128xf32>
    %235 = arith.truncf %234 : vector<24x128xf32> to vector<24x128xbf16>
    %236 = vector.extract_strided_slice %227 {offsets = [0, 256], sizes = [24, 128], strides = [1, 1]} : vector<24x384xf32> to vector<24x128xf32>
    %237 = arith.truncf %236 : vector<24x128xf32> to vector<24x128xbf16>
    %238 = vector.extract_strided_slice %233 {offsets = [0, 0], sizes = [8, 32], strides = [1, 1]} : vector<8x128xbf16> to vector<8x32xbf16>
    %239 = vector.extract_strided_slice %235 {offsets = [0, 0], sizes = [24, 32], strides = [1, 1]} : vector<24x128xbf16> to vector<24x32xbf16>
    %cst_102 = arith.constant dense<0.000000e+00> : vector<8x24xf32>
    %240 = tpu.matmul %238, %239, %cst_102 {dimension_numbers = #tpu.dot_dimension_numbers<[1], [1], [0], [0], [0, 0, 1, 0], [], []>} : vector<8x32xbf16>, vector<24x32xbf16>, vector<8x24xf32> -> vector<8x24xf32>
    %241 = vector.extract_strided_slice %34 {offsets = [0, 0], sizes = [8, 24], strides = [1, 1]} : vector<24x24xf32> to vector<8x24xf32>
    %242 = arith.addf %240, %241 : vector<8x24xf32>
    %cst_103 = arith.constant dense<0xFF800000> : vector<8xf32>
    %243 = vector.multi_reduction <maximumf>, %242, %cst_103 [1] : vector<8x24xf32> to vector<8xf32>
    %244 = vector.shape_cast %243 : vector<8xf32> to vector<8x1xf32>
    %245 = vector.broadcast %244 : vector<8x1xf32> to vector<8x24xf32>
    %246 = arith.subf %242, %245 : vector<8x24xf32>
    %247 = math.exp %246 : vector<8x24xf32>
    %cst_104 = arith.constant dense<0.000000e+00> : vector<8xf32>
    %248 = vector.multi_reduction <add>, %247, %cst_104 [1] : vector<8x24xf32> to vector<8xf32>
    %249 = vector.shape_cast %248 : vector<8xf32> to vector<8x1xf32>
    %250 = tpu.reciprocal %249 {approx = true} : vector<8x1xf32> -> vector<8x1xf32>
    %251 = vector.broadcast %250 : vector<8x1xf32> to vector<8x24xf32>
    %252 = arith.mulf %247, %251 : vector<8x24xf32>
    %253 = arith.truncf %252 : vector<8x24xf32> to vector<8x24xbf16>
    %254 = vector.extract_strided_slice %237 {offsets = [0, 0], sizes = [24, 32], strides = [1, 1]} : vector<24x128xbf16> to vector<24x32xbf16>
    %cst_105 = arith.constant dense<0.000000e+00> : vector<8x32xf32>
    %255 = tpu.matmul %253, %254, %cst_105 {dimension_numbers = #tpu.dot_dimension_numbers<[1], [0], [0], [1], [0, 0, 1, 1], [], []>} : vector<8x24xbf16>, vector<24x32xbf16>, vector<8x32xf32> -> vector<8x32xf32>
    %256 = vector.extract_strided_slice %233 {offsets = [0, 32], sizes = [8, 32], strides = [1, 1]} : vector<8x128xbf16> to vector<8x32xbf16>
    %257 = vector.extract_strided_slice %235 {offsets = [0, 32], sizes = [24, 32], strides = [1, 1]} : vector<24x128xbf16> to vector<24x32xbf16>
    %cst_106 = arith.constant dense<0.000000e+00> : vector<8x24xf32>
    %258 = tpu.matmul %256, %257, %cst_106 {dimension_numbers = #tpu.dot_dimension_numbers<[1], [1], [0], [0], [0, 0, 1, 0], [], []>} : vector<8x32xbf16>, vector<24x32xbf16>, vector<8x24xf32> -> vector<8x24xf32>
    %259 = vector.extract_strided_slice %34 {offsets = [0, 0], sizes = [8, 24], strides = [1, 1]} : vector<24x24xf32> to vector<8x24xf32>
    %260 = arith.addf %258, %259 : vector<8x24xf32>
    %cst_107 = arith.constant dense<0xFF800000> : vector<8xf32>
    %261 = vector.multi_reduction <maximumf>, %260, %cst_107 [1] : vector<8x24xf32> to vector<8xf32>
    %262 = vector.shape_cast %261 : vector<8xf32> to vector<8x1xf32>
    %263 = vector.broadcast %262 : vector<8x1xf32> to vector<8x24xf32>
    %264 = arith.subf %260, %263 : vector<8x24xf32>
    %265 = math.exp %264 : vector<8x24xf32>
    %cst_108 = arith.constant dense<0.000000e+00> : vector<8xf32>
    %266 = vector.multi_reduction <add>, %265, %cst_108 [1] : vector<8x24xf32> to vector<8xf32>
    %267 = vector.shape_cast %266 : vector<8xf32> to vector<8x1xf32>
    %268 = tpu.reciprocal %267 {approx = true} : vector<8x1xf32> -> vector<8x1xf32>
    %269 = vector.broadcast %268 : vector<8x1xf32> to vector<8x24xf32>
    %270 = arith.mulf %265, %269 : vector<8x24xf32>
    %271 = arith.truncf %270 : vector<8x24xf32> to vector<8x24xbf16>
    %272 = vector.extract_strided_slice %237 {offsets = [0, 32], sizes = [24, 32], strides = [1, 1]} : vector<24x128xbf16> to vector<24x32xbf16>
    %cst_109 = arith.constant dense<0.000000e+00> : vector<8x32xf32>
    %273 = tpu.matmul %271, %272, %cst_109 {dimension_numbers = #tpu.dot_dimension_numbers<[1], [0], [0], [1], [0, 0, 1, 1], [], []>} : vector<8x24xbf16>, vector<24x32xbf16>, vector<8x32xf32> -> vector<8x32xf32>
    %274 = vector.extract_strided_slice %233 {offsets = [0, 64], sizes = [8, 32], strides = [1, 1]} : vector<8x128xbf16> to vector<8x32xbf16>
    %275 = vector.extract_strided_slice %235 {offsets = [0, 64], sizes = [24, 32], strides = [1, 1]} : vector<24x128xbf16> to vector<24x32xbf16>
    %cst_110 = arith.constant dense<0.000000e+00> : vector<8x24xf32>
    %276 = tpu.matmul %274, %275, %cst_110 {dimension_numbers = #tpu.dot_dimension_numbers<[1], [1], [0], [0], [0, 0, 1, 0], [], []>} : vector<8x32xbf16>, vector<24x32xbf16>, vector<8x24xf32> -> vector<8x24xf32>
    %277 = vector.extract_strided_slice %34 {offsets = [0, 0], sizes = [8, 24], strides = [1, 1]} : vector<24x24xf32> to vector<8x24xf32>
    %278 = arith.addf %276, %277 : vector<8x24xf32>
    %cst_111 = arith.constant dense<0xFF800000> : vector<8xf32>
    %279 = vector.multi_reduction <maximumf>, %278, %cst_111 [1] : vector<8x24xf32> to vector<8xf32>
    %280 = vector.shape_cast %279 : vector<8xf32> to vector<8x1xf32>
    %281 = vector.broadcast %280 : vector<8x1xf32> to vector<8x24xf32>
    %282 = arith.subf %278, %281 : vector<8x24xf32>
    %283 = math.exp %282 : vector<8x24xf32>
    %cst_112 = arith.constant dense<0.000000e+00> : vector<8xf32>
    %284 = vector.multi_reduction <add>, %283, %cst_112 [1] : vector<8x24xf32> to vector<8xf32>
    %285 = vector.shape_cast %284 : vector<8xf32> to vector<8x1xf32>
    %286 = tpu.reciprocal %285 {approx = true} : vector<8x1xf32> -> vector<8x1xf32>
    %287 = vector.broadcast %286 : vector<8x1xf32> to vector<8x24xf32>
    %288 = arith.mulf %283, %287 : vector<8x24xf32>
    %289 = arith.truncf %288 : vector<8x24xf32> to vector<8x24xbf16>
    %290 = vector.extract_strided_slice %237 {offsets = [0, 64], sizes = [24, 32], strides = [1, 1]} : vector<24x128xbf16> to vector<24x32xbf16>
    %cst_113 = arith.constant dense<0.000000e+00> : vector<8x32xf32>
    %291 = tpu.matmul %289, %290, %cst_113 {dimension_numbers = #tpu.dot_dimension_numbers<[1], [0], [0], [1], [0, 0, 1, 1], [], []>} : vector<8x24xbf16>, vector<24x32xbf16>, vector<8x32xf32> -> vector<8x32xf32>
    %292 = vector.extract_strided_slice %233 {offsets = [0, 96], sizes = [8, 32], strides = [1, 1]} : vector<8x128xbf16> to vector<8x32xbf16>
    %293 = vector.extract_strided_slice %235 {offsets = [0, 96], sizes = [24, 32], strides = [1, 1]} : vector<24x128xbf16> to vector<24x32xbf16>
    %cst_114 = arith.constant dense<0.000000e+00> : vector<8x24xf32>
    %294 = tpu.matmul %292, %293, %cst_114 {dimension_numbers = #tpu.dot_dimension_numbers<[1], [1], [0], [0], [0, 0, 1, 0], [], []>} : vector<8x32xbf16>, vector<24x32xbf16>, vector<8x24xf32> -> vector<8x24xf32>
    %295 = vector.extract_strided_slice %34 {offsets = [0, 0], sizes = [8, 24], strides = [1, 1]} : vector<24x24xf32> to vector<8x24xf32>
    %296 = arith.addf %294, %295 : vector<8x24xf32>
    %cst_115 = arith.constant dense<0xFF800000> : vector<8xf32>
    %297 = vector.multi_reduction <maximumf>, %296, %cst_115 [1] : vector<8x24xf32> to vector<8xf32>
    %298 = vector.shape_cast %297 : vector<8xf32> to vector<8x1xf32>
    %299 = vector.broadcast %298 : vector<8x1xf32> to vector<8x24xf32>
    %300 = arith.subf %296, %299 : vector<8x24xf32>
    %301 = math.exp %300 : vector<8x24xf32>
    %cst_116 = arith.constant dense<0.000000e+00> : vector<8xf32>
    %302 = vector.multi_reduction <add>, %301, %cst_116 [1] : vector<8x24xf32> to vector<8xf32>
    %303 = vector.shape_cast %302 : vector<8xf32> to vector<8x1xf32>
    %304 = tpu.reciprocal %303 {approx = true} : vector<8x1xf32> -> vector<8x1xf32>
    %305 = vector.broadcast %304 : vector<8x1xf32> to vector<8x24xf32>
    %306 = arith.mulf %301, %305 : vector<8x24xf32>
    %307 = arith.truncf %306 : vector<8x24xf32> to vector<8x24xbf16>
    %308 = vector.extract_strided_slice %237 {offsets = [0, 96], sizes = [24, 32], strides = [1, 1]} : vector<24x128xbf16> to vector<24x32xbf16>
    %cst_117 = arith.constant dense<0.000000e+00> : vector<8x32xf32>
    %309 = tpu.matmul %307, %308, %cst_117 {dimension_numbers = #tpu.dot_dimension_numbers<[1], [0], [0], [1], [0, 0, 1, 1], [], []>} : vector<8x24xbf16>, vector<24x32xbf16>, vector<8x32xf32> -> vector<8x32xf32>
    %310 = tpu.concatenate %255, %273, %291, %309 in 1 : vector<8x32xf32>, vector<8x32xf32>, vector<8x32xf32>, vector<8x32xf32> -> vector<8x128xf32>
    %311 = arith.truncf %310 : vector<8x128xf32> to vector<8x128xbf16>
    %312 = vector.extract_strided_slice %199 {offsets = [0, 0], sizes = [8, 128], strides = [1, 1]} : vector<24x128xf32> to vector<8x128xf32>
    %c1_118 = arith.constant 1 : index
    %c0_119 = arith.constant 0 : index
    %c0_120 = arith.constant 0 : index
    %313 = vector.load %arg10[%c1_118, %c0_119, %c0_120] : memref<2x128x128xbf16, #tpu.memory_space<vmem>>, vector<1x128x128xbf16>
    %314 = vector.shape_cast %313 : vector<1x128x128xbf16> to vector<128x128xbf16>
    %cst_121 = arith.constant dense<0.000000e+00> : vector<8x128xf32>
    %315 = tpu.matmul %311, %314, %cst_121 {dimension_numbers = #tpu.dot_dimension_numbers<[1], [0], [0], [1], [0, 0, 1, 1], [], []>} : vector<8x128xbf16>, vector<128x128xbf16>, vector<8x128xf32> -> vector<8x128xf32>
    %316 = arith.addf %312, %315 : vector<8x128xf32>
    %c1_122 = arith.constant 1 : index
    %c0_123 = arith.constant 0 : index
    %c0_124 = arith.constant 0 : index
    %317 = vector.load %arg11[%c1_122, %c0_123, %c0_124] : memref<2x1x128xf32, #tpu.memory_space<vmem>>, vector<1x1x128xf32>
    %318 = vector.shape_cast %317 : vector<1x1x128xf32> to vector<1x128xf32>
    %319 = vector.broadcast %318 : vector<1x128xf32> to vector<8x128xf32>
    %320 = arith.addf %316, %319 : vector<8x128xf32>
    %c1_125 = arith.constant 1 : index
    %c0_126 = arith.constant 0 : index
    %c0_127 = arith.constant 0 : index
    %321 = vector.load %arg12[%c1_125, %c0_126, %c0_127] : memref<2x1x128xf32, #tpu.memory_space<vmem>>, vector<1x1x128xf32>
    %322 = vector.shape_cast %321 : vector<1x1x128xf32> to vector<1x128xf32>
    %c1_128 = arith.constant 1 : index
    %c0_129 = arith.constant 0 : index
    %c0_130 = arith.constant 0 : index
    %323 = vector.load %arg13[%c1_128, %c0_129, %c0_130] : memref<2x1x128xf32, #tpu.memory_space<vmem>>, vector<1x1x128xf32>
    %324 = vector.shape_cast %323 : vector<1x1x128xf32> to vector<1x128xf32>
    %cst_131 = arith.constant dense<0.000000e+00> : vector<8xf32>
    %325 = vector.multi_reduction <add>, %320, %cst_131 [1] : vector<8x128xf32> to vector<8xf32>
    %326 = vector.shape_cast %325 : vector<8xf32> to vector<8x1xf32>
    %cst_132 = arith.constant 1.280000e+02 : f32
    %327 = vector.broadcast %cst_132 : f32 to vector<8x1xf32>
    %328 = arith.divf %326, %327 : vector<8x1xf32>
    %329 = vector.broadcast %328 : vector<8x1xf32> to vector<8x128xf32>
    %330 = arith.subf %320, %329 : vector<8x128xf32>
    %331 = arith.mulf %330, %330 : vector<8x128xf32>
    %cst_133 = arith.constant dense<0.000000e+00> : vector<8xf32>
    %332 = vector.multi_reduction <add>, %331, %cst_133 [1] : vector<8x128xf32> to vector<8xf32>
    %333 = vector.shape_cast %332 : vector<8xf32> to vector<8x1xf32>
    %cst_134 = arith.constant 1.280000e+02 : f32
    %334 = vector.broadcast %cst_134 : f32 to vector<8x1xf32>
    %335 = arith.divf %333, %334 : vector<8x1xf32>
    %cst_135 = arith.constant 9.99999974E-6 : f32
    %336 = vector.broadcast %cst_135 : f32 to vector<8x1xf32>
    %337 = arith.addf %335, %336 : vector<8x1xf32>
    %338 = math.rsqrt %337 : vector<8x1xf32>
    %339 = vector.broadcast %338 : vector<8x1xf32> to vector<8x128xf32>
    %340 = arith.mulf %330, %339 : vector<8x128xf32>
    %341 = vector.broadcast %322 : vector<1x128xf32> to vector<8x128xf32>
    %342 = arith.mulf %340, %341 : vector<8x128xf32>
    %343 = vector.broadcast %324 : vector<1x128xf32> to vector<8x128xf32>
    %344 = arith.addf %342, %343 : vector<8x128xf32>
    %345 = arith.truncf %344 : vector<8x128xf32> to vector<8x128xbf16>
    %c1_136 = arith.constant 1 : index
    %c0_137 = arith.constant 0 : index
    %c0_138 = arith.constant 0 : index
    %346 = vector.load %arg14[%c1_136, %c0_137, %c0_138] : memref<2x128x512xbf16, #tpu.memory_space<vmem>>, vector<1x128x512xbf16>
    %347 = vector.shape_cast %346 : vector<1x128x512xbf16> to vector<128x512xbf16>
    %cst_139 = arith.constant dense<0.000000e+00> : vector<8x512xf32>
    %348 = tpu.matmul %345, %347, %cst_139 {dimension_numbers = #tpu.dot_dimension_numbers<[1], [0], [0], [1], [0, 0, 1, 1], [], []>} : vector<8x128xbf16>, vector<128x512xbf16>, vector<8x512xf32> -> vector<8x512xf32>
    %c1_140 = arith.constant 1 : index
    %c0_141 = arith.constant 0 : index
    %c0_142 = arith.constant 0 : index
    %349 = vector.load %arg15[%c1_140, %c0_141, %c0_142] : memref<2x1x512xf32, #tpu.memory_space<vmem>>, vector<1x1x512xf32>
    %350 = vector.shape_cast %349 : vector<1x1x512xf32> to vector<1x512xf32>
    %351 = vector.broadcast %350 : vector<1x512xf32> to vector<8x512xf32>
    %352 = arith.addf %348, %351 : vector<8x512xf32>
    %cst_143 = arith.constant 1.702000e+00 : f32
    %353 = vector.broadcast %cst_143 : f32 to vector<8x512xf32>
    %354 = arith.mulf %353, %352 : vector<8x512xf32>
    %355 = arith.negf %354 : vector<8x512xf32>
    %356 = math.exp %355 : vector<8x512xf32>
    %cst_144 = arith.constant 1.000000e+00 : f32
    %357 = vector.broadcast %cst_144 : f32 to vector<8x512xf32>
    %358 = arith.addf %357, %356 : vector<8x512xf32>
    %359 = arith.divf %357, %358 : vector<8x512xf32>
    %360 = arith.mulf %352, %359 : vector<8x512xf32>
    %361 = arith.truncf %360 : vector<8x512xf32> to vector<8x512xbf16>
    %c1_145 = arith.constant 1 : index
    %c0_146 = arith.constant 0 : index
    %c0_147 = arith.constant 0 : index
    %362 = vector.load %arg16[%c1_145, %c0_146, %c0_147] : memref<2x512x128xbf16, #tpu.memory_space<vmem>>, vector<1x512x128xbf16>
    %363 = vector.shape_cast %362 : vector<1x512x128xbf16> to vector<512x128xbf16>
    %cst_148 = arith.constant dense<0.000000e+00> : vector<8x128xf32>
    %364 = tpu.matmul %361, %363, %cst_148 {dimension_numbers = #tpu.dot_dimension_numbers<[1], [0], [0], [1], [0, 0, 1, 1], [], []>} : vector<8x512xbf16>, vector<512x128xbf16>, vector<8x128xf32> -> vector<8x128xf32>
    %365 = arith.addf %320, %364 : vector<8x128xf32>
    %c1_149 = arith.constant 1 : index
    %c0_150 = arith.constant 0 : index
    %c0_151 = arith.constant 0 : index
    %366 = vector.load %arg17[%c1_149, %c0_150, %c0_151] : memref<2x1x128xf32, #tpu.memory_space<vmem>>, vector<1x1x128xf32>
    %367 = vector.shape_cast %366 : vector<1x1x128xf32> to vector<1x128xf32>
    %368 = vector.broadcast %367 : vector<1x128xf32> to vector<8x128xf32>
    %369 = arith.addf %365, %368 : vector<8x128xf32>
    %370 = vector.extract_strided_slice %369 {offsets = [0, 0], sizes = [1, 128], strides = [1, 1]} : vector<8x128xf32> to vector<1x128xf32>
    %c0_152 = arith.constant 0 : index
    %c0_153 = arith.constant 0 : index
    %371 = vector.load %arg18[%c0_152, %c0_153] : memref<1x128xf32, #tpu.memory_space<vmem>>, vector<1x128xf32>
    %c0_154 = arith.constant 0 : index
    %c0_155 = arith.constant 0 : index
    %372 = vector.load %arg19[%c0_154, %c0_155] : memref<1x128xf32, #tpu.memory_space<vmem>>, vector<1x128xf32>
    %cst_156 = arith.constant dense<0.000000e+00> : vector<1xf32>
    %373 = vector.multi_reduction <add>, %370, %cst_156 [1] : vector<1x128xf32> to vector<1xf32>
    %374 = vector.shape_cast %373 : vector<1xf32> to vector<1x1xf32>
    %cst_157 = arith.constant 1.280000e+02 : f32
    %375 = vector.broadcast %cst_157 : f32 to vector<1x1xf32>
    %376 = arith.divf %374, %375 : vector<1x1xf32>
    %377 = vector.broadcast %376 : vector<1x1xf32> to vector<1x128xf32>
    %378 = arith.subf %370, %377 : vector<1x128xf32>
    %379 = arith.mulf %378, %378 : vector<1x128xf32>
    %cst_158 = arith.constant dense<0.000000e+00> : vector<1xf32>
    %380 = vector.multi_reduction <add>, %379, %cst_158 [1] : vector<1x128xf32> to vector<1xf32>
    %381 = vector.shape_cast %380 : vector<1xf32> to vector<1x1xf32>
    %cst_159 = arith.constant 1.280000e+02 : f32
    %382 = vector.broadcast %cst_159 : f32 to vector<1x1xf32>
    %383 = arith.divf %381, %382 : vector<1x1xf32>
    %cst_160 = arith.constant 9.99999974E-6 : f32
    %384 = vector.broadcast %cst_160 : f32 to vector<1x1xf32>
    %385 = arith.addf %383, %384 : vector<1x1xf32>
    %386 = math.rsqrt %385 : vector<1x1xf32>
    %387 = vector.broadcast %386 : vector<1x1xf32> to vector<1x128xf32>
    %388 = arith.mulf %378, %387 : vector<1x128xf32>
    %389 = arith.mulf %388, %371 : vector<1x128xf32>
    %390 = arith.addf %389, %372 : vector<1x128xf32>
    %c0_161 = arith.constant 0 : index
    %c0_162 = arith.constant 0 : index
    %391 = vector.load %arg20[%c0_161, %c0_162] : memref<128x128xbf16, #tpu.memory_space<vmem>>, vector<128x128xbf16>
    %392 = arith.truncf %390 : vector<1x128xf32> to vector<1x128xbf16>
    %cst_163 = arith.constant dense<0.000000e+00> : vector<1x128xf32>
    %393 = tpu.matmul %392, %391, %cst_163 {dimension_numbers = #tpu.dot_dimension_numbers<[1], [0], [0], [1], [0, 0, 1, 1], [], []>} : vector<1x128xbf16>, vector<128x128xbf16>, vector<1x128xf32> -> vector<1x128xf32>
    %394 = arith.mulf %393, %393 : vector<1x128xf32>
    %cst_164 = arith.constant dense<0.000000e+00> : vector<1xf32>
    %395 = vector.multi_reduction <add>, %394, %cst_164 [1] : vector<1x128xf32> to vector<1xf32>
    %396 = vector.shape_cast %395 : vector<1xf32> to vector<1x1xf32>
    %397 = math.rsqrt %396 : vector<1x1xf32>
    %398 = vector.broadcast %397 : vector<1x1xf32> to vector<1x128xf32>
    %399 = arith.mulf %393, %398 : vector<1x128xf32>
    %c0_165 = arith.constant 0 : index
    %c0_166 = arith.constant 0 : index
    %c0_167 = arith.constant 0 : index
    %400 = vector.load %arg21[%c0_165, %c0_166, %c0_167] : memref<1x1x128xf32, #tpu.memory_space<vmem>>, vector<1x1x128xf32>
    %401 = vector.shape_cast %400 : vector<1x1x128xf32> to vector<1x128xf32>
    %402 = vector.shape_cast %399 : vector<1x128xf32> to vector<1x1x128xf32>
    tpu.vector_store %arg21[%c0_165, %c0_166, %c0_167], %402 {strides = array<i32>} : memref<1x1x128xf32, #tpu.memory_space<vmem>>, vector<1x1x128xf32>,
    return
  }
  func.func @transform_0(%arg0: i32) -> (i32, i32, i32) {
    %c0_i32 = arith.constant 0 : i32
    %c0_i32_0 = arith.constant 0 : i32
    %c0_i32_1 = arith.constant 0 : i32
    return %arg0, %c0_i32, %c0_i32_0 : i32, i32, i32
  }
  func.func @transform_1(%arg0: i32) -> (i32, i32) {
    %c0_i32 = arith.constant 0 : i32
    %c0_i32_0 = arith.constant 0 : i32
    %c0_i32_1 = arith.constant 0 : i32
    return %c0_i32, %c0_i32_0 : i32, i32
  }
  func.func @transform_2(%arg0: i32) -> (i32, i32) {
    %c0_i32 = arith.constant 0 : i32
    %c0_i32_0 = arith.constant 0 : i32
    %c0_i32_1 = arith.constant 0 : i32
    return %c0_i32, %c0_i32_0 : i32, i32
  }
  func.func @transform_3(%arg0: i32) -> (i32, i32) {
    %c0_i32 = arith.constant 0 : i32
    %c0_i32_0 = arith.constant 0 : i32
    %c0_i32_1 = arith.constant 0 : i32
    return %c0_i32, %c0_i32_0 : i32, i32
  }
  func.func @transform_4(%arg0: i32) -> (i32, i32) {
    %c0_i32 = arith.constant 0 : i32
    %c0_i32_0 = arith.constant 0 : i32
    %c0_i32_1 = arith.constant 0 : i32
    return %c0_i32, %c0_i32_0 : i32, i32
  }
  func.func @transform_5(%arg0: i32) -> (i32, i32, i32) {
    %c0_i32 = arith.constant 0 : i32
    %c0_i32_0 = arith.constant 0 : i32
    %c0_i32_1 = arith.constant 0 : i32
    %c0_i32_2 = arith.constant 0 : i32
    return %c0_i32, %c0_i32_0, %c0_i32_1 : i32, i32, i32
  }
  func.func @transform_6(%arg0: i32) -> (i32, i32, i32) {
    %c0_i32 = arith.constant 0 : i32
    %c0_i32_0 = arith.constant 0 : i32
    %c0_i32_1 = arith.constant 0 : i32
    %c0_i32_2 = arith.constant 0 : i32
    return %c0_i32, %c0_i32_0, %c0_i32_1 : i32, i32, i32
  }
  func.func @transform_7(%arg0: i32) -> (i32, i32, i32) {
    %c0_i32 = arith.constant 0 : i32
    %c0_i32_0 = arith.constant 0 : i32
    %c0_i32_1 = arith.constant 0 : i32
    %c0_i32_2 = arith.constant 0 : i32
    return %c0_i32, %c0_i32_0, %c0_i32_1 : i32, i32, i32
  }
  func.func @transform_8(%arg0: i32) -> (i32, i32, i32) {
    %c0_i32 = arith.constant 0 : i32
    %c0_i32_0 = arith.constant 0 : i32
    %c0_i32_1 = arith.constant 0 : i32
    %c0_i32_2 = arith.constant 0 : i32
    return %c0_i32, %c0_i32_0, %c0_i32_1 : i32, i32, i32
  }
  func.func @transform_9(%arg0: i32) -> (i32, i32, i32) {
    %c0_i32 = arith.constant 0 : i32
    %c0_i32_0 = arith.constant 0 : i32
    %c0_i32_1 = arith.constant 0 : i32
    %c0_i32_2 = arith.constant 0 : i32
    return %c0_i32, %c0_i32_0, %c0_i32_1 : i32, i32, i32
  }
  func.func @transform_10(%arg0: i32) -> (i32, i32, i32) {
    %c0_i32 = arith.constant 0 : i32
    %c0_i32_0 = arith.constant 0 : i32
    %c0_i32_1 = arith.constant 0 : i32
    %c0_i32_2 = arith.constant 0 : i32
    return %c0_i32, %c0_i32_0, %c0_i32_1 : i32, i32, i32
  }
  func.func @transform_11(%arg0: i32) -> (i32, i32, i32) {
    %c0_i32 = arith.constant 0 : i32
    %c0_i32_0 = arith.constant 0 : i32
    %c0_i32_1 = arith.constant 0 : i32
    %c0_i32_2 = arith.constant 0 : i32
    return %c0_i32, %c0_i32_0, %c0_i32_1 : i32, i32, i32
  }
  func.func @transform_12(%arg0: i32) -> (i32, i32, i32) {
    %c0_i32 = arith.constant 0 : i32
    %c0_i32_0 = arith.constant 0 : i32
    %c0_i32_1 = arith.constant 0 : i32
    %c0_i32_2 = arith.constant 0 : i32
    return %c0_i32, %c0_i32_0, %c0_i32_1 : i32, i32, i32
  }
  func.func @transform_13(%arg0: i32) -> (i32, i32, i32) {
    %c0_i32 = arith.constant 0 : i32
    %c0_i32_0 = arith.constant 0 : i32
    %c0_i32_1 = arith.constant 0 : i32
    %c0_i32_2 = arith.constant 0 : i32
    return %c0_i32, %c0_i32_0, %c0_i32_1 : i32, i32, i32
  }
  func.func @transform_14(%arg0: i32) -> (i32, i32, i32) {
    %c0_i32 = arith.constant 0 : i32
    %c0_i32_0 = arith.constant 0 : i32
    %c0_i32_1 = arith.constant 0 : i32
    %c0_i32_2 = arith.constant 0 : i32
    return %c0_i32, %c0_i32_0, %c0_i32_1 : i32, i32, i32
  }
  func.func @transform_15(%arg0: i32) -> (i32, i32, i32) {
    %c0_i32 = arith.constant 0 : i32
    %c0_i32_0 = arith.constant 0 : i32
    %c0_i32_1 = arith.constant 0 : i32
    %c0_i32_2 = arith.constant 0 : i32
    return %c0_i32, %c0_i32_0, %c0_i32_1 : i32, i32, i32
  }
  func.func @transform_16(%arg0: i32) -> (i32, i32, i32) {
    %c0_i32 = arith.constant 0 : i32
    %c0_i32_0 = arith.constant 0 : i32
    %c0_i32_1 = arith.constant 0 : i32
    %c0_i32_2 = arith.constant 0 : i32
    return %c0_i32, %c0_i32_0, %c0_i32_1 : i32, i32, i32
  }
  func.func @transform_17(%arg0: i32) -> (i32, i32) {
    %c0_i32 = arith.constant 0 : i32
    %c0_i32_0 = arith.constant 0 : i32
    %c0_i32_1 = arith.constant 0 : i32
    return %c0_i32, %c0_i32_0 : i32, i32
  }
  func.func @transform_18(%arg0: i32) -> (i32, i32) {
    %c0_i32 = arith.constant 0 : i32
    %c0_i32_0 = arith.constant 0 : i32
    %c0_i32_1 = arith.constant 0 : i32
    return %c0_i32, %c0_i32_0 : i32, i32
  }
  func.func @transform_19(%arg0: i32) -> (i32, i32) {
    %c0_i32 = arith.constant 0 : i32
    %c0_i32_0 = arith.constant 0 : i32
    %c0_i32_1 = arith.constant 0 : i32
    return %c0_i32, %c0_i32_0 : i32, i32
  }
  func.func @transform_20(%arg0: i32) -> (i32, i32, i32) {
    %c0_i32 = arith.constant 0 : i32
    %c0_i32_0 = arith.constant 0 : i32
    %c0_i32_1 = arith.constant 0 : i32
    return %arg0, %c0_i32, %c0_i32_0 : i32, i32, i32
  }
}

module attributes {stable_mosaic.version = 11 : i64} {
  func.func @_text_head_kernel(%arg0: i32, %arg1: memref<64x128xf32, #tpu.memory_space<vmem>>, %arg2: memref<4x1xi32, #tpu.memory_space<vmem>>, %arg3: memref<2x1x128xf32, #tpu.memory_space<vmem>>, %arg4: memref<1xf32, #tpu.memory_space<smem>>, %arg5: memref<2x1x128xf32, #tpu.memory_space<vmem>>, %arg6: memref<2x1x128xf32, #tpu.memory_space<vmem>>, %arg7: memref<2x128x384xbf16, #tpu.memory_space<vmem>>, %arg8: memref<2x1x128xf32, #tpu.memory_space<vmem>>, %arg9: memref<2x128x128xbf16, #tpu.memory_space<vmem>>, %arg10: memref<2x1x128xf32, #tpu.memory_space<vmem>>, %arg11: memref<2x1x128xf32, #tpu.memory_space<vmem>>, %arg12: memref<2x1x128xf32, #tpu.memory_space<vmem>>, %arg13: memref<2x128x512xbf16, #tpu.memory_space<vmem>>, %arg14: memref<2x1x512xf32, #tpu.memory_space<vmem>>, %arg15: memref<2x512x128xbf16, #tpu.memory_space<vmem>>, %arg16: memref<2x1x128xf32, #tpu.memory_space<vmem>>, %arg17: memref<1x128xf32, #tpu.memory_space<vmem>>, %arg18: memref<1x128xf32, #tpu.memory_space<vmem>>, %arg19: memref<128x128xbf16, #tpu.memory_space<vmem>>, %arg20: memref<2x4xf32, #tpu.memory_space<vmem>>) attributes {dimension_semantics = [#tpu.dimension_semantics<arbitrary>], iteration_bounds = array<i64: 1>, scalar_prefetch = 0 : i64, scratch_operands = 0 : i64, tpu.core_type = #tpu.core_type<tc>, window_params = [{pipeline_mode = #tpu.pipeline_mode<synchronous>, transform_indices = @transform_0, window_bounds = array<i64: 64, 128>}, {pipeline_mode = #tpu.pipeline_mode<synchronous>, transform_indices = @transform_1, window_bounds = array<i64: 4, 1>}, {pipeline_mode = #tpu.pipeline_mode<synchronous>, transform_indices = @transform_2, window_bounds = array<i64: 2, 1, 128>}, {transform_indices = @transform_3, window_bounds = array<i64: 1>}, {pipeline_mode = #tpu.pipeline_mode<synchronous>, transform_indices = @transform_4, window_bounds = array<i64: 2, 1, 128>}, {pipeline_mode = #tpu.pipeline_mode<synchronous>, transform_indices = @transform_5, window_bounds = array<i64: 2, 1, 128>}, {pipeline_mode = #tpu.pipeline_mode<synchronous>, transform_indices = @transform_6, window_bounds = array<i64: 2, 128, 384>}, {pipeline_mode = #tpu.pipeline_mode<synchronous>, transform_indices = @transform_7, window_bounds = array<i64: 2, 1, 128>}, {pipeline_mode = #tpu.pipeline_mode<synchronous>, transform_indices = @transform_8, window_bounds = array<i64: 2, 128, 128>}, {pipeline_mode = #tpu.pipeline_mode<synchronous>, transform_indices = @transform_9, window_bounds = array<i64: 2, 1, 128>}, {pipeline_mode = #tpu.pipeline_mode<synchronous>, transform_indices = @transform_10, window_bounds = array<i64: 2, 1, 128>}, {pipeline_mode = #tpu.pipeline_mode<synchronous>, transform_indices = @transform_11, window_bounds = array<i64: 2, 1, 128>}, {pipeline_mode = #tpu.pipeline_mode<synchronous>, transform_indices = @transform_12, window_bounds = array<i64: 2, 128, 512>}, {pipeline_mode = #tpu.pipeline_mode<synchronous>, transform_indices = @transform_13, window_bounds = array<i64: 2, 1, 512>}, {pipeline_mode = #tpu.pipeline_mode<synchronous>, transform_indices = @transform_14, window_bounds = array<i64: 2, 512, 128>}, {pipeline_mode = #tpu.pipeline_mode<synchronous>, transform_indices = @transform_15, window_bounds = array<i64: 2, 1, 128>}, {pipeline_mode = #tpu.pipeline_mode<synchronous>, transform_indices = @transform_16, window_bounds = array<i64: 1, 128>}, {pipeline_mode = #tpu.pipeline_mode<synchronous>, transform_indices = @transform_17, window_bounds = array<i64: 1, 128>}, {pipeline_mode = #tpu.pipeline_mode<synchronous>, transform_indices = @transform_18, window_bounds = array<i64: 128, 128>}, {pipeline_mode = #tpu.pipeline_mode<synchronous>, transform_indices = @transform_19, window_bounds = array<i64: 2, 4>}]} {
    %c0 = arith.constant 0 : index
    %c0_0 = arith.constant 0 : index
    %0 = vector.load %arg1[%c0, %c0_0] : memref<64x128xf32, #tpu.memory_space<vmem>>, vector<64x128xf32>
    %1 = tpu.iota {dimensions = array<i32: 0>} : vector<64x64xi32>
    %2 = tpu.iota {dimensions = array<i32: 1>} : vector<64x64xi32>
    %c-16_i32 = arith.constant -16 : i32
    %3 = vector.broadcast %c-16_i32 : i32 to vector<64x64xi32>
    %4 = arith.andi %1, %3 : vector<64x64xi32>
    %5 = arith.cmpi sle, %2, %1 : vector<64x64xi32>
    %6 = arith.cmpi sge, %2, %4 : vector<64x64xi32>
    %7 = arith.andi %5, %6 : vector<64x64xi1>
    %cst = arith.constant 0.000000e+00 : f32
    %cst_1 = arith.constant -1.000000e+09 : f32
    %8 = vector.broadcast %cst : f32 to vector<64x64xf32>
    %9 = vector.broadcast %cst_1 : f32 to vector<64x64xf32>
    %10 = arith.select %7, %8, %9 : vector<64x64xi1>, vector<64x64xf32>
    %c0_2 = arith.constant 0 : index
    %c0_3 = arith.constant 0 : index
    %c0_4 = arith.constant 0 : index
    %11 = vector.load %arg5[%c0_2, %c0_3, %c0_4] : memref<2x1x128xf32, #tpu.memory_space<vmem>>, vector<1x1x128xf32>
    %12 = vector.shape_cast %11 : vector<1x1x128xf32> to vector<1x128xf32>
    %c0_5 = arith.constant 0 : index
    %c0_6 = arith.constant 0 : index
    %c0_7 = arith.constant 0 : index
    %13 = vector.load %arg6[%c0_5, %c0_6, %c0_7] : memref<2x1x128xf32, #tpu.memory_space<vmem>>, vector<1x1x128xf32>
    %14 = vector.shape_cast %13 : vector<1x1x128xf32> to vector<1x128xf32>
    %cst_8 = arith.constant dense<0.000000e+00> : vector<64xf32>
    %15 = vector.multi_reduction <add>, %0, %cst_8 [1] : vector<64x128xf32> to vector<64xf32>
    %16 = vector.shape_cast %15 : vector<64xf32> to vector<64x1xf32>
    %cst_9 = arith.constant 1.280000e+02 : f32
    %17 = vector.broadcast %cst_9 : f32 to vector<64x1xf32>
    %18 = arith.divf %16, %17 : vector<64x1xf32>
    %19 = vector.broadcast %18 : vector<64x1xf32> to vector<64x128xf32>
    %20 = arith.subf %0, %19 : vector<64x128xf32>
    %21 = arith.mulf %20, %20 : vector<64x128xf32>
    %cst_10 = arith.constant dense<0.000000e+00> : vector<64xf32>
    %22 = vector.multi_reduction <add>, %21, %cst_10 [1] : vector<64x128xf32> to vector<64xf32>
    %23 = vector.shape_cast %22 : vector<64xf32> to vector<64x1xf32>
    %cst_11 = arith.constant 1.280000e+02 : f32
    %24 = vector.broadcast %cst_11 : f32 to vector<64x1xf32>
    %25 = arith.divf %23, %24 : vector<64x1xf32>
    %cst_12 = arith.constant 9.99999974E-6 : f32
    %26 = vector.broadcast %cst_12 : f32 to vector<64x1xf32>
    %27 = arith.addf %25, %26 : vector<64x1xf32>
    %28 = math.rsqrt %27 : vector<64x1xf32>
    %29 = vector.broadcast %28 : vector<64x1xf32> to vector<64x128xf32>
    %30 = arith.mulf %20, %29 : vector<64x128xf32>
    %31 = vector.broadcast %12 : vector<1x128xf32> to vector<64x128xf32>
    %32 = arith.mulf %30, %31 : vector<64x128xf32>
    %33 = vector.broadcast %14 : vector<1x128xf32> to vector<64x128xf32>
    %34 = arith.addf %32, %33 : vector<64x128xf32>
    %35 = arith.truncf %34 : vector<64x128xf32> to vector<64x128xbf16>
    %c0_13 = arith.constant 0 : index
    %c0_14 = arith.constant 0 : index
    %c0_15 = arith.constant 0 : index
    %36 = vector.load %arg7[%c0_13, %c0_14, %c0_15] : memref<2x128x384xbf16, #tpu.memory_space<vmem>>, vector<1x128x384xbf16>
    %37 = vector.shape_cast %36 : vector<1x128x384xbf16> to vector<128x384xbf16>
    %cst_16 = arith.constant dense<0.000000e+00> : vector<64x384xf32>
    %38 = tpu.matmul %35, %37, %cst_16 {dimension_numbers = #tpu.dot_dimension_numbers<[1], [0], [0], [1], [0, 0, 1, 1], [], []>} : vector<64x128xbf16>, vector<128x384xbf16>, vector<64x384xf32> -> vector<64x384xf32>
    %39 = vector.extract_strided_slice %38 {offsets = [0, 0], sizes = [64, 128], strides = [1, 1]} : vector<64x384xf32> to vector<64x128xf32>
    %c0_17 = arith.constant 0 : index
    %c0_18 = arith.constant 0 : index
    %c0_19 = arith.constant 0 : index
    %40 = vector.load %arg8[%c0_17, %c0_18, %c0_19] : memref<2x1x128xf32, #tpu.memory_space<vmem>>, vector<1x1x128xf32>
    %41 = vector.shape_cast %40 : vector<1x1x128xf32> to vector<1x128xf32>
    %42 = vector.broadcast %41 : vector<1x128xf32> to vector<64x128xf32>
    %43 = arith.addf %39, %42 : vector<64x128xf32>
    %44 = arith.truncf %43 : vector<64x128xf32> to vector<64x128xbf16>
    %45 = vector.extract_strided_slice %38 {offsets = [0, 128], sizes = [64, 128], strides = [1, 1]} : vector<64x384xf32> to vector<64x128xf32>
    %46 = arith.truncf %45 : vector<64x128xf32> to vector<64x128xbf16>
    %47 = vector.extract_strided_slice %38 {offsets = [0, 256], sizes = [64, 128], strides = [1, 1]} : vector<64x384xf32> to vector<64x128xf32>
    %48 = arith.truncf %47 : vector<64x128xf32> to vector<64x128xbf16>
    %49 = vector.extract_strided_slice %44 {offsets = [0, 0], sizes = [64, 32], strides = [1, 1]} : vector<64x128xbf16> to vector<64x32xbf16>
    %50 = vector.extract_strided_slice %46 {offsets = [0, 0], sizes = [64, 32], strides = [1, 1]} : vector<64x128xbf16> to vector<64x32xbf16>
    %cst_20 = arith.constant dense<0.000000e+00> : vector<64x64xf32>
    %51 = tpu.matmul %49, %50, %cst_20 {dimension_numbers = #tpu.dot_dimension_numbers<[1], [1], [0], [0], [0, 0, 1, 0], [], []>} : vector<64x32xbf16>, vector<64x32xbf16>, vector<64x64xf32> -> vector<64x64xf32>
    %52 = arith.addf %51, %10 : vector<64x64xf32>
    %cst_21 = arith.constant dense<0xFF800000> : vector<64xf32>
    %53 = vector.multi_reduction <maximumf>, %52, %cst_21 [1] : vector<64x64xf32> to vector<64xf32>
    %54 = vector.shape_cast %53 : vector<64xf32> to vector<64x1xf32>
    %55 = vector.broadcast %54 : vector<64x1xf32> to vector<64x64xf32>
    %56 = arith.subf %52, %55 : vector<64x64xf32>
    %57 = math.exp %56 : vector<64x64xf32>
    %cst_22 = arith.constant dense<0.000000e+00> : vector<64xf32>
    %58 = vector.multi_reduction <add>, %57, %cst_22 [1] : vector<64x64xf32> to vector<64xf32>
    %59 = vector.shape_cast %58 : vector<64xf32> to vector<64x1xf32>
    %60 = tpu.reciprocal %59 {approx = true} : vector<64x1xf32> -> vector<64x1xf32>
    %61 = vector.broadcast %60 : vector<64x1xf32> to vector<64x64xf32>
    %62 = arith.mulf %57, %61 : vector<64x64xf32>
    %63 = arith.truncf %62 : vector<64x64xf32> to vector<64x64xbf16>
    %64 = vector.extract_strided_slice %48 {offsets = [0, 0], sizes = [64, 32], strides = [1, 1]} : vector<64x128xbf16> to vector<64x32xbf16>
    %cst_23 = arith.constant dense<0.000000e+00> : vector<64x32xf32>
    %65 = tpu.matmul %63, %64, %cst_23 {dimension_numbers = #tpu.dot_dimension_numbers<[1], [0], [0], [1], [0, 0, 1, 1], [], []>} : vector<64x64xbf16>, vector<64x32xbf16>, vector<64x32xf32> -> vector<64x32xf32>
    %66 = vector.extract_strided_slice %44 {offsets = [0, 32], sizes = [64, 32], strides = [1, 1]} : vector<64x128xbf16> to vector<64x32xbf16>
    %67 = vector.extract_strided_slice %46 {offsets = [0, 32], sizes = [64, 32], strides = [1, 1]} : vector<64x128xbf16> to vector<64x32xbf16>
    %cst_24 = arith.constant dense<0.000000e+00> : vector<64x64xf32>
    %68 = tpu.matmul %66, %67, %cst_24 {dimension_numbers = #tpu.dot_dimension_numbers<[1], [1], [0], [0], [0, 0, 1, 0], [], []>} : vector<64x32xbf16>, vector<64x32xbf16>, vector<64x64xf32> -> vector<64x64xf32>
    %69 = arith.addf %68, %10 : vector<64x64xf32>
    %cst_25 = arith.constant dense<0xFF800000> : vector<64xf32>
    %70 = vector.multi_reduction <maximumf>, %69, %cst_25 [1] : vector<64x64xf32> to vector<64xf32>
    %71 = vector.shape_cast %70 : vector<64xf32> to vector<64x1xf32>
    %72 = vector.broadcast %71 : vector<64x1xf32> to vector<64x64xf32>
    %73 = arith.subf %69, %72 : vector<64x64xf32>
    %74 = math.exp %73 : vector<64x64xf32>
    %cst_26 = arith.constant dense<0.000000e+00> : vector<64xf32>
    %75 = vector.multi_reduction <add>, %74, %cst_26 [1] : vector<64x64xf32> to vector<64xf32>
    %76 = vector.shape_cast %75 : vector<64xf32> to vector<64x1xf32>
    %77 = tpu.reciprocal %76 {approx = true} : vector<64x1xf32> -> vector<64x1xf32>
    %78 = vector.broadcast %77 : vector<64x1xf32> to vector<64x64xf32>
    %79 = arith.mulf %74, %78 : vector<64x64xf32>
    %80 = arith.truncf %79 : vector<64x64xf32> to vector<64x64xbf16>
    %81 = vector.extract_strided_slice %48 {offsets = [0, 32], sizes = [64, 32], strides = [1, 1]} : vector<64x128xbf16> to vector<64x32xbf16>
    %cst_27 = arith.constant dense<0.000000e+00> : vector<64x32xf32>
    %82 = tpu.matmul %80, %81, %cst_27 {dimension_numbers = #tpu.dot_dimension_numbers<[1], [0], [0], [1], [0, 0, 1, 1], [], []>} : vector<64x64xbf16>, vector<64x32xbf16>, vector<64x32xf32> -> vector<64x32xf32>
    %83 = vector.extract_strided_slice %44 {offsets = [0, 64], sizes = [64, 32], strides = [1, 1]} : vector<64x128xbf16> to vector<64x32xbf16>
    %84 = vector.extract_strided_slice %46 {offsets = [0, 64], sizes = [64, 32], strides = [1, 1]} : vector<64x128xbf16> to vector<64x32xbf16>
    %cst_28 = arith.constant dense<0.000000e+00> : vector<64x64xf32>
    %85 = tpu.matmul %83, %84, %cst_28 {dimension_numbers = #tpu.dot_dimension_numbers<[1], [1], [0], [0], [0, 0, 1, 0], [], []>} : vector<64x32xbf16>, vector<64x32xbf16>, vector<64x64xf32> -> vector<64x64xf32>
    %86 = arith.addf %85, %10 : vector<64x64xf32>
    %cst_29 = arith.constant dense<0xFF800000> : vector<64xf32>
    %87 = vector.multi_reduction <maximumf>, %86, %cst_29 [1] : vector<64x64xf32> to vector<64xf32>
    %88 = vector.shape_cast %87 : vector<64xf32> to vector<64x1xf32>
    %89 = vector.broadcast %88 : vector<64x1xf32> to vector<64x64xf32>
    %90 = arith.subf %86, %89 : vector<64x64xf32>
    %91 = math.exp %90 : vector<64x64xf32>
    %cst_30 = arith.constant dense<0.000000e+00> : vector<64xf32>
    %92 = vector.multi_reduction <add>, %91, %cst_30 [1] : vector<64x64xf32> to vector<64xf32>
    %93 = vector.shape_cast %92 : vector<64xf32> to vector<64x1xf32>
    %94 = tpu.reciprocal %93 {approx = true} : vector<64x1xf32> -> vector<64x1xf32>
    %95 = vector.broadcast %94 : vector<64x1xf32> to vector<64x64xf32>
    %96 = arith.mulf %91, %95 : vector<64x64xf32>
    %97 = arith.truncf %96 : vector<64x64xf32> to vector<64x64xbf16>
    %98 = vector.extract_strided_slice %48 {offsets = [0, 64], sizes = [64, 32], strides = [1, 1]} : vector<64x128xbf16> to vector<64x32xbf16>
    %cst_31 = arith.constant dense<0.000000e+00> : vector<64x32xf32>
    %99 = tpu.matmul %97, %98, %cst_31 {dimension_numbers = #tpu.dot_dimension_numbers<[1], [0], [0], [1], [0, 0, 1, 1], [], []>} : vector<64x64xbf16>, vector<64x32xbf16>, vector<64x32xf32> -> vector<64x32xf32>
    %100 = vector.extract_strided_slice %44 {offsets = [0, 96], sizes = [64, 32], strides = [1, 1]} : vector<64x128xbf16> to vector<64x32xbf16>
    %101 = vector.extract_strided_slice %46 {offsets = [0, 96], sizes = [64, 32], strides = [1, 1]} : vector<64x128xbf16> to vector<64x32xbf16>
    %cst_32 = arith.constant dense<0.000000e+00> : vector<64x64xf32>
    %102 = tpu.matmul %100, %101, %cst_32 {dimension_numbers = #tpu.dot_dimension_numbers<[1], [1], [0], [0], [0, 0, 1, 0], [], []>} : vector<64x32xbf16>, vector<64x32xbf16>, vector<64x64xf32> -> vector<64x64xf32>
    %103 = arith.addf %102, %10 : vector<64x64xf32>
    %cst_33 = arith.constant dense<0xFF800000> : vector<64xf32>
    %104 = vector.multi_reduction <maximumf>, %103, %cst_33 [1] : vector<64x64xf32> to vector<64xf32>
    %105 = vector.shape_cast %104 : vector<64xf32> to vector<64x1xf32>
    %106 = vector.broadcast %105 : vector<64x1xf32> to vector<64x64xf32>
    %107 = arith.subf %103, %106 : vector<64x64xf32>
    %108 = math.exp %107 : vector<64x64xf32>
    %cst_34 = arith.constant dense<0.000000e+00> : vector<64xf32>
    %109 = vector.multi_reduction <add>, %108, %cst_34 [1] : vector<64x64xf32> to vector<64xf32>
    %110 = vector.shape_cast %109 : vector<64xf32> to vector<64x1xf32>
    %111 = tpu.reciprocal %110 {approx = true} : vector<64x1xf32> -> vector<64x1xf32>
    %112 = vector.broadcast %111 : vector<64x1xf32> to vector<64x64xf32>
    %113 = arith.mulf %108, %112 : vector<64x64xf32>
    %114 = arith.truncf %113 : vector<64x64xf32> to vector<64x64xbf16>
    %115 = vector.extract_strided_slice %48 {offsets = [0, 96], sizes = [64, 32], strides = [1, 1]} : vector<64x128xbf16> to vector<64x32xbf16>
    %cst_35 = arith.constant dense<0.000000e+00> : vector<64x32xf32>
    %116 = tpu.matmul %114, %115, %cst_35 {dimension_numbers = #tpu.dot_dimension_numbers<[1], [0], [0], [1], [0, 0, 1, 1], [], []>} : vector<64x64xbf16>, vector<64x32xbf16>, vector<64x32xf32> -> vector<64x32xf32>
    %117 = tpu.concatenate %65, %82, %99, %116 in 1 : vector<64x32xf32>, vector<64x32xf32>, vector<64x32xf32>, vector<64x32xf32> -> vector<64x128xf32>
    %118 = arith.truncf %117 : vector<64x128xf32> to vector<64x128xbf16>
    %c0_36 = arith.constant 0 : index
    %c0_37 = arith.constant 0 : index
    %c0_38 = arith.constant 0 : index
    %119 = vector.load %arg9[%c0_36, %c0_37, %c0_38] : memref<2x128x128xbf16, #tpu.memory_space<vmem>>, vector<1x128x128xbf16>
    %120 = vector.shape_cast %119 : vector<1x128x128xbf16> to vector<128x128xbf16>
    %cst_39 = arith.constant dense<0.000000e+00> : vector<64x128xf32>
    %121 = tpu.matmul %118, %120, %cst_39 {dimension_numbers = #tpu.dot_dimension_numbers<[1], [0], [0], [1], [0, 0, 1, 1], [], []>} : vector<64x128xbf16>, vector<128x128xbf16>, vector<64x128xf32> -> vector<64x128xf32>
    %122 = arith.addf %0, %121 : vector<64x128xf32>
    %c0_40 = arith.constant 0 : index
    %c0_41 = arith.constant 0 : index
    %c0_42 = arith.constant 0 : index
    %123 = vector.load %arg10[%c0_40, %c0_41, %c0_42] : memref<2x1x128xf32, #tpu.memory_space<vmem>>, vector<1x1x128xf32>
    %124 = vector.shape_cast %123 : vector<1x1x128xf32> to vector<1x128xf32>
    %125 = vector.broadcast %124 : vector<1x128xf32> to vector<64x128xf32>
    %126 = arith.addf %122, %125 : vector<64x128xf32>
    %c0_43 = arith.constant 0 : index
    %c0_44 = arith.constant 0 : index
    %c0_45 = arith.constant 0 : index
    %127 = vector.load %arg11[%c0_43, %c0_44, %c0_45] : memref<2x1x128xf32, #tpu.memory_space<vmem>>, vector<1x1x128xf32>
    %128 = vector.shape_cast %127 : vector<1x1x128xf32> to vector<1x128xf32>
    %c0_46 = arith.constant 0 : index
    %c0_47 = arith.constant 0 : index
    %c0_48 = arith.constant 0 : index
    %129 = vector.load %arg12[%c0_46, %c0_47, %c0_48] : memref<2x1x128xf32, #tpu.memory_space<vmem>>, vector<1x1x128xf32>
    %130 = vector.shape_cast %129 : vector<1x1x128xf32> to vector<1x128xf32>
    %cst_49 = arith.constant dense<0.000000e+00> : vector<64xf32>
    %131 = vector.multi_reduction <add>, %126, %cst_49 [1] : vector<64x128xf32> to vector<64xf32>
    %132 = vector.shape_cast %131 : vector<64xf32> to vector<64x1xf32>
    %cst_50 = arith.constant 1.280000e+02 : f32
    %133 = vector.broadcast %cst_50 : f32 to vector<64x1xf32>
    %134 = arith.divf %132, %133 : vector<64x1xf32>
    %135 = vector.broadcast %134 : vector<64x1xf32> to vector<64x128xf32>
    %136 = arith.subf %126, %135 : vector<64x128xf32>
    %137 = arith.mulf %136, %136 : vector<64x128xf32>
    %cst_51 = arith.constant dense<0.000000e+00> : vector<64xf32>
    %138 = vector.multi_reduction <add>, %137, %cst_51 [1] : vector<64x128xf32> to vector<64xf32>
    %139 = vector.shape_cast %138 : vector<64xf32> to vector<64x1xf32>
    %cst_52 = arith.constant 1.280000e+02 : f32
    %140 = vector.broadcast %cst_52 : f32 to vector<64x1xf32>
    %141 = arith.divf %139, %140 : vector<64x1xf32>
    %cst_53 = arith.constant 9.99999974E-6 : f32
    %142 = vector.broadcast %cst_53 : f32 to vector<64x1xf32>
    %143 = arith.addf %141, %142 : vector<64x1xf32>
    %144 = math.rsqrt %143 : vector<64x1xf32>
    %145 = vector.broadcast %144 : vector<64x1xf32> to vector<64x128xf32>
    %146 = arith.mulf %136, %145 : vector<64x128xf32>
    %147 = vector.broadcast %128 : vector<1x128xf32> to vector<64x128xf32>
    %148 = arith.mulf %146, %147 : vector<64x128xf32>
    %149 = vector.broadcast %130 : vector<1x128xf32> to vector<64x128xf32>
    %150 = arith.addf %148, %149 : vector<64x128xf32>
    %151 = arith.truncf %150 : vector<64x128xf32> to vector<64x128xbf16>
    %c0_54 = arith.constant 0 : index
    %c0_55 = arith.constant 0 : index
    %c0_56 = arith.constant 0 : index
    %152 = vector.load %arg13[%c0_54, %c0_55, %c0_56] : memref<2x128x512xbf16, #tpu.memory_space<vmem>>, vector<1x128x512xbf16>
    %153 = vector.shape_cast %152 : vector<1x128x512xbf16> to vector<128x512xbf16>
    %cst_57 = arith.constant dense<0.000000e+00> : vector<64x512xf32>
    %154 = tpu.matmul %151, %153, %cst_57 {dimension_numbers = #tpu.dot_dimension_numbers<[1], [0], [0], [1], [0, 0, 1, 1], [], []>} : vector<64x128xbf16>, vector<128x512xbf16>, vector<64x512xf32> -> vector<64x512xf32>
    %c0_58 = arith.constant 0 : index
    %c0_59 = arith.constant 0 : index
    %c0_60 = arith.constant 0 : index
    %155 = vector.load %arg14[%c0_58, %c0_59, %c0_60] : memref<2x1x512xf32, #tpu.memory_space<vmem>>, vector<1x1x512xf32>
    %156 = vector.shape_cast %155 : vector<1x1x512xf32> to vector<1x512xf32>
    %157 = vector.broadcast %156 : vector<1x512xf32> to vector<64x512xf32>
    %158 = arith.addf %154, %157 : vector<64x512xf32>
    %cst_61 = arith.constant 1.702000e+00 : f32
    %159 = vector.broadcast %cst_61 : f32 to vector<64x512xf32>
    %160 = arith.mulf %159, %158 : vector<64x512xf32>
    %161 = arith.negf %160 : vector<64x512xf32>
    %162 = math.exp %161 : vector<64x512xf32>
    %cst_62 = arith.constant 1.000000e+00 : f32
    %163 = vector.broadcast %cst_62 : f32 to vector<64x512xf32>
    %164 = arith.addf %163, %162 : vector<64x512xf32>
    %165 = arith.divf %163, %164 : vector<64x512xf32>
    %166 = arith.mulf %158, %165 : vector<64x512xf32>
    %167 = arith.truncf %166 : vector<64x512xf32> to vector<64x512xbf16>
    %c0_63 = arith.constant 0 : index
    %c0_64 = arith.constant 0 : index
    %c0_65 = arith.constant 0 : index
    %168 = vector.load %arg15[%c0_63, %c0_64, %c0_65] : memref<2x512x128xbf16, #tpu.memory_space<vmem>>, vector<1x512x128xbf16>
    %169 = vector.shape_cast %168 : vector<1x512x128xbf16> to vector<512x128xbf16>
    %cst_66 = arith.constant dense<0.000000e+00> : vector<64x128xf32>
    %170 = tpu.matmul %167, %169, %cst_66 {dimension_numbers = #tpu.dot_dimension_numbers<[1], [0], [0], [1], [0, 0, 1, 1], [], []>} : vector<64x512xbf16>, vector<512x128xbf16>, vector<64x128xf32> -> vector<64x128xf32>
    %171 = arith.addf %126, %170 : vector<64x128xf32>
    %c0_67 = arith.constant 0 : index
    %c0_68 = arith.constant 0 : index
    %c0_69 = arith.constant 0 : index
    %172 = vector.load %arg16[%c0_67, %c0_68, %c0_69] : memref<2x1x128xf32, #tpu.memory_space<vmem>>, vector<1x1x128xf32>
    %173 = vector.shape_cast %172 : vector<1x1x128xf32> to vector<1x128xf32>
    %174 = vector.broadcast %173 : vector<1x128xf32> to vector<64x128xf32>
    %175 = arith.addf %171, %174 : vector<64x128xf32>
    %c1 = arith.constant 1 : index
    %c0_70 = arith.constant 0 : index
    %c0_71 = arith.constant 0 : index
    %176 = vector.load %arg5[%c1, %c0_70, %c0_71] : memref<2x1x128xf32, #tpu.memory_space<vmem>>, vector<1x1x128xf32>
    %177 = vector.shape_cast %176 : vector<1x1x128xf32> to vector<1x128xf32>
    %c1_72 = arith.constant 1 : index
    %c0_73 = arith.constant 0 : index
    %c0_74 = arith.constant 0 : index
    %178 = vector.load %arg6[%c1_72, %c0_73, %c0_74] : memref<2x1x128xf32, #tpu.memory_space<vmem>>, vector<1x1x128xf32>
    %179 = vector.shape_cast %178 : vector<1x1x128xf32> to vector<1x128xf32>
    %cst_75 = arith.constant dense<0.000000e+00> : vector<64xf32>
    %180 = vector.multi_reduction <add>, %175, %cst_75 [1] : vector<64x128xf32> to vector<64xf32>
    %181 = vector.shape_cast %180 : vector<64xf32> to vector<64x1xf32>
    %cst_76 = arith.constant 1.280000e+02 : f32
    %182 = vector.broadcast %cst_76 : f32 to vector<64x1xf32>
    %183 = arith.divf %181, %182 : vector<64x1xf32>
    %184 = vector.broadcast %183 : vector<64x1xf32> to vector<64x128xf32>
    %185 = arith.subf %175, %184 : vector<64x128xf32>
    %186 = arith.mulf %185, %185 : vector<64x128xf32>
    %cst_77 = arith.constant dense<0.000000e+00> : vector<64xf32>
    %187 = vector.multi_reduction <add>, %186, %cst_77 [1] : vector<64x128xf32> to vector<64xf32>
    %188 = vector.shape_cast %187 : vector<64xf32> to vector<64x1xf32>
    %cst_78 = arith.constant 1.280000e+02 : f32
    %189 = vector.broadcast %cst_78 : f32 to vector<64x1xf32>
    %190 = arith.divf %188, %189 : vector<64x1xf32>
    %cst_79 = arith.constant 9.99999974E-6 : f32
    %191 = vector.broadcast %cst_79 : f32 to vector<64x1xf32>
    %192 = arith.addf %190, %191 : vector<64x1xf32>
    %193 = math.rsqrt %192 : vector<64x1xf32>
    %194 = vector.broadcast %193 : vector<64x1xf32> to vector<64x128xf32>
    %195 = arith.mulf %185, %194 : vector<64x128xf32>
    %196 = vector.broadcast %177 : vector<1x128xf32> to vector<64x128xf32>
    %197 = arith.mulf %195, %196 : vector<64x128xf32>
    %198 = vector.broadcast %179 : vector<1x128xf32> to vector<64x128xf32>
    %199 = arith.addf %197, %198 : vector<64x128xf32>
    %200 = arith.truncf %199 : vector<64x128xf32> to vector<64x128xbf16>
    %c1_80 = arith.constant 1 : index
    %c0_81 = arith.constant 0 : index
    %c0_82 = arith.constant 0 : index
    %201 = vector.load %arg7[%c1_80, %c0_81, %c0_82] : memref<2x128x384xbf16, #tpu.memory_space<vmem>>, vector<1x128x384xbf16>
    %202 = vector.shape_cast %201 : vector<1x128x384xbf16> to vector<128x384xbf16>
    %cst_83 = arith.constant dense<0.000000e+00> : vector<64x384xf32>
    %203 = tpu.matmul %200, %202, %cst_83 {dimension_numbers = #tpu.dot_dimension_numbers<[1], [0], [0], [1], [0, 0, 1, 1], [], []>} : vector<64x128xbf16>, vector<128x384xbf16>, vector<64x384xf32> -> vector<64x384xf32>
    %204 = vector.extract_strided_slice %203 {offsets = [0, 0], sizes = [64, 128], strides = [1, 1]} : vector<64x384xf32> to vector<64x128xf32>
    %c1_84 = arith.constant 1 : index
    %c0_85 = arith.constant 0 : index
    %c0_86 = arith.constant 0 : index
    %205 = vector.load %arg8[%c1_84, %c0_85, %c0_86] : memref<2x1x128xf32, #tpu.memory_space<vmem>>, vector<1x1x128xf32>
    %206 = vector.shape_cast %205 : vector<1x1x128xf32> to vector<1x128xf32>
    %207 = vector.broadcast %206 : vector<1x128xf32> to vector<64x128xf32>
    %208 = arith.addf %204, %207 : vector<64x128xf32>
    %209 = arith.truncf %208 : vector<64x128xf32> to vector<64x128xbf16>
    %210 = vector.extract_strided_slice %203 {offsets = [0, 128], sizes = [64, 128], strides = [1, 1]} : vector<64x384xf32> to vector<64x128xf32>
    %211 = arith.truncf %210 : vector<64x128xf32> to vector<64x128xbf16>
    %212 = vector.extract_strided_slice %203 {offsets = [0, 256], sizes = [64, 128], strides = [1, 1]} : vector<64x384xf32> to vector<64x128xf32>
    %213 = arith.truncf %212 : vector<64x128xf32> to vector<64x128xbf16>
    %214 = vector.extract_strided_slice %209 {offsets = [0, 0], sizes = [64, 32], strides = [1, 1]} : vector<64x128xbf16> to vector<64x32xbf16>
    %215 = vector.extract_strided_slice %211 {offsets = [0, 0], sizes = [64, 32], strides = [1, 1]} : vector<64x128xbf16> to vector<64x32xbf16>
    %cst_87 = arith.constant dense<0.000000e+00> : vector<64x64xf32>
    %216 = tpu.matmul %214, %215, %cst_87 {dimension_numbers = #tpu.dot_dimension_numbers<[1], [1], [0], [0], [0, 0, 1, 0], [], []>} : vector<64x32xbf16>, vector<64x32xbf16>, vector<64x64xf32> -> vector<64x64xf32>
    %217 = arith.addf %216, %10 : vector<64x64xf32>
    %cst_88 = arith.constant dense<0xFF800000> : vector<64xf32>
    %218 = vector.multi_reduction <maximumf>, %217, %cst_88 [1] : vector<64x64xf32> to vector<64xf32>
    %219 = vector.shape_cast %218 : vector<64xf32> to vector<64x1xf32>
    %220 = vector.broadcast %219 : vector<64x1xf32> to vector<64x64xf32>
    %221 = arith.subf %217, %220 : vector<64x64xf32>
    %222 = math.exp %221 : vector<64x64xf32>
    %cst_89 = arith.constant dense<0.000000e+00> : vector<64xf32>
    %223 = vector.multi_reduction <add>, %222, %cst_89 [1] : vector<64x64xf32> to vector<64xf32>
    %224 = vector.shape_cast %223 : vector<64xf32> to vector<64x1xf32>
    %225 = tpu.reciprocal %224 {approx = true} : vector<64x1xf32> -> vector<64x1xf32>
    %226 = vector.broadcast %225 : vector<64x1xf32> to vector<64x64xf32>
    %227 = arith.mulf %222, %226 : vector<64x64xf32>
    %228 = arith.truncf %227 : vector<64x64xf32> to vector<64x64xbf16>
    %229 = vector.extract_strided_slice %213 {offsets = [0, 0], sizes = [64, 32], strides = [1, 1]} : vector<64x128xbf16> to vector<64x32xbf16>
    %cst_90 = arith.constant dense<0.000000e+00> : vector<64x32xf32>
    %230 = tpu.matmul %228, %229, %cst_90 {dimension_numbers = #tpu.dot_dimension_numbers<[1], [0], [0], [1], [0, 0, 1, 1], [], []>} : vector<64x64xbf16>, vector<64x32xbf16>, vector<64x32xf32> -> vector<64x32xf32>
    %231 = vector.extract_strided_slice %209 {offsets = [0, 32], sizes = [64, 32], strides = [1, 1]} : vector<64x128xbf16> to vector<64x32xbf16>
    %232 = vector.extract_strided_slice %211 {offsets = [0, 32], sizes = [64, 32], strides = [1, 1]} : vector<64x128xbf16> to vector<64x32xbf16>
    %cst_91 = arith.constant dense<0.000000e+00> : vector<64x64xf32>
    %233 = tpu.matmul %231, %232, %cst_91 {dimension_numbers = #tpu.dot_dimension_numbers<[1], [1], [0], [0], [0, 0, 1, 0], [], []>} : vector<64x32xbf16>, vector<64x32xbf16>, vector<64x64xf32> -> vector<64x64xf32>
    %234 = arith.addf %233, %10 : vector<64x64xf32>
    %cst_92 = arith.constant dense<0xFF800000> : vector<64xf32>
    %235 = vector.multi_reduction <maximumf>, %234, %cst_92 [1] : vector<64x64xf32> to vector<64xf32>
    %236 = vector.shape_cast %235 : vector<64xf32> to vector<64x1xf32>
    %237 = vector.broadcast %236 : vector<64x1xf32> to vector<64x64xf32>
    %238 = arith.subf %234, %237 : vector<64x64xf32>
    %239 = math.exp %238 : vector<64x64xf32>
    %cst_93 = arith.constant dense<0.000000e+00> : vector<64xf32>
    %240 = vector.multi_reduction <add>, %239, %cst_93 [1] : vector<64x64xf32> to vector<64xf32>
    %241 = vector.shape_cast %240 : vector<64xf32> to vector<64x1xf32>
    %242 = tpu.reciprocal %241 {approx = true} : vector<64x1xf32> -> vector<64x1xf32>
    %243 = vector.broadcast %242 : vector<64x1xf32> to vector<64x64xf32>
    %244 = arith.mulf %239, %243 : vector<64x64xf32>
    %245 = arith.truncf %244 : vector<64x64xf32> to vector<64x64xbf16>
    %246 = vector.extract_strided_slice %213 {offsets = [0, 32], sizes = [64, 32], strides = [1, 1]} : vector<64x128xbf16> to vector<64x32xbf16>
    %cst_94 = arith.constant dense<0.000000e+00> : vector<64x32xf32>
    %247 = tpu.matmul %245, %246, %cst_94 {dimension_numbers = #tpu.dot_dimension_numbers<[1], [0], [0], [1], [0, 0, 1, 1], [], []>} : vector<64x64xbf16>, vector<64x32xbf16>, vector<64x32xf32> -> vector<64x32xf32>
    %248 = vector.extract_strided_slice %209 {offsets = [0, 64], sizes = [64, 32], strides = [1, 1]} : vector<64x128xbf16> to vector<64x32xbf16>
    %249 = vector.extract_strided_slice %211 {offsets = [0, 64], sizes = [64, 32], strides = [1, 1]} : vector<64x128xbf16> to vector<64x32xbf16>
    %cst_95 = arith.constant dense<0.000000e+00> : vector<64x64xf32>
    %250 = tpu.matmul %248, %249, %cst_95 {dimension_numbers = #tpu.dot_dimension_numbers<[1], [1], [0], [0], [0, 0, 1, 0], [], []>} : vector<64x32xbf16>, vector<64x32xbf16>, vector<64x64xf32> -> vector<64x64xf32>
    %251 = arith.addf %250, %10 : vector<64x64xf32>
    %cst_96 = arith.constant dense<0xFF800000> : vector<64xf32>
    %252 = vector.multi_reduction <maximumf>, %251, %cst_96 [1] : vector<64x64xf32> to vector<64xf32>
    %253 = vector.shape_cast %252 : vector<64xf32> to vector<64x1xf32>
    %254 = vector.broadcast %253 : vector<64x1xf32> to vector<64x64xf32>
    %255 = arith.subf %251, %254 : vector<64x64xf32>
    %256 = math.exp %255 : vector<64x64xf32>
    %cst_97 = arith.constant dense<0.000000e+00> : vector<64xf32>
    %257 = vector.multi_reduction <add>, %256, %cst_97 [1] : vector<64x64xf32> to vector<64xf32>
    %258 = vector.shape_cast %257 : vector<64xf32> to vector<64x1xf32>
    %259 = tpu.reciprocal %258 {approx = true} : vector<64x1xf32> -> vector<64x1xf32>
    %260 = vector.broadcast %259 : vector<64x1xf32> to vector<64x64xf32>
    %261 = arith.mulf %256, %260 : vector<64x64xf32>
    %262 = arith.truncf %261 : vector<64x64xf32> to vector<64x64xbf16>
    %263 = vector.extract_strided_slice %213 {offsets = [0, 64], sizes = [64, 32], strides = [1, 1]} : vector<64x128xbf16> to vector<64x32xbf16>
    %cst_98 = arith.constant dense<0.000000e+00> : vector<64x32xf32>
    %264 = tpu.matmul %262, %263, %cst_98 {dimension_numbers = #tpu.dot_dimension_numbers<[1], [0], [0], [1], [0, 0, 1, 1], [], []>} : vector<64x64xbf16>, vector<64x32xbf16>, vector<64x32xf32> -> vector<64x32xf32>
    %265 = vector.extract_strided_slice %209 {offsets = [0, 96], sizes = [64, 32], strides = [1, 1]} : vector<64x128xbf16> to vector<64x32xbf16>
    %266 = vector.extract_strided_slice %211 {offsets = [0, 96], sizes = [64, 32], strides = [1, 1]} : vector<64x128xbf16> to vector<64x32xbf16>
    %cst_99 = arith.constant dense<0.000000e+00> : vector<64x64xf32>
    %267 = tpu.matmul %265, %266, %cst_99 {dimension_numbers = #tpu.dot_dimension_numbers<[1], [1], [0], [0], [0, 0, 1, 0], [], []>} : vector<64x32xbf16>, vector<64x32xbf16>, vector<64x64xf32> -> vector<64x64xf32>
    %268 = arith.addf %267, %10 : vector<64x64xf32>
    %cst_100 = arith.constant dense<0xFF800000> : vector<64xf32>
    %269 = vector.multi_reduction <maximumf>, %268, %cst_100 [1] : vector<64x64xf32> to vector<64xf32>
    %270 = vector.shape_cast %269 : vector<64xf32> to vector<64x1xf32>
    %271 = vector.broadcast %270 : vector<64x1xf32> to vector<64x64xf32>
    %272 = arith.subf %268, %271 : vector<64x64xf32>
    %273 = math.exp %272 : vector<64x64xf32>
    %cst_101 = arith.constant dense<0.000000e+00> : vector<64xf32>
    %274 = vector.multi_reduction <add>, %273, %cst_101 [1] : vector<64x64xf32> to vector<64xf32>
    %275 = vector.shape_cast %274 : vector<64xf32> to vector<64x1xf32>
    %276 = tpu.reciprocal %275 {approx = true} : vector<64x1xf32> -> vector<64x1xf32>
    %277 = vector.broadcast %276 : vector<64x1xf32> to vector<64x64xf32>
    %278 = arith.mulf %273, %277 : vector<64x64xf32>
    %279 = arith.truncf %278 : vector<64x64xf32> to vector<64x64xbf16>
    %280 = vector.extract_strided_slice %213 {offsets = [0, 96], sizes = [64, 32], strides = [1, 1]} : vector<64x128xbf16> to vector<64x32xbf16>
    %cst_102 = arith.constant dense<0.000000e+00> : vector<64x32xf32>
    %281 = tpu.matmul %279, %280, %cst_102 {dimension_numbers = #tpu.dot_dimension_numbers<[1], [0], [0], [1], [0, 0, 1, 1], [], []>} : vector<64x64xbf16>, vector<64x32xbf16>, vector<64x32xf32> -> vector<64x32xf32>
    %282 = tpu.concatenate %230, %247, %264, %281 in 1 : vector<64x32xf32>, vector<64x32xf32>, vector<64x32xf32>, vector<64x32xf32> -> vector<64x128xf32>
    %283 = arith.truncf %282 : vector<64x128xf32> to vector<64x128xbf16>
    %c1_103 = arith.constant 1 : index
    %c0_104 = arith.constant 0 : index
    %c0_105 = arith.constant 0 : index
    %284 = vector.load %arg9[%c1_103, %c0_104, %c0_105] : memref<2x128x128xbf16, #tpu.memory_space<vmem>>, vector<1x128x128xbf16>
    %285 = vector.shape_cast %284 : vector<1x128x128xbf16> to vector<128x128xbf16>
    %cst_106 = arith.constant dense<0.000000e+00> : vector<64x128xf32>
    %286 = tpu.matmul %283, %285, %cst_106 {dimension_numbers = #tpu.dot_dimension_numbers<[1], [0], [0], [1], [0, 0, 1, 1], [], []>} : vector<64x128xbf16>, vector<128x128xbf16>, vector<64x128xf32> -> vector<64x128xf32>
    %287 = arith.addf %175, %286 : vector<64x128xf32>
    %c1_107 = arith.constant 1 : index
    %c0_108 = arith.constant 0 : index
    %c0_109 = arith.constant 0 : index
    %288 = vector.load %arg10[%c1_107, %c0_108, %c0_109] : memref<2x1x128xf32, #tpu.memory_space<vmem>>, vector<1x1x128xf32>
    %289 = vector.shape_cast %288 : vector<1x1x128xf32> to vector<1x128xf32>
    %290 = vector.broadcast %289 : vector<1x128xf32> to vector<64x128xf32>
    %291 = arith.addf %287, %290 : vector<64x128xf32>
    %c1_110 = arith.constant 1 : index
    %c0_111 = arith.constant 0 : index
    %c0_112 = arith.constant 0 : index
    %292 = vector.load %arg11[%c1_110, %c0_111, %c0_112] : memref<2x1x128xf32, #tpu.memory_space<vmem>>, vector<1x1x128xf32>
    %293 = vector.shape_cast %292 : vector<1x1x128xf32> to vector<1x128xf32>
    %c1_113 = arith.constant 1 : index
    %c0_114 = arith.constant 0 : index
    %c0_115 = arith.constant 0 : index
    %294 = vector.load %arg12[%c1_113, %c0_114, %c0_115] : memref<2x1x128xf32, #tpu.memory_space<vmem>>, vector<1x1x128xf32>
    %295 = vector.shape_cast %294 : vector<1x1x128xf32> to vector<1x128xf32>
    %cst_116 = arith.constant dense<0.000000e+00> : vector<64xf32>
    %296 = vector.multi_reduction <add>, %291, %cst_116 [1] : vector<64x128xf32> to vector<64xf32>
    %297 = vector.shape_cast %296 : vector<64xf32> to vector<64x1xf32>
    %cst_117 = arith.constant 1.280000e+02 : f32
    %298 = vector.broadcast %cst_117 : f32 to vector<64x1xf32>
    %299 = arith.divf %297, %298 : vector<64x1xf32>
    %300 = vector.broadcast %299 : vector<64x1xf32> to vector<64x128xf32>
    %301 = arith.subf %291, %300 : vector<64x128xf32>
    %302 = arith.mulf %301, %301 : vector<64x128xf32>
    %cst_118 = arith.constant dense<0.000000e+00> : vector<64xf32>
    %303 = vector.multi_reduction <add>, %302, %cst_118 [1] : vector<64x128xf32> to vector<64xf32>
    %304 = vector.shape_cast %303 : vector<64xf32> to vector<64x1xf32>
    %cst_119 = arith.constant 1.280000e+02 : f32
    %305 = vector.broadcast %cst_119 : f32 to vector<64x1xf32>
    %306 = arith.divf %304, %305 : vector<64x1xf32>
    %cst_120 = arith.constant 9.99999974E-6 : f32
    %307 = vector.broadcast %cst_120 : f32 to vector<64x1xf32>
    %308 = arith.addf %306, %307 : vector<64x1xf32>
    %309 = math.rsqrt %308 : vector<64x1xf32>
    %310 = vector.broadcast %309 : vector<64x1xf32> to vector<64x128xf32>
    %311 = arith.mulf %301, %310 : vector<64x128xf32>
    %312 = vector.broadcast %293 : vector<1x128xf32> to vector<64x128xf32>
    %313 = arith.mulf %311, %312 : vector<64x128xf32>
    %314 = vector.broadcast %295 : vector<1x128xf32> to vector<64x128xf32>
    %315 = arith.addf %313, %314 : vector<64x128xf32>
    %316 = arith.truncf %315 : vector<64x128xf32> to vector<64x128xbf16>
    %c1_121 = arith.constant 1 : index
    %c0_122 = arith.constant 0 : index
    %c0_123 = arith.constant 0 : index
    %317 = vector.load %arg13[%c1_121, %c0_122, %c0_123] : memref<2x128x512xbf16, #tpu.memory_space<vmem>>, vector<1x128x512xbf16>
    %318 = vector.shape_cast %317 : vector<1x128x512xbf16> to vector<128x512xbf16>
    %cst_124 = arith.constant dense<0.000000e+00> : vector<64x512xf32>
    %319 = tpu.matmul %316, %318, %cst_124 {dimension_numbers = #tpu.dot_dimension_numbers<[1], [0], [0], [1], [0, 0, 1, 1], [], []>} : vector<64x128xbf16>, vector<128x512xbf16>, vector<64x512xf32> -> vector<64x512xf32>
    %c1_125 = arith.constant 1 : index
    %c0_126 = arith.constant 0 : index
    %c0_127 = arith.constant 0 : index
    %320 = vector.load %arg14[%c1_125, %c0_126, %c0_127] : memref<2x1x512xf32, #tpu.memory_space<vmem>>, vector<1x1x512xf32>
    %321 = vector.shape_cast %320 : vector<1x1x512xf32> to vector<1x512xf32>
    %322 = vector.broadcast %321 : vector<1x512xf32> to vector<64x512xf32>
    %323 = arith.addf %319, %322 : vector<64x512xf32>
    %cst_128 = arith.constant 1.702000e+00 : f32
    %324 = vector.broadcast %cst_128 : f32 to vector<64x512xf32>
    %325 = arith.mulf %324, %323 : vector<64x512xf32>
    %326 = arith.negf %325 : vector<64x512xf32>
    %327 = math.exp %326 : vector<64x512xf32>
    %cst_129 = arith.constant 1.000000e+00 : f32
    %328 = vector.broadcast %cst_129 : f32 to vector<64x512xf32>
    %329 = arith.addf %328, %327 : vector<64x512xf32>
    %330 = arith.divf %328, %329 : vector<64x512xf32>
    %331 = arith.mulf %323, %330 : vector<64x512xf32>
    %332 = arith.truncf %331 : vector<64x512xf32> to vector<64x512xbf16>
    %c1_130 = arith.constant 1 : index
    %c0_131 = arith.constant 0 : index
    %c0_132 = arith.constant 0 : index
    %333 = vector.load %arg15[%c1_130, %c0_131, %c0_132] : memref<2x512x128xbf16, #tpu.memory_space<vmem>>, vector<1x512x128xbf16>
    %334 = vector.shape_cast %333 : vector<1x512x128xbf16> to vector<512x128xbf16>
    %cst_133 = arith.constant dense<0.000000e+00> : vector<64x128xf32>
    %335 = tpu.matmul %332, %334, %cst_133 {dimension_numbers = #tpu.dot_dimension_numbers<[1], [0], [0], [1], [0, 0, 1, 1], [], []>} : vector<64x512xbf16>, vector<512x128xbf16>, vector<64x128xf32> -> vector<64x128xf32>
    %336 = arith.addf %291, %335 : vector<64x128xf32>
    %c1_134 = arith.constant 1 : index
    %c0_135 = arith.constant 0 : index
    %c0_136 = arith.constant 0 : index
    %337 = vector.load %arg16[%c1_134, %c0_135, %c0_136] : memref<2x1x128xf32, #tpu.memory_space<vmem>>, vector<1x1x128xf32>
    %338 = vector.shape_cast %337 : vector<1x1x128xf32> to vector<1x128xf32>
    %339 = vector.broadcast %338 : vector<1x128xf32> to vector<64x128xf32>
    %340 = arith.addf %336, %339 : vector<64x128xf32>
    %341 = tpu.iota {dimensions = array<i32: 1>} : vector<4x64xi32>
    %c0_137 = arith.constant 0 : index
    %c0_138 = arith.constant 0 : index
    %342 = vector.load %arg2[%c0_137, %c0_138] : memref<4x1xi32, #tpu.memory_space<vmem>>, vector<4x1xi32>
    %343 = vector.broadcast %342 : vector<4x1xi32> to vector<4x64xi32>
    %344 = arith.cmpi eq, %341, %343 : vector<4x64xi32>
    %345 = arith.extui %344 : vector<4x64xi1> to vector<4x64xi32>
    %346 = arith.sitofp %345 : vector<4x64xi32> to vector<4x64xf32>
    %cst_139 = arith.constant dense<0.000000e+00> : vector<4x128xf32>
    %347 = tpu.matmul %346, %340, %cst_139 {dimension_numbers = #tpu.dot_dimension_numbers<[1], [0], [0], [1], [0, 0, 1, 1], [], []>} : vector<4x64xf32>, vector<64x128xf32>, vector<4x128xf32> -> vector<4x128xf32>
    %c0_140 = arith.constant 0 : index
    %c0_141 = arith.constant 0 : index
    %348 = vector.load %arg17[%c0_140, %c0_141] : memref<1x128xf32, #tpu.memory_space<vmem>>, vector<1x128xf32>
    %c0_142 = arith.constant 0 : index
    %c0_143 = arith.constant 0 : index
    %349 = vector.load %arg18[%c0_142, %c0_143] : memref<1x128xf32, #tpu.memory_space<vmem>>, vector<1x128xf32>
    %cst_144 = arith.constant dense<0.000000e+00> : vector<4xf32>
    %350 = vector.multi_reduction <add>, %347, %cst_144 [1] : vector<4x128xf32> to vector<4xf32>
    %351 = vector.shape_cast %350 : vector<4xf32> to vector<4x1xf32>
    %cst_145 = arith.constant 1.280000e+02 : f32
    %352 = vector.broadcast %cst_145 : f32 to vector<4x1xf32>
    %353 = arith.divf %351, %352 : vector<4x1xf32>
    %354 = vector.broadcast %353 : vector<4x1xf32> to vector<4x128xf32>
    %355 = arith.subf %347, %354 : vector<4x128xf32>
    %356 = arith.mulf %355, %355 : vector<4x128xf32>
    %cst_146 = arith.constant dense<0.000000e+00> : vector<4xf32>
    %357 = vector.multi_reduction <add>, %356, %cst_146 [1] : vector<4x128xf32> to vector<4xf32>
    %358 = vector.shape_cast %357 : vector<4xf32> to vector<4x1xf32>
    %cst_147 = arith.constant 1.280000e+02 : f32
    %359 = vector.broadcast %cst_147 : f32 to vector<4x1xf32>
    %360 = arith.divf %358, %359 : vector<4x1xf32>
    %cst_148 = arith.constant 9.99999974E-6 : f32
    %361 = vector.broadcast %cst_148 : f32 to vector<4x1xf32>
    %362 = arith.addf %360, %361 : vector<4x1xf32>
    %363 = math.rsqrt %362 : vector<4x1xf32>
    %364 = vector.broadcast %363 : vector<4x1xf32> to vector<4x128xf32>
    %365 = arith.mulf %355, %364 : vector<4x128xf32>
    %366 = vector.broadcast %348 : vector<1x128xf32> to vector<4x128xf32>
    %367 = arith.mulf %365, %366 : vector<4x128xf32>
    %368 = vector.broadcast %349 : vector<1x128xf32> to vector<4x128xf32>
    %369 = arith.addf %367, %368 : vector<4x128xf32>
    %c0_149 = arith.constant 0 : index
    %c0_150 = arith.constant 0 : index
    %370 = vector.load %arg19[%c0_149, %c0_150] : memref<128x128xbf16, #tpu.memory_space<vmem>>, vector<128x128xbf16>
    %371 = arith.truncf %369 : vector<4x128xf32> to vector<4x128xbf16>
    %cst_151 = arith.constant dense<0.000000e+00> : vector<4x128xf32>
    %372 = tpu.matmul %371, %370, %cst_151 {dimension_numbers = #tpu.dot_dimension_numbers<[1], [0], [0], [1], [0, 0, 1, 1], [], []>} : vector<4x128xbf16>, vector<128x128xbf16>, vector<4x128xf32> -> vector<4x128xf32>
    %373 = arith.mulf %372, %372 : vector<4x128xf32>
    %cst_152 = arith.constant dense<0.000000e+00> : vector<4xf32>
    %374 = vector.multi_reduction <add>, %373, %cst_152 [1] : vector<4x128xf32> to vector<4xf32>
    %375 = vector.shape_cast %374 : vector<4xf32> to vector<4x1xf32>
    %376 = math.rsqrt %375 : vector<4x1xf32>
    %377 = vector.broadcast %376 : vector<4x1xf32> to vector<4x128xf32>
    %378 = arith.mulf %372, %377 : vector<4x128xf32>
    %c0_153 = arith.constant 0 : index
    %c0_154 = arith.constant 0 : index
    %c0_155 = arith.constant 0 : index
    %379 = vector.load %arg3[%c0_153, %c0_154, %c0_155] : memref<2x1x128xf32, #tpu.memory_space<vmem>>, vector<2x1x128xf32>
    %380 = vector.shape_cast %379 : vector<2x1x128xf32> to vector<2x128xf32>
    %cst_156 = arith.constant dense<0.000000e+00> : vector<2x4xf32>
    %381 = tpu.matmul %380, %378, %cst_156 {dimension_numbers = #tpu.dot_dimension_numbers<[1], [1], [0], [0], [0, 0, 1, 0], [], []>} : vector<2x128xf32>, vector<4x128xf32>, vector<2x4xf32> -> vector<2x4xf32>
    %c0_157 = arith.constant 0 : index
    %382 = memref.load %arg4[%c0_157] : memref<1xf32, #tpu.memory_space<smem>>
    %383 = vector.broadcast %382 : f32 to vector<2x4xf32>
    %384 = arith.mulf %383, %381 : vector<2x4xf32>
    %c0_158 = arith.constant 0 : index
    %c0_159 = arith.constant 0 : index
    %385 = vector.load %arg20[%c0_158, %c0_159] : memref<2x4xf32, #tpu.memory_space<vmem>>, vector<2x4xf32>
    tpu.vector_store %arg20[%c0_158, %c0_159], %384 {strides = array<i32>} : memref<2x4xf32, #tpu.memory_space<vmem>>, vector<2x4xf32>,
    return
  }
  func.func @transform_0(%arg0: i32) -> (i32, i32) {
    %c0_i32 = arith.constant 0 : i32
    %c0_i32_0 = arith.constant 0 : i32
    %c0_i32_1 = arith.constant 0 : i32
    return %c0_i32, %c0_i32_0 : i32, i32
  }
  func.func @transform_1(%arg0: i32) -> (i32, i32) {
    %c0_i32 = arith.constant 0 : i32
    %c0_i32_0 = arith.constant 0 : i32
    %c0_i32_1 = arith.constant 0 : i32
    return %c0_i32, %c0_i32_0 : i32, i32
  }
  func.func @transform_2(%arg0: i32) -> (i32, i32, i32) {
    %c0_i32 = arith.constant 0 : i32
    %c0_i32_0 = arith.constant 0 : i32
    %c0_i32_1 = arith.constant 0 : i32
    %c0_i32_2 = arith.constant 0 : i32
    return %c0_i32, %c0_i32_0, %c0_i32_1 : i32, i32, i32
  }
  func.func @transform_3(%arg0: i32) -> i32 {
    %c0_i32 = arith.constant 0 : i32
    %c0_i32_0 = arith.constant 0 : i32
    return %c0_i32 : i32
  }
  func.func @transform_4(%arg0: i32) -> (i32, i32, i32) {
    %c0_i32 = arith.constant 0 : i32
    %c0_i32_0 = arith.constant 0 : i32
    %c0_i32_1 = arith.constant 0 : i32
    %c0_i32_2 = arith.constant 0 : i32
    return %c0_i32, %c0_i32_0, %c0_i32_1 : i32, i32, i32
  }
  func.func @transform_5(%arg0: i32) -> (i32, i32, i32) {
    %c0_i32 = arith.constant 0 : i32
    %c0_i32_0 = arith.constant 0 : i32
    %c0_i32_1 = arith.constant 0 : i32
    %c0_i32_2 = arith.constant 0 : i32
    return %c0_i32, %c0_i32_0, %c0_i32_1 : i32, i32, i32
  }
  func.func @transform_6(%arg0: i32) -> (i32, i32, i32) {
    %c0_i32 = arith.constant 0 : i32
    %c0_i32_0 = arith.constant 0 : i32
    %c0_i32_1 = arith.constant 0 : i32
    %c0_i32_2 = arith.constant 0 : i32
    return %c0_i32, %c0_i32_0, %c0_i32_1 : i32, i32, i32
  }
  func.func @transform_7(%arg0: i32) -> (i32, i32, i32) {
    %c0_i32 = arith.constant 0 : i32
    %c0_i32_0 = arith.constant 0 : i32
    %c0_i32_1 = arith.constant 0 : i32
    %c0_i32_2 = arith.constant 0 : i32
    return %c0_i32, %c0_i32_0, %c0_i32_1 : i32, i32, i32
  }
  func.func @transform_8(%arg0: i32) -> (i32, i32, i32) {
    %c0_i32 = arith.constant 0 : i32
    %c0_i32_0 = arith.constant 0 : i32
    %c0_i32_1 = arith.constant 0 : i32
    %c0_i32_2 = arith.constant 0 : i32
    return %c0_i32, %c0_i32_0, %c0_i32_1 : i32, i32, i32
  }
  func.func @transform_9(%arg0: i32) -> (i32, i32, i32) {
    %c0_i32 = arith.constant 0 : i32
    %c0_i32_0 = arith.constant 0 : i32
    %c0_i32_1 = arith.constant 0 : i32
    %c0_i32_2 = arith.constant 0 : i32
    return %c0_i32, %c0_i32_0, %c0_i32_1 : i32, i32, i32
  }
  func.func @transform_10(%arg0: i32) -> (i32, i32, i32) {
    %c0_i32 = arith.constant 0 : i32
    %c0_i32_0 = arith.constant 0 : i32
    %c0_i32_1 = arith.constant 0 : i32
    %c0_i32_2 = arith.constant 0 : i32
    return %c0_i32, %c0_i32_0, %c0_i32_1 : i32, i32, i32
  }
  func.func @transform_11(%arg0: i32) -> (i32, i32, i32) {
    %c0_i32 = arith.constant 0 : i32
    %c0_i32_0 = arith.constant 0 : i32
    %c0_i32_1 = arith.constant 0 : i32
    %c0_i32_2 = arith.constant 0 : i32
    return %c0_i32, %c0_i32_0, %c0_i32_1 : i32, i32, i32
  }
  func.func @transform_12(%arg0: i32) -> (i32, i32, i32) {
    %c0_i32 = arith.constant 0 : i32
    %c0_i32_0 = arith.constant 0 : i32
    %c0_i32_1 = arith.constant 0 : i32
    %c0_i32_2 = arith.constant 0 : i32
    return %c0_i32, %c0_i32_0, %c0_i32_1 : i32, i32, i32
  }
  func.func @transform_13(%arg0: i32) -> (i32, i32, i32) {
    %c0_i32 = arith.constant 0 : i32
    %c0_i32_0 = arith.constant 0 : i32
    %c0_i32_1 = arith.constant 0 : i32
    %c0_i32_2 = arith.constant 0 : i32
    return %c0_i32, %c0_i32_0, %c0_i32_1 : i32, i32, i32
  }
  func.func @transform_14(%arg0: i32) -> (i32, i32, i32) {
    %c0_i32 = arith.constant 0 : i32
    %c0_i32_0 = arith.constant 0 : i32
    %c0_i32_1 = arith.constant 0 : i32
    %c0_i32_2 = arith.constant 0 : i32
    return %c0_i32, %c0_i32_0, %c0_i32_1 : i32, i32, i32
  }
  func.func @transform_15(%arg0: i32) -> (i32, i32, i32) {
    %c0_i32 = arith.constant 0 : i32
    %c0_i32_0 = arith.constant 0 : i32
    %c0_i32_1 = arith.constant 0 : i32
    %c0_i32_2 = arith.constant 0 : i32
    return %c0_i32, %c0_i32_0, %c0_i32_1 : i32, i32, i32
  }
  func.func @transform_16(%arg0: i32) -> (i32, i32) {
    %c0_i32 = arith.constant 0 : i32
    %c0_i32_0 = arith.constant 0 : i32
    %c0_i32_1 = arith.constant 0 : i32
    return %c0_i32, %c0_i32_0 : i32, i32
  }
  func.func @transform_17(%arg0: i32) -> (i32, i32) {
    %c0_i32 = arith.constant 0 : i32
    %c0_i32_0 = arith.constant 0 : i32
    %c0_i32_1 = arith.constant 0 : i32
    return %c0_i32, %c0_i32_0 : i32, i32
  }
  func.func @transform_18(%arg0: i32) -> (i32, i32) {
    %c0_i32 = arith.constant 0 : i32
    %c0_i32_0 = arith.constant 0 : i32
    %c0_i32_1 = arith.constant 0 : i32
    return %c0_i32, %c0_i32_0 : i32, i32
  }
  func.func @transform_19(%arg0: i32) -> (i32, i32) {
    %c0_i32 = arith.constant 0 : i32
    %c0_i32_0 = arith.constant 0 : i32
    %c0_i32_1 = arith.constant 0 : i32
    return %c0_i32, %c0_i32_0 : i32, i32
  }
}

</mosaic_0001>

<bundles_post_ra>
// kernel: custom_clip_forward.2
= control target key start
LH: loop header
LB: loop body
LE: loop exit
PB: predicated region body
PF: predicated region fallthrough
CT: control target
= control target key end

     0   :  { %s7318_s0 = inlined_call_operand.vmem [shape: f32[2,24,192], index: 0, kind: input, shape index: {}]   ;;  %s7319_s1 = inlined_call_operand.vmem [shape: bf16[192,128], index: 1, kind: input, shape index: {}]   ;;  %s7320_s2 = inlined_call_operand.vmem [shape: f32[24,128], index: 2, kind: input, shape index: {}]   ;;  %s7321_s3 = inlined_call_operand.vmem [shape: f32[1,128], index: 3, kind: input, shape index: {}]   ;;  %s7322_s4 = inlined_call_operand.vmem [shape: f32[1,128], index: 4, kind: input, shape index: {}]   ;;  %s7323_s5 = inlined_call_operand.vmem [shape: f32[2,1,128], index: 5, kind: input, shape index: {}]   ;;  %s7324_s6 = inlined_call_operand.vmem [shape: f32[2,1,128], index: 6, kind: input, shape index: {}]   ;;  %s7325_s7 = inlined_call_operand.vmem [shape: bf16[2,128,384], index: 7, kind: input, shape index: {}]   ;;  %s7326_s8 = inlined_call_operand.vmem [shape: f32[2,1,128], index: 8, kind: input, shape index: {}]   ;;  %s7327_s9 = inlined_call_operand.vmem [shape: bf16[2,128,128], index: 9, kind: input, shape index: {}]   ;;  %s7328_s10 = inlined_call_operand.vmem [shape: f32[2,1,128], index: 10, kind: input, shape index: {}]   ;;  %s7329_s11 = inlined_call_operand.vmem [shape: f32[2,1,128], index: 11, kind: input, shape index: {}]   ;;  %s7330_s12 = inlined_call_operand.vmem [shape: f32[2,1,128], index: 12, kind: input, shape index: {}]   ;;  %s7331_s13 = inlined_call_operand.vmem [shape: bf16[2,128,512], index: 13, kind: input, shape index: {}]   ;;  %s7332_s14 = inlined_call_operand.vmem [shape: f32[2,1,512], index: 14, kind: input, shape index: {}]   ;;  %s7333_s15 = inlined_call_operand.vmem [shape: bf16[2,512,128], index: 15, kind: input, shape index: {}]   ;;  %s7334_s16 = inlined_call_operand.vmem [shape: f32[2,1,128], index: 16, kind: input, shape index: {}]   ;;  %s7335_s17 = inlined_call_operand.vmem [shape: f32[1,128], index: 17, kind: input, shape index: {}]   ;;  %s7336_s18 = inlined_call_operand.vmem [shape: f32[1,128], index: 18, kind: input, shape index: {}]   ;;  %s7337_s19 = inlined_call_operand.vmem [shape: bf16[128,128], index: 19, kind: input, shape index: {}]   ;;  %s7338_s20 = inlined_call_operand.vmem [shape: f32[2,1,128], index: 20, kind: output, shape index: {}]  }
   0x1   :  { %7347 = sst [smem:[#allocation2_spill]] %s7318_s0 }
   0x2   :  { %7348 = sst [smem:[#allocation3_spill]] %s7319_s1  ;;  %s6105_s1 = smov 0  }
   0x3   :  { %7349 = sst [smem:[#allocation4_spill]] %s7320_s2 }
   0x4   :  { %7350 = sst [smem:[#allocation5_spill]] %s7321_s3 }
   0x5   :  { %7351 = sst [smem:[#allocation6_spill]] %s7322_s4 }
   0x6 LB: > { %s4662_s22 = sadd.s32 4294967295, %s5991_s1   ;;  %p4666_p0 = scmp.ge.s32.totalorder %s5991_s1, 1  ;;  %s5991_s1 = sphi %s6105_s1, %s30_s1  }
   0x7   : > { %p562_p1 = scmp.lt.s32.totalorder %s5991_s1, 3 }
   0x9   : > { %p563_p2 = pnand %p4666_p0, %p562_p1 }
   0xa   : > { %s7352_s2 = sld [smem:[#allocation3_spill]] (!%p563_p2)  ;;  %p618_p3 = scmp.lt.s32.totalorder (!%p563_p2), %s4662_s22, 1 }
   0xb   : > { %566 = sbr.rel (%p563_p2) target bundleno = 8605 (0x219d), region = 100  ;;  %s7353_s30 = sld [smem:[#allocation2_spill]] (!%p563_p2) }
   0xc   : > { %s7354_s29 = sld [smem:[#allocation4_spill]] (!%p563_p2)  ;;  %s7343_s4 = smov (!%p563_p2), 64  }
   0xd   : > { %s7355_s3 = sld [smem:[#allocation5_spill]] (!%p563_p2) }
   0xe   : > { %s7356_s28 = sld [smem:[#allocation6_spill]] (!%p563_p2) }
  0x10   : > { %v5567_v0 = vld [vmem:[%s7352_s2 + $0x38] sm:$0xff]   ;;  %v5993_v1 = vmov 0   ;;  %v5568_v2 = vld [vmem:[%s7352_s2 + $0x30] sm:$0xff]   ;;  %s7361_s22 = smov (!%p618_p3, %s4662_s22), 1  ;;  %v5569_v3 = vld [vmem:[%s7352_s2 + $0x28] sm:$0xff]   ;;  %vm736_vm0 = vcmask 523264  }
  0x11   : > { %743 = vmatprep.subr.bf16.mxu0 %v5993_v1  ;;  %1096 = vmatprep.mubr.bf16.mxu1 %v5993_v1  ;;  %s5536_s26 = smul.u32 48, %s7361_s22  ;;  %v5570_v4 = vld [vmem:[%s7352_s2 + $0x20] sm:$0xff]   ;;  %v5571_v8 = vld [vmem:[%s7352_s2 + $0x18] sm:$0xff]   ;;  %v5572_v9 = vld [vmem:[%s7352_s2 + $0x10] sm:$0xff]   ;;  %vm1179_vm1 = vcmask 261120   ;;  %vm1282_vm2 = vcmask 1043456   ;;  %s625_s24 = scalar_lea.vmem %s7338_s20, %s7361_s22 }
  0x12   : > { %744 = vmatpush1.bf16.msra.mxu0 %v5567_v0  ;;  %v5573_v10 = vld [vmem:[%s7352_s2 + $0x8] sm:$0xff]   ;;  %v5574_v11 = vld [vmem:[%s7352_s2] sm:$0xff]   ;;  %v5575_v12 = vld [vmem:[%s7352_s2 + $0x58] sm:$0xff]   ;;  %vm1240_vm4 = vcmask 195584   ;;  %vm1877_vm5 = vcmask 785408   ;;  %vm5999_vm6 = vmmov 0  }
  0x13   : > { %745 = vmatprep.subr.bf16.mxu0 %v5993_v1  ;;  %s6132_s0 = scalar_lea.vmem %s7353_s30, %s5536_s26  ;;  %v5576_v13 = vld [vmem:[%s7352_s2 + $0x50] sm:$0xff]   ;;  %v5577_v14 = vld [vmem:[%s7352_s2 + $0x48] sm:$0xff]   ;;  %v5578_v15 = vld [vmem:[%s7352_s2 + $0x40] sm:$0xff]   ;;  %s7341_s30 = smov 32   ;;  %vm4487_vm7 = vcmask 1040384  }
  0x14   : > { %v628_v5 = vld [vmem:[%s6132_s0 + $0x8] sm:$0xff]  ;;  %v630_v6 = vld [vmem:[%s6132_s0 + $0x18] sm:$0xff]  ;;  %v627_v16 = vld [vmem:[%s6132_s0] sm:$0xff] }
  0x15   : > { %v658_v7 = vpack.c.bf16 %v630_v6, %v628_v5  ;;  %v629_v17 = vld [vmem:[%s6132_s0 + $0x10] sm:$0xff]  ;;  %v632_v18 = vld [vmem:[%s6132_s0 + $0x28] sm:$0xff]  ;;  %v631_v21 = vld [vmem:[%s6132_s0 + $0x20] sm:$0xff]  ;;  %s7357_s0 = smov 96  }
  0x16   : > { %746 = vmatpush1.bf16.msra.mxu0 %v5568_v2  ;;  %v657_v19 = vpack.c.bf16 %v629_v17, %v627_v16  ;;  %v660_v20 = vpack.c.bf16 %v632_v18, %v632_v18  ;;  %v659_v22 = vpack.c.bf16 %v631_v21, %v631_v21  ;;  %v661_v23 = vld [vmem:[%s7354_s29] sm:$0xff]  ;;  %v662_v27 = vld [vmem:[%s7354_s29 + $0x8] sm:$0xff]  ;;  %v663_v31 = vld [vmem:[%s7354_s29 + $0x10] sm:$0xff] }
  0x17   : > { %747 = vmatprep.subr.bf16.mxu0 %v5993_v1  ;;  %4680 = vmatprep.mubr.msk.bf16.mxu0 %vm736_vm0, %v658_v7  ;;  %v4682_v59 = vld [vmem:[%s7355_s3] ss:$0 sm:$0xff] }
  0x18   : > { %v4683_v61 = vld [vmem:[%s7356_s28] ss:$0 sm:$0xff]  ;;  %s7345_s28 = smov 96  }
  0x1a   : > { %748 = vmatpush1.bf16.msra.mxu0 %v5569_v3 }
  0x1b   : > { %749 = vmatprep.subr.bf16.mxu0 %v5993_v1 }
  0x1e   : > { %750 = vmatpush1.bf16.msra.mxu0 %v5570_v4 }
  0x1f   : > { %751 = vmatprep.subr.bf16.mxu0 %v5993_v1 }
  0x22   : > { %752 = vmatpush1.bf16.msra.mxu0 %v5571_v8 }
  0x23   : > { %753 = vmatprep.subr.bf16.mxu0 %v5993_v1 }
  0x26   : > { %754 = vmatpush1.bf16.msra.mxu0 %v5572_v9  ;;  %v5579_v9 = vld [vmem:[%s7325_s7 + $0xac] ss:$12 sps:$4 sm:$0xff]  }
  0x27   : > { %755 = vmatprep.subr.bf16.mxu0 %v5993_v1  ;;  %1064 = vmatprep.subr.bf16.mxu1 %v5579_v9  ;;  %v5610_v9 = vld [vmem:[%s7325_s7 + $0x8] ss:$12 sps:$4 sm:$0xff]  }
  0x2a   : > { %756 = vmatpush1.bf16.msra.mxu0 %v5573_v10  ;;  %v5581_v10 = vld [vmem:[%s7325_s7 + $0xa8] ss:$12 sps:$4 sm:$0xff]  }
  0x2b   : > { %757 = vmatprep.subr.bf16.mxu0 %v5993_v1  ;;  %1065 = vmatpush1.bf16.msra.mxu1 %v5581_v10 }
  0x2e   : > { %758 = vmatpush1.bf16.msra.mxu0 %v5574_v11 }
  0x2f   : > { %767 = vmatprep.subr.bf16.mxu0 %v5993_v1 }
  0x32   : > { %768 = vmatpush2.bf16.msra.mxu0 %v5575_v12 }
  0x33   : > { %769 = vmatprep.subr.bf16.mxu0 %v5993_v1 }
  0x36   : > { %770 = vmatpush2.bf16.msra.mxu0 %v5576_v13 }
  0x37   : > { %771 = vmatprep.subr.bf16.mxu0 %v5993_v1 }
  0x3a   : > { %772 = vmatpush2.bf16.msra.mxu0 %v5577_v14 }
  0x3b   : > { %773 = vmatprep.subr.bf16.mxu0 %v5993_v1 }
  0x3e   : > { %774 = vmatpush2.bf16.msra.mxu0 %v5578_v15 }
  0x41   : > { %776 = vmatmul.mubr.bf16.vlgmr.msra.gmra.mxu0 %v657_v19 }
  0x42   : > { %4681 = vmatprep.mubr.msk.bf16.mxu0 %vm736_vm0, %v660_v20 }
  0x49   : > { %784 = vmatmul.mubr.bf16.gmra.mxu0 %v659_v22 }
 0x101   : > { %v777_v24 = vpop.f32.mrf.mxu0 }
 0x102   : > { %v778_v25 = vadd.f32 %v777_v24, %v661_v23  ;;  %v5582_v23 = vld [vmem:[%s7325_s7 + $0x94] ss:$12 sps:$4 sm:$0xff]   ;;  %v5584_v24 = vld [vmem:[%s7325_s7 + $0x90] ss:$12 sps:$4 sm:$0xff]  }
 0x103   : > { %v779_v26 = vpop.f32.mrf.mxu0  ;;  %1066 = vmatprep.subr.bf16.mxu1 %v5582_v23 }
 0x104   : > { %793 = vadd.xlane.f32.xlu0 %v778_v25  ;;  %1067 = vmatpush1.bf16.msra.mxu1 %v5584_v24  ;;  %v5587_v26 = vld [vmem:[%s7325_s7 + $0x78] ss:$12 sps:$4 sm:$0xff]  }
 0x105   : > { %v780_v28 = vpop.f32.mrf.mxu0 }
 0x106   : > { %v781_v29 = vadd.f32 %v780_v28, %v662_v27  ;;  %v5588_v27 = vld [vmem:[%s7325_s7 + $0x64] ss:$12 sps:$4 sm:$0xff]   ;;  %v5590_v28 = vld [vmem:[%s7325_s7 + $0x60] ss:$12 sps:$4 sm:$0xff]  }
 0x107   : > { %v782_v30 = vpop.f32.mrf.mxu0 }
 0x108   : > { %795 = vadd.xlane.f32.xlu0 %v781_v29  ;;  %v5593_v30 = vld [vmem:[%s7325_s7 + $0x48] ss:$12 sps:$4 sm:$0xff]  }
 0x109   : > { %v785_v32 = vpop.f32.mrf.mxu0 }
 0x10a   : > { %v786_v33 = vadd.f32 %v785_v32, %v663_v31  ;;  %v5594_v31 = vld [vmem:[%s7325_s7 + $0x34] ss:$12 sps:$4 sm:$0xff]   ;;  %v5596_v32 = vld [vmem:[%s7325_s7 + $0x30] ss:$12 sps:$4 sm:$0xff]  }
 0x10b   : > { %v787_v34 = vpop.f32.mrf.mxu0 }
 0x10c   : > { %797 = vadd.xlane.f32.xlu1 %v786_v33  ;;  %v5599_v34 = vld [vmem:[%s7325_s7 + $0x18] ss:$12 sps:$4 sm:$0xff]  }
 0x10d   : > { %v788_v35 = vpop.f32.mrf.mxu0 }
 0x10e   : > { %v5600_v35 = vld [vmem:[%s7325_s7 + $0x4] ss:$12 sps:$4 sm:$0xff]  }
 0x10f   : > { %v789_v36 = vpop.f32.mrf.mxu0 }
 0x110   : > { %v5602_v36 = vld [vmem:[%s7325_s7] ss:$12 sps:$4 sm:$0xff]  }
 0x18d   : > { %v794_v37 = vpop.xlane.xlu0 %793 }
 0x18e   : > { %v800_v38 = vmul.f32 0.0078125, %v794_v37  ;;  %v5603_v37 = vld [vmem:[%s7325_s7 + $0xb0] ss:$12 sps:$4 sm:$0xff]  }
 0x190   : > { %v803_v39 = vsub.f32 %v778_v25, %v800_v38  ;;  %v5585_v25 = vld [vmem:[%s7325_s7 + $0x7c] ss:$12 sps:$4 sm:$0xff]  }
 0x191   : > { %v796_v40 = vpop.xlane.xlu0 %795  ;;  %1068 = vmatprep.subr.bf16.mxu1 %v5585_v25 }
 0x192   : > { %v801_v41 = vmul.f32 0.0078125, %v796_v40  ;;  %v806_v42 = vmul.f32 %v803_v39, %v803_v39  ;;  %1069 = vmatpush1.bf16.msra.mxu1 %v5587_v26 }
 0x193   : > { %1070 = vmatprep.subr.bf16.mxu1 %v5588_v27 }
 0x194   : > { %809 = vadd.xlane.f32.xlu1 %v806_v42  ;;  %v804_v43 = vsub.f32 %v781_v29, %v801_v41  ;;  %v5591_v29 = vld [vmem:[%s7325_s7 + $0x4c] ss:$12 sps:$4 sm:$0xff]  }
 0x195   : > { %v798_v44 = vpop.xlane.xlu1 %797 }
 0x196   : > { %v802_v45 = vmul.f32 0.0078125, %v798_v44  ;;  %v807_v46 = vmul.f32 %v804_v43, %v804_v43  ;;  %1071 = vmatpush1.bf16.msra.mxu1 %v5590_v28 }
 0x197   : > { %1072 = vmatprep.subr.bf16.mxu1 %v5591_v29 }
 0x198   : > { %811 = vadd.xlane.f32.xlu0 %v807_v46  ;;  %v805_v47 = vsub.f32 %v786_v33, %v802_v45  ;;  %v5597_v33 = vld [vmem:[%s7325_s7 + $0x1c] ss:$12 sps:$4 sm:$0xff]  }
 0x19a   : > { %v808_v48 = vmul.f32 %v805_v47, %v805_v47  ;;  %1073 = vmatpush1.bf16.msra.mxu1 %v5593_v30 }
 0x19b   : > { %1074 = vmatprep.subr.bf16.mxu1 %v5594_v31 }
 0x19c   : > { %813 = vadd.xlane.f32.xlu1 %v808_v48 }
 0x19e   : > { %1075 = vmatpush1.bf16.msra.mxu1 %v5596_v32 }
 0x19f   : > { %1076 = vmatprep.subr.bf16.mxu1 %v5597_v33 }
 0x1a2   : > { %1077 = vmatpush1.bf16.msra.mxu1 %v5599_v34 }
 0x1a3   : > { %1078 = vmatprep.subr.bf16.mxu1 %v5600_v35 }
 0x1a6   : > { %1079 = vmatpush1.bf16.msra.mxu1 %v5602_v36 }
 0x1a7   : > { %5296 = vmatprep.subr.bf16.mxu1 %v5603_v37 }
 0x21d   : > { %v810_v49 = vpop.xlane.xlu1 %809 }
 0x21e   : > { %v815_v50 = vmul.f32 0.0078125, %v810_v49  ;;  %v4684_v49 = vld [vmem:[%s7323_s5] ss:$0 sm:$0xff] }
 0x220   : > { %v818_v51 = vadd.f32 1e-05, %v815_v50 }
 0x221   : > { %v812_v52 = vpop.xlane.xlu0 %811 }
 0x222   : > { %5827 = vrsqrt.f32 %v818_v51  ;;  %v816_v53 = vmul.f32 0.0078125, %v812_v52 }
 0x224   : > { %v819_v54 = vadd.f32 1e-05, %v816_v53  ;;  %v4685_v53 = vld [vmem:[%s7324_s6] ss:$0 sm:$0xff] }
 0x225   : > { %v814_v55 = vpop.xlane.xlu1 %813 }
 0x226   : > { %5829 = vrsqrt.f32 %v819_v54  ;;  %v817_v56 = vmul.f32 0.0078125, %v814_v55 }
 0x228   : > { %v820_v57 = vadd.f32 1e-05, %v817_v56 }
 0x22a   : > { %5831 = vrsqrt.f32 %v820_v57 }
 0x22f   : > { %v5828_v58 = vpop.eup %5827 }
 0x230   : > { %v824_v60 = vmul.f32 %v5828_v58, %v803_v39 }
 0x232   : > { %v833_v62 = vmul.f32 %v4682_v59, %v824_v60  ;;  %v5604_v60 = vld [vmem:[%s7325_s7 + $0x98] ss:$12 sps:$4 sm:$0xff]  }
 0x233   : > { %v5830_v63 = vpop.eup %5829 }
 0x234   : > { %v6193_v0 = vadd.f32 %v4683_v61, %v833_v62  ;;  %v825_v2 = vmul.f32 %v5830_v63, %v804_v43  ;;  %v5605_v62 = vld [vmem:[%s7325_s7 + $0x80] ss:$12 sps:$4 sm:$0xff]  }
 0x236   : > { %851 = vadd.xlane.f32.xlu0 %v6193_v0  ;;  %v834_v3 = vmul.f32 %v4682_v59, %v825_v2 }
 0x237   : > { %v5832_v4 = vpop.eup %5831 }
 0x238   : > { %v6196_v5 = vadd.f32 %v4683_v61, %v834_v3  ;;  %v826_v6 = vmul.f32 %v5832_v4, %v805_v47  ;;  %v5606_v3 = vld [vmem:[%s7325_s7 + $0x68] ss:$12 sps:$4 sm:$0xff]   ;;  %v5607_v4 = vld [vmem:[%s7325_s7 + $0x50] ss:$12 sps:$4 sm:$0xff]  }
 0x23a   : > { %853 = vadd.xlane.f32.xlu1 %v6196_v5  ;;  %v835_v7 = vmul.f32 %v4682_v59, %v826_v6  ;;  %v5608_v6 = vld [vmem:[%s7325_s7 + $0x38] ss:$12 sps:$4 sm:$0xff]  }
 0x23c   : > { %v6199_v8 = vadd.f32 %v4683_v61, %v835_v7  ;;  %v5609_v7 = vld [vmem:[%s7325_s7 + $0x20] ss:$12 sps:$4 sm:$0xff]  }
 0x23e   : > { %855 = vadd.xlane.f32.xlu0 %v6199_v8 }
 0x2bf   : > { %v852_v11 = vpop.xlane.xlu0 %851 }
 0x2c0   : > { %v857_v12 = vmul.f32 0.0078125, %v852_v11  ;;  %v4710_v11 = vld [vmem:[%s7326_s8] ss:$0 sm:$0xff] }
 0x2c2   : > { %v860_v13 = vsub.f32 %v6193_v0, %v857_v12 }
 0x2c3   : > { %v854_v14 = vpop.xlane.xlu1 %853 }
 0x2c4   : > { %v858_v15 = vmul.f32 0.0078125, %v854_v14  ;;  %v863_v16 = vmul.f32 %v860_v13, %v860_v13 }
 0x2c6   : > { %v861_v17 = vsub.f32 %v6196_v5, %v858_v15  ;;  %866 = vadd.xlane.f32.xlu1 %v863_v16 }
 0x2c7   : > { %v856_v18 = vpop.xlane.xlu0 %855 }
 0x2c8   : > { %v859_v19 = vmul.f32 0.0078125, %v856_v18  ;;  %v864_v20 = vmul.f32 %v861_v17, %v861_v17 }
 0x2ca   : > { %v862_v21 = vsub.f32 %v6199_v8, %v859_v19  ;;  %868 = vadd.xlane.f32.xlu0 %v864_v20 }
 0x2cc   : > { %v865_v22 = vmul.f32 %v862_v21, %v862_v21 }
 0x2ce   : > { %870 = vadd.xlane.f32.xlu1 %v865_v22 }
 0x34f   : > { %v867_v38 = vpop.xlane.xlu1 %866 }
 0x350   : > { %v872_v39 = vmul.f32 0.0078125, %v867_v38 }
 0x352   : > { %v875_v40 = vadd.f32 1e-05, %v872_v39 }
 0x353   : > { %v869_v41 = vpop.xlane.xlu0 %868 }
 0x354   : > { %5833 = vrsqrt.f32 %v875_v40  ;;  %v873_v42 = vmul.f32 0.0078125, %v869_v41  ;;  %v845_v41 = vlaneseq }
 0x356   : > { %v876_v43 = vadd.f32 1e-05, %v873_v42  ;;  %v846_v42 = vand.u32 127, %v845_v41 }
 0x357   : > { %v871_v44 = vpop.xlane.xlu1 %870 }
 0x358   : > { %5835 = vrsqrt.f32 %v876_v43  ;;  %v874_v45 = vmul.f32 0.0078125, %v871_v44  ;;  %vm847_vm3 = vcmp.lt.s32.totalorder %v846_v42, 17  ;;  %v5995_v44 = vmov -1e+09  }
 0x35a   : > { %v877_v46 = vadd.f32 1e-05, %v874_v45  ;;  %v6332_v45 = vsel %vm847_vm3, 0.0, %v5995_v44 }
 0x35c   : > { %5837 = vrsqrt.f32 %v877_v46 }
 0x361   : > { %v5834_v47 = vpop.eup %5833 }
 0x362   : > { %v881_v48 = vmul.f32 %v5834_v47, %v860_v13 }
 0x364   : > { %v890_v52 = vmul.f32 %v4684_v49, %v881_v48 }
 0x365   : > { %v5836_v50 = vpop.eup %5835 }
 0x366   : > { %v882_v51 = vmul.f32 %v5836_v50, %v861_v17  ;;  %v899_v56 = vadd.f32 %v4685_v53, %v890_v52 }
 0x368   : > { %v891_v54 = vmul.f32 %v4684_v49, %v882_v51 }
 0x369   : > { %v5838_v55 = vpop.eup %5837 }
 0x36a   : > { %v900_v57 = vadd.f32 %v4685_v53, %v891_v54  ;;  %v883_v58 = vmul.f32 %v5838_v55, %v862_v21 }
 0x36c   : > { %v902_v59 = vpack.c.bf16 %v900_v57, %v899_v56  ;;  %v892_v61 = vmul.f32 %v4684_v49, %v883_v58 }
 0x36e   : > { %1097 = vmatmul.mubr.bf16.vlgmr.msra.gmra.mxu1 %v902_v59  ;;  %v901_v63 = vadd.f32 %v4685_v53, %v892_v61 }
 0x36f   : > { %5297 = vmatpush3.bf16.msra.mxu1 %v5603_v37  ;;  %1106 = vmatprep.mubr.bf16.mxu1 %v5993_v1 }
 0x370   : > { %5298 = vmatprep.subr.bf16.mxu1 %v5604_v60  ;;  %v903_v2 = vpack.c.bf16 %v901_v63, %v901_v63 }
 0x373   : > { %5299 = vmatpush3.bf16.msra.mxu1 %v5604_v60 }
 0x374   : > { %5300 = vmatprep.subr.bf16.mxu1 %v5605_v62 }
 0x376   : > { %1107 = vmatmul.mubr.bf16.gmra.mxu1 %v903_v2 }
 0x377   : > { %5301 = vmatpush3.bf16.msra.mxu1 %v5605_v62  ;;  %5312 = vmatprep.mubr.bf16.mxu1 %v902_v59 }
 0x378   : > { %5302 = vmatprep.subr.bf16.mxu1 %v5606_v3 }
 0x37b   : > { %5303 = vmatpush3.bf16.msra.mxu1 %v5606_v3 }
 0x37c   : > { %5304 = vmatprep.subr.bf16.mxu1 %v5607_v4 }
 0x37f   : > { %5305 = vmatpush3.bf16.msra.mxu1 %v5607_v4 }
 0x380   : > { %5306 = vmatprep.subr.bf16.mxu1 %v5608_v6 }
 0x383   : > { %5307 = vmatpush3.bf16.msra.mxu1 %v5608_v6 }
 0x384   : > { %5308 = vmatprep.subr.bf16.mxu1 %v5609_v7 }
 0x387   : > { %5309 = vmatpush3.bf16.msra.mxu1 %v5609_v7 }
 0x388   : > { %5310 = vmatprep.subr.bf16.mxu1 %v5610_v9 }
 0x38b   : > { %5311 = vmatpush3.bf16.msra.mxu1 %v5610_v9 }
 0x38e   : > { %5313 = vmatmul.mubr.bf16.vlgmr.msra.gmra.mxu1 %v903_v2 }
 0x42e   : > { %v1098_v10 = vpop.f32.mrf.mxu1 }
 0x42f   : > { %v1170_v14 = vadd.f32 %v4710_v11, %v1098_v10 }
 0x430   : > { %v1100_v12 = vpop.f32.mrf.mxu1 }
 0x432   : > { %v1102_v13 = vpop.f32.mrf.mxu1 }
 0x433   : > { %v1171_v15 = vadd.f32 %v4710_v11, %v1102_v13 }
 0x434   : > { %v1104_v16 = vpop.f32.mrf.mxu1 }
 0x435   : > { %v6287_v17 = vpack.c.bf16 %v1171_v15, %v1170_v14  ;;  %v6289_v18 = vpack.c.bf16 %v1104_v16, %v1100_v12 }
 0x436   : > { %v1108_v19 = vpop.f32.mrf.mxu1 }
 0x437   : > { %5320 = vmatprep.mubr.msk.bf16.mxu0 %vm1179_vm1, %v6287_v17  ;;  %1342 = vrot.lane.b32.xlu1 %v6289_v18, %s7345_s28  ;;  %v1172_v21 = vadd.f32 %v4710_v11, %v1108_v19  ;;  %v1187_v27 = vsel %vm1179_vm1, %v6289_v18, 0 }
 0x438   : > { %v1110_v20 = vpop.f32.mrf.mxu1 }
 0x439   : > { %v6295_v22 = vpack.c.bf16 %v1110_v20, %v1110_v20  ;;  %v6305_v26 = vpack.c.bf16 %v1172_v21, %v1172_v21 }
 0x43a   : > { %v1112_v23 = vpop.f32.mrf.mxu1 }
 0x43b   : > { %1336 = vrot.lane.b32.xlu1 %v6287_v17, %s7345_s28  ;;  %1344 = vrot.lane.b32.xlu0 %v6295_v22, %s7345_s28  ;;  %v1190_v24 = vsel %vm1179_vm1, %v6295_v22, 0 }
 0x43c   : > { %5524 = vmatprep.subr.msk.bf16.mxu0 %vm1179_vm1, %v6295_v22  ;;  %v1113_v25 = vpop.f32.mrf.mxu1 }
 0x43d   : > { %5317 = vmatpush3.bf16.xpose.msra.mxu0 %v1190_v24 }
 0x43e   : > { %5525 = vmatprep.subr.msk.bf16.mxu0 %vm1179_vm1, %v6289_v18 }
 0x43f   : > { %1338 = vrot.lane.b32.xlu1 %v6305_v26, %s7345_s28 }
 0x445   : > { %5319 = vmatpush3.bf16.xpose.msra.mxu0 %v1187_v27 }
 0x44c   : > { %5321 = vmatmul.mubr.msk.bf16.vlgmr.msra.gmra.mxu0 %vm1179_vm1, %v6305_v26 }
 0x44e   : > { %v5314_v28 = vpop.f32.mrf.mxu1 }
 0x44f   : > { %v6315_v29 = vpack.c.bf16 %v5314_v28, %v5314_v28 }
 0x450   : > { %v1149_v30 = vpop.f32.mrf.mxu1 }
 0x451   : > { %5526 = vmatprep.subr.msk.bf16.mxu0 %vm1282_vm2, %v6315_v29  ;;  %v1284_v31 = vsel %vm1282_vm2, %v6315_v29, 0 }
 0x452   : > { %v5315_v32 = vpop.f32.mrf.mxu1  ;;  %5325 = vmatpush3.bf16.msra.mxu0 %v1284_v31 }
 0x454   : > { %v1152_v33 = vpop.f32.mrf.mxu1 }
 0x455   : > { %v6321_v34 = vpack.c.bf16 %v1152_v33, %v1149_v30 }
 0x457   : > { %5326 = vmatprep.subr.bf16.mxu0 %v6321_v34 }
 0x458   : > { %5327 = vmatpush3.bf16.msra.mxu0 %v6321_v34 }
 0x4a9   : > { %v1343_v35 = vpop.permute.xlu1 %1342 }
 0x4aa   : > { %v1353_v39 = vsel %vm1179_vm1, %v1343_v35, 0 }
 0x4ad   : > { %v1337_v36 = vpop.permute.xlu1 %1336  ;;  %v1345_v37 = vpop.permute.xlu0 %1344 }
 0x4ae   : > { %v1356_v38 = vsel %vm1179_vm1, %v1345_v37, 0  ;;  %5527 = vmatprep.subr.msk.bf16.mxu1 %vm1179_vm1, %v1345_v37  ;;  %5336 = vmatprep.mubr.msk.bf16.mxu1 %vm1179_vm1, %v1337_v36 }
 0x4af   : > { %5333 = vmatpush3.bf16.xpose.msra.mxu1 %v1356_v38 }
 0x4b0   : > { %5528 = vmatprep.subr.msk.bf16.mxu1 %vm1179_vm1, %v1343_v35 }
 0x4b1   : > { %v1339_v40 = vpop.permute.xlu1 %1338 }
 0x4b7   : > { %5335 = vmatpush3.bf16.xpose.msra.mxu1 %v1353_v39 }
 0x4be   : > { %5337 = vmatmul.mubr.msk.bf16.vlgmr.msra.gmra.mxu1 %vm1179_vm1, %v1339_v40 }
 0x50c   : > { %v5322_v43 = vpop.f32.mrf.mxu0 }
 0x50d   : > { %v1235_v49 = vadd.f32 %v5322_v43, %v6332_v45 }
 0x50e   : > { %v1226_v46 = vpop.f32.mrf.mxu0 }
 0x50f   : > { %v1227_v47 = vadd.f32 %v1226_v46, %v6332_v45  ;;  %v1247_v54 = vsel %vm1240_vm4, %v1235_v49, -inf }
 0x510   : > { %v5323_v48 = vpop.f32.mrf.mxu0 }
 0x511   : > { %v1241_v50 = vsel %vm1240_vm4, %v1227_v47, -inf }
 0x512   : > { %v1229_v51 = vpop.f32.mrf.mxu0  ;;  %1242 = vmax.xlane.f32.xlu0 %v1241_v50 }
 0x513   : > { %v1230_v52 = vadd.f32 %v1229_v51, %v6332_v45 }
 0x515   : > { %v1244_v53 = vsel %vm1240_vm4, %v1230_v52, -inf }
 0x516   : > { %1245 = vmax.xlane.f32.xlu1 %v1244_v53  ;;  %1248 = vmax.xlane.f32.xlu0 %v1247_v54 }
 0x57e   : > { %v5338_v55 = vpop.f32.mrf.mxu1 }
 0x57f   : > { %v1401_v56 = vadd.f32 %v5338_v55, %v6332_v45 }
 0x580   : > { %v1392_v57 = vpop.f32.mrf.mxu1 }
 0x581   : > { %v1393_v58 = vadd.f32 %v1392_v57, %v6332_v45  ;;  %v1412_v59 = vsel %vm1240_vm4, %v1401_v56, -inf }
 0x582   : > { %1413 = vmax.xlane.f32.xlu1 %v1412_v59  ;;  %v5339_v60 = vpop.f32.mrf.mxu1 }
 0x583   : > { %v1406_v61 = vsel %vm1240_vm4, %v1393_v58, -inf }
 0x584   : > { %v1395_v62 = vpop.f32.mrf.mxu1  ;;  %1407 = vmax.xlane.f32.xlu0 %v1406_v61 }
 0x585   : > { %v1396_v63 = vadd.f32 %v1395_v62, %v6332_v45 }
 0x587   : > { %v1409_v2 = vsel %vm1240_vm4, %v1396_v63, -inf }
 0x588   : > { %1410 = vmax.xlane.f32.xlu0 %v1409_v2 }
 0x59b   : > { %v1243_v3 = vpop.xlane.xlu0 %1242 }
 0x59c   : > { %v1250_v4 = vsub.f32 %v1227_v47, %v1243_v3 }
 0x59e   : > { %v1253_v13 = vmul.f32 1.442695, %v1250_v4 }
 0x59f   : > { %v1246_v6 = vpop.xlane.xlu1 %1245  ;;  %v1249_v7 = vpop.xlane.xlu0 %1248 }
 0x5a0   : > { %v1251_v9 = vsub.f32 %v1230_v52, %v1246_v6  ;;  %v1252_v10 = vsub.f32 %v1235_v49, %v1249_v7 }
 0x5a2   : > { %v1255_v11 = vmul.f32 1.442695, %v1251_v9  ;;  %v1257_v12 = vmul.f32 1.442695, %v1252_v10 }
 0x5a4   : > { %5839 = vpow2.f32 %v1255_v11 }
 0x5a5   : > { %5841 = vpow2.f32 %v1257_v12 }
 0x5a6   : > { %5843 = vpow2.f32 %v1253_v13 }
 0x5b1   : > { %v5840_v14 = vpop.eup %5839 }
 0x5b2   : > { %v5842_v15 = vpop.eup %5841  ;;  %v1262_v16 = vsel %vm1240_vm4, %v5840_v14, 0.0 }
 0x5b3   : > { %1263 = vadd.xlane.f32.xlu1 %v1262_v16  ;;  %v1265_v19 = vsel %vm1240_vm4, %v5842_v15, 0.0  ;;  %v5844_v20 = vpop.eup %5843 }
 0x5b4   : > { %1266 = vadd.xlane.f32.xlu0 %v1265_v19  ;;  %v1259_v21 = vsel %vm1240_vm4, %v5844_v20, 0.0 }
 0x5b8   : > { %1260 = vadd.xlane.f32.xlu0 %v1259_v21 }
 0x60b   : > { %v1414_v23 = vpop.xlane.xlu1 %1413 }
 0x60c   : > { %v1417_v24 = vsub.f32 %v1401_v56, %v1414_v23 }
 0x60d   : > { %v1408_v25 = vpop.xlane.xlu0 %1407 }
 0x60e   : > { %v1422_v27 = vmul.f32 1.442695, %v1417_v24  ;;  %v1415_v28 = vsub.f32 %v1393_v58, %v1408_v25 }
 0x610   : > { %5845 = vpow2.f32 %v1422_v27  ;;  %v1418_v30 = vmul.f32 1.442695, %v1415_v28 }
 0x611   : > { %v1411_v31 = vpop.xlane.xlu0 %1410 }
 0x612   : > { %5847 = vpow2.f32 %v1418_v30  ;;  %v1416_v32 = vsub.f32 %v1396_v63, %v1411_v31 }
 0x614   : > { %v1420_v33 = vmul.f32 1.442695, %v1416_v32 }
 0x616   : > { %5849 = vpow2.f32 %v1420_v33 }
 0x61d   : > { %v5846_v35 = vpop.eup %5845 }
 0x61e   : > { %v1430_v36 = vsel %vm1240_vm4, %v5846_v35, 0.0 }
 0x61f   : > { %v5848_v37 = vpop.eup %5847  ;;  %1431 = vadd.xlane.f32.xlu1 %v1430_v36 }
 0x620   : > { %v1424_v38 = vsel %vm1240_vm4, %v5848_v37, 0.0 }
 0x623   : > { %v5850_v39 = vpop.eup %5849  ;;  %1425 = vadd.xlane.f32.xlu1 %v1424_v38 }
 0x624   : > { %v1427_v40 = vsel %vm1240_vm4, %v5850_v39, 0.0 }
 0x625   : > { %1428 = vadd.xlane.f32.xlu0 %v1427_v40 }
 0x634   : > { %1443 = vrot.lane.b32.xlu1 %v6321_v34, %s7345_s28 }
 0x638   : > { %1511 = vrot.lane.b32.xlu1 %v6295_v22, %s7343_s4 }
 0x63b   : > { %1445 = vrot.lane.b32.xlu0 %v6315_v29, %s7345_s28 }
 0x63c   : > { %1509 = vrot.lane.b32.xlu1 %v6289_v18, %s7343_s4  ;;  %v1264_v42 = vpop.xlane.xlu1 %1263 }
 0x63d   : > { %v1267_v43 = vpop.xlane.xlu0 %1266 }
 0x63e   : > { %5851 = vrcp.f32 %v1267_v43 }
 0x63f   : > { %1505 = vrot.lane.b32.xlu0 %v6287_v17, %s7343_s4  ;;  %5853 = vrcp.f32 %v1264_v42 }
 0x640   : > { %1507 = vrot.lane.b32.xlu1 %v6305_v26, %s7343_s4 }
 0x641   : > { %v1261_v44 = vpop.xlane.xlu0 %1260 }
 0x642   : > { %5855 = vrcp.f32 %v1261_v44 }
 0x64b   : > { %v5852_v46 = vpop.eup %5851 }
 0x64c   : > { %v5854_v47 = vpop.eup %5853  ;;  %v1273_v49 = vmul.f32 %v5852_v46, %v5842_v15 }
 0x64d   : > { %v1272_v51 = vmul.f32 %v5854_v47, %v5840_v14 }
 0x64e   : > { %v1275_v53 = vpack.c.bf16 %v1273_v49, %v1273_v49 }
 0x64f   : > { %v5856_v48 = vpop.eup %5855 }
 0x650   : > { %v1271_v50 = vmul.f32 %v5856_v48, %v5844_v20 }
 0x652   : > { %v1274_v52 = vpack.c.bf16 %v1272_v51, %v1271_v50 }
 0x654   : > { %5328 = vmatprep.mubr.msk.bf16.mxu0 %vm1240_vm4, %v1274_v52 }
 0x655   : > { %5329 = vmatmul.mubr.msk.bf16.vlgmr.msra.gmra.mxu0 %vm1240_vm4, %v1275_v53 }
 0x6a8   : > { %v1432_v54 = vpop.xlane.xlu1 %1431 }
 0x6a9   : > { %5857 = vrcp.f32 %v1432_v54 }
 0x6ac   : > { %v1426_v55 = vpop.xlane.xlu1 %1425 }
 0x6ad   : > { %5859 = vrcp.f32 %v1426_v55 }
 0x6ae   : > { %v1429_v56 = vpop.xlane.xlu0 %1428 }
 0x6af   : > { %5861 = vrcp.f32 %v1429_v56 }
 0x6b0   : > { %v1444_v57 = vpop.permute.xlu1 %1443 }
 0x6b2   : > { %v1446_v58 = vpop.permute.xlu0 %1445 }
 0x6b3   : > { %v1455_v59 = vsel %vm1282_vm2, %v1446_v58, 0  ;;  %5529 = vmatprep.subr.msk.bf16.mxu0 %vm1282_vm2, %v1446_v58 }
 0x6b4   : > { %5341 = vmatpush3.bf16.msra.mxu0 %v1455_v59  ;;  %v1512_v60 = vpop.permute.xlu1 %1511 }
 0x6b5   : > { %5342 = vmatprep.subr.bf16.mxu0 %v1444_v57  ;;  %v1523_v9 = vsel %vm1179_vm1, %v1512_v60, 0 }
 0x6b6   : > { %v5858_v61 = vpop.eup %5857  ;;  %v1506_v10 = vpop.permute.xlu0 %1505 }
 0x6b7   : > { %v1438_v2 = vmul.f32 %v5858_v61, %v5846_v35 }
 0x6b8   : > { %5343 = vmatpush3.bf16.msra.mxu0 %v1444_v57  ;;  %v1510_v11 = vpop.permute.xlu1 %1509 }
 0x6b9   : > { %5530 = vmatprep.subr.msk.bf16.mxu0 %vm1179_vm1, %v1512_v60  ;;  %v1440_v7 = vpack.c.bf16 %v1438_v2, %v1438_v2  ;;  %v1520_v12 = vsel %vm1179_vm1, %v1510_v11, 0 }
 0x6ba   : > { %v5860_v62 = vpop.eup %5859 }
 0x6bb   : > { %v1436_v3 = vmul.f32 %v5860_v62, %v5848_v37 }
 0x6bc   : > { %v5862_v63 = vpop.eup %5861  ;;  %v1508_v13 = vpop.permute.xlu1 %1507 }
 0x6bd   : > { %v1437_v4 = vmul.f32 %v5862_v63, %v5850_v39 }
 0x6bf   : > { %v1439_v6 = vpack.c.bf16 %v1437_v4, %v1436_v3 }
 0x6c1   : > { %5344 = vmatprep.mubr.msk.bf16.mxu0 %vm1240_vm4, %v1439_v6 }
 0x6c2   : > { %5345 = vmatmul.mubr.msk.bf16.vlgmr.msra.gmra.mxu0 %vm1240_vm4, %v1440_v7 }
 0x6c3   : > { %5349 = vmatpush3.bf16.xpose.msra.mxu0 %v1523_v9  ;;  %5352 = vmatprep.mubr.msk.bf16.mxu0 %vm1179_vm1, %v1506_v10 }
 0x6c4   : > { %5531 = vmatprep.subr.msk.bf16.mxu0 %vm1179_vm1, %v1510_v11 }
 0x6cb   : > { %5351 = vmatpush3.bf16.xpose.msra.mxu0 %v1520_v12 }
 0x6d2   : > { %5353 = vmatmul.mubr.msk.bf16.vlgmr.msra.gmra.mxu0 %vm1179_vm1, %v1508_v13 }
 0x715   : > { %v6376_v14 = vpop.f32.mrf.mxu0 }
 0x717   : > { %v6378_v15 = vpop.f32.mrf.mxu0 }
 0x719   : > { %v5331_v16 = vpop.f32.mrf.mxu0 }
 0x71b   : > { %v6380_v19 = vpop.f32.mrf.mxu0 }
 0x782   : > { %v6382_v20 = vpop.f32.mrf.mxu0 }
 0x784   : > { %v6384_v21 = vpop.f32.mrf.mxu0 }
 0x786   : > { %v5347_v23 = vpop.f32.mrf.mxu0 }
 0x788   : > { %v6386_v24 = vpop.f32.mrf.mxu0 }
 0x789   : > { %v5552_v25 = vpack.i.bf16 %v6386_v24, %v6384_v21 }
 0x792   : > { %v5354_v27 = vpop.f32.mrf.mxu0 }
 0x793   : > { %v1568_v32 = vadd.f32 %v5354_v27, %v6332_v45 }
 0x794   : > { %v1559_v28 = vpop.f32.mrf.mxu0 }
 0x795   : > { %v1560_v30 = vadd.f32 %v1559_v28, %v6332_v45  ;;  %v1579_v38 = vsel %vm1240_vm4, %v1568_v32, -inf }
 0x796   : > { %v5355_v31 = vpop.f32.mrf.mxu0 }
 0x797   : > { %v1573_v33 = vsel %vm1240_vm4, %v1560_v30, -inf }
 0x798   : > { %v1562_v35 = vpop.f32.mrf.mxu0  ;;  %1574 = vmax.xlane.f32.xlu0 %v1573_v33 }
 0x799   : > { %v1563_v36 = vadd.f32 %v1562_v35, %v6332_v45 }
 0x79b   : > { %v1576_v37 = vsel %vm1240_vm4, %v1563_v36, -inf }
 0x79c   : > { %1577 = vmax.xlane.f32.xlu1 %v1576_v37  ;;  %1580 = vmax.xlane.f32.xlu0 %v1579_v38 }
 0x821   : > { %v1575_v39 = vpop.xlane.xlu0 %1574 }
 0x822   : > { %v1582_v40 = vsub.f32 %v1560_v30, %v1575_v39 }
 0x824   : > { %v1585_v42 = vmul.f32 1.442695, %v1582_v40 }
 0x825   : > { %v1578_v43 = vpop.xlane.xlu1 %1577  ;;  %v1581_v44 = vpop.xlane.xlu0 %1580 }
 0x826   : > { %5863 = vpow2.f32 %v1585_v42  ;;  %v1583_v46 = vsub.f32 %v1563_v36, %v1578_v43  ;;  %v1584_v47 = vsub.f32 %v1568_v32, %v1581_v44 }
 0x828   : > { %v1587_v48 = vmul.f32 1.442695, %v1583_v46  ;;  %v1589_v49 = vmul.f32 1.442695, %v1584_v47 }
 0x82a   : > { %5865 = vpow2.f32 %v1587_v48 }
 0x82b   : > { %5867 = vpow2.f32 %v1589_v49 }
 0x833   : > { %v5864_v50 = vpop.eup %5863 }
 0x834   : > { %v1591_v51 = vsel %vm1240_vm4, %v5864_v50, 0.0 }
 0x835   : > { %1592 = vadd.xlane.f32.xlu0 %v1591_v51 }
 0x837   : > { %v5866_v52 = vpop.eup %5865 }
 0x838   : > { %v5868_v53 = vpop.eup %5867  ;;  %v1594_v54 = vsel %vm1240_vm4, %v5866_v52, 0.0 }
 0x839   : > { %1595 = vadd.xlane.f32.xlu0 %v1594_v54  ;;  %v1597_v55 = vsel %vm1240_vm4, %v5868_v53, 0.0 }
 0x83a   : > { %1598 = vadd.xlane.f32.xlu1 %v1597_v55 }
 0x84b   : > { %1608 = vrot.lane.b32.xlu1 %v6321_v34, %s7343_s4 }
 0x84f   : > { %1676 = vrot.lane.b32.xlu1 %v6295_v22, %s7341_s30  ;;  %1610 = vrot.lane.b32.xlu0 %v6315_v29, %s7343_s4 }
 0x853   : > { %1674 = vrot.lane.b32.xlu1 %v6289_v18, %s7341_s30  ;;  %1670 = vrot.lane.b32.xlu0 %v6287_v17, %s7341_s30 }
 0x857   : > { %1672 = vrot.lane.b32.xlu1 %v6305_v26, %s7341_s30 }
 0x8be   : > { %v1593_v56 = vpop.xlane.xlu0 %1592 }
 0x8bf   : > { %5869 = vrcp.f32 %v1593_v56 }
 0x8c2   : > { %v1596_v57 = vpop.xlane.xlu0 %1595 }
 0x8c3   : > { %v1599_v58 = vpop.xlane.xlu1 %1598  ;;  %5871 = vrcp.f32 %v1596_v57 }
 0x8c4   : > { %5873 = vrcp.f32 %v1599_v58 }
 0x8c6   : > { %v1611_v59 = vpop.permute.xlu0 %1610 }
 0x8c7   : > { %v1609_v22 = vpop.permute.xlu1 %1608  ;;  %v1620_v60 = vsel %vm1282_vm2, %v1611_v59, 0  ;;  %5532 = vmatprep.subr.msk.bf16.mxu1 %vm1282_vm2, %v1611_v59 }
 0x8c8   : > { %5357 = vmatpush3.bf16.msra.mxu1 %v1620_v60 }
 0x8c9   : > { %5358 = vmatprep.subr.bf16.mxu1 %v1609_v22 }
 0x8ca   : > { %v1671_v7 = vpop.permute.xlu0 %1670 }
 0x8cb   : > { %v1677_v18 = vpop.permute.xlu1 %1676 }
 0x8cc   : > { %5359 = vmatpush3.bf16.msra.mxu1 %v1609_v22  ;;  %v5870_v17 = vpop.eup %5869  ;;  %v1688_v6 = vsel %vm1179_vm1, %v1677_v18, 0 }
 0x8cd   : > { %5533 = vmatprep.subr.msk.bf16.mxu1 %vm1179_vm1, %v1677_v18  ;;  %v1603_v62 = vmul.f32 %v5870_v17, %v5864_v50 }
 0x8cf   : > { %v1675_v9 = vpop.permute.xlu1 %1674 }
 0x8d0   : > { %v5872_v26 = vpop.eup %5871  ;;  %v1685_v10 = vsel %vm1179_vm1, %v1675_v9, 0 }
 0x8d1   : > { %v5874_v61 = vpop.eup %5873  ;;  %v1604_v63 = vmul.f32 %v5872_v26, %v5866_v52 }
 0x8d2   : > { %v1605_v2 = vmul.f32 %v5874_v61, %v5868_v53  ;;  %v5611_v61 = vld [vmem:[%s7327_s9 + $0x38] sm:$0xff]  }
 0x8d3   : > { %v1606_v3 = vpack.c.bf16 %v1604_v63, %v1603_v62  ;;  %v1673_v11 = vpop.permute.xlu1 %1672  ;;  %v5612_v62 = vld [vmem:[%s7327_s9 + $0x30] sm:$0xff]   ;;  %v5613_v63 = vld [vmem:[%s7327_s9 + $0x28] sm:$0xff]  }
 0x8d4   : > { %v1607_v4 = vpack.c.bf16 %v1605_v2, %v1605_v2  ;;  %v5614_v2 = vld [vmem:[%s7327_s9 + $0x20] sm:$0xff]  }
 0x8d5   : > { %5360 = vmatprep.mubr.msk.bf16.mxu1 %vm1240_vm4, %v1606_v3  ;;  %v5615_v3 = vld [vmem:[%s7327_s9 + $0x18] sm:$0xff]  }
 0x8d6   : > { %5361 = vmatmul.mubr.msk.bf16.vlgmr.msra.gmra.mxu1 %vm1240_vm4, %v1607_v4  ;;  %v5616_v4 = vld [vmem:[%s7327_s9 + $0x10] sm:$0xff]  }
 0x8d7   : > { %5365 = vmatpush3.bf16.xpose.msra.mxu1 %v1688_v6  ;;  %5368 = vmatprep.mubr.msk.bf16.mxu1 %vm1179_vm1, %v1671_v7  ;;  %v5617_v6 = vld [vmem:[%s7327_s9 + $0x8] sm:$0xff]   ;;  %v5618_v7 = vld [vmem:[%s7327_s9] sm:$0xff]  }
 0x8d8   : > { %5534 = vmatprep.subr.msk.bf16.mxu1 %vm1179_vm1, %v1675_v9 }
 0x8df   : > { %5367 = vmatpush3.bf16.xpose.msra.mxu1 %v1685_v10 }
 0x8e6   : > { %5369 = vmatmul.mubr.msk.bf16.vlgmr.msra.gmra.mxu1 %vm1179_vm1, %v1673_v11 }
 0x8e7   : > { %2309 = vmatprep.mubr.bf16.mxu1 %v5993_v1 }
 0x996   : > { %v5362_v12 = vpop.f32.mrf.mxu1 }
 0x998   : > { %v1656_v13 = vpop.f32.mrf.mxu1 }
 0x99a   : > { %v5363_v16 = vpop.f32.mrf.mxu1 }
 0x99c   : > { %v1659_v23 = vpop.f32.mrf.mxu1 }
 0x99d   : > { %v5557_v27 = vpack.i.bf16 %v1659_v23, %v1656_v13 }
 0x9a6   : > { %v5370_v28 = vpop.f32.mrf.mxu1 }
 0x9a7   : > { %v1733_v33 = vadd.f32 %v5370_v28, %v6332_v45 }
 0x9a8   : > { %v1724_v30 = vpop.f32.mrf.mxu1 }
 0x9a9   : > { %v1725_v31 = vadd.f32 %v1724_v30, %v6332_v45  ;;  %v1744_v39 = vsel %vm1240_vm4, %v1733_v33, -inf }
 0x9aa   : > { %v5371_v32 = vpop.f32.mrf.mxu1 }
 0x9ab   : > { %v1738_v35 = vsel %vm1240_vm4, %v1725_v31, -inf }
 0x9ac   : > { %v1727_v36 = vpop.f32.mrf.mxu1  ;;  %1739 = vmax.xlane.f32.xlu0 %v1738_v35 }
 0x9ad   : > { %v1728_v37 = vadd.f32 %v1727_v36, %v6332_v45 }
 0x9af   : > { %v1741_v38 = vsel %vm1240_vm4, %v1728_v37, -inf }
 0x9b0   : > { %1742 = vmax.xlane.f32.xlu1 %v1741_v38  ;;  %1745 = vmax.xlane.f32.xlu0 %v1744_v39 }
 0xa35   : > { %v1740_v40 = vpop.xlane.xlu0 %1739 }
 0xa36   : > { %v1747_v42 = vsub.f32 %v1725_v31, %v1740_v40 }
 0xa38   : > { %v1750_v43 = vmul.f32 1.442695, %v1747_v42 }
 0xa39   : > { %v1743_v44 = vpop.xlane.xlu1 %1742  ;;  %v1746_v46 = vpop.xlane.xlu0 %1745 }
 0xa3a   : > { %5875 = vpow2.f32 %v1750_v43  ;;  %v1748_v47 = vsub.f32 %v1728_v37, %v1743_v44  ;;  %v1749_v48 = vsub.f32 %v1733_v33, %v1746_v46 }
 0xa3c   : > { %v1752_v49 = vmul.f32 1.442695, %v1748_v47  ;;  %v1754_v50 = vmul.f32 1.442695, %v1749_v48 }
 0xa3e   : > { %5877 = vpow2.f32 %v1752_v49 }
 0xa3f   : > { %5879 = vpow2.f32 %v1754_v50 }
 0xa47   : > { %v5876_v51 = vpop.eup %5875 }
 0xa48   : > { %v1756_v52 = vsel %vm1240_vm4, %v5876_v51, 0.0 }
 0xa49   : > { %1757 = vadd.xlane.f32.xlu0 %v1756_v52  ;;  %v4735_v52 = vld [vmem:[%s7328_s10] ss:$0 sm:$0xff] }
 0xa4b   : > { %v5878_v53 = vpop.eup %5877 }
 0xa4c   : > { %v5880_v54 = vpop.eup %5879  ;;  %v1759_v55 = vsel %vm1240_vm4, %v5878_v53, 0.0 }
 0xa4d   : > { %1760 = vadd.xlane.f32.xlu0 %v1759_v55  ;;  %v1762_v56 = vsel %vm1240_vm4, %v5880_v54, 0.0 }
 0xa4e   : > { %1763 = vadd.xlane.f32.xlu1 %v1762_v56 }
 0xa5f   : > { %1773 = vrot.lane.b32.xlu1 %v6321_v34, %s7341_s30 }
 0xa63   : > { %5553 = vrot.lane.b32.xlu1 %v5552_v25, %s7341_s30  ;;  %1775 = vrot.lane.b32.xlu0 %v6315_v29, %s7341_s30 }
 0xa67   : > { %1842 = vrot.lane.b32.xlu1 %v6382_v20, %s7341_s30  ;;  %5558 = vrot.lane.b32.xlu0 %v5557_v27, %s7343_s4  ;;  %s7359_s30 = smov 32  }
 0xa6b   : > { %1854 = vrot.lane.b32.xlu1 %v5362_v12, %s7343_s4  ;;  %s7358_s4 = smov 64  }
 0xad2   : > { %v1758_v57 = vpop.xlane.xlu0 %1757 }
 0xad3   : > { %5881 = vrcp.f32 %v1758_v57 }
 0xad6   : > { %v1761_v58 = vpop.xlane.xlu0 %1760 }
 0xad7   : > { %v1764_v59 = vpop.xlane.xlu1 %1763  ;;  %5883 = vrcp.f32 %v1761_v58 }
 0xad8   : > { %5885 = vrcp.f32 %v1764_v59 }
 0xada   : > { %v1776_v34 = vpop.permute.xlu0 %1775 }
 0xadb   : > { %v1785_v21 = vsel %vm1282_vm2, %v1776_v34, 0  ;;  %5535 = vmatprep.subr.msk.bf16.mxu0 %vm1282_vm2, %v1776_v34  ;;  %v1774_v24 = vpop.permute.xlu1 %1773  ;;  %v5624_v34 = vld [vmem:[%s7331_s13 + $0xec] ss:$16 sps:$4 sm:$0xff]  }
 0xadc   : > { %5373 = vmatpush3.bf16.msra.mxu0 %v1785_v21 }
 0xadd   : > { %5374 = vmatprep.subr.bf16.mxu0 %v1774_v24 }
 0xade   : > { %v5559_v30 = vpop.permute.xlu0 %5558 }
 0xadf   : > { %v5554_v16 = vpop.permute.xlu1 %5553  ;;  %v5561_v32 = vunpack.i.h.bf16 %v5559_v30  ;;  %v5560_v33 = vunpack.i.l.bf16 %v5559_v30  ;;  %v5646_v30 = vld [vmem:[%s7331_s13 + $0x68] ss:$16 sps:$4 sm:$0xff]  }
 0xae0   : > { %5375 = vmatpush3.bf16.msra.mxu0 %v1774_v24  ;;  %v5882_v29 = vpop.eup %5881  ;;  %v5556_v27 = vunpack.i.h.bf16 %v5554_v16  ;;  %v5555_v28 = vunpack.i.l.bf16 %v5554_v16  ;;  %v5642_v16 = vld [vmem:[%s7331_s13 + $0x8c] ss:$16 sps:$4 sm:$0xff]  }
 0xae1   : > { %v1768_v22 = vmul.f32 %v5882_v29, %v5876_v51  ;;  %5380 = vmatprep.subr.bf16.mxu0 %v5611_v61 }
 0xae2   : > { %v1872_v35 = vsel %vm1179_vm1, %v6380_v19, %v5556_v27  ;;  %v1871_v36 = vsel %vm1179_vm1, %v6378_v15, %v5555_v28  ;;  %v5648_v27 = vld [vmem:[%s7331_s13 + $0x6c] ss:$16 sps:$4 sm:$0xff]   ;;  %v5643_v28 = vld [vmem:[%s7331_s13 + $0x60] ss:$16 sps:$4 sm:$0xff]  }
 0xae3   : > { %v1843_v23 = vpop.permute.xlu1 %1842  ;;  %v1875_v44 = vsel %vm736_vm0, %v1872_v35, %v5561_v32  ;;  %v1874_v46 = vsel %vm736_vm0, %v1871_v36, %v5560_v33  ;;  %v5654_v32 = vld [vmem:[%s7331_s13 + $0x4c] ss:$16 sps:$4 sm:$0xff]   ;;  %v5649_v33 = vld [vmem:[%s7331_s13 + $0x40] ss:$16 sps:$4 sm:$0xff]   ;;  %v5652_v35 = vld [vmem:[%s7331_s13 + $0x48] ss:$16 sps:$4 sm:$0xff]  }
 0xae4   : > { %v5884_v20 = vpop.eup %5883  ;;  %v1873_v38 = vsel %vm1179_vm1, %v6376_v14, %v1843_v23  ;;  %v5645_v23 = vld [vmem:[%s7331_s13 + $0x64] ss:$16 sps:$4 sm:$0xff]  }
 0xae5   : > { %v5886_v25 = vpop.eup %5885  ;;  %v1769_v60 = vmul.f32 %v5884_v20, %v5878_v53  ;;  %v5657_v36 = vld [vmem:[%s7331_s13 + $0x24] ss:$16 sps:$4 sm:$0xff]  }
 0xae6   : > { %v1770_v18 = vmul.f32 %v5886_v25, %v5880_v54 }
 0xae7   : > { %v1771_v17 = vpack.c.bf16 %v1769_v60, %v1768_v22  ;;  %v1855_v31 = vpop.permute.xlu1 %1854 }
 0xae8   : > { %v1772_v26 = vpack.c.bf16 %v1770_v18, %v1770_v18  ;;  %v1876_v40 = vsel %vm736_vm0, %v1873_v38, %v1855_v31  ;;  %v5651_v31 = vld [vmem:[%s7331_s13 + $0x44] ss:$16 sps:$4 sm:$0xff]   ;;  %v5655_v38 = vld [vmem:[%s7331_s13 + $0x20] ss:$16 sps:$4 sm:$0xff]  }
 0xae9   : > { %5376 = vmatprep.mubr.msk.bf16.mxu0 %vm1240_vm4, %v1771_v17 }
 0xaea   : > { %5377 = vmatmul.mubr.msk.bf16.vlgmr.msra.gmra.mxu0 %vm1240_vm4, %v1772_v26 }
 0xaeb   : > { %5381 = vmatpush3.bf16.msra.mxu0 %v5611_v61 }
 0xaec   : > { %5382 = vmatprep.subr.bf16.mxu0 %v5612_v62 }
 0xaef   : > { %5383 = vmatpush3.bf16.msra.mxu0 %v5612_v62 }
 0xaf0   : > { %5384 = vmatprep.subr.bf16.mxu0 %v5613_v63 }
 0xaf3   : > { %5385 = vmatpush3.bf16.msra.mxu0 %v5613_v63  ;;  %v5627_v63 = vld [vmem:[%s7331_s13 + $0xc4] ss:$16 sps:$4 sm:$0xff]  }
 0xaf4   : > { %5386 = vmatprep.subr.bf16.mxu0 %v5614_v2 }
 0xaf7   : > { %5387 = vmatpush3.bf16.msra.mxu0 %v5614_v2  ;;  %v5630_v2 = vld [vmem:[%s7331_s13 + $0xcc] ss:$16 sps:$4 sm:$0xff]  }
 0xaf8   : > { %5388 = vmatprep.subr.bf16.mxu0 %v5615_v3 }
 0xafb   : > { %5389 = vmatpush3.bf16.msra.mxu0 %v5615_v3  ;;  %v5625_v3 = vld [vmem:[%s7331_s13 + $0xc0] ss:$16 sps:$4 sm:$0xff]  }
 0xafc   : > { %5390 = vmatprep.subr.bf16.mxu0 %v5616_v4 }
 0xaff   : > { %5391 = vmatpush3.bf16.msra.mxu0 %v5616_v4  ;;  %v5628_v4 = vld [vmem:[%s7331_s13 + $0xc8] ss:$16 sps:$4 sm:$0xff]  }
 0xb00   : > { %5392 = vmatprep.subr.bf16.mxu0 %v5617_v6 }
 0xb03   : > { %5393 = vmatpush3.bf16.msra.mxu0 %v5617_v6  ;;  %v5633_v6 = vld [vmem:[%s7331_s13 + $0xa4] ss:$16 sps:$4 sm:$0xff]  }
 0xb04   : > { %5394 = vmatprep.subr.bf16.mxu0 %v5618_v7 }
 0xb07   : > { %5395 = vmatpush3.bf16.msra.mxu0 %v5618_v7  ;;  %v5636_v7 = vld [vmem:[%s7331_s13 + $0xac] ss:$16 sps:$4 sm:$0xff]  }
 0xb08   : > { %2328 = vmatprep.subr.bf16.mxu0 %v5624_v34 }
 0xbaa   : > { %v5378_v9 = vpop.f32.mrf.mxu0 }
 0xbab   : > { %1866 = vrot.lane.b32.xlu1 %v5378_v9, %s7345_s28  ;;  %v5631_v9 = vld [vmem:[%s7331_s13 + $0xa0] ss:$16 sps:$4 sm:$0xff]  }
 0xbac   : > { %v1821_v10 = vpop.f32.mrf.mxu0 }
 0xbae   : > { %v5379_v11 = vpop.f32.mrf.mxu0 }
 0xbaf   : > { %v5637_v11 = vld [vmem:[%s7331_s13 + $0x80] ss:$16 sps:$4 sm:$0xff]  }
 0xbb0   : > { %v1824_v12 = vpop.f32.mrf.mxu0 }
 0xbb1   : > { %v5562_v13 = vpack.i.bf16 %v1824_v12, %v1821_v10  ;;  %v5634_v10 = vld [vmem:[%s7331_s13 + $0xa8] ss:$16 sps:$4 sm:$0xff]   ;;  %v5639_v12 = vld [vmem:[%s7331_s13 + $0x84] ss:$16 sps:$4 sm:$0xff]  }
 0xbb3   : > { %5563 = vrot.lane.b32.xlu0 %v5562_v13, %s7345_s28  ;;  %v5640_v13 = vld [vmem:[%s7331_s13 + $0x88] ss:$16 sps:$4 sm:$0xff]  }
 0xc1d   : > { %v1867_v37 = vpop.permute.xlu1 %1866 }
 0xc1e   : > { %v1880_v47 = vsel %vm1877_vm5, %v1876_v40, %v1867_v37  ;;  %v5660_v37 = vld [vmem:[%s7331_s13 + $0x2c] ss:$16 sps:$4 sm:$0xff]   ;;  %v5663_v40 = vld [vmem:[%s7331_s13 + $0x4] ss:$16 sps:$4 sm:$0xff]  }
 0xc1f   : > { %v1882_v49 = vpack.c.bf16 %v1880_v47, %v1880_v47 }
 0xc25   : > { %v5564_v39 = vpop.permute.xlu0 %5563 }
 0xc26   : > { %v5566_v42 = vunpack.i.h.bf16 %v5564_v39  ;;  %v5565_v43 = vunpack.i.l.bf16 %v5564_v39  ;;  %v5658_v39 = vld [vmem:[%s7331_s13 + $0x28] ss:$16 sps:$4 sm:$0xff]  }
 0xc28   : > { %v1878_v19 = vsel %vm1877_vm5, %v1874_v46, %v5565_v43  ;;  %v1879_v15 = vsel %vm1877_vm5, %v1875_v44, %v5566_v42  ;;  %v5666_v42 = vld [vmem:[%s7331_s13 + $0xc] ss:$16 sps:$4 sm:$0xff]   ;;  %v5661_v43 = vld [vmem:[%s7331_s13] ss:$16 sps:$4 sm:$0xff]   ;;  %v5664_v44 = vld [vmem:[%s7331_s13 + $0x8] ss:$16 sps:$4 sm:$0xff]  }
 0xc29   : > { %v1881_v48 = vpack.c.bf16 %v1879_v15, %v1878_v19 }
 0xc2b   : > { %5396 = vmatprep.mubr.bf16.mxu0 %v1881_v48 }
 0xc2c   : > { %5397 = vmatmul.mubr.bf16.vlgmr.msra.gmra.mxu0 %v1882_v49 }
 0xc2d   : > { %2360 = vmatprep.mubr.bf16.mxu0 %v5993_v1 }
 0xcec   : > { %v5398_v14 = vpop.f32.mrf.mxu0 }
 0xced   : > { %v1997_v54 = vadd.f32 %v5398_v14, %v6199_v8  ;;  %v5621_v8 = vld [vmem:[%s7331_s13 + $0xe4] ss:$16 sps:$4 sm:$0xff]  }
 0xcee   : > { %v1981_v50 = vpop.f32.mrf.mxu0  ;;  %2277 = vmatprep.subr.bf16.mxu1 %v5621_v8 }
 0xcef   : > { %v1995_v51 = vadd.f32 %v1981_v50, %v6193_v0  ;;  %v6495_v58 = vadd.f32 %v4735_v52, %v1997_v54  ;;  %v5619_v0 = vld [vmem:[%s7331_s13 + $0xe0] ss:$16 sps:$4 sm:$0xff]  }
 0xcf0   : > { %v5399_v53 = vpop.f32.mrf.mxu0  ;;  %2278 = vmatpush1.bf16.msra.mxu1 %v5619_v0  ;;  %v4736_v54 = vld [vmem:[%s7329_s11] ss:$0 sm:$0xff] }
 0xcf1   : > { %v6491_v55 = vadd.f32 %v4735_v52, %v1995_v51  ;;  %2279 = vmatprep.subr.bf16.mxu1 %v5627_v63  ;;  %v5672_v63 = vld [vmem:[%s7333_s15 + $0xf0] sm:$0xff]  }
 0xcf2   : > { %v1984_v56 = vpop.f32.mrf.mxu0 }
 0xcf3   : > { %v1996_v57 = vadd.f32 %v1984_v56, %v6196_v5  ;;  %2010 = vadd.xlane.f32.xlu0 %v6491_v55  ;;  %v5622_v5 = vld [vmem:[%s7331_s13 + $0xe8] ss:$16 sps:$4 sm:$0xff]  }
 0xcf4   : > { %2329 = vmatpush1.bf16.msra.mxu0 %v5622_v5  ;;  %2280 = vmatpush1.bf16.msra.mxu1 %v5625_v3  ;;  %v4737_v5 = vld [vmem:[%s7330_s12] ss:$0 sm:$0xff]  ;;  %v5674_v3 = vld [vmem:[%s7333_s15 + $0xb0] sm:$0xff]  }
 0xcf5   : > { %v6497_v59 = vadd.f32 %v4735_v52, %v1996_v57  ;;  %2330 = vmatprep.subr.bf16.mxu0 %v5630_v2  ;;  %2281 = vmatprep.subr.bf16.mxu1 %v5633_v6  ;;  %v5673_v2 = vld [vmem:[%s7333_s15 + $0x30] sm:$0xff]   ;;  %v5676_v6 = vld [vmem:[%s7333_s15 + $0xe8] sm:$0xff]  }
 0xcf7   : > { %2014 = vadd.xlane.f32.xlu0 %v6495_v58  ;;  %2012 = vadd.xlane.f32.xlu1 %v6497_v59 }
 0xcf8   : > { %2331 = vmatpush1.bf16.msra.mxu0 %v5628_v4  ;;  %2282 = vmatpush1.bf16.msra.mxu1 %v5631_v9  ;;  %v5675_v4 = vld [vmem:[%s7333_s15 + $0x68] sm:$0xff]  }
 0xcf9   : > { %2332 = vmatprep.subr.bf16.mxu0 %v5636_v7  ;;  %2283 = vmatprep.subr.bf16.mxu1 %v5639_v12  ;;  %v5677_v7 = vld [vmem:[%s7333_s15 + $0x28] sm:$0xff]   ;;  %v5681_v12 = vld [vmem:[%s7333_s15 + $0x20] sm:$0xff]  }
 0xcfa   : > { %v5678_v9 = vld [vmem:[%s7333_s15 + $0xa8] sm:$0xff]  }
 0xcfc   : > { %2333 = vmatpush1.bf16.msra.mxu0 %v5634_v10  ;;  %2284 = vmatpush1.bf16.msra.mxu1 %v5637_v11  ;;  %v5679_v10 = vld [vmem:[%s7333_s15 + $0x60] sm:$0xff]  }
 0xcfd   : > { %2334 = vmatprep.subr.bf16.mxu0 %v5642_v16  ;;  %2285 = vmatprep.subr.bf16.mxu1 %v5645_v23  ;;  %v5680_v11 = vld [vmem:[%s7333_s15 + $0xe0] sm:$0xff]   ;;  %v5683_v16 = vld [vmem:[%s7333_s15 + $0x58] sm:$0xff]  }
 0xcfe   : > { %v5684_v23 = vld [vmem:[%s7333_s15 + $0xd8] sm:$0xff]  }
 0xd00   : > { %2335 = vmatpush1.bf16.msra.mxu0 %v5640_v13  ;;  %2286 = vmatpush1.bf16.msra.mxu1 %v5643_v28  ;;  %v5682_v13 = vld [vmem:[%s7333_s15 + $0xa0] sm:$0xff]   ;;  %v5686_v28 = vld [vmem:[%s7333_s15 + $0x98] sm:$0xff]  }
 0xd01   : > { %2336 = vmatprep.subr.bf16.mxu0 %v5648_v27  ;;  %2287 = vmatprep.subr.bf16.mxu1 %v5651_v31  ;;  %v5685_v27 = vld [vmem:[%s7333_s15 + $0x18] sm:$0xff]   ;;  %v5688_v31 = vld [vmem:[%s7333_s15 + $0xd0] sm:$0xff]  }
 0xd04   : > { %2337 = vmatpush1.bf16.msra.mxu0 %v5646_v30  ;;  %2288 = vmatpush1.bf16.msra.mxu1 %v5649_v33  ;;  %v5687_v30 = vld [vmem:[%s7333_s15 + $0x50] sm:$0xff]  }
 0xd05   : > { %2338 = vmatprep.subr.bf16.mxu0 %v5654_v32  ;;  %2289 = vmatprep.subr.bf16.mxu1 %v5657_v36  ;;  %v5689_v32 = vld [vmem:[%s7333_s15 + $0x10] sm:$0xff]   ;;  %v5692_v36 = vld [vmem:[%s7333_s15 + $0xc8] sm:$0xff]  }
 0xd06   : > { %v5690_v33 = vld [vmem:[%s7333_s15 + $0x90] sm:$0xff]  }
 0xd08   : > { %2339 = vmatpush1.bf16.msra.mxu0 %v5652_v35  ;;  %2290 = vmatpush1.bf16.msra.mxu1 %v5655_v38  ;;  %v5691_v35 = vld [vmem:[%s7333_s15 + $0x48] sm:$0xff]  }
 0xd09   : > { %2340 = vmatprep.subr.bf16.mxu0 %v5660_v37  ;;  %2291 = vmatprep.subr.bf16.mxu1 %v5663_v40  ;;  %v5693_v37 = vld [vmem:[%s7333_s15 + $0x8] sm:$0xff]   ;;  %v5696_v40 = vld [vmem:[%s7333_s15 + $0xc0] sm:$0xff]  }
 0xd0a   : > { %v5694_v38 = vld [vmem:[%s7333_s15 + $0x88] sm:$0xff]  }
 0xd0c   : > { %2341 = vmatpush1.bf16.msra.mxu0 %v5658_v39  ;;  %2292 = vmatpush1.bf16.msra.mxu1 %v5661_v43  ;;  %v5695_v39 = vld [vmem:[%s7333_s15 + $0x40] sm:$0xff]  }
 0xd0d   : > { %2342 = vmatprep.subr.bf16.mxu0 %v5666_v42  ;;  %v5697_v42 = vld [vmem:[%s7333_s15] sm:$0xff]  }
 0xd0e   : > { %v5698_v43 = vld [vmem:[%s7333_s15 + $0x80] sm:$0xff]  }
 0xd10   : > { %2343 = vmatpush1.bf16.msra.mxu0 %v5664_v44  ;;  %v6720_v44 = vshrl.u32 %v845_v41, 7 }
 0xd7c   : > { %v2011_v21 = vpop.xlane.xlu0 %2010 }
 0xd7d   : > { %v2016_v24 = vmul.f32 0.0078125, %v2011_v21 }
 0xd7f   : > { %v6514_v29 = vsub.f32 %v6491_v55, %v2016_v24 }
 0xd80   : > { %v2015_v20 = vpop.xlane.xlu0 %2014  ;;  %v2013_v25 = vpop.xlane.xlu1 %2012 }
 0xd81   : > { %v2018_v22 = vmul.f32 0.0078125, %v2015_v20  ;;  %v2017_v60 = vmul.f32 0.0078125, %v2013_v25  ;;  %v2022_v18 = vmul.f32 %v6514_v29, %v6514_v29 }
 0xd83   : > { %v6519_v17 = vsub.f32 %v6495_v58, %v2018_v22  ;;  %v6522_v26 = vsub.f32 %v6497_v59, %v2017_v60  ;;  %2025 = vadd.xlane.f32.xlu0 %v2022_v18  ;;  %v5667_v18 = vld [vmem:[%s7333_s15 + $0x78] sm:$0xff]  }
 0xd84   : > { %5144 = vmatprep.subr.bf16.mxu1 %v5667_v18 }
 0xd85   : > { %v2024_v61 = vmul.f32 %v6519_v17, %v6519_v17  ;;  %v2023_v62 = vmul.f32 %v6522_v26, %v6522_v26 }
 0xd87   : > { %2029 = vadd.xlane.f32.xlu1 %v2024_v61  ;;  %2027 = vadd.xlane.f32.xlu0 %v2023_v62  ;;  %v5670_v61 = vld [vmem:[%s7333_s15 + $0xb8] sm:$0xff]   ;;  %v5671_v62 = vld [vmem:[%s7333_s15 + $0x70] sm:$0xff]  }
 0xe0c   : > { %v2026_v46 = vpop.xlane.xlu0 %2025 }
 0xe0d   : > { %v2031_v47 = vmul.f32 0.0078125, %v2026_v46  ;;  %v2099_v46 = vsub.s32 0, %v6720_v44 }
 0xe0f   : > { %v2034_v19 = vadd.f32 1e-05, %v2031_v47  ;;  %v2107_v47 = vsub.s32 2, %v6720_v44 }
 0xe10   : > { %v2028_v15 = vpop.xlane.xlu0 %2027  ;;  %v2030_v48 = vpop.xlane.xlu1 %2029 }
 0xe11   : > { %5887 = vrsqrt.f32 %v2034_v19  ;;  %v2032_v49 = vmul.f32 0.0078125, %v2028_v15  ;;  %v2033_v14 = vmul.f32 0.0078125, %v2030_v48  ;;  %v2095_v19 = vld [vmem:[%s7332_s14] sm:$0xf]  ;;  %v2103_v15 = vsub.s32 1, %v6720_v44 }
 0xe12   : > { %v2111_v48 = vsub.s32 3, %v6720_v44 }
 0xe13   : > { %v2035_v50 = vadd.f32 1e-05, %v2032_v49  ;;  %v2036_v51 = vadd.f32 1e-05, %v2033_v14  ;;  %v2100_v49 = vrot.slane %v2095_v19, %v2099_v46  ;;  %v2108_v14 = vrot.slane %v2095_v19, %v2107_v47 }
 0xe14   : > { %v2104_v41 = vrot.slane %v2095_v19, %v2103_v15 }
 0xe15   : > { %5889 = vrsqrt.f32 %v2035_v50  ;;  %v2112_v50 = vrot.slane %v2095_v19, %v2111_v48 }
 0xe16   : > { %5891 = vrsqrt.f32 %v2036_v51 }
 0xe1e   : > { %v5888_v52 = vpop.eup %5887 }
 0xe1f   : > { %v2040_v53 = vmul.f32 %v5888_v52, %v6514_v29 }
 0xe21   : > { %v2049_v8 = vmul.f32 %v4736_v54, %v2040_v53 }
 0xe22   : > { %v5890_v56 = vpop.eup %5889 }
 0xe23   : > { %v5892_v57 = vpop.eup %5891  ;;  %v2041_v0 = vmul.f32 %v5890_v56, %v6522_v26  ;;  %v2058_v24 = vadd.f32 %v4737_v5, %v2049_v8  ;;  %v5669_v26 = vld [vmem:[%s7333_s15 + $0x38] sm:$0xff]  }
 0xe24   : > { %v2042_v21 = vmul.f32 %v5892_v57, %v6519_v17  ;;  %v5668_v17 = vld [vmem:[%s7333_s15 + $0xf8] sm:$0xff]  }
 0xe25   : > { %v2050_v34 = vmul.f32 %v4736_v54, %v2041_v0  ;;  %5172 = vmatprep.subr.bf16.mxu0 %v5668_v17 }
 0xe26   : > { %v2051_v29 = vmul.f32 %v4736_v54, %v2042_v21 }
 0xe27   : > { %v2059_v20 = vadd.f32 %v4737_v5, %v2050_v34 }
 0xe28   : > { %v2060_v22 = vadd.f32 %v4737_v5, %v2051_v29 }
 0xe29   : > { %v2061_v25 = vpack.c.bf16 %v2059_v20, %v2058_v24 }
 0xe2a   : > { %v2062_v60 = vpack.c.bf16 %v2060_v22, %v2060_v22 }
 0xe2b   : > { %2310 = vmatmul.mubr.bf16.vlgmr.msra.gmra.mxu1 %v2061_v25  ;;  %2361 = vmatmul.mubr.bf16.vlgmr.msra.gmra.mxu0 %v2061_v25 }
 0xe2c   : > { %2319 = vmatprep.mubr.bf16.mxu1 %v5993_v1  ;;  %2370 = vmatprep.mubr.bf16.mxu0 %v5993_v1 }
 0xe2d   : > { %5145 = vmatpush3.bf16.msra.mxu1 %v5669_v26  ;;  %5173 = vmatpush3.bf16.msra.mxu0 %v5670_v61 }
 0xe2e   : > { %5146 = vmatprep.subr.bf16.mxu1 %v5671_v62  ;;  %5174 = vmatprep.subr.bf16.mxu0 %v5672_v63 }
 0xe31   : > { %5147 = vmatpush3.bf16.msra.mxu1 %v5673_v2  ;;  %5175 = vmatpush3.bf16.msra.mxu0 %v5674_v3 }
 0xe32   : > { %5148 = vmatprep.subr.bf16.mxu1 %v5675_v4  ;;  %5176 = vmatprep.subr.bf16.mxu0 %v5676_v6 }
 0xe33   : > { %2320 = vmatmul.mubr.bf16.gmra.mxu1 %v2062_v60  ;;  %2371 = vmatmul.mubr.bf16.gmra.mxu0 %v2062_v60 }
 0xe35   : > { %5149 = vmatpush3.bf16.msra.mxu1 %v5677_v7  ;;  %5177 = vmatpush3.bf16.msra.mxu0 %v5678_v9 }
 0xe36   : > { %5150 = vmatprep.subr.bf16.mxu1 %v5679_v10  ;;  %5178 = vmatprep.subr.bf16.mxu0 %v5680_v11 }
 0xe39   : > { %5151 = vmatpush3.bf16.msra.mxu1 %v5681_v12  ;;  %5179 = vmatpush3.bf16.msra.mxu0 %v5682_v13 }
 0xe3a   : > { %5152 = vmatprep.subr.bf16.mxu1 %v5683_v16  ;;  %5180 = vmatprep.subr.bf16.mxu0 %v5684_v23 }
 0xe3d   : > { %5153 = vmatpush3.bf16.msra.mxu1 %v5685_v27  ;;  %5181 = vmatpush3.bf16.msra.mxu0 %v5686_v28 }
 0xe3e   : > { %5154 = vmatprep.subr.bf16.mxu1 %v5687_v30  ;;  %5182 = vmatprep.subr.bf16.mxu0 %v5688_v31 }
 0xe41   : > { %5155 = vmatpush3.bf16.msra.mxu1 %v5689_v32  ;;  %5183 = vmatpush3.bf16.msra.mxu0 %v5690_v33 }
 0xe42   : > { %5156 = vmatprep.subr.bf16.mxu1 %v5691_v35  ;;  %5184 = vmatprep.subr.bf16.mxu0 %v5692_v36 }
 0xe45   : > { %5157 = vmatpush3.bf16.msra.mxu1 %v5693_v37  ;;  %5185 = vmatpush3.bf16.msra.mxu0 %v5694_v38 }
 0xe46   : > { %5158 = vmatprep.subr.bf16.mxu1 %v5695_v39  ;;  %5186 = vmatprep.subr.bf16.mxu0 %v5696_v40 }
 0xe49   : > { %5159 = vmatpush3.bf16.msra.mxu1 %v5697_v42  ;;  %5187 = vmatpush3.bf16.msra.mxu0 %v5698_v43 }
 0xeeb   : > { %v2311_v51 = vpop.f32.mrf.mxu1  ;;  %v2362_v52 = vpop.f32.mrf.mxu0 }
 0xeec   : > { %v6737_v53 = vadd.f32 %v2311_v51, %v2100_v49  ;;  %v6739_v54 = vadd.f32 %v2362_v52, %v2108_v14 }
 0xeed   : > { %v2313_v56 = vpop.f32.mrf.mxu1  ;;  %v2364_v57 = vpop.f32.mrf.mxu0 }
 0xeee   : > { %v4770_v0 = vmul.f32 -1.702, %v6737_v53  ;;  %v4772_v8 = vmul.f32 -1.702, %v6739_v54  ;;  %v6743_v5 = vadd.f32 %v2313_v56, %v2104_v41  ;;  %v6745_v34 = vadd.f32 %v2364_v57, %v2112_v50 }
 0xeef   : > { %v2315_v21 = vpop.f32.mrf.mxu1  ;;  %v2366_v24 = vpop.f32.mrf.mxu0 }
 0xef0   : > { %v2403_v20 = vmul.f32 1.442695, %v4770_v0  ;;  %v2407_v25 = vmul.f32 1.442695, %v4772_v8  ;;  %v4771_v29 = vmul.f32 -1.702, %v6743_v5  ;;  %v6748_v22 = vadd.f32 %v2315_v21, %v2100_v49 }
 0xef1   : > { %v4773_v60 = vmul.f32 -1.702, %v6745_v34  ;;  %v6751_v18 = vadd.f32 %v2366_v24, %v2108_v14  ;;  %v2317_v17 = vpop.f32.mrf.mxu1  ;;  %v2368_v26 = vpop.f32.mrf.mxu0 }
 0xef2   : > { %5893 = vpow2.f32 %v2403_v20  ;;  %v2405_v61 = vmul.f32 1.442695, %v4771_v29  ;;  %v4774_v62 = vmul.f32 -1.702, %v6748_v22  ;;  %v6754_v63 = vadd.f32 %v2317_v17, %v2104_v41 }
 0xef3   : > { %5895 = vpow2.f32 %v2407_v25  ;;  %v2409_v2 = vmul.f32 1.442695, %v4773_v60  ;;  %v4776_v3 = vmul.f32 -1.702, %v6751_v18  ;;  %v6757_v4 = vadd.f32 %v2368_v26, %v2112_v50  ;;  %v2321_v6 = vpop.f32.mrf.mxu1  ;;  %v2372_v7 = vpop.f32.mrf.mxu0 }
 0xef4   : > { %5897 = vpow2.f32 %v2405_v61  ;;  %v2411_v9 = vmul.f32 1.442695, %v4774_v62  ;;  %v4775_v10 = vmul.f32 -1.702, %v6754_v63  ;;  %v6760_v11 = vadd.f32 %v2321_v6, %v2100_v49 }
 0xef5   : > { %5899 = vpow2.f32 %v2409_v2  ;;  %v2415_v12 = vmul.f32 1.442695, %v4776_v3  ;;  %v4777_v13 = vmul.f32 -1.702, %v6757_v4  ;;  %v6763_v16 = vadd.f32 %v2372_v7, %v2108_v14  ;;  %v2323_v23 = vpop.f32.mrf.mxu1  ;;  %v2374_v27 = vpop.f32.mrf.mxu0 }
 0xef6   : > { %5901 = vpow2.f32 %v2411_v9  ;;  %v2413_v28 = vmul.f32 1.442695, %v4775_v10  ;;  %v4778_v30 = vmul.f32 -1.702, %v6760_v11  ;;  %v6766_v31 = vadd.f32 %v2323_v23, %v2104_v41 }
 0xef7   : > { %5903 = vpow2.f32 %v2415_v12  ;;  %v2417_v32 = vmul.f32 1.442695, %v4777_v13  ;;  %v4780_v33 = vmul.f32 -1.702, %v6763_v16  ;;  %v6769_v35 = vadd.f32 %v2374_v27, %v2112_v50  ;;  %v2325_v36 = vpop.f32.mrf.mxu1  ;;  %v2376_v37 = vpop.f32.mrf.mxu0 }
 0xef8   : > { %5905 = vpow2.f32 %v2413_v28  ;;  %v2419_v38 = vmul.f32 1.442695, %v4778_v30  ;;  %v4779_v39 = vmul.f32 -1.702, %v6766_v31 }
 0xef9   : > { %5907 = vpow2.f32 %v2417_v32  ;;  %v2423_v40 = vmul.f32 1.442695, %v4780_v33  ;;  %v4781_v42 = vmul.f32 -1.702, %v6769_v35  ;;  %v2326_v43 = vpop.f32.mrf.mxu1  ;;  %v2377_v19 = vpop.f32.mrf.mxu0 }
 0xefa   : > { %5909 = vpow2.f32 %v2419_v38  ;;  %v2421_v49 = vmul.f32 1.442695, %v4779_v39 }
 0xefb   : > { %5911 = vpow2.f32 %v2423_v40  ;;  %v2425_v14 = vmul.f32 1.442695, %v4781_v42 }
 0xefc   : > { %5913 = vpow2.f32 %v2421_v49 }
 0xefd   : > { %5915 = vpow2.f32 %v2425_v14 }
 0xeff   : > { %v5894_v41 = vpop.eup %5893 }
 0xf00   : > { %v5896_v50 = vpop.eup %5895  ;;  %v2427_v51 = vadd.f32 1.0, %v5894_v41 }
 0xf01   : > { %v5898_v52 = vpop.eup %5897  ;;  %v2429_v56 = vadd.f32 1.0, %v5896_v50 }
 0xf02   : > { %v5900_v57 = vpop.eup %5899  ;;  %5917 = vrcp.f32 %v2427_v51  ;;  %v2428_v0 = vadd.f32 1.0, %v5898_v52 }
 0xf03   : > { %v5902_v8 = vpop.eup %5901  ;;  %5919 = vrcp.f32 %v2429_v56  ;;  %v2430_v21 = vadd.f32 1.0, %v5900_v57 }
 0xf04   : > { %v5904_v24 = vpop.eup %5903  ;;  %5921 = vrcp.f32 %v2428_v0  ;;  %v2431_v20 = vadd.f32 1.0, %v5902_v8 }
 0xf05   : > { %v5906_v25 = vpop.eup %5905  ;;  %5923 = vrcp.f32 %v2430_v21  ;;  %v2433_v29 = vadd.f32 1.0, %v5904_v24 }
 0xf06   : > { %v5908_v60 = vpop.eup %5907  ;;  %5925 = vrcp.f32 %v2431_v20  ;;  %v2432_v17 = vadd.f32 1.0, %v5906_v25 }
 0xf07   : > { %v5910_v26 = vpop.eup %5909  ;;  %5927 = vrcp.f32 %v2433_v29  ;;  %v2434_v61 = vadd.f32 1.0, %v5908_v60 }
 0xf08   : > { %v5912_v62 = vpop.eup %5911  ;;  %5929 = vrcp.f32 %v2432_v17  ;;  %v2435_v2 = vadd.f32 1.0, %v5910_v26  ;;  %v4814_v17 = vld [vmem:[%s7334_s16] ss:$0 sm:$0xff] }
 0xf09   : > { %v5914_v3 = vpop.eup %5913  ;;  %5931 = vrcp.f32 %v2434_v61  ;;  %v2437_v7 = vadd.f32 1.0, %v5912_v62 }
 0xf0a   : > { %v5916_v6 = vpop.eup %5915  ;;  %v2436_v9 = vadd.f32 1.0, %v5914_v3  ;;  %5933 = vrcp.f32 %v2435_v2 }
 0xf0b   : > { %v2438_v10 = vadd.f32 1.0, %v5916_v6 }
 0xf0c   : > { %5935 = vrcp.f32 %v2436_v9 }
 0xf0d   : > { %5937 = vrcp.f32 %v2438_v10 }
 0xf0e   : > { %5939 = vrcp.f32 %v2437_v7 }
 0xf0f   : > { %v5918_v12 = vpop.eup %5917 }
 0xf10   : > { %v5920_v13 = vpop.eup %5919  ;;  %v2463_v40 = vmul.f32 %v5918_v12, %v6737_v53 }
 0xf11   : > { %v5922_v23 = vpop.eup %5921  ;;  %v2465_v49 = vmul.f32 %v5920_v13, %v6739_v54 }
 0xf12   : > { %v5924_v27 = vpop.eup %5923  ;;  %v2464_v37 = vmul.f32 %v5922_v23, %v6743_v5 }
 0xf13   : > { %v5926_v28 = vpop.eup %5925  ;;  %v2466_v42 = vmul.f32 %v5924_v27, %v6745_v34 }
 0xf14   : > { %v5928_v30 = vpop.eup %5927  ;;  %v2467_v33 = vmul.f32 %v5926_v28, %v6748_v22 }
 0xf15   : > { %v5930_v32 = vpop.eup %5929  ;;  %v2469_v38 = vmul.f32 %v5928_v30, %v6751_v18 }
 0xf16   : > { %v5932_v36 = vpop.eup %5931  ;;  %v2468_v39 = vmul.f32 %v5930_v32, %v6754_v63  ;;  %v2475_v50 = vpack.c.bf16 %v2467_v33, %v2463_v40 }
 0xf17   : > { %v2470_v43 = vmul.f32 %v5932_v36, %v6757_v4  ;;  %v5934_v19 = vpop.eup %5933  ;;  %v2477_v52 = vpack.c.bf16 %v2469_v38, %v2465_v49  ;;  %v5701_v38 = vld [vmem:[%s7325_s7 + $0x16c] ss:$12 sps:$4 sm:$0xff]  }
 0xf18   : > { %v2476_v14 = vpack.c.bf16 %v2468_v39, %v2464_v37  ;;  %v2471_v34 = vmul.f32 %v5934_v19, %v6760_v11  ;;  %v5699_v37 = vld [vmem:[%s7325_s7 + $0x168] ss:$12 sps:$4 sm:$0xff]   ;;  %3066 = vmatprep.subr.bf16.mxu1 %v5701_v38 }
 0xf19   : > { %v5936_v41 = vpop.eup %5935  ;;  %v2478_v22 = vpack.c.bf16 %v2470_v43, %v2466_v42 }
 0xf1a   : > { %v5938_v51 = vpop.eup %5937  ;;  %v2472_v5 = vmul.f32 %v5936_v41, %v6766_v31  ;;  %2771 = vmatprep.mubr.bf16.mxu1 %v2476_v14  ;;  %v2479_v56 = vpack.c.bf16 %v2471_v34, %v2471_v34  ;;  %v5712_v34 = vld [vmem:[%s7325_s7 + $0x124] ss:$12 sps:$4 sm:$0xff]  }
 0xf1b   : > { %v5940_v18 = vpop.eup %5939  ;;  %v2474_v63 = vmul.f32 %v5938_v51, %v6769_v35  ;;  %2819 = vmatprep.mubr.bf16.mxu0 %v2478_v22  ;;  %2772 = vmatmul.mubr.bf16.vlgmr.msra.gmra.mxu1 %v2475_v50  ;;  %v5704_v51 = vld [vmem:[%s7325_s7 + $0x154] ss:$12 sps:$4 sm:$0xff]  }
 0xf1c   : > { %v2480_v53 = vpack.c.bf16 %v2472_v5, %v2472_v5  ;;  %2820 = vmatmul.mubr.bf16.vlgmr.msra.gmra.mxu0 %v2477_v52  ;;  %v2473_v54 = vmul.f32 %v5940_v18, %v6763_v16  ;;  %3067 = vmatpush1.bf16.msra.mxu1 %v5699_v37  ;;  %v5705_v52 = vld [vmem:[%s7325_s7 + $0x170] ss:$12 sps:$4 sm:$0xff]  }
 0xf1d   : > { %v2482_v4 = vpack.c.bf16 %v2474_v63, %v2474_v63  ;;  %v5702_v5 = vld [vmem:[%s7325_s7 + $0x150] ss:$12 sps:$4 sm:$0xff]   ;;  %3068 = vmatprep.subr.bf16.mxu1 %v5704_v51  ;;  %5400 = vmatprep.subr.bf16.mxu0 %v5705_v52  ;;  %v5709_v63 = vld [vmem:[%s7325_s7 + $0x158] ss:$12 sps:$4 sm:$0xff]  }
 0xf1e   : > { %2779 = vmatprep.mubr.bf16.mxu1 %v2480_v53  ;;  %v2481_v57 = vpack.c.bf16 %v2473_v54, %v2473_v54  ;;  %5401 = vmatpush3.bf16.msra.mxu0 %v5705_v52  ;;  %v5708_v18 = vld [vmem:[%s7325_s7 + $0x13c] ss:$12 sps:$4 sm:$0xff]   ;;  %v5706_v53 = vld [vmem:[%s7325_s7 + $0x138] ss:$12 sps:$4 sm:$0xff]   ;;  %v5710_v54 = vld [vmem:[%s7325_s7 + $0x120] ss:$12 sps:$4 sm:$0xff]  }
 0xf1f   : > { %2827 = vmatprep.mubr.bf16.mxu0 %v2482_v4  ;;  %5402 = vmatprep.subr.bf16.mxu0 %v5709_v63  ;;  %v5713_v4 = vld [vmem:[%s7325_s7 + $0x140] ss:$12 sps:$4 sm:$0xff]  }
 0xf20   : > { %3069 = vmatpush1.bf16.msra.mxu1 %v5702_v5 }
 0xf21   : > { %3070 = vmatprep.subr.bf16.mxu1 %v5708_v18 }
 0xf22   : > { %5403 = vmatpush3.bf16.msra.mxu0 %v5709_v63 }
 0xf23   : > { %2780 = vmatmul.mubr.bf16.gmra.mxu1 %v2479_v56  ;;  %5404 = vmatprep.subr.bf16.mxu0 %v5713_v4  ;;  %v5716_v56 = vld [vmem:[%s7325_s7 + $0x10c] ss:$12 sps:$4 sm:$0xff]  }
 0xf24   : > { %2828 = vmatmul.mubr.bf16.gmra.mxu0 %v2481_v57  ;;  %3098 = vmatprep.mubr.bf16.mxu1 %v5993_v1  ;;  %v5717_v57 = vld [vmem:[%s7325_s7 + $0x128] ss:$12 sps:$4 sm:$0xff]  }
 0xf25   : > { %3071 = vmatpush1.bf16.msra.mxu1 %v5706_v53 }
 0xf26   : > { %3072 = vmatprep.subr.bf16.mxu1 %v5712_v34  ;;  %5405 = vmatpush3.bf16.msra.mxu0 %v5713_v4  ;;  %v4876_v34 = vld [vmem:[%s7326_s8 + $0x1] ss:$0 sm:$0xff] }
 0xf27   : > { %5406 = vmatprep.subr.bf16.mxu0 %v5717_v57 }
 0xf29   : > { %3073 = vmatpush1.bf16.msra.mxu1 %v5710_v54 }
 0xf2a   : > { %3074 = vmatprep.subr.bf16.mxu1 %v5716_v56  ;;  %5407 = vmatpush3.bf16.msra.mxu0 %v5717_v57 }
 0xfdb   : > { %v5160_v31 = vpop.f32.mrf.mxu1 }
 0xfdc   : > { %v5188_v0 = vpop.f32.mrf.mxu0 }
 0xfdd   : > { %v5161_v35 = vpop.f32.mrf.mxu1 }
 0xfde   : > { %v5162_v8 = vadd.f32 %v5161_v35, %v5160_v31  ;;  %v5189_v21 = vpop.f32.mrf.mxu0  ;;  %v5714_v31 = vld [vmem:[%s7325_s7 + $0x108] ss:$12 sps:$4 sm:$0xff]   ;;  %v5721_v35 = vld [vmem:[%s7325_s7 + $0x110] ss:$12 sps:$4 sm:$0xff]  }
 0xfdf   : > { %v5190_v24 = vadd.f32 %v5189_v21, %v5188_v0  ;;  %v5163_v20 = vpop.f32.mrf.mxu1  ;;  %3075 = vmatpush1.bf16.msra.mxu1 %v5714_v31  ;;  %v5720_v0 = vld [vmem:[%s7325_s7 + $0xf4] ss:$12 sps:$4 sm:$0xff]   ;;  %5408 = vmatprep.subr.bf16.mxu0 %v5721_v35  ;;  %v5724_v21 = vld [vmem:[%s7325_s7 + $0xdc] ss:$12 sps:$4 sm:$0xff]  }
 0xfe0   : > { %v5191_v25 = vpop.f32.mrf.mxu0  ;;  %3076 = vmatprep.subr.bf16.mxu1 %v5720_v0  ;;  %5409 = vmatpush3.bf16.msra.mxu0 %v5721_v35 }
 0xfe1   : > { %v2822_v11 = vadd.f32 %v5190_v24, %v5162_v8  ;;  %v5164_v29 = vpop.f32.mrf.mxu1  ;;  %v5718_v8 = vld [vmem:[%s7325_s7 + $0xf0] ss:$12 sps:$4 sm:$0xff]   ;;  %v5725_v24 = vld [vmem:[%s7325_s7 + $0xf8] ss:$12 sps:$4 sm:$0xff]  }
 0xfe2   : > { %v5165_v60 = vadd.f32 %v5164_v29, %v5163_v20  ;;  %v5192_v16 = vpop.f32.mrf.mxu0  ;;  %v5722_v20 = vld [vmem:[%s7325_s7 + $0xd8] ss:$12 sps:$4 sm:$0xff]   ;;  %5410 = vmatprep.subr.bf16.mxu0 %v5725_v24  ;;  %v5726_v29 = vld [vmem:[%s7325_s7 + $0xc0] ss:$12 sps:$4 sm:$0xff]  }
 0xfe3   : > { %v2835_v26 = vadd.f32 %v2822_v11, %v6491_v55  ;;  %v5193_v61 = vadd.f32 %v5192_v16, %v5191_v25  ;;  %v5166_v62 = vpop.f32.mrf.mxu1  ;;  %3077 = vmatpush1.bf16.msra.mxu1 %v5718_v8  ;;  %v5728_v25 = vld [vmem:[%s7325_s7 + $0xc4] ss:$12 sps:$4 sm:$0xff]   ;;  %v5729_v11 = vld [vmem:[%s7325_s7 + $0xe0] ss:$12 sps:$4 sm:$0xff]  }
 0xfe4   : > { %v5194_v2 = vpop.f32.mrf.mxu0  ;;  %3078 = vmatprep.subr.bf16.mxu1 %v5724_v21  ;;  %5411 = vmatpush3.bf16.msra.mxu0 %v5725_v24 }
 0xfe5   : > { %v2825_v3 = vadd.f32 %v5193_v61, %v5165_v60  ;;  %v5167_v6 = vpop.f32.mrf.mxu1  ;;  %v6790_v7 = vadd.f32 %v4814_v17, %v2835_v26  ;;  %5412 = vmatprep.subr.bf16.mxu0 %v5729_v11  ;;  %v5730_v60 = vld [vmem:[%s7325_s7 + $0xc8] ss:$12 sps:$4 sm:$0xff]  }
 0xfe6   : > { %v5168_v9 = vadd.f32 %v5167_v6, %v5166_v62  ;;  %v5195_v10 = vpop.f32.mrf.mxu0 }
 0xfe7   : > { %v5196_v12 = vadd.f32 %v5195_v10, %v5194_v2  ;;  %2852 = vadd.xlane.f32.xlu0 %v6790_v7  ;;  %v5169_v13 = vpop.f32.mrf.mxu1  ;;  %v2836_v23 = vadd.f32 %v2825_v3, %v6497_v59  ;;  %3079 = vmatpush1.bf16.msra.mxu1 %v5722_v20 }
 0xfe8   : > { %v5197_v27 = vpop.f32.mrf.mxu0  ;;  %3080 = vmatprep.subr.bf16.mxu1 %v5728_v25  ;;  %5413 = vmatpush3.bf16.msra.mxu0 %v5729_v11  ;;  %v4817_v13 = vld [vmem:[%s7323_s5 + $0x1] ss:$0 sm:$0xff] }
 0xfe9   : > { %v2830_v28 = vadd.f32 %v5196_v12, %v5168_v9  ;;  %v5170_v30 = vpop.f32.mrf.mxu1  ;;  %v2846_v32 = vadd.f32 %v4814_v17, %v2836_v23  ;;  %5414 = vmatprep.subr.bf16.mxu0 %v5730_v60 }
 0xfea   : > { %v5198_v55 = vpop.f32.mrf.mxu0  ;;  %v4818_v30 = vld [vmem:[%s7324_s6 + $0x1] ss:$0 sm:$0xff] }
 0xfeb   : > { %2854 = vadd.xlane.f32.xlu1 %v2846_v32  ;;  %v2837_v33 = vadd.f32 %v2830_v28, %v6495_v58  ;;  %3081 = vmatpush1.bf16.msra.mxu1 %v5726_v29 }
 0xfec   : > { %5415 = vmatpush3.bf16.msra.mxu0 %v5730_v60 }
 0xfed   : > { %v2847_v36 = vadd.f32 %v4814_v17, %v2837_v33 }
 0xfef   : > { %2856 = vadd.xlane.f32.xlu0 %v2847_v36 }
0x1070   : > { %v2853_v59 = vpop.xlane.xlu0 %2852 }
0x1071   : > { %v2858_v39 = vmul.f32 0.0078125, %v2853_v59 }
0x1073   : > { %v6802_v40 = vsub.f32 %v6790_v7, %v2858_v39 }
0x1074   : > { %v2855_v42 = vpop.xlane.xlu1 %2854 }
0x1075   : > { %v2859_v43 = vmul.f32 0.0078125, %v2855_v42  ;;  %v2864_v58 = vmul.f32 %v6802_v40, %v6802_v40  ;;  %v5998_v42 = vmov 0.0  }
0x1076   : > { %5420 = vmatprep.subr.bf16.mxu1 %v5998_v42  ;;  %5444 = vmatprep.subr.bf16.mxu0 %v5998_v42 }
0x1077   : > { %v6806_v19 = vsub.f32 %v2846_v32, %v2859_v43  ;;  %2867 = vadd.xlane.f32.xlu1 %v2864_v58 }
0x1078   : > { %v2857_v49 = vpop.xlane.xlu0 %2856 }
0x1079   : > { %v2860_v14 = vmul.f32 0.0078125, %v2857_v49  ;;  %v2865_v41 = vmul.f32 %v6806_v19, %v6806_v19 }
0x107b   : > { %v6810_v50 = vsub.f32 %v2847_v36, %v2860_v14  ;;  %2869 = vadd.xlane.f32.xlu0 %v2865_v41 }
0x107d   : > { %v2866_v22 = vmul.f32 %v6810_v50, %v6810_v50 }
0x107f   : > { %2871 = vadd.xlane.f32.xlu1 %v2866_v22 }
0x1100   : > { %v2868_v16 = vpop.xlane.xlu1 %2867 }
0x1101   : > { %v2873_v17 = vmul.f32 0.0078125, %v2868_v16 }
0x1103   : > { %v2876_v26 = vadd.f32 1e-05, %v2873_v17 }
0x1104   : > { %v2870_v61 = vpop.xlane.xlu0 %2869 }
0x1105   : > { %5941 = vrsqrt.f32 %v2876_v26  ;;  %v2874_v62 = vmul.f32 0.0078125, %v2870_v61 }
0x1107   : > { %v2877_v2 = vadd.f32 1e-05, %v2874_v62 }
0x1108   : > { %v2872_v3 = vpop.xlane.xlu1 %2871 }
0x1109   : > { %5943 = vrsqrt.f32 %v2877_v2  ;;  %v2875_v6 = vmul.f32 0.0078125, %v2872_v3 }
0x110b   : > { %v2878_v9 = vadd.f32 1e-05, %v2875_v6 }
0x110d   : > { %5945 = vrsqrt.f32 %v2878_v9 }
0x1112   : > { %v5942_v10 = vpop.eup %5941 }
0x1113   : > { %v2882_v12 = vmul.f32 %v5942_v10, %v6802_v40 }
0x1115   : > { %v2891_v28 = vmul.f32 %v4817_v13, %v2882_v12 }
0x1116   : > { %v5944_v23 = vpop.eup %5943 }
0x1117   : > { %v2883_v27 = vmul.f32 %v5944_v23, %v6806_v19  ;;  %v2900_v36 = vadd.f32 %v4818_v30, %v2891_v28 }
0x1119   : > { %v2892_v32 = vmul.f32 %v4817_v13, %v2883_v27 }
0x111a   : > { %v5946_v55 = vpop.eup %5945 }
0x111b   : > { %v2884_v33 = vmul.f32 %v5946_v55, %v6810_v50  ;;  %v2901_v37 = vadd.f32 %v4818_v30, %v2892_v32 }
0x111d   : > { %v2903_v38 = vpack.c.bf16 %v2901_v37, %v2900_v36  ;;  %v2893_v59 = vmul.f32 %v4817_v13, %v2884_v33 }
0x111f   : > { %3099 = vmatmul.mubr.bf16.vlgmr.msra.gmra.mxu1 %v2903_v38  ;;  %5416 = vmatprep.mubr.bf16.mxu0 %v2903_v38  ;;  %v2902_v39 = vadd.f32 %v4818_v30, %v2893_v59 }
0x1120   : > { %3107 = vmatprep.mubr.bf16.mxu1 %v5993_v1 }
0x1121   : > { %v2904_v40 = vpack.c.bf16 %v2902_v39, %v2902_v39 }
0x1123   : > { %5417 = vmatmul.mubr.bf16.vlgmr.msra.gmra.mxu0 %v2904_v40 }
0x1124   : > { %5448 = vmatprep.mubr.msk.bf16.mxu0 %vm5999_vm6, %v5998_v42 }
0x1127   : > { %3108 = vmatmul.mubr.bf16.gmra.mxu1 %v2904_v40 }
0x1128   : > { %5424 = vmatprep.mubr.msk.bf16.mxu1 %vm5999_vm6, %v5998_v42 }
0x11df   : > { %v3100_v43 = vpop.f32.mrf.mxu1 }
0x11e0   : > { %v3171_v54 = vadd.f32 %v4876_v34, %v3100_v43 }
0x11e1   : > { %v3102_v58 = vpop.f32.mrf.mxu1 }
0x11e2   : > { %v6911_v57 = vpack.c.bf16 %v3171_v54, %v3171_v54 }
0x11e3   : > { %v3104_v19 = vpop.f32.mrf.mxu1  ;;  %v5418_v49 = vpop.f32.mrf.mxu0 }
0x11e4   : > { %v6909_v56 = vpack.c.bf16 %v5418_v49, %v5418_v49 }
0x11e5   : > { %v3105_v14 = vpop.f32.mrf.mxu1  ;;  %v3149_v41 = vpop.f32.mrf.mxu0 }
0x11e6   : > { %v6901_v53 = vpack.c.bf16 %v3105_v14, %v3102_v58  ;;  %v3242_v0 = vsel %vm1282_vm2, %v6909_v56, 0 }
0x11e7   : > { %v3109_v50 = vpop.f32.mrf.mxu1  ;;  %v5419_v22 = vpop.f32.mrf.mxu0 }
0x11e8   : > { %v3181_v4 = vsel %vm1179_vm1, %v6901_v53, 0 }
0x11e9   : > { %v3110_v51 = vpop.f32.mrf.mxu1  ;;  %v3152_v31 = vpop.f32.mrf.mxu0 }
0x11ea   : > { %v6896_v52 = vpack.c.bf16 %v3110_v51, %v3110_v51  ;;  %v6920_v35 = vpack.c.bf16 %v3152_v31, %v3149_v41 }
0x11eb   : > { %v3112_v5 = vpop.f32.mrf.mxu1 }
0x11ec   : > { %v3184_v18 = vsel %vm1179_vm1, %v6896_v52, 0 }
0x11ed   : > { %v3113_v63 = vpop.f32.mrf.mxu1  ;;  %5421 = vmatpush3.bf16.xpose.msra.mxu1 %v3184_v18 }
0x11ee   : > { %5422 = vmatprep.subr.bf16.mxu1 %v5998_v42 }
0x11f5   : > { %5423 = vmatpush3.bf16.xpose.msra.mxu1 %v3181_v4 }
0x11f6   : > { %5428 = vmatprep.subr.bf16.mxu1 %v5998_v42 }
0x11fc   : > { %5425 = vmatmul.mubr.msk.bf16.vlgmr.msra.gmra.mxu1 %vm1179_vm1, %v6911_v57 }
0x11fd   : > { %5429 = vmatpush3.bf16.msra.mxu1 %v3242_v0  ;;  %5432 = vmatprep.mubr.msk.bf16.mxu1 %vm5999_vm6, %v5998_v42 }
0x11fe   : > { %5430 = vmatprep.subr.bf16.mxu1 %v5998_v42 }
0x1201   : > { %5431 = vmatpush3.bf16.msra.mxu1 %v6920_v35 }
0x1202   : > { %5436 = vmatprep.subr.bf16.mxu1 %v5998_v42 }
0x12bc   : > { %v3220_v8 = vpop.f32.mrf.mxu1 }
0x12bd   : > { %v3221_v21 = vadd.f32 %v3220_v8, %v6332_v45 }
0x12be   : > { %v5426_v24 = vpop.f32.mrf.mxu1 }
0x12bf   : > { %v3226_v20 = vsel %vm1240_vm4, %v3221_v21, -inf }
0x12c0   : > { %3227 = vmax.xlane.f32.xlu0 %v3226_v20  ;;  %v3223_v25 = vpop.f32.mrf.mxu1 }
0x12c2   : > { %v5427_v11 = vpop.f32.mrf.mxu1 }
0x12d6   : > { %3291 = vrot.lane.b32.xlu0 %v6896_v52, %s7357_s0 }
0x1349   : > { %v3228_v29 = vpop.xlane.xlu0 %3227 }
0x134a   : > { %v3229_v60 = vsub.f32 %v3221_v21, %v3228_v29 }
0x134c   : > { %v3230_v16 = vmul.f32 1.442695, %v3229_v60 }
0x134d   : > { %v3292_v3 = vpop.permute.xlu0 %3291 }
0x134e   : > { %5947 = vpow2.f32 %v3230_v16  ;;  %v3300_v9 = vsel %vm1179_vm1, %v3292_v3, 0 }
0x135b   : > { %v5948_v17 = vpop.eup %5947 }
0x135c   : > { %v3232_v26 = vsel %vm1240_vm4, %v5948_v17, 0.0 }
0x135d   : > { %3233 = vadd.xlane.f32.xlu1 %v3232_v26 }
0x136e   : > { %3289 = vrot.lane.b32.xlu1 %v6901_v53, %s7357_s0 }
0x1372   : > { %3285 = vrot.lane.b32.xlu1 %v6911_v57, %s7357_s0 }
0x13e6   : > { %v3234_v61 = vpop.xlane.xlu1 %3233 }
0x13e7   : > { %5949 = vrcp.f32 %v3234_v61 }
0x13ea   : > { %v3290_v10 = vpop.permute.xlu1 %3289 }
0x13eb   : > { %v3297_v12 = vsel %vm1179_vm1, %v3290_v10, 0 }
0x13ee   : > { %v3286_v13 = vpop.permute.xlu1 %3285 }
0x13f4   : > { %v5950_v62 = vpop.eup %5949 }
0x13f5   : > { %v3236_v2 = vmul.f32 %v5950_v62, %v5948_v17 }
0x13f7   : > { %v3237_v6 = vpack.c.bf16 %v3236_v2, %v3236_v2 }
0x13f9   : > { %5433 = vmatmul.mubr.msk.bf16.vlgmr.msra.gmra.mxu1 %vm1240_vm4, %v3237_v6 }
0x13fa   : > { %5437 = vmatpush3.bf16.xpose.msra.mxu1 %v3300_v9  ;;  %5440 = vmatprep.mubr.msk.bf16.mxu1 %vm5999_vm6, %v5998_v42 }
0x13fb   : > { %5438 = vmatprep.subr.bf16.mxu1 %v5998_v42 }
0x1402   : > { %5439 = vmatpush3.bf16.xpose.msra.mxu1 %v3297_v12 }
0x1403   : > { %5460 = vmatprep.subr.bf16.mxu1 %v5998_v42 }
0x1409   : > { %5441 = vmatmul.mubr.msk.bf16.vlgmr.msra.gmra.mxu1 %vm1179_vm1, %v3286_v13 }
0x140a   : > { %5464 = vmatprep.mubr.msk.bf16.mxu1 %vm5999_vm6, %v5998_v42 }
0x14b9   : > { %v6943_v23 = vpop.f32.mrf.mxu1 }
0x14bb   : > { %v5434_v27 = vpop.f32.mrf.mxu1 }
0x14bd   : > { %v3281_v28 = vpop.f32.mrf.mxu1 }
0x14bf   : > { %v5435_v30 = vpop.f32.mrf.mxu1 }
0x14c9   : > { %v3336_v32 = vpop.f32.mrf.mxu1 }
0x14ca   : > { %v3337_v55 = vadd.f32 %v3336_v32, %v6332_v45 }
0x14cb   : > { %v5442_v33 = vpop.f32.mrf.mxu1 }
0x14cc   : > { %v3342_v36 = vsel %vm1240_vm4, %v3337_v55, -inf }
0x14cd   : > { %3343 = vmax.xlane.f32.xlu1 %v3342_v36  ;;  %v3339_v37 = vpop.f32.mrf.mxu1 }
0x14cf   : > { %v5443_v38 = vpop.f32.mrf.mxu1 }
0x14de   : > { %3356 = vrot.lane.b32.xlu1 %v6920_v35, %s7357_s0 }
0x14e2   : > { %3411 = vrot.lane.b32.xlu1 %v6896_v52, %s7358_s4 }
0x14e6   : > { %3407 = vrot.lane.b32.xlu1 %v6911_v57, %s7358_s4 }
0x1556   : > { %v3344_v59 = vpop.xlane.xlu1 %3343 }
0x1557   : > { %v3345_v39 = vsub.f32 %v3337_v55, %v3344_v59 }
0x1559   : > { %v3346_v40 = vmul.f32 1.442695, %v3345_v39 }
0x155a   : > { %v3357_v41 = vpop.permute.xlu1 %3356 }
0x155b   : > { %5951 = vpow2.f32 %v3346_v40 }
0x155e   : > { %v3412_v51 = vpop.permute.xlu1 %3411 }
0x155f   : > { %v3420_v18 = vsel %vm1179_vm1, %v3412_v51, 0 }
0x1562   : > { %v3408_v4 = vpop.permute.xlu1 %3407 }
0x1568   : > { %v5952_v43 = vpop.eup %5951 }
0x1569   : > { %v3348_v58 = vsel %vm1240_vm4, %v5952_v43, 0.0 }
0x156a   : > { %3349 = vadd.xlane.f32.xlu0 %v3348_v58 }
0x1580   : > { %3358 = vrot.lane.b32.xlu0 %v6909_v56, %s7357_s0 }
0x1584   : > { %3409 = vrot.lane.b32.xlu0 %v6901_v53, %s7358_s4 }
0x15f3   : > { %v3350_v19 = vpop.xlane.xlu0 %3349 }
0x15f4   : > { %5953 = vrcp.f32 %v3350_v19 }
0x15f7   : > { %v3359_v49 = vpop.permute.xlu0 %3358 }
0x15f8   : > { %v3365_v14 = vsel %vm1282_vm2, %v3359_v49, 0 }
0x15f9   : > { %5445 = vmatpush3.bf16.msra.mxu0 %v3365_v14 }
0x15fa   : > { %5446 = vmatprep.subr.bf16.mxu0 %v5998_v42 }
0x15fb   : > { %v3410_v63 = vpop.permute.xlu0 %3409 }
0x15fc   : > { %v3417_v34 = vsel %vm1179_vm1, %v3410_v63, 0  ;;  %v5734_v63 = vld [vmem:[%s7327_s9 + $0x60] sm:$0xff]  }
0x15fd   : > { %5447 = vmatpush3.bf16.msra.mxu0 %v3357_v41 }
0x15fe   : > { %5452 = vmatprep.subr.bf16.mxu0 %v5998_v42 }
0x1601   : > { %v5954_v50 = vpop.eup %5953 }
0x1602   : > { %v3352_v22 = vmul.f32 %v5954_v50, %v5952_v43 }
0x1604   : > { %v3353_v5 = vpack.c.bf16 %v3352_v22, %v3352_v22 }
0x1606   : > { %5449 = vmatmul.mubr.msk.bf16.vlgmr.msra.gmra.mxu0 %vm1240_vm4, %v3353_v5  ;;  %v5732_v5 = vld [vmem:[%s7327_s9 + $0x70] sm:$0xff]  }
0x1607   : > { %5453 = vmatpush3.bf16.xpose.msra.mxu0 %v3420_v18  ;;  %5456 = vmatprep.mubr.msk.bf16.mxu0 %vm5999_vm6, %v5998_v42  ;;  %v5733_v18 = vld [vmem:[%s7327_s9 + $0x68] sm:$0xff]  }
0x1608   : > { %5454 = vmatprep.subr.bf16.mxu0 %v5998_v42 }
0x160f   : > { %5455 = vmatpush3.bf16.xpose.msra.mxu0 %v3417_v34  ;;  %v5735_v34 = vld [vmem:[%s7327_s9 + $0x58] sm:$0xff]  }
0x1610   : > { %5476 = vmatprep.subr.bf16.mxu0 %v5998_v42 }
0x1616   : > { %5457 = vmatmul.mubr.msk.bf16.vlgmr.msra.gmra.mxu0 %vm1179_vm1, %v3408_v4  ;;  %v5736_v4 = vld [vmem:[%s7327_s9 + $0x50] sm:$0xff]  }
0x1617   : > { %5480 = vmatprep.mubr.msk.bf16.mxu0 %vm5999_vm6, %v5998_v42 }
0x16c6   : > { %v3401_v54 = vpop.f32.mrf.mxu0 }
0x16c8   : > { %v5450_v31 = vpop.f32.mrf.mxu0 }
0x16c9   : > { %v5738_v31 = vld [vmem:[%s7327_s9 + $0x40] sm:$0xff]  }
0x16ca   : > { %v3404_v0 = vpop.f32.mrf.mxu0 }
0x16cc   : > { %v5451_v8 = vpop.f32.mrf.mxu0 }
0x16d6   : > { %v3456_v21 = vpop.f32.mrf.mxu0 }
0x16d7   : > { %v3457_v24 = vadd.f32 %v3456_v21, %v6332_v45 }
0x16d8   : > { %v5458_v20 = vpop.f32.mrf.mxu0 }
0x16d9   : > { %v3462_v25 = vsel %vm1240_vm4, %v3457_v24, -inf }
0x16da   : > { %3463 = vmax.xlane.f32.xlu0 %v3462_v25  ;;  %v3459_v11 = vpop.f32.mrf.mxu0 }
0x16dc   : > { %v5459_v29 = vpop.f32.mrf.mxu0 }
0x16f0   : > { %3476 = vrot.lane.b32.xlu0 %v6909_v56, %s7358_s4 }
0x16f4   : > { %3529 = vrot.lane.b32.xlu0 %v6896_v52, %s7359_s30 }
0x16f8   : > { %3525 = vrot.lane.b32.xlu0 %v6911_v57, %s7359_s30 }
0x1763   : > { %v3464_v60 = vpop.xlane.xlu0 %3463 }
0x1764   : > { %v3465_v16 = vsub.f32 %v3457_v24, %v3464_v60 }
0x1766   : > { %v3466_v17 = vmul.f32 1.442695, %v3465_v16 }
0x1767   : > { %v3477_v26 = vpop.permute.xlu0 %3476 }
0x1768   : > { %5955 = vpow2.f32 %v3466_v17  ;;  %v3483_v61 = vsel %vm1282_vm2, %v3477_v26, 0 }
0x1769   : > { %5461 = vmatpush3.bf16.msra.mxu1 %v3483_v61  ;;  %v4910_v61 = vld [vmem:[%s7328_s10 + $0x1] ss:$0 sm:$0xff] }
0x176a   : > { %5462 = vmatprep.subr.bf16.mxu1 %v5998_v42 }
0x176b   : > { %v3530_v9 = vpop.permute.xlu0 %3529 }
0x176c   : > { %v3538_v12 = vsel %vm1179_vm1, %v3530_v9, 0  ;;  %v5747_v9 = vld [vmem:[%s7331_s13 + $0x1c4] ss:$16 sps:$4 sm:$0xff]  }
0x176f   : > { %v3526_v27 = vpop.permute.xlu0 %3525 }
0x1775   : > { %v5956_v62 = vpop.eup %5955 }
0x1776   : > { %v3468_v2 = vsel %vm1240_vm4, %v5956_v62, 0.0 }
0x1777   : > { %3469 = vadd.xlane.f32.xlu1 %v3468_v2 }
0x1788   : > { %3474 = vrot.lane.b32.xlu1 %v6920_v35, %s7358_s4 }
0x178c   : > { %3527 = vrot.lane.b32.xlu1 %v6901_v53, %s7359_s30 }
0x1800   : > { %v3470_v52 = vpop.xlane.xlu1 %3469 }
0x1801   : > { %5957 = vrcp.f32 %v3470_v52 }
0x1804   : > { %v3475_v57 = vpop.permute.xlu1 %3474 }
0x1805   : > { %5463 = vmatpush3.bf16.msra.mxu1 %v3475_v57 }
0x1806   : > { %5468 = vmatprep.subr.bf16.mxu1 %v5998_v42 }
0x1808   : > { %v3528_v53 = vpop.permute.xlu1 %3527 }
0x1809   : > { %v3535_v13 = vsel %vm1179_vm1, %v3528_v53, 0  ;;  %v5748_v53 = vld [vmem:[%s7331_s13 + $0x1c8] ss:$16 sps:$4 sm:$0xff]  }
0x180e   : > { %v5958_v3 = vpop.eup %5957 }
0x180f   : > { %v3472_v6 = vmul.f32 %v5958_v3, %v5956_v62  ;;  %v5739_v3 = vld [vmem:[%s7331_s13 + $0x1e0] ss:$16 sps:$4 sm:$0xff]  }
0x1811   : > { %v3473_v10 = vpack.c.bf16 %v3472_v6, %v3472_v6  ;;  %v5742_v6 = vld [vmem:[%s7331_s13 + $0x1e8] ss:$16 sps:$4 sm:$0xff]  }
0x1813   : > { %5465 = vmatmul.mubr.msk.bf16.vlgmr.msra.gmra.mxu1 %vm1240_vm4, %v3473_v10  ;;  %v5750_v10 = vld [vmem:[%s7331_s13 + $0x1cc] ss:$16 sps:$4 sm:$0xff]  }
0x1814   : > { %5469 = vmatpush3.bf16.xpose.msra.mxu1 %v3538_v12  ;;  %5472 = vmatprep.mubr.msk.bf16.mxu1 %vm5999_vm6, %v5998_v42  ;;  %v5745_v12 = vld [vmem:[%s7331_s13 + $0x1c0] ss:$16 sps:$4 sm:$0xff]  }
0x1815   : > { %5470 = vmatprep.subr.bf16.mxu1 %v5998_v42 }
0x181c   : > { %5471 = vmatpush3.bf16.xpose.msra.mxu1 %v3535_v13 }
0x1823   : > { %5473 = vmatmul.mubr.msk.bf16.vlgmr.msra.gmra.mxu1 %vm1179_vm1, %v3526_v27 }
0x1824   : > { %4052 = vmatprep.mubr.bf16.mxu1 %v5993_v1 }
0x18d3   : > { %v3519_v28 = vpop.f32.mrf.mxu1 }
0x18d5   : > { %v5466_v30 = vpop.f32.mrf.mxu1 }
0x18d7   : > { %v3522_v32 = vpop.f32.mrf.mxu1 }
0x18d8   : > { %v5753_v32 = vld [vmem:[%s7331_s13 + $0x1a4] ss:$16 sps:$4 sm:$0xff]  }
0x18d9   : > { %v5467_v55 = vpop.f32.mrf.mxu1 }
0x18da   : > { %v5756_v55 = vld [vmem:[%s7331_s13 + $0x1ac] ss:$16 sps:$4 sm:$0xff]  }
0x18e3   : > { %v3574_v33 = vpop.f32.mrf.mxu1 }
0x18e4   : > { %v3575_v36 = vadd.f32 %v3574_v33, %v6332_v45  ;;  %v5751_v33 = vld [vmem:[%s7331_s13 + $0x1a0] ss:$16 sps:$4 sm:$0xff]  }
0x18e5   : > { %v5474_v37 = vpop.f32.mrf.mxu1 }
0x18e6   : > { %v3580_v38 = vsel %vm1240_vm4, %v3575_v36, -inf  ;;  %v5757_v37 = vld [vmem:[%s7331_s13 + $0x180] ss:$16 sps:$4 sm:$0xff]  }
0x18e7   : > { %3581 = vmax.xlane.f32.xlu1 %v3580_v38  ;;  %v3577_v59 = vpop.f32.mrf.mxu1  ;;  %v5759_v38 = vld [vmem:[%s7331_s13 + $0x184] ss:$16 sps:$4 sm:$0xff]  }
0x18e8   : > { %v5760_v59 = vld [vmem:[%s7331_s13 + $0x188] ss:$16 sps:$4 sm:$0xff]  }
0x18e9   : > { %v5475_v39 = vpop.f32.mrf.mxu1 }
0x18ea   : > { %v5762_v39 = vld [vmem:[%s7331_s13 + $0x18c] ss:$16 sps:$4 sm:$0xff]  }
0x18f8   : > { %3592 = vrot.lane.b32.xlu1 %v6920_v35, %s7359_s30 }
0x18fc   : > { %3644 = vrot.lane.b32.xlu1 %v3401_v54, %s7359_s30  ;;  %v5737_v54 = vld [vmem:[%s7327_s9 + $0x48] sm:$0xff]  }
0x1970   : > { %v3582_v40 = vpop.xlane.xlu1 %3581 }
0x1971   : > { %v3583_v43 = vsub.f32 %v3575_v36, %v3582_v40  ;;  %v5754_v36 = vld [vmem:[%s7331_s13 + $0x1a8] ss:$16 sps:$4 sm:$0xff]   ;;  %v5765_v40 = vld [vmem:[%s7331_s13 + $0x164] ss:$16 sps:$4 sm:$0xff]  }
0x1973   : > { %v3584_v58 = vmul.f32 1.442695, %v3583_v43  ;;  %v5768_v43 = vld [vmem:[%s7331_s13 + $0x16c] ss:$16 sps:$4 sm:$0xff]  }
0x1974   : > { %v3593_v41 = vpop.permute.xlu1 %3592 }
0x1975   : > { %5959 = vpow2.f32 %v3584_v58  ;;  %v5763_v58 = vld [vmem:[%s7331_s13 + $0x160] ss:$16 sps:$4 sm:$0xff]  }
0x1978   : > { %v3645_v20 = vpop.permute.xlu1 %3644 }
0x1979   : > { %v3655_v11 = vsel %vm1179_vm1, %v6943_v23, %v3645_v20 }
0x1982   : > { %v5960_v19 = vpop.eup %5959 }
0x1983   : > { %v3586_v49 = vsel %vm1240_vm4, %v5960_v19, 0.0 }
0x1984   : > { %3587 = vadd.xlane.f32.xlu0 %v3586_v49  ;;  %v5771_v49 = vld [vmem:[%s7331_s13 + $0x144] ss:$16 sps:$4 sm:$0xff]  }
0x199a   : > { %3594 = vrot.lane.b32.xlu0 %v6909_v56, %s7359_s30  ;;  %v5731_v56 = vld [vmem:[%s7327_s9 + $0x78] sm:$0xff]  }
0x199e   : > { %3648 = vrot.lane.b32.xlu0 %v3519_v28, %s7358_s4 }
0x1a0d   : > { %v3588_v45 = vpop.xlane.xlu0 %3587 }
0x1a0e   : > { %5961 = vrcp.f32 %v3588_v45  ;;  %v5774_v45 = vld [vmem:[%s7331_s13 + $0x14c] ss:$16 sps:$4 sm:$0xff]  }
0x1a11   : > { %v3595_v14 = vpop.permute.xlu0 %3594 }
0x1a12   : > { %v3601_v35 = vsel %vm1282_vm2, %v3595_v14, 0  ;;  %v5769_v14 = vld [vmem:[%s7331_s13 + $0x140] ss:$16 sps:$4 sm:$0xff]  }
0x1a13   : > { %5477 = vmatpush3.bf16.msra.mxu0 %v3601_v35  ;;  %v5772_v35 = vld [vmem:[%s7331_s13 + $0x148] ss:$16 sps:$4 sm:$0xff]  }
0x1a14   : > { %5478 = vmatprep.subr.bf16.mxu0 %v5998_v42 }
0x1a15   : > { %v3649_v25 = vpop.permute.xlu0 %3648 }
0x1a16   : > { %v3656_v29 = vsel %vm736_vm0, %v3655_v11, %v3649_v25  ;;  %v5787_v11 = vld [vmem:[%s7333_s15 + $0x178] sm:$0xff]  }
0x1a17   : > { %5479 = vmatpush3.bf16.msra.mxu0 %v3593_v41  ;;  %v5777_v41 = vld [vmem:[%s7331_s13 + $0x124] ss:$16 sps:$4 sm:$0xff]  }
0x1a18   : > { %5484 = vmatprep.subr.bf16.mxu0 %v5998_v42 }
0x1a1b   : > { %v5962_v50 = vpop.eup %5961 }
0x1a1c   : > { %v3590_v22 = vmul.f32 %v5962_v50, %v5960_v19  ;;  %v5766_v19 = vld [vmem:[%s7331_s13 + $0x168] ss:$16 sps:$4 sm:$0xff]   ;;  %v5780_v50 = vld [vmem:[%s7331_s13 + $0x12c] ss:$16 sps:$4 sm:$0xff]  }
0x1a1e   : > { %v3591_v51 = vpack.c.bf16 %v3590_v22, %v3590_v22  ;;  %v5775_v22 = vld [vmem:[%s7331_s13 + $0x120] ss:$16 sps:$4 sm:$0xff]  }
0x1a20   : > { %5481 = vmatmul.mubr.msk.bf16.vlgmr.msra.gmra.mxu0 %vm1240_vm4, %v3591_v51  ;;  %v5778_v51 = vld [vmem:[%s7331_s13 + $0x128] ss:$16 sps:$4 sm:$0xff]  }
0x1a21   : > { %5500 = vmatprep.mubr.msk.bf16.mxu0 %vm5999_vm6, %v5998_v42  ;;  %5485 = vmatpush3.bf16.msra.mxu0 %v5731_v56  ;;  %v5783_v56 = vld [vmem:[%s7331_s13 + $0x104] ss:$16 sps:$4 sm:$0xff]  }
0x1a22   : > { %5486 = vmatprep.subr.bf16.mxu0 %v5998_v42 }
0x1a25   : > { %5487 = vmatpush3.bf16.msra.mxu0 %v5732_v5  ;;  %v5786_v5 = vld [vmem:[%s7331_s13 + $0x10c] ss:$16 sps:$4 sm:$0xff]  }
0x1a26   : > { %5488 = vmatprep.subr.bf16.mxu0 %v5998_v42 }
0x1a29   : > { %5489 = vmatpush3.bf16.msra.mxu0 %v5733_v18  ;;  %v5781_v18 = vld [vmem:[%s7331_s13 + $0x100] ss:$16 sps:$4 sm:$0xff]  }
0x1a2a   : > { %5490 = vmatprep.subr.bf16.mxu0 %v5998_v42 }
0x1a2d   : > { %5491 = vmatpush3.bf16.msra.mxu0 %v5734_v63  ;;  %v5784_v63 = vld [vmem:[%s7331_s13 + $0x108] ss:$16 sps:$4 sm:$0xff]  }
0x1a2e   : > { %5492 = vmatprep.subr.bf16.mxu0 %v5998_v42 }
0x1a31   : > { %5493 = vmatpush3.bf16.msra.mxu0 %v5735_v34 }
0x1a32   : > { %5494 = vmatprep.subr.bf16.mxu0 %v5998_v42 }
0x1a35   : > { %5495 = vmatpush3.bf16.msra.mxu0 %v5736_v4 }
0x1a36   : > { %5496 = vmatprep.subr.bf16.mxu0 %v5998_v42 }
0x1a39   : > { %5497 = vmatpush3.bf16.msra.mxu0 %v5737_v54 }
0x1a3a   : > { %5498 = vmatprep.subr.bf16.mxu0 %v5998_v42 }
0x1a3d   : > { %5499 = vmatpush3.bf16.msra.mxu0 %v5738_v31 }
0x1ae0   : > { %v3637_v0 = vpop.f32.mrf.mxu0 }
0x1ae1   : > { %3652 = vrot.lane.b32.xlu1 %v3637_v0, %s7357_s0  ;;  %v4913_v0 = vld [vmem:[%s7329_s11 + $0x1] ss:$0 sm:$0xff] }
0x1ae2   : > { %v5482_v8 = vpop.f32.mrf.mxu0 }
0x1ae4   : > { %v3640_v21 = vpop.f32.mrf.mxu0 }
0x1ae5   : > { %v4914_v21 = vld [vmem:[%s7330_s12 + $0x1] ss:$0 sm:$0xff] }
0x1ae6   : > { %v5483_v24 = vpop.f32.mrf.mxu0 }
0x1b53   : > { %v3653_v60 = vpop.permute.xlu1 %3652 }
0x1b54   : > { %v3657_v16 = vsel %vm1877_vm5, %v3656_v29, %v3653_v60  ;;  %v5788_v29 = vld [vmem:[%s7333_s15 + $0x1f8] sm:$0xff]  }
0x1b55   : > { %v3658_v17 = vpack.c.bf16 %v3657_v16, %v3657_v16  ;;  %v5789_v60 = vld [vmem:[%s7333_s15 + $0x138] sm:$0xff]  }
0x1b56   : > { %v5790_v16 = vld [vmem:[%s7333_s15 + $0x1b8] sm:$0xff]  }
0x1b57   : > { %5501 = vmatmul.mubr.bf16.vlgmr.msra.gmra.mxu0 %v3658_v17  ;;  %v5791_v17 = vld [vmem:[%s7333_s15 + $0x170] sm:$0xff]  }
0x1b58   : > { %4093 = vmatprep.mubr.bf16.mxu0 %v5993_v1  ;;  %v5741_v1 = vld [vmem:[%s7331_s13 + $0x1e4] ss:$16 sps:$4 sm:$0xff]  }
0x1b59   : > { %4020 = vmatprep.subr.bf16.mxu1 %v5741_v1  ;;  %v5799_v1 = vld [vmem:[%s7333_s15 + $0x160] sm:$0xff]  }
0x1b5a   : > { %4021 = vmatpush1.bf16.msra.mxu1 %v5739_v3  ;;  %v5798_v3 = vld [vmem:[%s7333_s15 + $0x1a8] sm:$0xff]  }
0x1b5b   : > { %4022 = vmatprep.subr.bf16.mxu1 %v5747_v9  ;;  %v5802_v9 = vld [vmem:[%s7333_s15 + $0x1a0] sm:$0xff]  }
0x1b5e   : > { %4023 = vmatpush1.bf16.msra.mxu1 %v5745_v12  ;;  %v5804_v12 = vld [vmem:[%s7333_s15 + $0x1d8] sm:$0xff]  }
0x1b5f   : > { %4024 = vmatprep.subr.bf16.mxu1 %v5753_v32  ;;  %v5810_v32 = vld [vmem:[%s7333_s15 + $0x190] sm:$0xff]  }
0x1b62   : > { %4025 = vmatpush1.bf16.msra.mxu1 %v5751_v33  ;;  %v5812_v33 = vld [vmem:[%s7333_s15 + $0x1c8] sm:$0xff]  }
0x1b63   : > { %4026 = vmatprep.subr.bf16.mxu1 %v5759_v38  ;;  %v5815_v38 = vld [vmem:[%s7333_s15 + $0x140] sm:$0xff]  }
0x1b66   : > { %4027 = vmatpush1.bf16.msra.mxu1 %v5757_v37  ;;  %v5814_v37 = vld [vmem:[%s7333_s15 + $0x188] sm:$0xff]  }
0x1b67   : > { %4028 = vmatprep.subr.bf16.mxu1 %v5765_v40  ;;  %v5818_v40 = vld [vmem:[%s7333_s15 + $0x180] sm:$0xff]  }
0x1b6a   : > { %4029 = vmatpush1.bf16.msra.mxu1 %v5763_v58 }
0x1b6b   : > { %4030 = vmatprep.subr.bf16.mxu1 %v5771_v49 }
0x1b6e   : > { %4031 = vmatpush1.bf16.msra.mxu1 %v5769_v14 }
0x1b6f   : > { %4032 = vmatprep.subr.bf16.mxu1 %v5777_v41 }
0x1b72   : > { %4033 = vmatpush1.bf16.msra.mxu1 %v5775_v22 }
0x1b73   : > { %4034 = vmatprep.subr.bf16.mxu1 %v5783_v56 }
0x1b76   : > { %4035 = vmatpush1.bf16.msra.mxu1 %v5781_v18 }
0x1b77   : > { %5243 = vmatprep.subr.bf16.mxu1 %v5787_v11 }
0x1c17   : > { %v3758_v26 = vpop.f32.mrf.mxu0 }
0x1c18   : > { %v3764_v62 = vadd.f32 %v3758_v26, %v6790_v7  ;;  %v5744_v7 = vld [vmem:[%s7331_s13 + $0x1ec] ss:$16 sps:$4 sm:$0xff]   ;;  %v5792_v26 = vld [vmem:[%s7333_s15 + $0x1f0] sm:$0xff]  }
0x1c19   : > { %v5502_v2 = vpop.f32.mrf.mxu0  ;;  %4061 = vmatprep.subr.bf16.mxu0 %v5744_v7  ;;  %v5801_v7 = vld [vmem:[%s7333_s15 + $0x120] sm:$0xff]  }
0x1c1a   : > { %v7051_v52 = vadd.f32 %v4910_v61, %v3764_v62  ;;  %4062 = vmatpush1.bf16.msra.mxu0 %v5742_v6  ;;  %v5793_v61 = vld [vmem:[%s7333_s15 + $0x130] sm:$0xff]   ;;  %v5795_v2 = vld [vmem:[%s7333_s15 + $0x168] sm:$0xff]   ;;  %v5800_v6 = vld [vmem:[%s7333_s15 + $0x1e0] sm:$0xff]  }
0x1c1b   : > { %v3761_v23 = vpop.f32.mrf.mxu0  ;;  %4063 = vmatprep.subr.bf16.mxu0 %v5750_v10  ;;  %v5794_v62 = vld [vmem:[%s7333_s15 + $0x1b0] sm:$0xff]   ;;  %v5803_v10 = vld [vmem:[%s7333_s15 + $0x158] sm:$0xff]  }
0x1c1c   : > { %3778 = vadd.xlane.f32.xlu0 %v7051_v52  ;;  %v5796_v23 = vld [vmem:[%s7333_s15 + $0x1e8] sm:$0xff]  }
0x1c1d   : > { %v5503_v57 = vpop.f32.mrf.mxu0 }
0x1c1e   : > { %4064 = vmatpush1.bf16.msra.mxu0 %v5748_v53  ;;  %v5797_v57 = vld [vmem:[%s7333_s15 + $0x128] sm:$0xff]   ;;  %v5805_v53 = vld [vmem:[%s7333_s15 + $0x118] sm:$0xff]  }
0x1c1f   : > { %4065 = vmatprep.subr.bf16.mxu0 %v5756_v55  ;;  %v5811_v55 = vld [vmem:[%s7333_s15 + $0x148] sm:$0xff]  }
0x1c22   : > { %4066 = vmatpush1.bf16.msra.mxu0 %v5754_v36  ;;  %v5813_v36 = vld [vmem:[%s7333_s15 + $0x108] sm:$0xff]  }
0x1c23   : > { %4067 = vmatprep.subr.bf16.mxu0 %v5762_v39  ;;  %v5817_v39 = vld [vmem:[%s7333_s15 + $0x100] sm:$0xff]  }
0x1c26   : > { %4068 = vmatpush1.bf16.msra.mxu0 %v5760_v59  ;;  %v5816_v59 = vld [vmem:[%s7333_s15 + $0x1c0] sm:$0xff]  }
0x1c27   : > { %4069 = vmatprep.subr.bf16.mxu0 %v5768_v43  ;;  %v4947_v43 = vld [vmem:[%s7332_s14 + $0x4] sm:$0xf] }
0x1c28   : > { %v3843_v58 = vrot.slane %v4947_v43, %v2099_v46  ;;  %v3847_v49 = vrot.slane %v4947_v43, %v2103_v15 }
0x1c2a   : > { %4070 = vmatpush1.bf16.msra.mxu0 %v5766_v19  ;;  %v3851_v19 = vrot.slane %v4947_v43, %v2107_v47 }
0x1c2b   : > { %4071 = vmatprep.subr.bf16.mxu0 %v5774_v45  ;;  %v3855_v45 = vrot.slane %v4947_v43, %v2111_v48 }
0x1c2e   : > { %4072 = vmatpush1.bf16.msra.mxu0 %v5772_v35 }
0x1c2f   : > { %4073 = vmatprep.subr.bf16.mxu0 %v5780_v50 }
0x1c32   : > { %4074 = vmatpush1.bf16.msra.mxu0 %v5778_v51 }
0x1c33   : > { %4075 = vmatprep.subr.bf16.mxu0 %v5786_v5 }
0x1c36   : > { %4076 = vmatpush1.bf16.msra.mxu0 %v5784_v63 }
0x1c37   : > { %5265 = vmatprep.subr.bf16.mxu0 %v5788_v29 }
0x1ca5   : > { %v3779_v13 = vpop.xlane.xlu0 %3778 }
0x1ca6   : > { %v3780_v27 = vmul.f32 0.0078125, %v3779_v13  ;;  %v5806_v13 = vld [vmem:[%s7333_s15 + $0x198] sm:$0xff]  }
0x1ca8   : > { %v3781_v28 = vsub.f32 %v7051_v52, %v3780_v27  ;;  %v5807_v27 = vld [vmem:[%s7333_s15 + $0x150] sm:$0xff]  }
0x1caa   : > { %v3782_v30 = vmul.f32 %v3781_v28, %v3781_v28 }
0x1cac   : > { %3783 = vadd.xlane.f32.xlu1 %v3782_v30  ;;  %v5809_v30 = vld [vmem:[%s7333_s15 + $0x110] sm:$0xff]  }
0x1d35   : > { %v3784_v34 = vpop.xlane.xlu1 %3783 }
0x1d36   : > { %v3785_v4 = vmul.f32 0.0078125, %v3784_v34 }
0x1d38   : > { %v3786_v54 = vadd.f32 1e-05, %v3785_v4 }
0x1d3a   : > { %5963 = vrsqrt.f32 %v3786_v54 }
0x1d47   : > { %v5964_v31 = vpop.eup %5963 }
0x1d48   : > { %v3788_v8 = vmul.f32 %v5964_v31, %v3781_v28  ;;  %v5808_v28 = vld [vmem:[%s7333_s15 + $0x1d0] sm:$0xff]  }
0x1d4a   : > { %v3795_v24 = vmul.f32 %v4913_v0, %v3788_v8 }
0x1d4c   : > { %v3802_v20 = vadd.f32 %v4914_v21, %v3795_v24 }
0x1d4e   : > { %v3803_v25 = vpack.c.bf16 %v3802_v20, %v3802_v20 }
0x1d50   : > { %4053 = vmatmul.mubr.bf16.vlgmr.msra.gmra.mxu1 %v3803_v25  ;;  %4094 = vmatmul.mubr.bf16.vlgmr.msra.gmra.mxu0 %v3803_v25 }
0x1d51   : > { %5244 = vmatpush3.bf16.msra.mxu1 %v5789_v60  ;;  %5266 = vmatpush3.bf16.msra.mxu0 %v5790_v16 }
0x1d52   : > { %5245 = vmatprep.subr.bf16.mxu1 %v5791_v17  ;;  %5267 = vmatprep.subr.bf16.mxu0 %v5792_v26 }
0x1d55   : > { %5246 = vmatpush3.bf16.msra.mxu1 %v5793_v61  ;;  %5268 = vmatpush3.bf16.msra.mxu0 %v5794_v62 }
0x1d56   : > { %5247 = vmatprep.subr.bf16.mxu1 %v5795_v2  ;;  %5269 = vmatprep.subr.bf16.mxu0 %v5796_v23 }
0x1d59   : > { %5248 = vmatpush3.bf16.msra.mxu1 %v5797_v57  ;;  %5270 = vmatpush3.bf16.msra.mxu0 %v5798_v3 }
0x1d5a   : > { %5249 = vmatprep.subr.bf16.mxu1 %v5799_v1  ;;  %5271 = vmatprep.subr.bf16.mxu0 %v5800_v6 }
0x1d5d   : > { %5250 = vmatpush3.bf16.msra.mxu1 %v5801_v7  ;;  %5272 = vmatpush3.bf16.msra.mxu0 %v5802_v9 }
0x1d5e   : > { %5251 = vmatprep.subr.bf16.mxu1 %v5803_v10  ;;  %5273 = vmatprep.subr.bf16.mxu0 %v5804_v12 }
0x1d61   : > { %5252 = vmatpush3.bf16.msra.mxu1 %v5805_v53  ;;  %5274 = vmatpush3.bf16.msra.mxu0 %v5806_v13 }
0x1d62   : > { %5253 = vmatprep.subr.bf16.mxu1 %v5807_v27  ;;  %5275 = vmatprep.subr.bf16.mxu0 %v5808_v28 }
0x1d65   : > { %5254 = vmatpush3.bf16.msra.mxu1 %v5809_v30  ;;  %5276 = vmatpush3.bf16.msra.mxu0 %v5810_v32 }
0x1d66   : > { %5255 = vmatprep.subr.bf16.mxu1 %v5811_v55  ;;  %5277 = vmatprep.subr.bf16.mxu0 %v5812_v33 }
0x1d69   : > { %5256 = vmatpush3.bf16.msra.mxu1 %v5813_v36  ;;  %5278 = vmatpush3.bf16.msra.mxu0 %v5814_v37  ;;  %v5081_v36 = vld [vmem:[%s7334_s16 + $0x1] ss:$0 sm:$0xff] }
0x1d6a   : > { %5257 = vmatprep.subr.bf16.mxu1 %v5815_v38  ;;  %5279 = vmatprep.subr.bf16.mxu0 %v5816_v59 }
0x1d6d   : > { %5258 = vmatpush3.bf16.msra.mxu1 %v5817_v39  ;;  %5280 = vmatpush3.bf16.msra.mxu0 %v5818_v40  ;;  %v5819_v39 = vld [vmem:[%s7337_s19 + $0x38] sm:$0xff]   ;;  %v5820_v40 = vld [vmem:[%s7337_s19 + $0x30] sm:$0xff]  }
0x1d6e   : > { %5504 = vmatprep.subr.bf16.mxu1 %v5998_v42 }
0x1e10   : > { %v4054_v14 = vpop.f32.mrf.mxu1  ;;  %v4095_v35 = vpop.f32.mrf.mxu0 }
0x1e11   : > { %v4055_v41 = vadd.f32 %v4054_v14, %v3843_v58  ;;  %v4096_v50 = vadd.f32 %v4095_v35, %v3851_v19  ;;  %v5822_v14 = vld [vmem:[%s7337_s19 + $0x20] sm:$0xff]   ;;  %v5823_v35 = vld [vmem:[%s7337_s19 + $0x18] sm:$0xff]  }
0x1e12   : > { %v4056_v22 = vpop.f32.mrf.mxu1  ;;  %v4097_v51 = vpop.f32.mrf.mxu0 }
0x1e13   : > { %v4980_v56 = vmul.f32 -1.702, %v4055_v41  ;;  %v4982_v5 = vmul.f32 -1.702, %v4096_v50  ;;  %v4057_v18 = vadd.f32 %v4056_v22, %v3847_v49  ;;  %v4098_v63 = vadd.f32 %v4097_v51, %v3855_v45  ;;  %v5821_v45 = vld [vmem:[%s7337_s19 + $0x28] sm:$0xff]   ;;  %v5826_v22 = vld [vmem:[%s7337_s19] sm:$0xff]  }
0x1e14   : > { %v4058_v46 = vpop.f32.mrf.mxu1  ;;  %v4099_v34 = vpop.f32.mrf.mxu0 }
0x1e15   : > { %v4110_v4 = vmul.f32 1.442695, %v4980_v56  ;;  %v4114_v47 = vmul.f32 1.442695, %v4982_v5  ;;  %v4981_v54 = vmul.f32 -1.702, %v4057_v18 }
0x1e16   : > { %v4983_v31 = vmul.f32 -1.702, %v4098_v63  ;;  %v4059_v15 = vpop.f32.mrf.mxu1  ;;  %v4100_v0 = vpop.f32.mrf.mxu0  ;;  %v4486_v34 = vld [vmem:[%s7336_s18] sm:$0x1] }
0x1e17   : > { %5965 = vpow2.f32 %v4110_v4  ;;  %v4112_v44 = vmul.f32 1.442695, %v4981_v54 }
0x1e18   : > { %5967 = vpow2.f32 %v4114_v47  ;;  %v4116_v48 = vmul.f32 1.442695, %v4983_v31 }
0x1e19   : > { %5969 = vpow2.f32 %v4112_v44 }
0x1e1a   : > { %5971 = vpow2.f32 %v4116_v48 }
0x1e24   : > { %v5966_v8 = vpop.eup %5965 }
0x1e25   : > { %v5968_v21 = vpop.eup %5967  ;;  %v4118_v24 = vadd.f32 1.0, %v5966_v8 }
0x1e26   : > { %v5970_v20 = vpop.eup %5969  ;;  %v4120_v25 = vadd.f32 1.0, %v5968_v21 }
0x1e27   : > { %v5972_v11 = vpop.eup %5971  ;;  %5973 = vrcp.f32 %v4118_v24  ;;  %v4119_v29 = vadd.f32 1.0, %v5970_v20 }
0x1e28   : > { %5975 = vrcp.f32 %v4120_v25  ;;  %v4121_v60 = vadd.f32 1.0, %v5972_v11 }
0x1e29   : > { %5977 = vrcp.f32 %v4119_v29 }
0x1e2a   : > { %5979 = vrcp.f32 %v4121_v60 }
0x1e34   : > { %v5974_v16 = vpop.eup %5973 }
0x1e35   : > { %v5976_v17 = vpop.eup %5975  ;;  %v4130_v61 = vmul.f32 %v5974_v16, %v4055_v41  ;;  %v5824_v41 = vld [vmem:[%s7337_s19 + $0x10] sm:$0xff]  }
0x1e36   : > { %v5978_v26 = vpop.eup %5977  ;;  %v4132_v2 = vmul.f32 %v5976_v17, %v4096_v50  ;;  %v5825_v50 = vld [vmem:[%s7337_s19 + $0x8] sm:$0xff]  }
0x1e37   : > { %v5980_v62 = vpop.eup %5979  ;;  %v4131_v23 = vmul.f32 %v5978_v26, %v4057_v18  ;;  %v4134_v1 = vpack.c.bf16 %v4130_v61, %v4130_v61 }
0x1e38   : > { %v4133_v57 = vmul.f32 %v5980_v62, %v4098_v63  ;;  %v4136_v7 = vpack.c.bf16 %v4132_v2, %v4132_v2  ;;  %v4485_v63 = vld [vmem:[%s7335_s17] sm:$0x1] }
0x1e39   : > { %v4135_v3 = vpack.c.bf16 %v4131_v23, %v4131_v23 }
0x1e3a   : > { %v4137_v6 = vpack.c.bf16 %v4133_v57, %v4133_v57 }
0x1e3b   : > { %4427 = vmatprep.mubr.bf16.mxu1 %v4135_v3 }
0x1e3c   : > { %4467 = vmatprep.mubr.bf16.mxu0 %v4137_v6  ;;  %4428 = vmatmul.mubr.bf16.vlgmr.msra.gmra.mxu1 %v4134_v1 }
0x1e3d   : > { %4468 = vmatmul.mubr.bf16.vlgmr.msra.gmra.mxu0 %v4136_v7  ;;  %5520 = vmatprep.mubr.msk.bf16.mxu1 %vm5999_vm6, %v5998_v42 }
0x1e3e   : > { %5505 = vmatpush3.bf16.msra.mxu1 %v5819_v39 }
0x1e3f   : > { %5506 = vmatprep.subr.bf16.mxu1 %v5998_v42 }
0x1e42   : > { %5507 = vmatpush3.bf16.msra.mxu1 %v5820_v40 }
0x1e43   : > { %5508 = vmatprep.subr.bf16.mxu1 %v5998_v42 }
0x1e46   : > { %5509 = vmatpush3.bf16.msra.mxu1 %v5821_v45 }
0x1e47   : > { %5510 = vmatprep.subr.bf16.mxu1 %v5998_v42 }
0x1e4a   : > { %5511 = vmatpush3.bf16.msra.mxu1 %v5822_v14 }
0x1e4b   : > { %5512 = vmatprep.subr.bf16.mxu1 %v5998_v42 }
0x1e4e   : > { %5513 = vmatpush3.bf16.msra.mxu1 %v5823_v35 }
0x1e4f   : > { %5514 = vmatprep.subr.bf16.mxu1 %v5998_v42 }
0x1e52   : > { %5515 = vmatpush3.bf16.msra.mxu1 %v5824_v41 }
0x1e53   : > { %5516 = vmatprep.subr.bf16.mxu1 %v5998_v42 }
0x1e56   : > { %5517 = vmatpush3.bf16.msra.mxu1 %v5825_v50 }
0x1e57   : > { %5518 = vmatprep.subr.bf16.mxu1 %v5998_v42 }
0x1e5a   : > { %5519 = vmatpush3.bf16.msra.mxu1 %v5826_v22 }
0x1efc   : > { %v5259_v9 = vpop.f32.mrf.mxu1 }
0x1efd   : > { %v5281_v10 = vpop.f32.mrf.mxu0 }
0x1efe   : > { %v5260_v12 = vpop.f32.mrf.mxu1 }
0x1eff   : > { %v5261_v53 = vadd.f32 %v5260_v12, %v5259_v9  ;;  %v5282_v13 = vpop.f32.mrf.mxu0 }
0x1f00   : > { %v5283_v27 = vadd.f32 %v5282_v13, %v5281_v10  ;;  %v5262_v28 = vpop.f32.mrf.mxu1 }
0x1f01   : > { %v5284_v30 = vpop.f32.mrf.mxu0 }
0x1f02   : > { %v4470_v32 = vadd.f32 %v5283_v27, %v5261_v53  ;;  %v5263_v55 = vpop.f32.mrf.mxu1 }
0x1f03   : > { %v5285_v33 = vpop.f32.mrf.mxu0 }
0x1f04   : > { %v4475_v37 = vadd.f32 %v4470_v32, %v7051_v52 }
0x1f06   : > { %v4484_v38 = vadd.f32 %v5081_v36, %v4475_v37 }
0x1f08   : > { %v4488_v59 = vsel %vm4487_vm7, %v4484_v38, 0.0 }
0x1f09   : > { %4489 = vadd.xlane.f32.xlu0 %v4488_v59 }
0x1f92   : > { %v4490_v52 = vpop.xlane.xlu0 %4489 }
0x1f93   : > { %v4491_v43 = vmul.f32 0.0078125, %v4490_v52 }
0x1f95   : > { %v4492_v58 = vsub.f32 %v4484_v38, %v4491_v43 }
0x1f97   : > { %v4493_v19 = vmul.f32 %v4492_v58, %v4492_v58 }
0x1f99   : > { %v4494_v49 = vsel %vm4487_vm7, %v4493_v19, 0.0 }
0x1f9a   : > { %4495 = vadd.xlane.f32.xlu0 %v4494_v49 }
0x2023   : > { %v4496_v51 = vpop.xlane.xlu0 %4495 }
0x2024   : > { %v4497_v56 = vmul.f32 0.0078125, %v4496_v51 }
0x2026   : > { %v4498_v5 = vadd.f32 1e-05, %v4497_v56 }
0x2028   : > { %5981 = vrsqrt.f32 %v4498_v5 }
0x2035   : > { %v5982_v18 = vpop.eup %5981 }
0x2036   : > { %v4500_v46 = vmul.f32 %v5982_v18, %v4492_v58 }
0x2038   : > { %v4501_v4 = vmul.f32 %v4500_v46, %v4485_v63 }
0x203a   : > { %v4502_v47 = vadd.f32 %v4501_v4, %v4486_v34 }
0x203c   : > { %v4519_v54 = vpack.c.bf16 %v4502_v47, %v4502_v47 }
0x203e   : > { %5521 = vmatmul.mubr.bf16.vlgmr.msra.gmra.mxu1 %v4519_v54 }
0x20fe   : > { %v4602_v42 = vpop.f32.mrf.mxu1 }
0x20ff   : > { %v4608_v31 = vmul.f32 %v4602_v42, %v4602_v42 }
0x2100   : > { %v5522_v15 = vpop.f32.mrf.mxu1 }
0x2101   : > { %v4609_v0 = vsel %vm4487_vm7, %v4608_v31, 0.0 }
0x2102   : > { %4610 = vadd.xlane.f32.xlu0 %v4609_v0  ;;  %v4605_v44 = vpop.f32.mrf.mxu1 }
0x2104   : > { %v5523_v48 = vpop.f32.mrf.mxu1 }
0x218b   : > { %v4611_v8 = vpop.xlane.xlu0 %4610 }
0x218c   : > { %5983 = vrsqrt.f32 %v4611_v8 }
0x2199   : > { %v5984_v21 = vpop.eup %5983 }
0x219a   : > { %v4613_v24 = vmul.f32 %v5984_v21, %v4602_v42 }
0x219c   : > { %4614 = vst [vmem:[%s625_s24] sm:$0x1] %v4613_v24 }
0x219d PF: > { %s30_s1 = sadd.s32 1, %s5991_s1  }
0x219e   : > { %p27_p4 = scmp.ge.s32.totalorder %s30_s1, 4  }
0x21a0   :  { %29 = sbr.rel (!%p27_p4) target bundleno = 6 (0x6), region = 142 }

// kernel: custom_clip_forward.3
= control target key start
LH: loop header
LB: loop body
LE: loop exit
PB: predicated region body
PF: predicated region fallthrough
CT: control target
= control target key end

     0   :  { %s11472_s0 = inlined_call_operand.vmem [shape: f32[64,128], index: 0, kind: input, shape index: {}]   ;;  %s11473_s1 = inlined_call_operand.vmem [shape: s32[4,1], index: 1, kind: input, shape index: {}]   ;;  %s11474_s2 = inlined_call_operand.vmem [shape: f32[2,1,128], index: 2, kind: input, shape index: {}]   ;;  %s11475_s3 = inlined_call_operand.<no memory space> [shape: f32[1], index: 3, kind: input, shape index: {}]   ;;  %s11476_s4 = inlined_call_operand.vmem [shape: f32[2,1,128], index: 4, kind: input, shape index: {}]   ;;  %s11477_s5 = inlined_call_operand.vmem [shape: f32[2,1,128], index: 5, kind: input, shape index: {}]   ;;  %s11478_s6 = inlined_call_operand.vmem [shape: bf16[2,128,384], index: 6, kind: input, shape index: {}]   ;;  %s11479_s7 = inlined_call_operand.vmem [shape: f32[2,1,128], index: 7, kind: input, shape index: {}]   ;;  %s11480_s8 = inlined_call_operand.vmem [shape: bf16[2,128,128], index: 8, kind: input, shape index: {}]   ;;  %s11481_s9 = inlined_call_operand.vmem [shape: f32[2,1,128], index: 9, kind: input, shape index: {}]   ;;  %s11482_s10 = inlined_call_operand.vmem [shape: f32[2,1,128], index: 10, kind: input, shape index: {}]   ;;  %s11483_s11 = inlined_call_operand.vmem [shape: f32[2,1,128], index: 11, kind: input, shape index: {}]   ;;  %s11484_s12 = inlined_call_operand.vmem [shape: bf16[2,128,512], index: 12, kind: input, shape index: {}]   ;;  %s11485_s13 = inlined_call_operand.vmem [shape: f32[2,1,512], index: 13, kind: input, shape index: {}]   ;;  %s11486_s14 = inlined_call_operand.vmem [shape: bf16[2,512,128], index: 14, kind: input, shape index: {}]   ;;  %s11487_s15 = inlined_call_operand.vmem [shape: f32[2,1,128], index: 15, kind: input, shape index: {}]   ;;  %s11488_s16 = inlined_call_operand.vmem [shape: f32[1,128], index: 16, kind: input, shape index: {}]   ;;  %s11489_s17 = inlined_call_operand.vmem [shape: f32[1,128], index: 17, kind: input, shape index: {}]   ;;  %s11490_s18 = inlined_call_operand.vmem [shape: bf16[128,128], index: 18, kind: input, shape index: {}]   ;;  %s11491_s19 = inlined_call_operand.hbm [shape: f32[2,4], index: 19, kind: output, shape index: {}]  }
   0x1   :  { %11542 = sst [smem:[#allocation24_spill]] %s11472_s0 }
   0x2   :  { %11543 = sst [smem:[#allocation25_spill]] %s11473_s1 }
   0x3   :  { %11544 = sst [smem:[#allocation26_spill]] %s11474_s2 }
   0x4   :  { %11545 = sst [smem:[#allocation27_spill]] %s11475_s3 }
   0x5   :  { %s11546_s20 = sld [smem:[#allocation24_spill]]  ;;  %v7910_v8 = vld [vmem:[%s11478_s6 + $0xac] ss:$12 sps:$4 sm:$0xff]   ;;  %v7912_v9 = vld [vmem:[%s11478_s6 + $0xa8] ss:$12 sps:$4 sm:$0xff]  }
   0x6   :  { %407 = vmatprep.subr.bf16.mxu0 %v7910_v8 }
   0x7   :  { %408 = vmatpush1.bf16.msra.mxu0 %v7912_v9 }
   0xb   :  { %v65_v0 = vld [vmem:[%s11546_s20] sm:$0xff]  ;;  %v67_v1 = vld [vmem:[%s11546_s20 + $0x10] sm:$0xff]  ;;  %v66_v2 = vld [vmem:[%s11546_s20 + $0x8] sm:$0xff] }
   0xc   :  { %126 = vadd.xlane.f32.xlu0 %v65_v0  ;;  %130 = vadd.xlane.f32.xlu1 %v67_v1  ;;  %v68_v3 = vld [vmem:[%s11546_s20 + $0x18] sm:$0xff]  ;;  %v69_v4 = vld [vmem:[%s11546_s20 + $0x20] sm:$0xff]  ;;  %v70_v5 = vld [vmem:[%s11546_s20 + $0x28] sm:$0xff] }
   0xd   :  { %v71_v6 = vld [vmem:[%s11546_s20 + $0x30] sm:$0xff]  ;;  %v72_v7 = vld [vmem:[%s11546_s20 + $0x38] sm:$0xff] }
  0x10   :  { %128 = vadd.xlane.f32.xlu0 %v66_v2  ;;  %132 = vadd.xlane.f32.xlu1 %v68_v3 }
  0x14   :  { %134 = vadd.xlane.f32.xlu0 %v69_v4  ;;  %136 = vadd.xlane.f32.xlu1 %v70_v5 }
  0x18   :  { %138 = vadd.xlane.f32.xlu0 %v71_v6  ;;  %140 = vadd.xlane.f32.xlu1 %v72_v7 }
  0x19   :  { %25 = vsyncpa [#allocation4], 0  ;;  %v7913_v41 = vld [vmem:[%s11478_s6 + $0x94] ss:$12 sps:$4 sm:$0xff]   ;;  %v7915_v42 = vld [vmem:[%s11478_s6 + $0xb0] ss:$12 sps:$4 sm:$0xff]  }
  0x1a   :  { %v7916_v43 = vld [vmem:[%s11478_s6 + $0x90] ss:$12 sps:$4 sm:$0xff]   ;;  %409 = vmatprep.subr.bf16.mxu0 %v7913_v41  ;;  %7352 = vmatprep.subr.bf16.mxu1 %v7915_v42  ;;  %v7919_v46 = vld [vmem:[%s11478_s6 + $0x98] ss:$12 sps:$4 sm:$0xff]   ;;  %v7923_v49 = vld [vmem:[%s11478_s6 + $0x80] ss:$12 sps:$4 sm:$0xff]  }
  0x1b   :  { %410 = vmatpush1.bf16.msra.mxu0 %v7916_v43  ;;  %7353 = vmatpush3.bf16.msra.mxu1 %v7915_v42  ;;  %v7917_v45 = vld [vmem:[%s11478_s6 + $0x7c] ss:$12 sps:$4 sm:$0xff]   ;;  %v7920_v47 = vld [vmem:[%s11478_s6 + $0x78] ss:$12 sps:$4 sm:$0xff]   ;;  %v7924_v50 = vld [vmem:[%s11478_s6 + $0x60] ss:$12 sps:$4 sm:$0xff]  }
  0x1c   :  { %411 = vmatprep.subr.bf16.mxu0 %v7917_v45  ;;  %7354 = vmatprep.subr.bf16.mxu1 %v7919_v46  ;;  %v7921_v48 = vld [vmem:[%s11478_s6 + $0x64] ss:$12 sps:$4 sm:$0xff]   ;;  %v7925_v51 = vld [vmem:[%s11478_s6 + $0x4c] ss:$12 sps:$4 sm:$0xff]   ;;  %v7927_v52 = vld [vmem:[%s11478_s6 + $0x68] ss:$12 sps:$4 sm:$0xff]  }
  0x1d   :  { %v7928_v53 = vld [vmem:[%s11478_s6 + $0x48] ss:$12 sps:$4 sm:$0xff]   ;;  %v7931_v55 = vld [vmem:[%s11478_s6 + $0x50] ss:$12 sps:$4 sm:$0xff]   ;;  %v7935_v58 = vld [vmem:[%s11478_s6 + $0x38] ss:$12 sps:$4 sm:$0xff]  }
  0x1e   :  { %v7929_v54 = vld [vmem:[%s11478_s6 + $0x34] ss:$12 sps:$4 sm:$0xff]   ;;  %v7932_v56 = vld [vmem:[%s11478_s6 + $0x30] ss:$12 sps:$4 sm:$0xff]   ;;  %v7936_v59 = vld [vmem:[%s11478_s6 + $0x18] ss:$12 sps:$4 sm:$0xff]  }
  0x1f   :  { %412 = vmatpush1.bf16.msra.mxu0 %v7920_v47  ;;  %7355 = vmatpush3.bf16.msra.mxu1 %v7919_v46  ;;  %v7933_v57 = vld [vmem:[%s11478_s6 + $0x1c] ss:$12 sps:$4 sm:$0xff]   ;;  %v7937_v60 = vld [vmem:[%s11478_s6 + $0x4] ss:$12 sps:$4 sm:$0xff]   ;;  %v7939_v61 = vld [vmem:[%s11478_s6 + $0x20] ss:$12 sps:$4 sm:$0xff]  }
  0x20   :  { %413 = vmatprep.subr.bf16.mxu0 %v7921_v48  ;;  %7356 = vmatprep.subr.bf16.mxu1 %v7923_v49  ;;  %v11494_v62 = vmov 0   ;;  %v7940_v63 = vld [vmem:[%s11478_s6] ss:$12 sps:$4 sm:$0xff]   ;;  %vm572_vm0 = vcmask 261120   ;;  %vm662_vm13 = vcmask 523264   ;;  %s8770_s0 = smov 96  }
  0x21   :  { %439 = vmatprep.mubr.bf16.mxu0 %v11494_v62  ;;  %7909 = vset.pattern.permute.xlu0 %v11494_v62  ;;  %s8771_s30 = smov 64   ;;  %s8772_s21 = smov 32  }
  0x23   :  { %414 = vmatpush1.bf16.msra.mxu0 %v7924_v50  ;;  %7357 = vmatpush3.bf16.msra.mxu1 %v7923_v49 }
  0x24   :  { %415 = vmatprep.subr.bf16.mxu0 %v7925_v51  ;;  %7358 = vmatprep.subr.bf16.mxu1 %v7927_v52 }
  0x27   :  { %416 = vmatpush1.bf16.msra.mxu0 %v7928_v53  ;;  %7359 = vmatpush3.bf16.msra.mxu1 %v7927_v52 }
  0x28   :  { %417 = vmatprep.subr.bf16.mxu0 %v7929_v54  ;;  %7360 = vmatprep.subr.bf16.mxu1 %v7931_v55 }
  0x2b   :  { %418 = vmatpush1.bf16.msra.mxu0 %v7932_v56  ;;  %7361 = vmatpush3.bf16.msra.mxu1 %v7931_v55 }
  0x2c   :  { %419 = vmatprep.subr.bf16.mxu0 %v7933_v57  ;;  %7362 = vmatprep.subr.bf16.mxu1 %v7935_v58 }
  0x2f   :  { %420 = vmatpush1.bf16.msra.mxu0 %v7936_v59  ;;  %7363 = vmatpush3.bf16.msra.mxu1 %v7935_v58 }
  0x30   :  { %421 = vmatprep.subr.bf16.mxu0 %v7937_v60  ;;  %7364 = vmatprep.subr.bf16.mxu1 %v7939_v61 }
  0x33   :  { %422 = vmatpush1.bf16.msra.mxu0 %v7940_v63  ;;  %7365 = vmatpush3.bf16.msra.mxu1 %v7939_v61 }
  0x95   :  { %v127_v10 = vpop.xlane.xlu0 %126  ;;  %v131_v11 = vpop.xlane.xlu1 %130 }
  0x96   :  { %v143_v12 = vmul.f32 0.0078125, %v127_v10  ;;  %v145_v13 = vmul.f32 0.0078125, %v131_v11 }
  0x98   :  { %v8907_v14 = vsub.f32 %v65_v0, %v143_v12  ;;  %v8909_v15 = vsub.f32 %v67_v1, %v145_v13  ;;  %v7941_v0 = vld [vmem:[%s11478_s6 + $0x8] ss:$12 sps:$4 sm:$0xff]  }
  0x99   :  { %v129_v16 = vpop.xlane.xlu0 %128  ;;  %v133_v17 = vpop.xlane.xlu1 %132  ;;  %7366 = vmatprep.subr.bf16.mxu1 %v7941_v0 }
  0x9a   :  { %v144_v18 = vmul.f32 0.0078125, %v129_v16  ;;  %v159_v19 = vmul.f32 %v8907_v14, %v8907_v14  ;;  %v146_v20 = vmul.f32 0.0078125, %v133_v17  ;;  %v161_v21 = vmul.f32 %v8909_v15, %v8909_v15  ;;  %7367 = vmatpush3.bf16.msra.mxu1 %v7941_v0 }
  0x9c   :  { %167 = vadd.xlane.f32.xlu0 %v159_v19  ;;  %v8915_v22 = vsub.f32 %v66_v2, %v144_v18  ;;  %v8917_v23 = vsub.f32 %v68_v3, %v146_v20 }
  0x9d   :  { %v135_v24 = vpop.xlane.xlu0 %134  ;;  %v137_v25 = vpop.xlane.xlu1 %136 }
  0x9e   :  { %v147_v26 = vmul.f32 0.0078125, %v135_v24  ;;  %v160_v27 = vmul.f32 %v8915_v22, %v8915_v22  ;;  %v148_v28 = vmul.f32 0.0078125, %v137_v25  ;;  %v162_v29 = vmul.f32 %v8917_v23, %v8917_v23 }
  0xa0   :  { %171 = vadd.xlane.f32.xlu0 %v161_v21  ;;  %169 = vadd.xlane.f32.xlu1 %v160_v27  ;;  %v8923_v30 = vsub.f32 %v69_v4, %v147_v26  ;;  %v8925_v31 = vsub.f32 %v70_v5, %v148_v28 }
  0xa1   :  { %v139_v32 = vpop.xlane.xlu0 %138  ;;  %v141_v33 = vpop.xlane.xlu1 %140 }
  0xa2   :  { %v149_v34 = vmul.f32 0.0078125, %v139_v32  ;;  %v163_v35 = vmul.f32 %v8923_v30, %v8923_v30  ;;  %v150_v36 = vmul.f32 0.0078125, %v141_v33  ;;  %v164_v37 = vmul.f32 %v8925_v31, %v8925_v31  ;;  %v6498_v33 = vld [vmem:[%s11476_s4] ss:$0 sm:$0xff] }
  0xa4   :  { %173 = vadd.xlane.f32.xlu1 %v162_v29  ;;  %175 = vadd.xlane.f32.xlu0 %v163_v35  ;;  %v8931_v38 = vsub.f32 %v71_v6, %v149_v34  ;;  %v8933_v39 = vsub.f32 %v72_v7, %v150_v36 }
  0xa6   :  { %v165_v40 = vmul.f32 %v8931_v38, %v8931_v38  ;;  %v166_v44 = vmul.f32 %v8933_v39, %v8933_v39 }
  0xa8   :  { %177 = vadd.xlane.f32.xlu1 %v164_v37  ;;  %179 = vadd.xlane.f32.xlu0 %v165_v40  ;;  %v6499_v40 = vld [vmem:[%s11477_s5] ss:$0 sm:$0xff] }
  0xac   :  { %181 = vadd.xlane.f32.xlu1 %v166_v44 }
 0x125   :  { %v168_v1 = vpop.xlane.xlu0 %167 }
 0x126   :  { %v183_v2 = vmul.f32 0.0078125, %v168_v1 }
 0x128   :  { %v191_v3 = vadd.f32 1e-05, %v183_v2 }
 0x129   :  { %v170_v4 = vpop.xlane.xlu1 %169  ;;  %v172_v5 = vpop.xlane.xlu0 %171 }
 0x12a   :  { %8158 = vrsqrt.f32 %v191_v3  ;;  %v184_v6 = vmul.f32 0.0078125, %v170_v4  ;;  %v185_v7 = vmul.f32 0.0078125, %v172_v5 }
 0x12c   :  { %v192_v8 = vadd.f32 1e-05, %v184_v6  ;;  %v193_v9 = vadd.f32 1e-05, %v185_v7 }
 0x12d   :  { %v174_v10 = vpop.xlane.xlu1 %173  ;;  %v176_v11 = vpop.xlane.xlu0 %175 }
 0x12e   :  { %8160 = vrsqrt.f32 %v192_v8  ;;  %v186_v12 = vmul.f32 0.0078125, %v174_v10  ;;  %v187_v13 = vmul.f32 0.0078125, %v176_v11 }
 0x12f   :  { %8162 = vrsqrt.f32 %v193_v9 }
 0x130   :  { %v194_v16 = vadd.f32 1e-05, %v186_v12  ;;  %v195_v17 = vadd.f32 1e-05, %v187_v13 }
 0x131   :  { %v178_v18 = vpop.xlane.xlu1 %177  ;;  %v180_v19 = vpop.xlane.xlu0 %179 }
 0x132   :  { %8164 = vrsqrt.f32 %v194_v16  ;;  %v188_v20 = vmul.f32 0.0078125, %v178_v18  ;;  %v189_v21 = vmul.f32 0.0078125, %v180_v19 }
 0x133   :  { %8166 = vrsqrt.f32 %v195_v17 }
 0x134   :  { %v196_v24 = vadd.f32 1e-05, %v188_v20  ;;  %v197_v25 = vadd.f32 1e-05, %v189_v21 }
 0x135   :  { %v182_v26 = vpop.xlane.xlu1 %181 }
 0x136   :  { %8168 = vrsqrt.f32 %v196_v24  ;;  %v190_v27 = vmul.f32 0.0078125, %v182_v26 }
 0x137   :  { %v8159_v28 = vpop.eup %8158  ;;  %8170 = vrsqrt.f32 %v197_v25 }
 0x138   :  { %v198_v29 = vadd.f32 1e-05, %v190_v27  ;;  %v207_v32 = vmul.f32 %v8159_v28, %v8907_v14 }
 0x13a   :  { %8172 = vrsqrt.f32 %v198_v29  ;;  %v221_v37 = vmul.f32 %v6498_v33, %v207_v32 }
 0x13b   :  { %v8161_v34 = vpop.eup %8160 }
 0x13c   :  { %v8163_v35 = vpop.eup %8162  ;;  %v208_v36 = vmul.f32 %v8161_v34, %v8915_v22  ;;  %v235_v45 = vadd.f32 %v6499_v40, %v221_v37 }
 0x13d   :  { %v209_v41 = vmul.f32 %v8163_v35, %v8909_v15 }
 0x13e   :  { %v222_v42 = vmul.f32 %v6498_v33, %v208_v36 }
 0x13f   :  { %v8165_v43 = vpop.eup %8164  ;;  %v223_v44 = vmul.f32 %v6498_v33, %v209_v41 }
 0x140   :  { %v8167_v14 = vpop.eup %8166  ;;  %v236_v46 = vadd.f32 %v6499_v40, %v222_v42  ;;  %v210_v47 = vmul.f32 %v8165_v43, %v8917_v23 }
 0x141   :  { %v211_v48 = vmul.f32 %v8167_v14, %v8923_v30  ;;  %v237_v51 = vadd.f32 %v6499_v40, %v223_v44 }
 0x142   :  { %v243_v49 = vpack.c.bf16 %v236_v46, %v235_v45  ;;  %v224_v50 = vmul.f32 %v6498_v33, %v210_v47 }
 0x143   :  { %v8169_v22 = vpop.eup %8168  ;;  %v225_v54 = vmul.f32 %v6498_v33, %v211_v48 }
 0x144   :  { %v8171_v52 = vpop.eup %8170  ;;  %440 = vmatmul.mubr.bf16.vlgmr.msra.gmra.mxu0 %v243_v49  ;;  %7368 = vmatprep.mubr.bf16.mxu1 %v243_v49  ;;  %v238_v53 = vadd.f32 %v6499_v40, %v224_v50  ;;  %v212_v15 = vmul.f32 %v8169_v22, %v8925_v31 }
 0x145   :  { %449 = vmatprep.mubr.bf16.mxu0 %v11494_v62  ;;  %v213_v55 = vmul.f32 %v8171_v52, %v8931_v38  ;;  %v239_v30 = vadd.f32 %v6499_v40, %v225_v54  ;;  %v73_v54 = vlaneseq }
 0x146   :  { %v244_v56 = vpack.c.bf16 %v238_v53, %v237_v51  ;;  %v226_v57 = vmul.f32 %v6498_v33, %v212_v15 }
 0x147   :  { %v8173_v23 = vpop.eup %8172  ;;  %v227_v60 = vmul.f32 %v6498_v33, %v213_v55  ;;  %v9093_v55 = vshrl.u32 %v73_v54, 7 }
 0x148   :  { %7369 = vmatmul.mubr.bf16.vlgmr.msra.gmra.mxu1 %v244_v56  ;;  %v240_v58 = vadd.f32 %v6499_v40, %v226_v57  ;;  %v214_v59 = vmul.f32 %v8173_v23, %v8933_v39  ;;  %v9027_v39 = vld [vmem:[%s11479_s7] ss:$0 sm:$0xff]  ;;  %v9097_v23 = vand.u32 127, %v73_v54 }
 0x149   :  { %v241_v0 = vadd.f32 %v6499_v40, %v227_v60  ;;  %11547 = vst [vmem:[#allocation6_spill] sm:$0xff] %v9093_v55  ;;  %v77_v57 = vadd.s32 24, %v9093_v55  ;;  %v80_v60 = vadd.s32 48, %v9093_v55 }
 0x14a   :  { %v245_v61 = vpack.c.bf16 %v240_v58, %v239_v30  ;;  %v228_v63 = vmul.f32 %v6498_v33, %v214_v59  ;;  %11548 = vst [vmem:[#allocation7_spill] sm:$0xff] %v9097_v23  ;;  %v78_v59 = vadd.s32 32, %v9093_v55  ;;  %vm92_vm5 = vcmp.le.s32.totalorder %v9097_v23, %v9093_v55 }
 0x14b   :  { %v87_v58 = vand.u32 4294967280, %v77_v57  ;;  %vm95_vm3 = vcmp.le.s32.totalorder %v9097_v23, %v77_v57  ;;  %vm98_vm11 = vcmp.le.s32.totalorder %v9097_v23, %v80_v60 }
 0x14c   :  { %450 = vmatmul.mubr.bf16.gmra.mxu0 %v244_v56  ;;  %7372 = vmatprep.mubr.bf16.mxu1 %v245_v61  ;;  %v242_v31 = vadd.f32 %v6499_v40, %v228_v63  ;;  %v76_v56 = vadd.s32 16, %v9093_v55  ;;  %v75_v63 = vadd.s32 8, %v9093_v55  ;;  %vm96_vm9 = vcmp.le.s32.totalorder %v9097_v23, %v78_v59 }
 0x14d   :  { %459 = vmatprep.mubr.bf16.mxu0 %v11494_v62  ;;  %vm103_vm4 = vcmp.ge.s32.totalorder %v9097_v23, %v87_v58 }
 0x14e   :  { %v246_v1 = vpack.c.bf16 %v242_v31, %v241_v0  ;;  %v86_v30 = vand.u32 4294967280, %v76_v56  ;;  %vm94_vm1 = vcmp.le.s32.totalorder %v9097_v23, %v76_v56  ;;  %v88_v0 = vand.u32 4294967280, %v78_v59  ;;  %vm111_vm7 = vmand %vm95_vm3, %vm103_vm4 }
 0x14f   :  { %v79_v31 = vadd.s32 40, %v9093_v55  ;;  %vm93_vm8 = vcmp.le.s32.totalorder %v9097_v23, %v75_v63 }
 0x150   :  { %7373 = vmatmul.mubr.bf16.gmra.mxu1 %v246_v1  ;;  %vm102_vm2 = vcmp.ge.s32.totalorder %v9097_v23, %v86_v30  ;;  %vm104_vm10 = vcmp.ge.s32.totalorder %v9097_v23, %v88_v0 }
 0x151   :  { %vm110_vm6 = vmand %vm94_vm1, %vm102_vm2  ;;  %vm97_vm3 = vcmp.le.s32.totalorder %v9097_v23, %v79_v31 }
 0x152   :  { %vm112_vm1 = vmand %vm96_vm9, %vm104_vm10  ;;  %vm6250_vm9 = vcmask 1043456   ;;  %vm6482_vm10 = vcmask 25600  }
 0x154   :  { %460 = vmatmul.mubr.bf16.gmra.mxu0 %v245_v61  ;;  %v81_v61 = vadd.s32 56, %v9093_v55 }
 0x155   :  { %469 = vmatprep.mubr.bf16.mxu0 %v11494_v62 }
 0x156   :  { %vm99_vm14 = vcmp.le.s32.totalorder %v9097_v23, %v81_v61 }
 0x15c   :  { %470 = vmatmul.mubr.bf16.gmra.mxu0 %v246_v1  ;;  %v90_v1 = vand.u32 4294967280, %v80_v60 }
 0x15e   :  { %vm106_vm12 = vcmp.ge.s32.totalorder %v9097_v23, %v90_v1 }
 0x15f   :  { %vm114_vm2 = vmand %vm98_vm11, %vm106_vm12 }
 0x204   :  { %v441_v38 = vpop.f32.mrf.mxu0 }
 0x205   :  { %v552_v5 = vadd.f32 %v9027_v39, %v441_v38 }
 0x206   :  { %v443_v2 = vpop.f32.mrf.mxu0 }
 0x208   :  { %v445_v3 = vpop.f32.mrf.mxu0  ;;  %v7370_v4 = vpop.f32.mrf.mxu1 }
 0x209   :  { %v553_v6 = vadd.f32 %v9027_v39, %v445_v3  ;;  %v91_v3 = vand.u32 4294967280, %v81_v61 }
 0x20a   :  { %v447_v7 = vpop.f32.mrf.mxu0  ;;  %v514_v8 = vpop.f32.mrf.mxu1 }
 0x20b   :  { %v9031_v9 = vpack.c.bf16 %v553_v6, %v552_v5  ;;  %v9067_v14 = vpack.c.bf16 %v447_v7, %v443_v2  ;;  %v89_v7 = vand.u32 4294967280, %v79_v31  ;;  %vm107_vm15 = vcmp.ge.s32.totalorder %v9097_v23, %v91_v3 }
 0x20c   :  { %v451_v10 = vpop.f32.mrf.mxu0  ;;  %v7371_v11 = vpop.f32.mrf.mxu1 }
 0x20d   :  { %7384 = vmatprep.mubr.msk.bf16.mxu0 %vm572_vm0, %v9031_v9  ;;  %v9042_v32 = vpack.c.bf16 %v7371_v11, %v7370_v4  ;;  %v586_v46 = vsel %vm572_vm0, %v9067_v14, 0  ;;  %v554_v49 = vadd.f32 %v9027_v39, %v451_v10  ;;  %vm105_vm4 = vcmp.ge.s32.totalorder %v9097_v23, %v89_v7 }
 0x20e   :  { %v453_v12 = vpop.f32.mrf.mxu0  ;;  %v517_v13 = vpop.f32.mrf.mxu1 }
 0x20f   :  { %v9046_v35 = vpack.c.bf16 %v517_v13, %v514_v8 }
 0x210   :  { %v455_v16 = vpop.f32.mrf.mxu0  ;;  %v7374_v17 = vpop.f32.mrf.mxu1 }
 0x211   :  { %v555_v47 = vadd.f32 %v9027_v39, %v455_v16 }
 0x212   :  { %v457_v18 = vpop.f32.mrf.mxu0  ;;  %v530_v19 = vpop.f32.mrf.mxu1 }
 0x213   :  { %v9061_v43 = vpack.c.bf16 %v457_v18, %v453_v12  ;;  %v9079_v22 = vpack.c.bf16 %v555_v47, %v554_v49 }
 0x214   :  { %v461_v20 = vpop.f32.mrf.mxu0  ;;  %v7375_v21 = vpop.f32.mrf.mxu1 }
 0x215   :  { %v9035_v24 = vpack.c.bf16 %v7375_v21, %v7374_v17  ;;  %v589_v45 = vsel %vm572_vm0, %v9061_v43, 0  ;;  %v556_v50 = vadd.f32 %v9027_v39, %v461_v20 }
 0x216   :  { %v463_v25 = vpop.f32.mrf.mxu0  ;;  %v533_v26 = vpop.f32.mrf.mxu1 }
 0x217   :  { %v9037_v27 = vpack.c.bf16 %v533_v26, %v530_v19  ;;  %7392 = vmatprep.subr.bf16.mxu1 %v9035_v24 }
 0x218   :  { %v465_v28 = vpop.f32.mrf.mxu0  ;;  %7393 = vmatpush3.bf16.msra.mxu1 %v9035_v24 }
 0x219   :  { %7394 = vmatprep.subr.bf16.mxu1 %v9037_v27  ;;  %v557_v48 = vadd.f32 %v9027_v39, %v465_v28 }
 0x21a   :  { %v467_v29 = vpop.f32.mrf.mxu0 }
 0x21b   :  { %v9053_v41 = vpack.c.bf16 %v467_v29, %v463_v25  ;;  %v9081_v51 = vpack.c.bf16 %v557_v48, %v556_v50 }
 0x21c   :  { %v471_v33 = vpop.f32.mrf.mxu0  ;;  %7395 = vmatpush3.bf16.msra.mxu1 %v9037_v27 }
 0x21d   :  { %7396 = vmatprep.subr.bf16.mxu1 %v9042_v32  ;;  %v592_v44 = vsel %vm572_vm0, %v9053_v41, 0  ;;  %v558_v53 = vadd.f32 %v9027_v39, %v471_v33 }
 0x21e   :  { %v473_v34 = vpop.f32.mrf.mxu0 }
 0x220   :  { %v475_v36 = vpop.f32.mrf.mxu0  ;;  %7397 = vmatpush3.bf16.msra.mxu1 %v9042_v32 }
 0x221   :  { %7398 = vmatprep.subr.bf16.mxu1 %v9046_v35  ;;  %v559_v52 = vadd.f32 %v9027_v39, %v475_v36  ;;  %v8769_v39 = vmov -1e+09  }
 0x222   :  { %v477_v37 = vpop.f32.mrf.mxu0  ;;  %v9110_v2 = vsel %vm92_vm5, 0.0, %v8769_v39  ;;  %v9112_v4 = vsel %vm110_vm6, 0.0, %v8769_v39  ;;  %v9115_v6 = vsel %vm111_vm7, 0.0, %v8769_v39  ;;  %v9122_v11 = vsel %vm93_vm8, 0.0, %v8769_v39  ;;  %vm115_vm5 = vmand %vm99_vm14, %vm107_vm15 }
 0x223   :  { %v9050_v40 = vpack.c.bf16 %v477_v37, %v473_v34  ;;  %v9089_v15 = vpack.c.bf16 %v559_v52, %v558_v53  ;;  %11549 = vst [vmem:[#allocation8_spill] sm:$0xff] %v9110_v2  ;;  %11550 = vst [vmem:[#allocation9_spill] sm:$0xff] %v9112_v4  ;;  %v9133_v21 = vsel %vm112_vm1, 0.0, %v8769_v39  ;;  %v9136_v26 = vsel %vm114_vm2, 0.0, %v8769_v39 }
 0x224   :  { %7399 = vmatpush3.bf16.msra.mxu1 %v9046_v35  ;;  %11551 = vst [vmem:[#allocation10_spill] sm:$0xff] %v9115_v6  ;;  %11552 = vst [vmem:[#allocation11_spill] sm:$0xff] %v9122_v11  ;;  %v9138_v29 = vsel %vm115_vm5, 0.0, %v8769_v39  ;;  %vm1814_vm7 = vcmask 785408  }
 0x225   :  { %7748 = vmatprep.subr.msk.bf16.mxu0 %vm572_vm0, %v9050_v40  ;;  %v595_v42 = vsel %vm572_vm0, %v9050_v40, 0  ;;  %11553 = vst [vmem:[#allocation12_spill] sm:$0xff] %v9133_v21  ;;  %vm113_vm6 = vmand %vm97_vm3, %vm105_vm4 }
 0x226   :  { %7377 = vmatpush3.bf16.xpose.msra.mxu0 %v595_v42  ;;  %11554 = vst [vmem:[#allocation13_spill] sm:$0xff] %v9136_v26  ;;  %11555 = vst [vmem:[#allocation14_spill] sm:$0xff] %v9138_v29  ;;  %v9144_v37 = vsel %vm113_vm6, 0.0, %v8769_v39 }
 0x227   :  { %7749 = vmatprep.subr.msk.bf16.mxu0 %vm572_vm0, %v9053_v41  ;;  %11556 = vst [vmem:[#allocation15_spill] sm:$0xff] %v9144_v37 }
 0x22e   :  { %7379 = vmatpush3.bf16.xpose.msra.mxu0 %v592_v44 }
 0x22f   :  { %7750 = vmatprep.subr.msk.bf16.mxu0 %vm572_vm0, %v9061_v43 }
 0x236   :  { %7381 = vmatpush3.bf16.xpose.msra.mxu0 %v589_v45 }
 0x237   :  { %7751 = vmatprep.subr.msk.bf16.mxu0 %vm572_vm0, %v9067_v14 }
 0x23e   :  { %7383 = vmatpush3.bf16.xpose.msra.mxu0 %v586_v46 }
 0x245   :  { %7385 = vmatmul.mubr.msk.bf16.vlgmr.msra.gmra.mxu0 %vm572_vm0, %v9079_v22 }
 0x246   :  { %7388 = vmatprep.mubr.msk.bf16.mxu0 %vm572_vm0, %v9081_v51 }
 0x24d   :  { %7389 = vmatmul.mubr.msk.bf16.gmra.mxu0 %vm572_vm0, %v9089_v15 }
 0x305   :  { %v7386_v38 = vpop.f32.mrf.mxu0 }
 0x306   :  { %v640_v12 = vadd.f32 %v7386_v38, %v9112_v4 }
 0x307   :  { %v631_v5 = vpop.f32.mrf.mxu0 }
 0x308   :  { %v632_v8 = vadd.f32 %v631_v5, %v9110_v2  ;;  %v669_v25 = vsel %vm662_vm13, %v640_v12, -inf }
 0x309   :  { %v7387_v10 = vpop.f32.mrf.mxu0 }
 0x30a   :  { %v643_v13 = vadd.f32 %v7387_v10, %v9115_v6  ;;  %v663_v16 = vsel %vm662_vm13, %v632_v8, -inf }
 0x30b   :  { %v634_v17 = vpop.f32.mrf.mxu0  ;;  %664 = vmax.xlane.f32.xlu0 %v663_v16 }
 0x30c   :  { %v635_v18 = vadd.f32 %v634_v17, %v9122_v11  ;;  %v672_v19 = vsel %vm662_vm13, %v643_v13, -inf }
 0x30d   :  { %673 = vmax.xlane.f32.xlu1 %v672_v19  ;;  %v7390_v20 = vpop.f32.mrf.mxu0 }
 0x30e   :  { %v666_v34 = vsel %vm662_vm13, %v635_v18, -inf  ;;  %v656_v42 = vadd.f32 %v7390_v20, %v9136_v26 }
 0x30f   :  { %v647_v28 = vpop.f32.mrf.mxu0  ;;  %670 = vmax.xlane.f32.xlu0 %v669_v25 }
 0x310   :  { %v9141_v33 = vadd.f32 %v647_v28, %v9133_v21  ;;  %v681_v49 = vsel %vm662_vm13, %v656_v42, -inf }
 0x311   :  { %v7391_v36 = vpop.f32.mrf.mxu0  ;;  %667 = vmax.xlane.f32.xlu1 %v666_v34 }
 0x312   :  { %v659_v44 = vadd.f32 %v7391_v36, %v9138_v29  ;;  %v675_v45 = vsel %vm662_vm13, %v9141_v33, -inf }
 0x313   :  { %v650_v46 = vpop.f32.mrf.mxu0  ;;  %676 = vmax.xlane.f32.xlu0 %v675_v45 }
 0x314   :  { %v651_v47 = vadd.f32 %v650_v46, %v9144_v37  ;;  %v684_v48 = vsel %vm662_vm13, %v659_v44, -inf }
 0x315   :  { %685 = vmax.xlane.f32.xlu1 %v684_v48 }
 0x316   :  { %v678_v50 = vsel %vm662_vm13, %v651_v47, -inf }
 0x317   :  { %682 = vmax.xlane.f32.xlu0 %v681_v49 }
 0x319   :  { %679 = vmax.xlane.f32.xlu1 %v678_v50 }
 0x32a   :  { %852 = vrot.lane.b32.xlu1 %v9053_v41, %s8770_s0 }
 0x32e   :  { %850 = vrot.lane.b32.xlu1 %v9061_v43, %s8770_s0 }
 0x394   :  { %v665_v52 = vpop.xlane.xlu0 %664 }
 0x395   :  { %v687_v53 = vsub.f32 %v632_v8, %v665_v52 }
 0x396   :  { %v674_v54 = vpop.xlane.xlu1 %673 }
 0x397   :  { %v690_v56 = vsub.f32 %v643_v13, %v674_v54  ;;  %v695_v59 = vmul.f32 1.442695, %v687_v53 }
 0x398   :  { %v671_v57 = vpop.xlane.xlu0 %670 }
 0x399   :  { %v701_v30 = vmul.f32 1.442695, %v690_v56  ;;  %v689_v58 = vsub.f32 %v640_v12, %v671_v57 }
 0x39a   :  { %v668_v60 = vpop.xlane.xlu1 %667 }
 0x39b   :  { %8174 = vpow2.f32 %v701_v30  ;;  %v699_v61 = vmul.f32 1.442695, %v689_v58  ;;  %v688_v63 = vsub.f32 %v635_v18, %v668_v60 }
 0x39c   :  { %v677_v10 = vpop.xlane.xlu0 %676 }
 0x39d   :  { %8176 = vpow2.f32 %v699_v61  ;;  %v697_v0 = vmul.f32 1.442695, %v688_v63  ;;  %v691_v25 = vsub.f32 %v9141_v33, %v677_v10 }
 0x39e   :  { %8178 = vpow2.f32 %v695_v59  ;;  %v686_v12 = vpop.xlane.xlu1 %685 }
 0x39f   :  { %8180 = vpow2.f32 %v697_v0  ;;  %v694_v16 = vsub.f32 %v659_v44, %v686_v12  ;;  %v703_v36 = vmul.f32 1.442695, %v691_v25 }
 0x3a0   :  { %v683_v13 = vpop.xlane.xlu0 %682 }
 0x3a1   :  { %v693_v18 = vsub.f32 %v656_v42, %v683_v13  ;;  %v709_v19 = vmul.f32 1.442695, %v694_v16 }
 0x3a2   :  { %v680_v17 = vpop.xlane.xlu1 %679 }
 0x3a3   :  { %v692_v20 = vsub.f32 %v651_v47, %v680_v17  ;;  %v707_v28 = vmul.f32 1.442695, %v693_v18  ;;  %8182 = vpow2.f32 %v709_v19 }
 0x3a5   :  { %v705_v34 = vmul.f32 1.442695, %v692_v20  ;;  %8184 = vpow2.f32 %v707_v28 }
 0x3a6   :  { %v853_v50 = vpop.permute.xlu1 %852 }
 0x3a7   :  { %8186 = vpow2.f32 %v705_v34  ;;  %v875_v16 = vsel %vm572_vm0, %v853_v50, 0 }
 0x3a8   :  { %v9158_v31 = vpop.eup %8174  ;;  %8188 = vpow2.f32 %v703_v36 }
 0x3a9   :  { %v720_v1 = vsel %vm662_vm13, %v9158_v31, 0.0 }
 0x3aa   :  { %v9162_v38 = vpop.eup %8176  ;;  %721 = vadd.xlane.f32.xlu1 %v720_v1  ;;  %v851_v52 = vpop.permute.xlu1 %850 }
 0x3ab   :  { %v9164_v39 = vpop.eup %8178  ;;  %v717_v3 = vsel %vm662_vm13, %v9162_v38, 0.0 }
 0x3ac   :  { %v9168_v5 = vpop.eup %8180  ;;  %718 = vadd.xlane.f32.xlu0 %v717_v3  ;;  %v711_v8 = vsel %vm662_vm13, %v9164_v39, 0.0 }
 0x3ad   :  { %v714_v7 = vsel %vm662_vm13, %v9168_v5, 0.0 }
 0x3ae   :  { %715 = vadd.xlane.f32.xlu1 %v714_v7 }
 0x3b0   :  { %712 = vadd.xlane.f32.xlu0 %v711_v8  ;;  %v9179_v45 = vpop.eup %8182 }
 0x3b1   :  { %v732_v44 = vsel %vm662_vm13, %v9179_v45, 0.0 }
 0x3b2   :  { %v9181_v46 = vpop.eup %8184 }
 0x3b3   :  { %v729_v33 = vsel %vm662_vm13, %v9181_v46, 0.0 }
 0x3b4   :  { %v9185_v48 = vpop.eup %8186 }
 0x3b5   :  { %v9189_v42 = vpop.eup %8188  ;;  %v726_v47 = vsel %vm662_vm13, %v9185_v48, 0.0 }
 0x3b6   :  { %v723_v49 = vsel %vm662_vm13, %v9189_v42, 0.0 }
 0x3bf   :  { %1144 = vrot.lane.b32.xlu1 %v9050_v40, %s8771_s30 }
 0x3c6   :  { %854 = vrot.lane.b32.xlu0 %v9050_v40, %s8770_s0 }
 0x3e3   :  { %733 = vadd.xlane.f32.xlu1 %v732_v44 }
 0x3e5   :  { %730 = vadd.xlane.f32.xlu0 %v729_v33 }
 0x3e7   :  { %727 = vadd.xlane.f32.xlu1 %v726_v47 }
 0x3e9   :  { %724 = vadd.xlane.f32.xlu0 %v723_v49 }
 0x3f8   :  { %1142 = vrot.lane.b32.xlu1 %v9053_v41, %s8771_s30 }
 0x3fc   :  { %838 = vrot.lane.b32.xlu1 %v9079_v22, %s8770_s0 }
 0x3ff   :  { %848 = vrot.lane.b32.xlu0 %v9067_v14, %s8770_s0 }
 0x400   :  { %840 = vrot.lane.b32.xlu1 %v9081_v51, %s8770_s0 }
 0x403   :  { %836 = vrot.lane.b32.xlu0 %v9031_v9, %s8770_s0 }
 0x404   :  { %1138 = vrot.lane.b32.xlu1 %v9067_v14, %s8771_s30 }
 0x407   :  { %1140 = vrot.lane.b32.xlu0 %v9061_v43, %s8771_s30 }
 0x408   :  { %1132 = vrot.lane.b32.xlu1 %v9079_v22, %s8771_s30 }
 0x40b   :  { %842 = vrot.lane.b32.xlu0 %v9089_v15, %s8770_s0 }
 0x40c   :  { %1136 = vrot.lane.b32.xlu1 %v9089_v15, %s8771_s30 }
 0x40f   :  { %1130 = vrot.lane.b32.xlu0 %v9031_v9, %s8771_s30 }
 0x413   :  { %1134 = vrot.lane.b32.xlu0 %v9081_v51, %s8771_s30 }
 0x433   :  { %v722_v53 = vpop.xlane.xlu1 %721 }
 0x435   :  { %v719_v54 = vpop.xlane.xlu0 %718 }
 0x436   :  { %8190 = vrcp.f32 %v719_v54 }
 0x437   :  { %v716_v56 = vpop.xlane.xlu1 %715 }
 0x438   :  { %8192 = vrcp.f32 %v716_v56 }
 0x439   :  { %8194 = vrcp.f32 %v722_v53  ;;  %v713_v57 = vpop.xlane.xlu0 %712 }
 0x43a   :  { %8196 = vrcp.f32 %v713_v57 }
 0x43b   :  { %v1145_v30 = vpop.permute.xlu1 %1144 }
 0x43c   :  { %7756 = vmatprep.subr.msk.bf16.mxu0 %vm572_vm0, %v1145_v30  ;;  %v1168_v58 = vsel %vm572_vm0, %v1145_v30, 0 }
 0x43d   :  { %7441 = vmatpush3.bf16.xpose.msra.mxu0 %v1168_v58  ;;  %v855_v59 = vpop.permute.xlu0 %854 }
 0x43e   :  { %7752 = vmatprep.subr.msk.bf16.mxu1 %vm572_vm0, %v855_v59  ;;  %v878_v13 = vsel %vm572_vm0, %v855_v59, 0 }
 0x443   :  { %v8191_v60 = vpop.eup %8190 }
 0x444   :  { %v745_v1 = vmul.f32 %v8191_v60, %v9162_v38  ;;  %v872_v38 = vsel %vm572_vm0, %v851_v52, 0 }
 0x445   :  { %v8193_v61 = vpop.eup %8192 }
 0x446   :  { %v8195_v63 = vpop.eup %8194  ;;  %v744_v7 = vmul.f32 %v8193_v61, %v9168_v5 }
 0x447   :  { %v8197_v0 = vpop.eup %8196  ;;  %v746_v8 = vmul.f32 %v8195_v63, %v9158_v31 }
 0x448   :  { %v743_v3 = vmul.f32 %v8197_v0, %v9164_v39 }
 0x449   :  { %v752_v12 = vpack.c.bf16 %v746_v8, %v745_v1 }
 0x44a   :  { %v751_v10 = vpack.c.bf16 %v744_v7, %v743_v3 }
 0x44c   :  { %7400 = vmatprep.mubr.msk.bf16.mxu1 %vm662_vm13, %v751_v10 }
 0x44d   :  { %7401 = vmatmul.mubr.msk.bf16.vlgmr.msra.gmra.mxu1 %vm662_vm13, %v752_v12 }
 0x44e   :  { %7409 = vmatpush3.bf16.xpose.msra.mxu1 %v878_v13 }
 0x44f   :  { %7753 = vmatprep.subr.msk.bf16.mxu1 %vm572_vm0, %v853_v50 }
 0x456   :  { %7411 = vmatpush3.bf16.xpose.msra.mxu1 %v875_v16 }
 0x457   :  { %7754 = vmatprep.subr.msk.bf16.mxu1 %vm572_vm0, %v851_v52 }
 0x45e   :  { %7413 = vmatpush3.bf16.xpose.msra.mxu1 %v872_v38 }
 0x46c   :  { %v734_v31 = vpop.xlane.xlu1 %733 }
 0x46e   :  { %v731_v39 = vpop.xlane.xlu0 %730 }
 0x46f   :  { %8198 = vrcp.f32 %v731_v39 }
 0x470   :  { %v728_v5 = vpop.xlane.xlu1 %727 }
 0x471   :  { %8200 = vrcp.f32 %v728_v5 }
 0x472   :  { %8202 = vrcp.f32 %v734_v31  ;;  %v725_v17 = vpop.xlane.xlu0 %724 }
 0x473   :  { %8204 = vrcp.f32 %v725_v17 }
 0x474   :  { %v1143_v18 = vpop.permute.xlu1 %1142 }
 0x475   :  { %7757 = vmatprep.subr.msk.bf16.mxu0 %vm572_vm0, %v1143_v18  ;;  %v1165_v19 = vsel %vm572_vm0, %v1143_v18, 0 }
 0x476   :  { %7443 = vmatpush3.bf16.xpose.msra.mxu0 %v1165_v19  ;;  %v849_v20 = vpop.permute.xlu0 %848 }
 0x477   :  { %7755 = vmatprep.subr.msk.bf16.mxu1 %vm572_vm0, %v849_v20  ;;  %v869_v25 = vsel %vm572_vm0, %v849_v20, 0 }
 0x478   :  { %v839_v28 = vpop.permute.xlu1 %838  ;;  %7415 = vmatpush3.bf16.xpose.msra.mxu1 %v869_v25 }
 0x47a   :  { %v837_v34 = vpop.permute.xlu0 %836 }
 0x47c   :  { %v841_v36 = vpop.permute.xlu1 %840  ;;  %v8199_v44 = vpop.eup %8198 }
 0x47d   :  { %v749_v54 = vmul.f32 %v8199_v44, %v9181_v46 }
 0x47e   :  { %v8201_v33 = vpop.eup %8200  ;;  %v1141_v47 = vpop.permute.xlu0 %1140 }
 0x47f   :  { %v8203_v49 = vpop.eup %8202  ;;  %7758 = vmatprep.subr.msk.bf16.mxu0 %vm572_vm0, %v1141_v47  ;;  %v1162_v50 = vsel %vm572_vm0, %v1141_v47, 0  ;;  %v748_v57 = vmul.f32 %v8201_v33, %v9185_v48 }
 0x480   :  { %v8205_v52 = vpop.eup %8204  ;;  %v1139_v53 = vpop.permute.xlu1 %1138  ;;  %7445 = vmatpush3.bf16.xpose.msra.mxu0 %v1162_v50  ;;  %v750_v58 = vmul.f32 %v8203_v49, %v9179_v45 }
 0x481   :  { %7759 = vmatprep.subr.msk.bf16.mxu0 %vm572_vm0, %v1139_v53  ;;  %v747_v56 = vmul.f32 %v8205_v52, %v9189_v42  ;;  %v1159_v46 = vsel %vm572_vm0, %v1139_v53, 0 }
 0x482   :  { %v843_v30 = vpop.permute.xlu0 %842  ;;  %v754_v60 = vpack.c.bf16 %v750_v58, %v749_v54 }
 0x483   :  { %v753_v59 = vpack.c.bf16 %v748_v57, %v747_v56 }
 0x484   :  { %v1133_v42 = vpop.permute.xlu1 %1132 }
 0x485   :  { %7404 = vmatprep.mubr.msk.bf16.mxu1 %vm662_vm13, %v753_v59 }
 0x486   :  { %7405 = vmatmul.mubr.msk.bf16.gmra.mxu1 %vm662_vm13, %v754_v60  ;;  %v1131_v61 = vpop.permute.xlu0 %1130 }
 0x487   :  { %7416 = vmatprep.mubr.msk.bf16.mxu1 %vm572_vm0, %v837_v34  ;;  %7448 = vmatprep.mubr.msk.bf16.mxu0 %vm572_vm0, %v1131_v61 }
 0x488   :  { %7447 = vmatpush3.bf16.xpose.msra.mxu0 %v1159_v46  ;;  %v1137_v45 = vpop.permute.xlu1 %1136 }
 0x48a   :  { %v1135_v48 = vpop.permute.xlu0 %1134 }
 0x48e   :  { %7417 = vmatmul.mubr.msk.bf16.vlgmr.msra.gmra.mxu1 %vm572_vm0, %v839_v28 }
 0x48f   :  { %7420 = vmatprep.mubr.msk.bf16.mxu1 %vm572_vm0, %v841_v36  ;;  %7449 = vmatmul.mubr.msk.bf16.vlgmr.msra.gmra.mxu0 %vm572_vm0, %v1133_v42 }
 0x490   :  { %7452 = vmatprep.mubr.msk.bf16.mxu0 %vm572_vm0, %v1135_v48 }
 0x496   :  { %7421 = vmatmul.mubr.msk.bf16.gmra.mxu1 %vm572_vm0, %v843_v30 }
 0x497   :  { %7453 = vmatmul.mubr.msk.bf16.gmra.mxu0 %vm572_vm0, %v1137_v45 }
 0x50d   :  { %v9255_v63 = vpop.f32.mrf.mxu1 }
 0x50f   :  { %v9257_v0 = vpop.f32.mrf.mxu1 }
 0x511   :  { %v9259_v1 = vpop.f32.mrf.mxu1 }
 0x513   :  { %v9261_v3 = vpop.f32.mrf.mxu1 }
 0x546   :  { %v9263_v7 = vpop.f32.mrf.mxu1 }
 0x548   :  { %v9265_v8 = vpop.f32.mrf.mxu1 }
 0x54a   :  { %v9267_v10 = vpop.f32.mrf.mxu1 }
 0x54c   :  { %v9269_v12 = vpop.f32.mrf.mxu1 }
 0x54e   :  { %v7418_v13 = vpop.f32.mrf.mxu1 }
 0x54f   :  { %v7450_v16 = vpop.f32.mrf.mxu0  ;;  %v9293_v52 = vadd.f32 %v7418_v13, %v9112_v4 }
 0x550   :  { %v914_v38 = vpop.f32.mrf.mxu1  ;;  %v9275_v17 = vadd.f32 %v7450_v16, %v9112_v4 }
 0x551   :  { %v1204_v31 = vpop.f32.mrf.mxu0  ;;  %v9301_v58 = vadd.f32 %v914_v38, %v9110_v2  ;;  %v951_v61 = vsel %vm662_vm13, %v9293_v52, -inf }
 0x552   :  { %v9272_v39 = vadd.f32 %v1204_v31, %v9110_v2  ;;  %v7419_v19 = vpop.f32.mrf.mxu1  ;;  %v1241_v44 = vsel %vm662_vm13, %v9275_v17, -inf }
 0x553   :  { %v7451_v5 = vpop.f32.mrf.mxu0  ;;  %v9310_v42 = vadd.f32 %v7419_v19, %v9115_v6  ;;  %v945_v13 = vsel %vm662_vm13, %v9301_v58, -inf }
 0x554   :  { %v1235_v18 = vsel %vm662_vm13, %v9272_v39, -inf  ;;  %v9283_v34 = vadd.f32 %v7451_v5, %v9115_v6  ;;  %v917_v33 = vpop.f32.mrf.mxu1 }
 0x555   :  { %v1207_v20 = vpop.f32.mrf.mxu0  ;;  %1236 = vmax.xlane.f32.xlu0 %v1235_v18  ;;  %v9304_v59 = vadd.f32 %v917_v33, %v9122_v11  ;;  %v954_v18 = vsel %vm662_vm13, %v9310_v42, -inf }
 0x556   :  { %v9280_v25 = vadd.f32 %v1207_v20, %v9122_v11  ;;  %v1244_v53 = vsel %vm662_vm13, %v9283_v34, -inf  ;;  %v7422_v56 = vpop.f32.mrf.mxu1 }
 0x557   :  { %v7454_v28 = vpop.f32.mrf.mxu0  ;;  %v948_v45 = vsel %vm662_vm13, %v9304_v59, -inf  ;;  %v9320_v38 = vadd.f32 %v7422_v56, %v9136_v26 }
 0x558   :  { %v1238_v36 = vsel %vm662_vm13, %v9280_v25, -inf  ;;  %v930_v46 = vpop.f32.mrf.mxu1 }
 0x559   :  { %1239 = vmax.xlane.f32.xlu1 %v1238_v36  ;;  %1242 = vmax.xlane.f32.xlu0 %v1241_v44  ;;  %v1220_v47 = vpop.f32.mrf.mxu0  ;;  %v9330_v20 = vadd.f32 %v930_v46, %v9133_v21  ;;  %v963_v33 = vsel %vm662_vm13, %v9320_v38, -inf }
 0x55a   :  { %v9290_v49 = vadd.f32 %v1220_v47, %v9133_v21  ;;  %v7423_v16 = vpop.f32.mrf.mxu1  ;;  %v9340_v47 = vadd.f32 %v7454_v28, %v9136_v26 }
 0x55b   :  { %v7455_v50 = vpop.f32.mrf.mxu0  ;;  %v9323_v31 = vadd.f32 %v7423_v16, %v9138_v29 }
 0x55c   :  { %v1247_v54 = vsel %vm662_vm13, %v9290_v49, -inf  ;;  %v9313_v48 = vadd.f32 %v7455_v50, %v9138_v29  ;;  %v933_v19 = vpop.f32.mrf.mxu1 }
 0x55d   :  { %1245 = vmax.xlane.f32.xlu1 %v1244_v53  ;;  %v1223_v57 = vpop.f32.mrf.mxu0  ;;  %1248 = vmax.xlane.f32.xlu0 %v1247_v54  ;;  %v9333_v36 = vadd.f32 %v933_v19, %v9144_v37  ;;  %v966_v44 = vsel %vm662_vm13, %v9323_v31, -inf  ;;  %v957_v53 = vsel %vm662_vm13, %v9330_v20, -inf  ;;  %v1253_v54 = vsel %vm662_vm13, %v9340_v47, -inf }
 0x55e   :  { %v1224_v30 = vadd.f32 %v1223_v57, %v9144_v37  ;;  %v1256_v5 = vsel %vm662_vm13, %v9313_v48, -inf }
 0x55f   :  { %v960_v50 = vsel %vm662_vm13, %v9333_v36, -inf }
 0x560   :  { %v1250_v60 = vsel %vm662_vm13, %v1224_v30, -inf }
 0x561   :  { %1251 = vmax.xlane.f32.xlu1 %v1250_v60  ;;  %952 = vmax.xlane.f32.xlu0 %v951_v61 }
 0x565   :  { %949 = vmax.xlane.f32.xlu1 %v948_v45  ;;  %946 = vmax.xlane.f32.xlu0 %v945_v13 }
 0x569   :  { %1257 = vmax.xlane.f32.xlu1 %v1256_v5  ;;  %955 = vmax.xlane.f32.xlu0 %v954_v18 }
 0x56d   :  { %967 = vmax.xlane.f32.xlu1 %v966_v44  ;;  %964 = vmax.xlane.f32.xlu0 %v963_v33 }
 0x571   :  { %961 = vmax.xlane.f32.xlu1 %v960_v50  ;;  %958 = vmax.xlane.f32.xlu0 %v957_v53 }
 0x575   :  { %1254 = vmax.xlane.f32.xlu0 %v1253_v54 }
 0x58b   :  { %1047 = vrot.lane.b32.xlu0 %v9035_v24, %s8770_s0 }
 0x58f   :  { %1043 = vrot.lane.b32.xlu0 %v9042_v32, %s8770_s0 }
 0x593   :  { %1041 = vrot.lane.b32.xlu0 %v9046_v35, %s8770_s0 }
 0x597   :  { %1333 = vrot.lane.b32.xlu0 %v9035_v24, %s8771_s30 }
 0x59b   :  { %1329 = vrot.lane.b32.xlu0 %v9042_v32, %s8771_s30 }
 0x5de   :  { %v1237_v28 = vpop.xlane.xlu0 %1236 }
 0x5df   :  { %v1259_v56 = vsub.f32 %v9272_v39, %v1237_v28 }
 0x5e1   :  { %v1267_v57 = vmul.f32 1.442695, %v1259_v56 }
 0x5e2   :  { %v1240_v60 = vpop.xlane.xlu1 %1239  ;;  %v1243_v61 = vpop.xlane.xlu0 %1242 }
 0x5e3   :  { %8206 = vpow2.f32 %v1267_v57  ;;  %v1260_v46 = vsub.f32 %v9280_v25, %v1240_v60  ;;  %v1261_v45 = vsub.f32 %v9275_v17, %v1243_v61 }
 0x5e5   :  { %v1269_v13 = vmul.f32 1.442695, %v1260_v46  ;;  %v1271_v16 = vmul.f32 1.442695, %v1261_v45 }
 0x5e6   :  { %v1246_v5 = vpop.xlane.xlu1 %1245  ;;  %v9361_v18 = vpop.xlane.xlu0 %1248 }
 0x5e7   :  { %8208 = vpow2.f32 %v1269_v13  ;;  %v1262_v19 = vsub.f32 %v9283_v34, %v1246_v5 }
 0x5e8   :  { %8210 = vpow2.f32 %v1271_v16 }
 0x5e9   :  { %v1273_v44 = vmul.f32 1.442695, %v1262_v19 }
 0x5ea   :  { %v1252_v33 = vpop.xlane.xlu1 %1251  ;;  %v953_v39 = vpop.xlane.xlu0 %952 }
 0x5eb   :  { %v1264_v50 = vsub.f32 %v1224_v30, %v1252_v33  ;;  %v971_v53 = vsub.f32 %v9293_v52, %v953_v39  ;;  %8212 = vpow2.f32 %v1273_v44 }
 0x5ed   :  { %v1277_v54 = vmul.f32 1.442695, %v1264_v50  ;;  %v981_v25 = vmul.f32 1.442695, %v971_v53 }
 0x5ee   :  { %v947_v28 = vpop.xlane.xlu0 %946  ;;  %v950_v30 = vpop.xlane.xlu1 %949 }
 0x5ef   :  { %8214 = vpow2.f32 %v1277_v54  ;;  %v969_v17 = vsub.f32 %v9301_v58, %v947_v28 }
 0x5f0   :  { %v9366_v56 = vpop.eup %8206  ;;  %8216 = vpow2.f32 %v981_v25 }
 0x5f1   :  { %v977_v57 = vmul.f32 1.442695, %v969_v17  ;;  %v1283_v34 = vsel %vm662_vm13, %v9366_v56, 0.0 }
 0x5f2   :  { %1284 = vadd.xlane.f32.xlu1 %v1283_v34  ;;  %v956_v60 = vpop.xlane.xlu0 %955  ;;  %v1258_v44 = vpop.xlane.xlu1 %1257 }
 0x5f3   :  { %8218 = vpow2.f32 %v977_v57  ;;  %v1266_v25 = vsub.f32 %v9313_v48, %v1258_v44 }
 0x5f4   :  { %v9370_v61 = vpop.eup %8208 }
 0x5f5   :  { %v1286_v52 = vsel %vm662_vm13, %v9370_v61, 0.0  ;;  %v9374_v46 = vpop.eup %8210 }
 0x5f6   :  { %1287 = vadd.xlane.f32.xlu1 %v1286_v52  ;;  %v965_v58 = vpop.xlane.xlu0 %964  ;;  %v1289_v16 = vsel %vm662_vm13, %v9374_v46, 0.0  ;;  %v1281_v52 = vmul.f32 1.442695, %v1266_v25  ;;  %v972_v25 = vsub.f32 %v9310_v42, %v956_v60 }
 0x5f7   :  { %v975_v45 = vsub.f32 %v9320_v38, %v965_v58 }
 0x5f8   :  { %v9379_v5 = vpop.eup %8212 }
 0x5f9   :  { %v989_v13 = vmul.f32 1.442695, %v975_v45  ;;  %v1292_v38 = vsel %vm662_vm13, %v9379_v5, 0.0 }
 0x5fa   :  { %1290 = vadd.xlane.f32.xlu1 %v1289_v16  ;;  %v959_v19 = vpop.xlane.xlu0 %958 }
 0x5fb   :  { %v973_v33 = vsub.f32 %v9330_v20, %v959_v19  ;;  %8220 = vpow2.f32 %v989_v13 }
 0x5fc   :  { %v9382_v39 = vpop.eup %8214 }
 0x5fd   :  { %v985_v50 = vmul.f32 1.442695, %v973_v33  ;;  %v1298_v53 = vsel %vm662_vm13, %v9382_v39, 0.0  ;;  %v9388_v54 = vpop.eup %8216 }
 0x5fe   :  { %1299 = vadd.xlane.f32.xlu0 %v1298_v53  ;;  %1293 = vadd.xlane.f32.xlu1 %v1292_v38  ;;  %v1255_v28 = vpop.xlane.xlu0 %1254  ;;  %v999_v57 = vsel %vm662_vm13, %v9388_v54, 0.0  ;;  %v1263_v53 = vsub.f32 %v9290_v49, %v9361_v18 }
 0x5ff   :  { %v1265_v17 = vsub.f32 %v9340_v47, %v1255_v28  ;;  %8222 = vpow2.f32 %v985_v50  ;;  %v968_v28 = vpop.xlane.xlu1 %967 }
 0x600   :  { %v9394_v34 = vpop.eup %8218  ;;  %v1275_v38 = vmul.f32 1.442695, %v1263_v53 }
 0x601   :  { %v1279_v20 = vmul.f32 1.442695, %v1265_v17  ;;  %v993_v48 = vsel %vm662_vm13, %v9394_v34, 0.0  ;;  %v970_v17 = vsub.f32 %v9304_v59, %v950_v30 }
 0x602   :  { %1000 = vadd.xlane.f32.xlu0 %v999_v57  ;;  %v1048_v58 = vpop.permute.xlu0 %1047 }
 0x603   :  { %8224 = vpow2.f32 %v1279_v20  ;;  %7424 = vmatprep.subr.bf16.mxu1 %v1048_v58  ;;  %v983_v20 = vmul.f32 1.442695, %v972_v25  ;;  %v979_v57 = vmul.f32 1.442695, %v970_v17 }
 0x604   :  { %7425 = vmatpush3.bf16.msra.mxu1 %v1048_v58  ;;  %8226 = vpow2.f32 %v1281_v52  ;;  %v976_v52 = vsub.f32 %v9323_v31, %v968_v28  ;;  %v962_v58 = vpop.xlane.xlu1 %961 }
 0x605   :  { %8228 = vpow2.f32 %v1275_v38  ;;  %v974_v49 = vsub.f32 %v9333_v36, %v962_v58 }
 0x606   :  { %994 = vadd.xlane.f32.xlu0 %v993_v48  ;;  %8230 = vpow2.f32 %v983_v20  ;;  %v991_v48 = vmul.f32 1.442695, %v976_v52  ;;  %v1044_v38 = vpop.permute.xlu0 %1043 }
 0x607   :  { %8232 = vpow2.f32 %v979_v57  ;;  %v987_v42 = vmul.f32 1.442695, %v974_v49 }
 0x608   :  { %v9398_v45 = vpop.eup %8220  ;;  %8234 = vpow2.f32 %v991_v48 }
 0x609   :  { %v1011_v47 = vsel %vm662_vm13, %v9398_v45, 0.0  ;;  %8236 = vpow2.f32 %v987_v42 }
 0x60a   :  { %1012 = vadd.xlane.f32.xlu0 %v1011_v47 }
 0x60c   :  { %v9402_v13 = vpop.eup %8222 }
 0x60d   :  { %v1005_v16 = vsel %vm662_vm13, %v9402_v13, 0.0 }
 0x60e   :  { %1006 = vadd.xlane.f32.xlu0 %v1005_v16 }
 0x60f   :  { %1045 = vrot.lane.b32.xlu1 %v9037_v27, %s8770_s0 }
 0x610   :  { %v9408_v19 = vpop.eup %8224 }
 0x611   :  { %v1301_v44 = vsel %vm662_vm13, %v9408_v19, 0.0  ;;  %v9412_v33 = vpop.eup %8226 }
 0x612   :  { %1302 = vadd.xlane.f32.xlu0 %v1301_v44  ;;  %v1304_v50 = vsel %vm662_vm13, %v9412_v33, 0.0  ;;  %v9428_v59 = vpop.eup %8228 }
 0x613   :  { %1331 = vrot.lane.b32.xlu1 %v9037_v27, %s8771_s30  ;;  %v1295_v31 = vsel %vm662_vm13, %v9428_v59, 0.0  ;;  %v8231_v18 = vpop.eup %8230 }
 0x614   :  { %v8233_v60 = vpop.eup %8232 }
 0x615   :  { %v996_v36 = vsel %vm662_vm13, %v8233_v60, 0.0 }
 0x616   :  { %1305 = vadd.xlane.f32.xlu0 %v1304_v50 }
 0x62c   :  { %1430 = vrot.lane.b32.xlu0 %v9050_v40, %s8772_s21  ;;  %v1002_v40 = vsel %vm662_vm13, %v8231_v18, 0.0 }
 0x630   :  { %1416 = vrot.lane.b32.xlu0 %v9031_v9, %s8772_s21  ;;  %v9436_v9 = vpop.eup %8234 }
 0x631   :  { %v1014_v30 = vsel %vm662_vm13, %v9436_v9, 0.0  ;;  %v9440_v47 = vpop.eup %8236 }
 0x634   :  { %1420 = vrot.lane.b32.xlu0 %v9081_v51, %s8772_s21  ;;  %v1008_v51 = vsel %vm662_vm13, %v9440_v47, 0.0 }
 0x637   :  { %1296 = vadd.xlane.f32.xlu1 %v1295_v31 }
 0x63b   :  { %1003 = vadd.xlane.f32.xlu1 %v1002_v40 }
 0x63f   :  { %997 = vadd.xlane.f32.xlu1 %v996_v36 }
 0x643   :  { %1015 = vadd.xlane.f32.xlu1 %v1014_v30 }
 0x647   :  { %1009 = vadd.xlane.f32.xlu1 %v1008_v51 }
 0x658   :  { %1327 = vrot.lane.b32.xlu1 %v9046_v35, %s8771_s30 }
 0x65c   :  { %1428 = vrot.lane.b32.xlu1 %v9053_v41, %s8772_s21  ;;  %v1042_v41 = vpop.permute.xlu0 %1041 }
 0x660   :  { %1426 = vrot.lane.b32.xlu1 %v9061_v43, %s8772_s21  ;;  %v1334_v43 = vpop.permute.xlu0 %1333 }
 0x664   :  { %1424 = vrot.lane.b32.xlu1 %v9067_v14, %s8772_s21  ;;  %v9456_v14 = vpop.permute.xlu0 %1329 }
 0x668   :  { %1418 = vrot.lane.b32.xlu1 %v9079_v22, %s8772_s21 }
 0x66c   :  { %1422 = vrot.lane.b32.xlu1 %v9089_v15, %s8772_s21 }
 0x67b   :  { %v1285_v16 = vpop.xlane.xlu1 %1284 }
 0x67f   :  { %v1288_v44 = vpop.xlane.xlu1 %1287 }
 0x683   :  { %v1291_v50 = vpop.xlane.xlu1 %1290 }
 0x687   :  { %v1294_v53 = vpop.xlane.xlu1 %1293  ;;  %v1300_v22 = vpop.xlane.xlu0 %1299 }
 0x68b   :  { %v1046_v25 = vpop.permute.xlu1 %1045  ;;  %v1001_v28 = vpop.xlane.xlu0 %1000 }
 0x68c   :  { %7426 = vmatprep.subr.bf16.mxu1 %v1046_v25 }
 0x68d   :  { %7427 = vmatpush3.bf16.msra.mxu1 %v1046_v25 }
 0x68e   :  { %7428 = vmatprep.subr.bf16.mxu1 %v1044_v38 }
 0x68f   :  { %v1332_v15 = vpop.permute.xlu1 %1331  ;;  %v995_v17 = vpop.xlane.xlu0 %994 }
 0x691   :  { %7429 = vmatpush3.bf16.msra.mxu1 %v1044_v38 }
 0x692   :  { %7430 = vmatprep.subr.bf16.mxu1 %v1042_v41 }
 0x693   :  { %v1013_v52 = vpop.xlane.xlu0 %1012 }
 0x695   :  { %7431 = vmatpush3.bf16.msra.mxu1 %v1042_v41 }
 0x696   :  { %7456 = vmatprep.subr.bf16.mxu1 %v1334_v43 }
 0x697   :  { %v1007_v48 = vpop.xlane.xlu0 %1006 }
 0x69b   :  { %v1303_v30 = vpop.xlane.xlu0 %1302 }
 0x6c0   :  { %v1297_v20 = vpop.xlane.xlu1 %1296 }
 0x6c4   :  { %v1004_v57 = vpop.xlane.xlu1 %1003 }
 0x6c5   :  { %8238 = vrcp.f32 %v1004_v57 }
 0x6c6   :  { %8240 = vrcp.f32 %v995_v17 }
 0x6c7   :  { %8242 = vrcp.f32 %v1001_v28 }
 0x6c8   :  { %v998_v58 = vpop.xlane.xlu1 %997 }
 0x6c9   :  { %8244 = vrcp.f32 %v998_v58  ;;  %v1306_v58 = vpop.xlane.xlu0 %1305 }
 0x6ca   :  { %8246 = vrcp.f32 %v1285_v16 }
 0x6cb   :  { %8248 = vrcp.f32 %v1288_v44 }
 0x6cc   :  { %v1016_v49 = vpop.xlane.xlu1 %1015 }
 0x6cd   :  { %8250 = vrcp.f32 %v1016_v49 }
 0x6ce   :  { %8252 = vrcp.f32 %v1007_v48 }
 0x6cf   :  { %8254 = vrcp.f32 %v1013_v52 }
 0x6d0   :  { %v1010_v42 = vpop.xlane.xlu1 %1009 }
 0x6d1   :  { %8256 = vrcp.f32 %v1010_v42 }
 0x6d2   :  { %v8239_v31 = vpop.eup %8238  ;;  %8258 = vrcp.f32 %v1294_v53 }
 0x6d3   :  { %v8241_v40 = vpop.eup %8240  ;;  %v1028_v38 = vmul.f32 %v8239_v31, %v8231_v18  ;;  %8260 = vrcp.f32 %v1297_v20 }
 0x6d4   :  { %v8243_v36 = vpop.eup %8242  ;;  %v1025_v25 = vmul.f32 %v8241_v40, %v9394_v34  ;;  %8262 = vrcp.f32 %v1291_v50  ;;  %v1431_v40 = vpop.permute.xlu0 %1430 }
 0x6d5   :  { %v1027_v16 = vmul.f32 %v8243_v36, %v9388_v54  ;;  %8264 = vrcp.f32 %v1300_v22 }
 0x6d6   :  { %v8245_v51 = vpop.eup %8244  ;;  %8266 = vrcp.f32 %v1306_v58 }
 0x6d7   :  { %v1026_v41 = vmul.f32 %v8245_v51, %v8233_v60  ;;  %v8247_v44 = vpop.eup %8246  ;;  %v1034_v57 = vpack.c.bf16 %v1028_v38, %v1027_v16  ;;  %8268 = vrcp.f32 %v1303_v30 }
 0x6d8   :  { %v8249_v17 = vpop.eup %8248  ;;  %v1315_v49 = vmul.f32 %v8247_v44, %v9366_v56 }
 0x6d9   :  { %v1033_v28 = vpack.c.bf16 %v1026_v41, %v1025_v25  ;;  %v1316_v50 = vmul.f32 %v8249_v17, %v9370_v61  ;;  %v1417_v41 = vpop.permute.xlu0 %1416 }
 0x6da   :  { %v8251_v52 = vpop.eup %8250 }
 0x6db   :  { %7432 = vmatprep.mubr.msk.bf16.mxu1 %vm662_vm13, %v1033_v28  ;;  %v8253_v48 = vpop.eup %8252  ;;  %v1032_v34 = vmul.f32 %v8251_v52, %v9436_v9  ;;  %v1323_v9 = vpack.c.bf16 %v1316_v50, %v1315_v49 }
 0x6dc   :  { %7433 = vmatmul.mubr.msk.bf16.vlgmr.msra.gmra.mxu1 %vm662_vm13, %v1034_v57  ;;  %v8255_v18 = vpop.eup %8254  ;;  %v1029_v54 = vmul.f32 %v8253_v48, %v9402_v13 }
 0x6dd   :  { %7457 = vmatpush3.bf16.msra.mxu1 %v1334_v43  ;;  %v1031_v22 = vmul.f32 %v8255_v18, %v9398_v45  ;;  %v1421_v57 = vpop.permute.xlu0 %1420 }
 0x6de   :  { %v8257_v53 = vpop.eup %8256  ;;  %7458 = vmatprep.subr.bf16.mxu1 %v1332_v15 }
 0x6df   :  { %v1030_v60 = vmul.f32 %v8257_v53, %v9440_v47  ;;  %v1036_v43 = vpack.c.bf16 %v1032_v34, %v1031_v22  ;;  %v8259_v42 = vpop.eup %8258  ;;  %v1328_v47 = vpop.permute.xlu1 %1327 }
 0x6e0   :  { %v8261_v31 = vpop.eup %8260  ;;  %v1318_v45 = vmul.f32 %v8259_v42, %v9379_v5 }
 0x6e1   :  { %7459 = vmatpush3.bf16.msra.mxu1 %v1332_v15  ;;  %v1035_v20 = vpack.c.bf16 %v1030_v60, %v1029_v54  ;;  %v8263_v13 = vpop.eup %8262  ;;  %v1319_v56 = vmul.f32 %v8261_v31, %v9428_v59 }
 0x6e2   :  { %7460 = vmatprep.subr.bf16.mxu1 %v9456_v14  ;;  %v8265_v61 = vpop.eup %8264  ;;  %v1317_v15 = vmul.f32 %v8263_v13, %v9374_v46 }
 0x6e3   :  { %7436 = vmatprep.mubr.msk.bf16.mxu1 %vm662_vm13, %v1035_v20  ;;  %v1320_v36 = vmul.f32 %v8265_v61, %v9382_v39  ;;  %v8267_v51 = vpop.eup %8266  ;;  %v1429_v5 = vpop.permute.xlu1 %1428 }
 0x6e4   :  { %7437 = vmatmul.mubr.msk.bf16.gmra.mxu1 %vm662_vm13, %v1036_v43  ;;  %v1324_v30 = vpack.c.bf16 %v1318_v45, %v1317_v15  ;;  %v8269_v25 = vpop.eup %8268  ;;  %v1322_v46 = vmul.f32 %v8267_v51, %v9412_v33  ;;  %v1451_v16 = vsel %vm572_vm0, %v1429_v5, 0 }
 0x6e5   :  { %7461 = vmatpush3.bf16.msra.mxu1 %v9456_v14  ;;  %7464 = vmatprep.mubr.msk.bf16.mxu1 %vm662_vm13, %v1323_v9  ;;  %v1325_v38 = vpack.c.bf16 %v1320_v36, %v1319_v56  ;;  %v1454_v14 = vsel %vm572_vm0, %v1431_v40, 0  ;;  %v1321_v39 = vmul.f32 %v8269_v25, %v9408_v19 }
 0x6e6   :  { %7462 = vmatprep.subr.bf16.mxu1 %v1328_v47 }
 0x6e7   :  { %v1326_v59 = vpack.c.bf16 %v1322_v46, %v1321_v39  ;;  %v1427_v44 = vpop.permute.xlu1 %1426 }
 0x6e8   :  { %v1448_v28 = vsel %vm572_vm0, %v1427_v44, 0 }
 0x6e9   :  { %7463 = vmatpush3.bf16.msra.mxu1 %v1328_v47 }
 0x6ea   :  { %7760 = vmatprep.subr.msk.bf16.mxu1 %vm572_vm0, %v1431_v40 }
 0x6eb   :  { %v1425_v17 = vpop.permute.xlu1 %1424 }
 0x6ec   :  { %7465 = vmatmul.mubr.msk.bf16.vlgmr.msra.gmra.mxu1 %vm662_vm13, %v1324_v30  ;;  %v1445_v19 = vsel %vm572_vm0, %v1425_v17, 0 }
 0x6ed   :  { %7473 = vmatpush3.bf16.xpose.msra.mxu1 %v1454_v14  ;;  %7468 = vmatprep.mubr.msk.bf16.mxu1 %vm662_vm13, %v1325_v38 }
 0x6ee   :  { %7761 = vmatprep.subr.msk.bf16.mxu1 %vm572_vm0, %v1429_v5 }
 0x6ef   :  { %v1419_v33 = vpop.permute.xlu1 %1418 }
 0x6f3   :  { %v1423_v52 = vpop.permute.xlu1 %1422 }
 0x6f4   :  { %7469 = vmatmul.mubr.msk.bf16.gmra.mxu1 %vm662_vm13, %v1326_v59 }
 0x6f5   :  { %7475 = vmatpush3.bf16.xpose.msra.mxu1 %v1451_v16  ;;  %7480 = vmatprep.mubr.msk.bf16.mxu1 %vm572_vm0, %v1417_v41 }
 0x6f6   :  { %7762 = vmatprep.subr.msk.bf16.mxu1 %vm572_vm0, %v1427_v44 }
 0x6fd   :  { %7477 = vmatpush3.bf16.xpose.msra.mxu1 %v1448_v28 }
 0x6fe   :  { %7763 = vmatprep.subr.msk.bf16.mxu1 %vm572_vm0, %v1425_v17 }
 0x705   :  { %7479 = vmatpush3.bf16.xpose.msra.mxu1 %v1445_v19 }
 0x70c   :  { %7481 = vmatmul.mubr.msk.bf16.vlgmr.msra.gmra.mxu1 %vm572_vm0, %v1419_v33 }
 0x70d   :  { %7484 = vmatprep.mubr.msk.bf16.mxu1 %vm572_vm0, %v1421_v57 }
 0x714   :  { %7485 = vmatmul.mubr.msk.bf16.gmra.mxu1 %vm572_vm0, %v1423_v52 }
 0x715   :  { %2347 = vmatprep.mubr.bf16.mxu1 %v11494_v62 }
 0x79c   :  { %v9495_v58 = vpop.f32.mrf.mxu1 }
 0x79e   :  { %v9497_v48 = vpop.f32.mrf.mxu1 }
 0x7a0   :  { %v9499_v18 = vpop.f32.mrf.mxu1 }
 0x7a1   :  { %v7794_v53 = vpack.i.bf16 %v9499_v18, %v9495_v58 }
 0x7a2   :  { %v9503_v34 = vpop.f32.mrf.mxu1 }
 0x7a4   :  { %v9505_v54 = vpop.f32.mrf.mxu1 }
 0x7a6   :  { %v9507_v60 = vpop.f32.mrf.mxu1 }
 0x7a8   :  { %v9509_v50 = vpop.f32.mrf.mxu1 }
 0x7aa   :  { %v9513_v20 = vpop.f32.mrf.mxu1 }
 0x7ac   :  { %v9515_v49 = vpop.f32.mrf.mxu1 }
 0x7ae   :  { %v9517_v43 = vpop.f32.mrf.mxu1 }
 0x7b0   :  { %v9519_v42 = vpop.f32.mrf.mxu1 }
 0x7b2   :  { %v9523_v31 = vpop.f32.mrf.mxu1 }
 0x7b4   :  { %v9525_v13 = vpop.f32.mrf.mxu1 }
 0x7b6   :  { %v9527_v47 = vpop.f32.mrf.mxu1 }
 0x7b8   :  { %v9529_v61 = vpop.f32.mrf.mxu1 }
 0x7ba   :  { %v9533_v56 = vpop.f32.mrf.mxu1 }
 0x7cc   :  { %v7482_v15 = vpop.f32.mrf.mxu1 }
 0x7cd   :  { %v1499_v51 = vadd.f32 %v7482_v15, %v9112_v4 }
 0x7ce   :  { %v1490_v40 = vpop.f32.mrf.mxu1 }
 0x7cf   :  { %v1491_v36 = vadd.f32 %v1490_v40, %v9110_v2  ;;  %v1527_v59 = vsel %vm662_vm13, %v1499_v51, -inf }
 0x7d0   :  { %v7483_v30 = vpop.f32.mrf.mxu1 }
 0x7d1   :  { %v1521_v38 = vsel %vm662_vm13, %v1491_v36, -inf  ;;  %v1502_v46 = vadd.f32 %v7483_v30, %v9115_v6 }
 0x7d2   :  { %v1493_v14 = vpop.f32.mrf.mxu1  ;;  %1522 = vmax.xlane.f32.xlu0 %v1521_v38 }
 0x7d3   :  { %v1494_v25 = vadd.f32 %v1493_v14, %v9122_v11  ;;  %v1530_v28 = vsel %vm662_vm13, %v1502_v46, -inf }
 0x7d4   :  { %v7486_v5 = vpop.f32.mrf.mxu1 }
 0x7d5   :  { %v1524_v39 = vsel %vm662_vm13, %v1494_v25, -inf  ;;  %v1515_v33 = vadd.f32 %v7486_v5, %v9136_v26 }
 0x7d6   :  { %1525 = vmax.xlane.f32.xlu1 %v1524_v39  ;;  %1528 = vmax.xlane.f32.xlu0 %v1527_v59  ;;  %v1506_v41 = vpop.f32.mrf.mxu1 }
 0x7d7   :  { %v1507_v44 = vadd.f32 %v1506_v41, %v9133_v21  ;;  %v1539_v30 = vsel %vm662_vm13, %v1515_v33, -inf }
 0x7d8   :  { %v7487_v16 = vpop.f32.mrf.mxu1 }
 0x7d9   :  { %v1518_v57 = vadd.f32 %v7487_v16, %v9138_v29  ;;  %v1533_v15 = vsel %vm662_vm13, %v1507_v44, -inf }
 0x7da   :  { %1531 = vmax.xlane.f32.xlu0 %v1530_v28  ;;  %v1509_v17 = vpop.f32.mrf.mxu1 }
 0x7db   :  { %v1510_v19 = vadd.f32 %v1509_v17, %v9144_v37  ;;  %v1542_v40 = vsel %vm662_vm13, %v1518_v57, -inf }
 0x7dd   :  { %v1536_v52 = vsel %vm662_vm13, %v1510_v19, -inf }
 0x7de   :  { %1537 = vmax.xlane.f32.xlu1 %v1536_v52  ;;  %1534 = vmax.xlane.f32.xlu0 %v1533_v15 }
 0x7e2   :  { %1543 = vmax.xlane.f32.xlu1 %v1542_v40  ;;  %1540 = vmax.xlane.f32.xlu0 %v1539_v30 }
 0x7f8   :  { %1619 = vrot.lane.b32.xlu0 %v9035_v24, %s8772_s21 }
 0x85b   :  { %v1523_v38 = vpop.xlane.xlu0 %1522 }
 0x85c   :  { %v1545_v14 = vsub.f32 %v1491_v36, %v1523_v38 }
 0x85e   :  { %v1553_v28 = vmul.f32 1.442695, %v1545_v14 }
 0x85f   :  { %v1526_v5 = vpop.xlane.xlu1 %1525  ;;  %v1529_v39 = vpop.xlane.xlu0 %1528 }
 0x860   :  { %v1547_v59 = vsub.f32 %v1499_v51, %v1529_v39  ;;  %v1546_v41 = vsub.f32 %v1494_v25, %v1526_v5 }
 0x862   :  { %v1557_v16 = vmul.f32 1.442695, %v1547_v59  ;;  %v1555_v15 = vmul.f32 1.442695, %v1546_v41 }
 0x863   :  { %v1532_v17 = vpop.xlane.xlu0 %1531 }
 0x864   :  { %v1548_v52 = vsub.f32 %v1502_v46, %v1532_v17  ;;  %8270 = vpow2.f32 %v1557_v16 }
 0x865   :  { %8272 = vpow2.f32 %v1553_v28 }
 0x866   :  { %v1559_v62 = vmul.f32 1.442695, %v1548_v52 }
 0x867   :  { %v1538_v45 = vpop.xlane.xlu1 %1537  ;;  %v1535_v40 = vpop.xlane.xlu0 %1534 }
 0x868   :  { %8274 = vpow2.f32 %v1559_v62  ;;  %v1549_v30 = vsub.f32 %v1507_v44, %v1535_v40  ;;  %v1550_v14 = vsub.f32 %v1510_v19, %v1538_v45  ;;  %v7789_v40 = vpack.i.bf16 %v9503_v34, %v9497_v48 }
 0x869   :  { %8276 = vpow2.f32 %v1555_v15 }
 0x86a   :  { %v1561_v9 = vmul.f32 1.442695, %v1549_v30  ;;  %v7799_v30 = vpack.i.bf16 %v9523_v31, %v9517_v43 }
 0x86b   :  { %v1541_v24 = vpop.xlane.xlu0 %1540  ;;  %v1544_v22 = vpop.xlane.xlu1 %1543 }
 0x86c   :  { %v1551_v36 = vsub.f32 %v1515_v33, %v1541_v24  ;;  %v1552_v51 = vsub.f32 %v1518_v57, %v1544_v22  ;;  %v1563_v57 = vmul.f32 1.442695, %v1550_v14 }
 0x86e   :  { %v1565_v38 = vmul.f32 1.442695, %v1551_v36  ;;  %v1567_v5 = vmul.f32 1.442695, %v1552_v51 }
 0x86f   :  { %v1620_v25 = vpop.permute.xlu0 %1619 }
 0x870   :  { %7488 = vmatprep.subr.bf16.mxu0 %v1620_v25  ;;  %8278 = vpow2.f32 %v1565_v38 }
 0x871   :  { %7489 = vmatpush3.bf16.msra.mxu0 %v1620_v25  ;;  %v9553_v46 = vpop.eup %8270  ;;  %8280 = vpow2.f32 %v1561_v9 }
 0x872   :  { %v1575_v62 = vsel %vm662_vm13, %v9553_v46, 0.0  ;;  %v8273_v39 = vpop.eup %8272  ;;  %8282 = vpow2.f32 %v1567_v5 }
 0x873   :  { %1576 = vadd.xlane.f32.xlu0 %v1575_v62  ;;  %v1569_v59 = vsel %vm662_vm13, %v8273_v39, 0.0  ;;  %8284 = vpow2.f32 %v1563_v57 }
 0x875   :  { %v9557_v44 = vpop.eup %8274 }
 0x876   :  { %v1578_v33 = vsel %vm662_vm13, %v9557_v44, 0.0  ;;  %v8277_v22 = vpop.eup %8276 }
 0x877   :  { %1579 = vadd.xlane.f32.xlu1 %v1578_v33  ;;  %1570 = vadd.xlane.f32.xlu0 %v1569_v59  ;;  %v1572_v9 = vsel %vm662_vm13, %v8277_v22, 0.0 }
 0x87b   :  { %1573 = vadd.xlane.f32.xlu1 %v1572_v9 }
 0x87d   :  { %v9563_v45 = vpop.eup %8278 }
 0x87e   :  { %v1587_v19 = vsel %vm662_vm13, %v9563_v45, 0.0  ;;  %v8281_v41 = vpop.eup %8280 }
 0x87f   :  { %1588 = vadd.xlane.f32.xlu1 %v1587_v19  ;;  %v1581_v16 = vsel %vm662_vm13, %v8281_v41, 0.0  ;;  %v8283_v28 = vpop.eup %8282 }
 0x880   :  { %v1590_v17 = vsel %vm662_vm13, %v8283_v28, 0.0  ;;  %v8285_v52 = vpop.eup %8284 }
 0x881   :  { %v1584_v15 = vsel %vm662_vm13, %v8285_v52, 0.0 }
 0x883   :  { %1582 = vadd.xlane.f32.xlu1 %v1581_v16 }
 0x887   :  { %1591 = vadd.xlane.f32.xlu1 %v1590_v17 }
 0x88b   :  { %1585 = vadd.xlane.f32.xlu1 %v1584_v15 }
 0x88d   :  { %1615 = vrot.lane.b32.xlu0 %v9042_v32, %s8772_s21  ;;  %v11557_v32 = vpack.i.bf16 %v9519_v42, %v9515_v49 }
 0x891   :  { %1613 = vrot.lane.b32.xlu0 %v9046_v35, %s8772_s21 }
 0x895   :  { %7790 = vrot.lane.b32.xlu0 %v7789_v40, %s8772_s21 }
 0x899   :  { %7800 = vrot.lane.b32.xlu0 %v7799_v30, %s8771_s30  ;;  %v7947_v30 = vld [vmem:[%s11480_s8 + $0x10] sm:$0xff]  }
 0x89c   :  { %1617 = vrot.lane.b32.xlu1 %v9037_v27, %s8772_s21 }
 0x8a0   :  { %7795 = vrot.lane.b32.xlu1 %v7794_v53, %s8772_s21 }
 0x8a4   :  { %7805 = vrot.lane.b32.xlu1 %v11557_v32, %s8771_s30  ;;  %v7948_v32 = vld [vmem:[%s11480_s8 + $0x8] sm:$0xff]  }
 0x8fc   :  { %v1577_v35 = vpop.xlane.xlu0 %1576 }
 0x900   :  { %v1580_v48 = vpop.xlane.xlu1 %1579  ;;  %v1571_v34 = vpop.xlane.xlu0 %1570 }
 0x901   :  { %8286 = vrcp.f32 %v1571_v34 }
 0x904   :  { %v1574_v43 = vpop.xlane.xlu1 %1573  ;;  %v1616_v49 = vpop.permute.xlu0 %1615 }
 0x905   :  { %8288 = vrcp.f32 %v1574_v43 }
 0x906   :  { %8290 = vrcp.f32 %v1580_v48 }
 0x907   :  { %8292 = vrcp.f32 %v1577_v35  ;;  %v7949_v35 = vld [vmem:[%s11480_s8] sm:$0xff]  }
 0x908   :  { %v1589_v31 = vpop.xlane.xlu1 %1588  ;;  %v1614_v5 = vpop.permute.xlu0 %1613 }
 0x90c   :  { %v1583_v24 = vpop.xlane.xlu1 %1582 }
 0x90d   :  { %8294 = vrcp.f32 %v1583_v24 }
 0x90e   :  { %v8287_v36 = vpop.eup %8286 }
 0x90f   :  { %v1601_v58 = vmul.f32 %v8287_v36, %v8273_v39 }
 0x910   :  { %v1592_v27 = vpop.xlane.xlu1 %1591 }
 0x912   :  { %v8289_v38 = vpop.eup %8288 }
 0x913   :  { %v1602_v18 = vmul.f32 %v8289_v38, %v8277_v22  ;;  %v8291_v25 = vpop.eup %8290 }
 0x914   :  { %v1586_v53 = vpop.xlane.xlu1 %1585  ;;  %v8293_v14 = vpop.eup %8292  ;;  %v1604_v62 = vmul.f32 %v8291_v25, %v9557_v44 }
 0x915   :  { %v1609_v51 = vpack.c.bf16 %v1602_v18, %v1601_v58  ;;  %8296 = vrcp.f32 %v1586_v53  ;;  %v1603_v33 = vmul.f32 %v8293_v14, %v9553_v46  ;;  %v7942_v46 = vld [vmem:[%s11480_s8 + $0x38] sm:$0xff]   ;;  %v7819_v58 = vpack.i.bf16 %v9513_v20, %v9507_v60 }
 0x916   :  { %8298 = vrcp.f32 %v1592_v27  ;;  %v11558_v18 = vpack.i.bf16 %v9509_v50, %v9505_v54  ;;  %v7791_v50 = vpop.permute.xlu0 %7790 }
 0x917   :  { %7496 = vmatprep.mubr.msk.bf16.mxu0 %vm662_vm13, %v1609_v51  ;;  %8300 = vrcp.f32 %v1589_v31  ;;  %v1610_v57 = vpack.c.bf16 %v1604_v62, %v1603_v33  ;;  %v7829_v51 = vpack.i.bf16 %v9533_v56, %v9527_v47  ;;  %v7792_v47 = vunpack.i.l.bf16 %v7791_v50 }
 0x918   :  { %v1618_v42 = vpop.permute.xlu1 %1617 }
 0x919   :  { %7490 = vmatprep.subr.bf16.mxu0 %v1618_v42 }
 0x91a   :  { %7491 = vmatpush3.bf16.msra.mxu0 %v1618_v42  ;;  %v8295_v39 = vpop.eup %8294  ;;  %v7801_v14 = vpop.permute.xlu0 %7800 }
 0x91b   :  { %7492 = vmatprep.subr.bf16.mxu0 %v1616_v49  ;;  %v1605_v59 = vmul.f32 %v8295_v39, %v8281_v41  ;;  %v7943_v41 = vld [vmem:[%s11480_s8 + $0x30] sm:$0xff]   ;;  %v7802_v33 = vunpack.i.l.bf16 %v7801_v14 }
 0x91c   :  { %v7796_v54 = vpop.permute.xlu1 %7795 }
 0x91d   :  { %v7798_v56 = vunpack.i.h.bf16 %v7796_v54  ;;  %v7797_v62 = vunpack.i.l.bf16 %v7796_v54 }
 0x91e   :  { %7493 = vmatpush3.bf16.msra.mxu0 %v1616_v49  ;;  %v11559_v49 = vpack.i.bf16 %v9529_v61, %v9525_v13  ;;  %v7803_v61 = vunpack.i.h.bf16 %v7801_v14 }
 0x91f   :  { %7494 = vmatprep.subr.bf16.mxu0 %v1614_v5 }
 0x920   :  { %v7806_v20 = vpop.permute.xlu1 %7805 }
 0x921   :  { %v7808_v39 = vunpack.i.h.bf16 %v7806_v20  ;;  %v7807_v13 = vunpack.i.l.bf16 %v7806_v20 }
 0x922   :  { %v8297_v22 = vpop.eup %8296  ;;  %7495 = vmatpush3.bf16.msra.mxu0 %v1614_v5  ;;  %v7793_v5 = vunpack.i.h.bf16 %v7791_v50 }
 0x923   :  { %v1606_v9 = vmul.f32 %v8297_v22, %v8285_v52  ;;  %v8299_v19 = vpop.eup %8298  ;;  %7504 = vmatprep.subr.bf16.mxu0 %v7942_v46  ;;  %v7946_v52 = vld [vmem:[%s11480_s8 + $0x18] sm:$0xff]  }
 0x924   :  { %v8301_v17 = vpop.eup %8300  ;;  %v1608_v15 = vmul.f32 %v8299_v19, %v8283_v28  ;;  %v7944_v28 = vld [vmem:[%s11480_s8 + $0x28] sm:$0xff]   ;;  %v1798_v19 = vsel %vm572_vm0, %v9257_v0, %v7792_v47 }
 0x925   :  { %7497 = vmatmul.mubr.msk.bf16.vlgmr.msra.gmra.mxu0 %vm662_vm13, %v1610_v57  ;;  %v1611_v16 = vpack.c.bf16 %v1606_v9, %v1605_v59  ;;  %v1607_v40 = vmul.f32 %v8301_v17, %v9563_v45  ;;  %v7945_v45 = vld [vmem:[%s11480_s8 + $0x20] sm:$0xff]   ;;  %v1799_v9 = vsel %vm572_vm0, %v9261_v3, %v7793_v5  ;;  %v1800_v17 = vsel %vm572_vm0, %v9255_v63, %v7797_v62 }
 0x926   :  { %7505 = vmatpush3.bf16.msra.mxu0 %v7942_v46  ;;  %v1806_v0 = vsel %vm662_vm13, %v1798_v19, %v7802_v33 }
 0x927   :  { %7500 = vmatprep.mubr.msk.bf16.mxu0 %vm662_vm13, %v1611_v16  ;;  %v1612_v44 = vpack.c.bf16 %v1608_v15, %v1607_v40  ;;  %7506 = vmatprep.subr.bf16.mxu0 %v7943_v41  ;;  %v1801_v16 = vsel %vm572_vm0, %v9259_v1, %v7798_v56  ;;  %v1808_v40 = vsel %vm662_vm13, %v1800_v17, %v7807_v13 }
 0x92a   :  { %7507 = vmatpush3.bf16.msra.mxu0 %v7943_v41 }
 0x92b   :  { %7508 = vmatprep.subr.bf16.mxu0 %v7944_v28 }
 0x92d   :  { %7501 = vmatmul.mubr.msk.bf16.gmra.mxu0 %vm662_vm13, %v1612_v44  ;;  %v1809_v44 = vsel %vm662_vm13, %v1801_v16, %v7808_v39  ;;  %v8739_v16 = vld [vmem:[%s11546_s20 + $0x10] sm:$0xff] }
 0x92e   :  { %7509 = vmatpush3.bf16.msra.mxu0 %v7944_v28 }
 0x92f   :  { %7510 = vmatprep.subr.bf16.mxu0 %v7945_v45 }
 0x932   :  { %7511 = vmatpush3.bf16.msra.mxu0 %v7945_v45 }
 0x933   :  { %7512 = vmatprep.subr.bf16.mxu0 %v7946_v52 }
 0x936   :  { %7513 = vmatpush3.bf16.msra.mxu0 %v7946_v52  ;;  %v1807_v52 = vsel %vm662_vm13, %v1799_v9, %v7803_v61  ;;  %v11560_v61 = vmov 0   ;;  %v6565_v9 = vld [vmem:[%s11481_s9] ss:$0 sm:$0xff] }
 0x937   :  { %7514 = vmatprep.subr.bf16.mxu0 %v7947_v30 }
 0x93a   :  { %7515 = vmatpush3.bf16.msra.mxu0 %v7947_v30 }
 0x93b   :  { %7516 = vmatprep.subr.bf16.mxu0 %v7948_v32 }
 0x93e   :  { %7517 = vmatpush3.bf16.msra.mxu0 %v7948_v32 }
 0x93f   :  { %7518 = vmatprep.subr.bf16.mxu0 %v7949_v35 }
 0x942   :  { %7519 = vmatpush3.bf16.msra.mxu0 %v7949_v35 }
 0x9e5   :  { %v7498_v48 = vpop.f32.mrf.mxu0 }
 0x9e7   :  { %v1671_v34 = vpop.f32.mrf.mxu0 }
 0x9e9   :  { %v7499_v43 = vpop.f32.mrf.mxu0 }
 0x9ea   :  { %v7814_v31 = vpack.i.bf16 %v7499_v43, %v7498_v48 }
 0x9eb   :  { %v1674_v24 = vpop.f32.mrf.mxu0 }
 0x9ec   :  { %v7809_v36 = vpack.i.bf16 %v1674_v24, %v1671_v34  ;;  %7815 = vrot.lane.b32.xlu1 %v7814_v31, %s8770_s0 }
 0x9ed   :  { %v7502_v27 = vpop.f32.mrf.mxu0 }
 0x9ee   :  { %7810 = vrot.lane.b32.xlu0 %v7809_v36, %s8770_s0 }
 0x9ef   :  { %v1687_v38 = vpop.f32.mrf.mxu0 }
 0x9f0   :  { %7825 = vrot.lane.b32.xlu1 %v11558_v18, %s8772_s21 }
 0x9f1   :  { %v7503_v53 = vpop.f32.mrf.mxu0 }
 0x9f2   :  { %7820 = vrot.lane.b32.xlu0 %v7819_v58, %s8772_s21  ;;  %v7844_v25 = vpack.i.bf16 %v7503_v53, %v7502_v27 }
 0x9f3   :  { %v1690_v42 = vpop.f32.mrf.mxu0 }
 0x9f4   :  { %7835 = vrot.lane.b32.xlu1 %v11559_v49, %s8771_s30  ;;  %v7839_v60 = vpack.i.bf16 %v1690_v42, %v1687_v38 }
 0x9f6   :  { %7830 = vrot.lane.b32.xlu0 %v7829_v51, %s8771_s30 }
 0x9f8   :  { %7845 = vrot.lane.b32.xlu1 %v7844_v25, %s8770_s0 }
 0x9fa   :  { %7840 = vrot.lane.b32.xlu0 %v7839_v60, %s8770_s0 }
 0xa5e   :  { %v7816_v22 = vpop.permute.xlu1 %7815 }
 0xa5f   :  { %v7818_v57 = vunpack.i.h.bf16 %v7816_v22  ;;  %v7817_v59 = vunpack.i.l.bf16 %v7816_v22 }
 0xa60   :  { %v7811_v15 = vpop.permute.xlu0 %7810 }
 0xa61   :  { %v7813_v46 = vunpack.i.h.bf16 %v7811_v15  ;;  %v7812_v41 = vunpack.i.l.bf16 %v7811_v15  ;;  %v1818_v28 = vsel %vm1814_vm7, %v1809_v44, %v7818_v57  ;;  %v1817_v3 = vsel %vm1814_vm7, %v1808_v40, %v7817_v59  ;;  %v8738_v57 = vld [vmem:[%s11546_s20] sm:$0xff]  ;;  %v8740_v44 = vld [vmem:[%s11546_s20 + $0x8] sm:$0xff] }
 0xa62   :  { %v7826_v45 = vpop.permute.xlu1 %7825  ;;  %v1824_v35 = vpack.c.bf16 %v1818_v28, %v1817_v3  ;;  %v8741_v28 = vld [vmem:[%s11546_s20 + $0x18] sm:$0xff] }
 0xa63   :  { %v1815_v1 = vsel %vm1814_vm7, %v1806_v0, %v7812_v41  ;;  %v1816_v63 = vsel %vm1814_vm7, %v1807_v52, %v7813_v46  ;;  %v7828_v34 = vunpack.i.h.bf16 %v7826_v45  ;;  %v7827_v43 = vunpack.i.l.bf16 %v7826_v45 }
 0xa64   :  { %v7821_v30 = vpop.permute.xlu0 %7820  ;;  %v1823_v32 = vpack.c.bf16 %v1816_v63, %v1815_v1  ;;  %v8742_v63 = vld [vmem:[%s11546_s20 + $0x20] sm:$0xff] }
 0xa65   :  { %v7823_v31 = vunpack.i.h.bf16 %v7821_v30  ;;  %v7822_v24 = vunpack.i.l.bf16 %v7821_v30  ;;  %v1805_v42 = vsel %vm572_vm0, %v9267_v10, %v7828_v34  ;;  %v1804_v25 = vsel %vm572_vm0, %v9263_v7, %v7827_v43 }
 0xa66   :  { %v7836_v48 = vpop.permute.xlu1 %7835  ;;  %7520 = vmatprep.mubr.bf16.mxu0 %v1823_v32 }
 0xa67   :  { %7521 = vmatmul.mubr.bf16.vlgmr.msra.gmra.mxu0 %v1824_v35  ;;  %v7838_v27 = vunpack.i.h.bf16 %v7836_v48  ;;  %v7837_v38 = vunpack.i.l.bf16 %v7836_v48  ;;  %v1803_v60 = vsel %vm572_vm0, %v9269_v12, %v7823_v31  ;;  %v1802_v54 = vsel %vm572_vm0, %v9265_v8, %v7822_v24  ;;  %v8743_v35 = vld [vmem:[%s11546_s20 + $0x30] sm:$0xff]  ;;  %v8744_v31 = vld [vmem:[%s11546_s20 + $0x28] sm:$0xff] }
 0xa68   :  { %v7831_v36 = vpop.permute.xlu0 %7830 }
 0xa69   :  { %v7833_v58 = vunpack.i.h.bf16 %v7831_v36  ;;  %v7832_v18 = vunpack.i.l.bf16 %v7831_v36  ;;  %v1812_v5 = vsel %vm662_vm13, %v1804_v25, %v7837_v38  ;;  %v1813_v47 = vsel %vm662_vm13, %v1805_v42, %v7838_v27  ;;  %v8745_v27 = vld [vmem:[%s11546_s20 + $0x38] sm:$0xff] }
 0xa6a   :  { %v7846_v53 = vpop.permute.xlu1 %7845  ;;  %v7955_v42 = vld [vmem:[%s11484_s12 + $0xec] ss:$16 sps:$4 sm:$0xff]  }
 0xa6b   :  { %v7848_v51 = vunpack.i.h.bf16 %v7846_v53  ;;  %v7847_v49 = vunpack.i.l.bf16 %v7846_v53  ;;  %v1810_v56 = vsel %vm662_vm13, %v1802_v54, %v7832_v18  ;;  %v1811_v10 = vsel %vm662_vm13, %v1803_v60, %v7833_v58  ;;  %v7950_v53 = vld [vmem:[%s11484_s12 + $0xe0] ss:$16 sps:$4 sm:$0xff]   ;;  %2388 = vmatprep.subr.bf16.mxu0 %v7955_v42  ;;  %v7976_v42 = vld [vmem:[%s11484_s12 + $0x64] ss:$16 sps:$4 sm:$0xff]  }
 0xa6c   :  { %v7841_v50 = vpop.permute.xlu0 %7840 }
 0xa6d   :  { %v7843_v20 = vunpack.i.h.bf16 %v7841_v50  ;;  %v7842_v14 = vunpack.i.l.bf16 %v7841_v50  ;;  %v1821_v62 = vsel %vm1814_vm7, %v1812_v5, %v7847_v49  ;;  %v1822_v7 = vsel %vm1814_vm7, %v1813_v47, %v7848_v51  ;;  %v7952_v51 = vld [vmem:[%s11484_s12 + $0xe4] ss:$16 sps:$4 sm:$0xff]   ;;  %v7953_v49 = vld [vmem:[%s11484_s12 + $0xe8] ss:$16 sps:$4 sm:$0xff]  }
 0xa6e   :  { %v1826_v13 = vpack.c.bf16 %v1822_v7, %v1821_v62  ;;  %2315 = vmatprep.subr.bf16.mxu1 %v7952_v51  ;;  %2389 = vmatpush1.bf16.msra.mxu0 %v7953_v49  ;;  %v7968_v51 = vld [vmem:[%s11484_s12 + $0x80] ss:$16 sps:$4 sm:$0xff]   ;;  %v7971_v49 = vld [vmem:[%s11484_s12 + $0x88] ss:$16 sps:$4 sm:$0xff]  }
 0xa6f   :  { %v1819_v12 = vsel %vm1814_vm7, %v1810_v56, %v7842_v14  ;;  %v1820_v39 = vsel %vm1814_vm7, %v1811_v10, %v7843_v20  ;;  %2316 = vmatpush1.bf16.msra.mxu1 %v7950_v53  ;;  %v7973_v53 = vld [vmem:[%s11484_s12 + $0x8c] ss:$16 sps:$4 sm:$0xff]  }
 0xa70   :  { %v1825_v8 = vpack.c.bf16 %v1820_v39, %v1819_v12 }
 0xa72   :  { %7524 = vmatprep.mubr.bf16.mxu0 %v1825_v8 }
 0xa73   :  { %7525 = vmatmul.mubr.bf16.gmra.mxu0 %v1826_v13 }
 0xa74   :  { %2420 = vmatprep.mubr.bf16.mxu0 %v11560_v61 }
 0xb27   :  { %v7522_v33 = vpop.f32.mrf.mxu0 }
 0xb28   :  { %v1958_v17 = vadd.f32 %v8739_v16, %v7522_v33 }
 0xb29   :  { %v1925_v22 = vpop.f32.mrf.mxu0 }
 0xb2a   :  { %v1956_v59 = vadd.f32 %v8738_v57, %v1925_v22  ;;  %v9687_v41 = vadd.f32 %v6565_v9, %v1958_v17 }
 0xb2b   :  { %v7523_v19 = vpop.f32.mrf.mxu0 }
 0xb2c   :  { %v9681_v15 = vadd.f32 %v6565_v9, %v1956_v59  ;;  %11562 = vst [vmem:[#allocation17_spill] sm:$0xff] %v9687_v41  ;;  %v1959_v3 = vadd.f32 %v8741_v28, %v7523_v19  ;;  %v7959_v28 = vld [vmem:[%s11484_s12 + $0xc8] ss:$16 sps:$4 sm:$0xff]  }
 0xb2d   :  { %v1928_v40 = vpop.f32.mrf.mxu0 }
 0xb2e   :  { %11561 = vst [vmem:[#allocation16_spill] sm:$0xff] %v9681_v15  ;;  %v1957_v46 = vadd.f32 %v8740_v44, %v1928_v40  ;;  %1981 = vadd.xlane.f32.xlu0 %v9681_v15  ;;  %v9696_v52 = vadd.f32 %v6565_v9, %v1959_v3  ;;  %v7958_v40 = vld [vmem:[%s11484_s12 + $0xc4] ss:$16 sps:$4 sm:$0xff]   ;;  %v7961_v44 = vld [vmem:[%s11484_s12 + $0xcc] ss:$16 sps:$4 sm:$0xff]  }
 0xb2f   :  { %2317 = vmatprep.subr.bf16.mxu1 %v7958_v40  ;;  %2390 = vmatprep.subr.bf16.mxu0 %v7961_v44 }
 0xb30   :  { %v9692_v45 = vadd.f32 %v6565_v9, %v1957_v46  ;;  %11564 = vst [vmem:[#allocation19_spill] sm:$0xff] %v9696_v52  ;;  %v7956_v46 = vld [vmem:[%s11484_s12 + $0xc0] ss:$16 sps:$4 sm:$0xff]   ;;  %2391 = vmatpush1.bf16.msra.mxu0 %v7959_v28 }
 0xb31   :  { %2318 = vmatpush1.bf16.msra.mxu1 %v7956_v46 }
 0xb32   :  { %11563 = vst [vmem:[#allocation18_spill] sm:$0xff] %v9692_v45  ;;  %1985 = vadd.xlane.f32.xlu0 %v9687_v41  ;;  %1983 = vadd.xlane.f32.xlu1 %v9692_v45 }
 0xb33   :  { %v7526_v0 = vpop.f32.mrf.mxu0 }
 0xb34   :  { %v1962_v48 = vadd.f32 %v8743_v35, %v7526_v0  ;;  %v7964_v35 = vld [vmem:[%s11484_s12 + $0xa4] ss:$16 sps:$4 sm:$0xff]  }
 0xb35   :  { %v1941_v1 = vpop.f32.mrf.mxu0  ;;  %2319 = vmatprep.subr.bf16.mxu1 %v7964_v35 }
 0xb36   :  { %v1960_v30 = vadd.f32 %v8742_v63, %v1941_v1  ;;  %1987 = vadd.xlane.f32.xlu0 %v9696_v52  ;;  %v9711_v36 = vadd.f32 %v6565_v9, %v1962_v48  ;;  %v7967_v48 = vld [vmem:[%s11484_s12 + $0xac] ss:$16 sps:$4 sm:$0xff]  }
 0xb37   :  { %v7527_v32 = vpop.f32.mrf.mxu0  ;;  %2392 = vmatprep.subr.bf16.mxu0 %v7967_v48 }
 0xb38   :  { %v9705_v34 = vadd.f32 %v6565_v9, %v1960_v30  ;;  %11566 = vst [vmem:[#allocation21_spill] sm:$0xff] %v9711_v36  ;;  %v1963_v38 = vadd.f32 %v8745_v27, %v7527_v32 }
 0xb39   :  { %v1944_v43 = vpop.f32.mrf.mxu0 }
 0xb3a   :  { %11565 = vst [vmem:[#allocation20_spill] sm:$0xff] %v9705_v34  ;;  %v1961_v24 = vadd.f32 %v8744_v31, %v1944_v43  ;;  %1989 = vadd.xlane.f32.xlu0 %v9705_v34  ;;  %v9720_v18 = vadd.f32 %v6565_v9, %v1963_v38  ;;  %v7962_v31 = vld [vmem:[%s11484_s12 + $0xa0] ss:$16 sps:$4 sm:$0xff]   ;;  %v7970_v38 = vld [vmem:[%s11484_s12 + $0x84] ss:$16 sps:$4 sm:$0xff]  }
 0xb3b   :  { %2320 = vmatpush1.bf16.msra.mxu1 %v7962_v31 }
 0xb3c   :  { %v9716_v58 = vadd.f32 %v6565_v9, %v1961_v24  ;;  %11568 = vst [vmem:[#allocation23_spill] sm:$0xff] %v9720_v18  ;;  %v7965_v24 = vld [vmem:[%s11484_s12 + $0xa8] ss:$16 sps:$4 sm:$0xff]   ;;  %2321 = vmatprep.subr.bf16.mxu1 %v7970_v38 }
 0xb3d   :  { %2393 = vmatpush1.bf16.msra.mxu0 %v7965_v24 }
 0xb3e   :  { %11567 = vst [vmem:[#allocation22_spill] sm:$0xff] %v9716_v58  ;;  %1993 = vadd.xlane.f32.xlu0 %v9711_v36  ;;  %1991 = vadd.xlane.f32.xlu1 %v9716_v58 }
 0xb3f   :  { %2394 = vmatprep.subr.bf16.mxu0 %v7973_v53  ;;  %2322 = vmatpush1.bf16.msra.mxu1 %v7968_v51 }
 0xb40   :  { %2323 = vmatprep.subr.bf16.mxu1 %v7976_v42 }
 0xb41   :  { %2395 = vmatpush1.bf16.msra.mxu0 %v7971_v49 }
 0xb42   :  { %1995 = vadd.xlane.f32.xlu1 %v9720_v18 }
 0xbb7   :  { %v1982_v25 = vpop.xlane.xlu0 %1981 }
 0xbb8   :  { %v1997_v60 = vmul.f32 0.0078125, %v1982_v25  ;;  %v7979_v25 = vld [vmem:[%s11484_s12 + $0x6c] ss:$16 sps:$4 sm:$0xff]  }
 0xbb9   :  { %2396 = vmatprep.subr.bf16.mxu0 %v7979_v25 }
 0xbba   :  { %v9736_v54 = vsub.f32 %v9681_v15, %v1997_v60  ;;  %v7974_v60 = vld [vmem:[%s11484_s12 + $0x60] ss:$16 sps:$4 sm:$0xff]  }
 0xbbb   :  { %v1986_v50 = vpop.xlane.xlu0 %1985  ;;  %v1984_v20 = vpop.xlane.xlu1 %1983  ;;  %2324 = vmatpush1.bf16.msra.mxu1 %v7974_v60 }
 0xbbc   :  { %v1999_v14 = vmul.f32 0.0078125, %v1986_v50  ;;  %v1998_v5 = vmul.f32 0.0078125, %v1984_v20  ;;  %v2013_v47 = vmul.f32 %v9736_v54, %v9736_v54  ;;  %v7977_v50 = vld [vmem:[%s11484_s12 + $0x68] ss:$16 sps:$4 sm:$0xff]   ;;  %v7982_v20 = vld [vmem:[%s11484_s12 + $0x44] ss:$16 sps:$4 sm:$0xff]  }
 0xbbd   :  { %2397 = vmatpush1.bf16.msra.mxu0 %v7977_v50  ;;  %2325 = vmatprep.subr.bf16.mxu1 %v7982_v20  ;;  %v6566_v50 = vld [vmem:[%s11482_s10] ss:$0 sm:$0xff] }
 0xbbe   :  { %v9741_v56 = vsub.f32 %v9687_v41, %v1999_v14  ;;  %v9744_v10 = vsub.f32 %v9692_v45, %v1998_v5  ;;  %2021 = vadd.xlane.f32.xlu0 %v2013_v47  ;;  %v7985_v14 = vld [vmem:[%s11484_s12 + $0x4c] ss:$16 sps:$4 sm:$0xff]   ;;  %v7980_v5 = vld [vmem:[%s11484_s12 + $0x40] ss:$16 sps:$4 sm:$0xff]   ;;  %v7983_v47 = vld [vmem:[%s11484_s12 + $0x48] ss:$16 sps:$4 sm:$0xff]  }
 0xbbf   :  { %v1988_v62 = vpop.xlane.xlu0 %1987  ;;  %2398 = vmatprep.subr.bf16.mxu0 %v7985_v14  ;;  %2326 = vmatpush1.bf16.msra.mxu1 %v7980_v5 }
 0xbc0   :  { %v2000_v7 = vmul.f32 0.0078125, %v1988_v62  ;;  %v2015_v12 = vmul.f32 %v9741_v56, %v9741_v56  ;;  %v2014_v39 = vmul.f32 %v9744_v10, %v9744_v10  ;;  %v7988_v62 = vld [vmem:[%s11484_s12 + $0x24] ss:$16 sps:$4 sm:$0xff]  }
 0xbc1   :  { %2399 = vmatpush1.bf16.msra.mxu0 %v7983_v47  ;;  %2327 = vmatprep.subr.bf16.mxu1 %v7988_v62 }
 0xbc2   :  { %v9751_v8 = vsub.f32 %v9696_v52, %v2000_v7  ;;  %2025 = vadd.xlane.f32.xlu0 %v2015_v12  ;;  %2023 = vadd.xlane.f32.xlu1 %v2014_v39  ;;  %v7991_v7 = vld [vmem:[%s11484_s12 + $0x2c] ss:$16 sps:$4 sm:$0xff]   ;;  %v7986_v12 = vld [vmem:[%s11484_s12 + $0x20] ss:$16 sps:$4 sm:$0xff]   ;;  %v7989_v39 = vld [vmem:[%s11484_s12 + $0x28] ss:$16 sps:$4 sm:$0xff]  }
 0xbc3   :  { %v1990_v13 = vpop.xlane.xlu0 %1989  ;;  %2400 = vmatprep.subr.bf16.mxu0 %v7991_v7  ;;  %2328 = vmatpush1.bf16.msra.mxu1 %v7986_v12 }
 0xbc4   :  { %v2001_v33 = vmul.f32 0.0078125, %v1990_v13  ;;  %v2016_v22 = vmul.f32 %v9751_v8, %v9751_v8  ;;  %v7992_v13 = vld [vmem:[%s11484_s12] ss:$16 sps:$4 sm:$0xff]  }
 0xbc5   :  { %2401 = vmatpush1.bf16.msra.mxu0 %v7989_v39 }
 0xbc6   :  { %v9756_v57 = vsub.f32 %v9705_v34, %v2001_v33  ;;  %2027 = vadd.xlane.f32.xlu1 %v2016_v22  ;;  %v7994_v33 = vld [vmem:[%s11484_s12 + $0x4] ss:$16 sps:$4 sm:$0xff]   ;;  %v7995_v22 = vld [vmem:[%s11484_s12 + $0x8] ss:$16 sps:$4 sm:$0xff]  }
 0xbc7   :  { %v1994_v59 = vpop.xlane.xlu0 %1993  ;;  %v1992_v9 = vpop.xlane.xlu1 %1991  ;;  %2329 = vmatprep.subr.bf16.mxu1 %v7994_v33 }
 0xbc8   :  { %v2003_v19 = vmul.f32 0.0078125, %v1994_v59  ;;  %v2002_v16 = vmul.f32 0.0078125, %v1992_v9  ;;  %v2017_v17 = vmul.f32 %v9756_v57, %v9756_v57  ;;  %v7997_v59 = vld [vmem:[%s11484_s12 + $0xc] ss:$16 sps:$4 sm:$0xff]   ;;  %2330 = vmatpush1.bf16.msra.mxu1 %v7992_v13 }
 0xbc9   :  { %2402 = vmatprep.subr.bf16.mxu0 %v7997_v59 }
 0xbca   :  { %v9773_v3 = vsub.f32 %v9711_v36, %v2003_v19  ;;  %v9776_v0 = vsub.f32 %v9716_v58, %v2002_v16  ;;  %2029 = vadd.xlane.f32.xlu0 %v2017_v17  ;;  %2403 = vmatpush1.bf16.msra.mxu0 %v7995_v22 }
 0xbcb   :  { %v1996_v1 = vpop.xlane.xlu1 %1995 }
 0xbcc   :  { %v2004_v63 = vmul.f32 0.0078125, %v1996_v1  ;;  %v2019_v30 = vmul.f32 %v9773_v3, %v9773_v3  ;;  %v2018_v32 = vmul.f32 %v9776_v0, %v9776_v0 }
 0xbce   :  { %v9789_v43 = vsub.f32 %v9720_v18, %v2004_v63  ;;  %2033 = vadd.xlane.f32.xlu0 %v2019_v30  ;;  %2031 = vadd.xlane.f32.xlu1 %v2018_v32 }
 0xbd0   :  { %v2020_v27 = vmul.f32 %v9789_v43, %v9789_v43 }
 0xbd2   :  { %2035 = vadd.xlane.f32.xlu1 %v2020_v27 }
 0xc47   :  { %v2022_v9 = vpop.xlane.xlu0 %2021 }
 0xc48   :  { %v2037_v19 = vmul.f32 0.0078125, %v2022_v9 }
 0xc4a   :  { %v2045_v16 = vadd.f32 1e-05, %v2037_v19 }
 0xc4b   :  { %v2026_v17 = vpop.xlane.xlu0 %2025  ;;  %v2024_v40 = vpop.xlane.xlu1 %2023 }
 0xc4c   :  { %8302 = vrsqrt.f32 %v2045_v16  ;;  %v2039_v44 = vmul.f32 0.0078125, %v2026_v17  ;;  %v2038_v46 = vmul.f32 0.0078125, %v2024_v40 }
 0xc4e   :  { %v2046_v28 = vadd.f32 1e-05, %v2038_v46  ;;  %v2047_v1 = vadd.f32 1e-05, %v2039_v44 }
 0xc4f   :  { %v2028_v63 = vpop.xlane.xlu1 %2027 }
 0xc50   :  { %v2040_v30 = vmul.f32 0.0078125, %v2028_v63  ;;  %8304 = vrsqrt.f32 %v2046_v28 }
 0xc51   :  { %8306 = vrsqrt.f32 %v2047_v1 }
 0xc52   :  { %v2048_v32 = vadd.f32 1e-05, %v2040_v30 }
 0xc53   :  { %v2030_v35 = vpop.xlane.xlu0 %2029 }
 0xc54   :  { %8308 = vrsqrt.f32 %v2048_v32  ;;  %v2041_v48 = vmul.f32 0.0078125, %v2030_v35 }
 0xc56   :  { %v2049_v31 = vadd.f32 1e-05, %v2041_v48 }
 0xc57   :  { %v2032_v24 = vpop.xlane.xlu1 %2031  ;;  %v2034_v27 = vpop.xlane.xlu0 %2033 }
 0xc58   :  { %v2042_v38 = vmul.f32 0.0078125, %v2032_v24  ;;  %8310 = vrsqrt.f32 %v2049_v31  ;;  %v2043_v42 = vmul.f32 0.0078125, %v2034_v27 }
 0xc59   :  { %v8303_v53 = vpop.eup %8302 }
 0xc5a   :  { %v2050_v51 = vadd.f32 1e-05, %v2042_v38  ;;  %v2061_v49 = vmul.f32 %v8303_v53, %v9736_v54  ;;  %v2051_v47 = vadd.f32 1e-05, %v2043_v42  ;;  %v6567_v54 = vld [vmem:[%s11483_s11] ss:$0 sm:$0xff] }
 0xc5b   :  { %v2036_v25 = vpop.xlane.xlu1 %2035  ;;  %v8002_v42 = vld [vmem:[%s11486_s14 + $0x70] sm:$0xff]  }
 0xc5c   :  { %v2044_v60 = vmul.f32 0.0078125, %v2036_v25  ;;  %8312 = vrsqrt.f32 %v2050_v51  ;;  %v2075_v62 = vmul.f32 %v6566_v50, %v2061_v49  ;;  %v8000_v51 = vld [vmem:[%s11486_s14 + $0x38] sm:$0xff]   ;;  %v8003_v25 = vld [vmem:[%s11486_s14 + $0xf0] sm:$0xff]  }
 0xc5d   :  { %v8305_v20 = vpop.eup %8304  ;;  %v8001_v49 = vld [vmem:[%s11486_s14 + $0xb8] sm:$0xff]  }
 0xc5e   :  { %v2052_v14 = vadd.f32 1e-05, %v2044_v60  ;;  %v2062_v5 = vmul.f32 %v8305_v20, %v9744_v10  ;;  %v8307_v7 = vpop.eup %8306  ;;  %v2089_v33 = vadd.f32 %v6567_v54, %v2075_v62  ;;  %v8004_v60 = vld [vmem:[%s11486_s14 + $0x30] sm:$0xff]   ;;  %v8006_v20 = vld [vmem:[%s11486_s14 + $0x68] sm:$0xff]   ;;  %v8010_v62 = vld [vmem:[%s11486_s14 + $0x60] sm:$0xff]  }
 0xc5f   :  { %v2063_v59 = vmul.f32 %v8307_v7, %v9741_v56  ;;  %v8011_v7 = vld [vmem:[%s11486_s14 + $0xe0] sm:$0xff]  }
 0xc60   :  { %8314 = vrsqrt.f32 %v2052_v14  ;;  %v2076_v39 = vmul.f32 %v6566_v50, %v2062_v5  ;;  %v8007_v14 = vld [vmem:[%s11486_s14 + $0xe8] sm:$0xff]  }
 0xc61   :  { %v8309_v12 = vpop.eup %8308  ;;  %8316 = vrsqrt.f32 %v2051_v47  ;;  %v2077_v10 = vmul.f32 %v6566_v50, %v2063_v59  ;;  %v8008_v5 = vld [vmem:[%s11486_s14 + $0x28] sm:$0xff]   ;;  %v8018_v59 = vld [vmem:[%s11486_s14 + $0x50] sm:$0xff]  }
 0xc62   :  { %v2064_v13 = vmul.f32 %v8309_v12, %v9751_v8  ;;  %v2090_v22 = vadd.f32 %v6567_v54, %v2076_v39  ;;  %v8009_v47 = vld [vmem:[%s11486_s14 + $0xa8] sm:$0xff]   ;;  %v8013_v12 = vld [vmem:[%s11486_s14 + $0xa0] sm:$0xff]   ;;  %v8014_v39 = vld [vmem:[%s11486_s14 + $0x58] sm:$0xff]  }
 0xc63   :  { %v2091_v44 = vadd.f32 %v6567_v54, %v2077_v10  ;;  %v8021_v10 = vld [vmem:[%s11486_s14 + $0x90] sm:$0xff]  }
 0xc64   :  { %v2097_v9 = vpack.c.bf16 %v2090_v22, %v2089_v33  ;;  %v2078_v19 = vmul.f32 %v6566_v50, %v2064_v13  ;;  %v8015_v13 = vld [vmem:[%s11486_s14 + $0xd8] sm:$0xff]  }
 0xc65   :  { %v8311_v16 = vpop.eup %8310  ;;  %v8016_v33 = vld [vmem:[%s11486_s14 + $0x18] sm:$0xff]  }
 0xc66   :  { %2348 = vmatmul.mubr.bf16.vlgmr.msra.gmra.mxu1 %v2097_v9  ;;  %2421 = vmatmul.mubr.bf16.vlgmr.msra.gmra.mxu0 %v2097_v9  ;;  %v2092_v17 = vadd.f32 %v6567_v54, %v2078_v19  ;;  %v2065_v8 = vmul.f32 %v8311_v16, %v9756_v57  ;;  %v8017_v22 = vld [vmem:[%s11486_s14 + $0x98] sm:$0xff]   ;;  %v8019_v9 = vld [vmem:[%s11486_s14 + $0xd0] sm:$0xff]   ;;  %v8022_v16 = vld [vmem:[%s11486_s14 + $0x48] sm:$0xff]  }
 0xc67   :  { %2357 = vmatprep.mubr.bf16.mxu1 %v11560_v61  ;;  %2430 = vmatprep.mubr.bf16.mxu0 %v11560_v61  ;;  %v8020_v19 = vld [vmem:[%s11486_s14 + $0x10] sm:$0xff]  }
 0xc68   :  { %v2098_v28 = vpack.c.bf16 %v2092_v17, %v2091_v44  ;;  %v2079_v63 = vmul.f32 %v6566_v50, %v2065_v8  ;;  %v8023_v17 = vld [vmem:[%s11486_s14 + $0xc8] sm:$0xff]   ;;  %v8026_v8 = vld [vmem:[%s11486_s14 + $0x40] sm:$0xff]  }
 0xc69   :  { %v8313_v40 = vpop.eup %8312  ;;  %v8025_v44 = vld [vmem:[%s11486_s14 + $0x88] sm:$0xff]  }
 0xc6a   :  { %v2066_v46 = vmul.f32 %v8313_v40, %v9776_v0  ;;  %v2093_v48 = vadd.f32 %v6567_v54, %v2079_v63  ;;  %v8024_v40 = vld [vmem:[%s11486_s14 + $0x8] sm:$0xff]   ;;  %v11498_v63 = vsub.s32 2, %v9093_v55 }
 0xc6c   :  { %v2080_v1 = vmul.f32 %v6566_v50, %v2066_v46  ;;  %v8027_v46 = vld [vmem:[%s11486_s14 + $0xc0] sm:$0xff]  }
 0xc6d   :  { %v8315_v56 = vpop.eup %8314 }
 0xc6e   :  { %2358 = vmatmul.mubr.bf16.gmra.mxu1 %v2098_v28  ;;  %2431 = vmatmul.mubr.bf16.gmra.mxu0 %v2098_v28  ;;  %v8317_v30 = vpop.eup %8316  ;;  %v2094_v32 = vadd.f32 %v6567_v54, %v2080_v1  ;;  %v2068_v35 = vmul.f32 %v8315_v56, %v9789_v43  ;;  %v7998_v43 = vld [vmem:[%s11486_s14 + $0x78] sm:$0xff]   ;;  %v8028_v28 = vld [vmem:[%s11486_s14] sm:$0xff]   ;;  %v11499_v56 = vsub.s32 0, %v9093_v55 }
 0xc6f   :  { %2367 = vmatprep.mubr.bf16.mxu1 %v11560_v61  ;;  %2440 = vmatprep.mubr.bf16.mxu0 %v11560_v61  ;;  %v2067_v31 = vmul.f32 %v8317_v30, %v9773_v3  ;;  %v7999_v3 = vld [vmem:[%s11486_s14 + $0xf8] sm:$0xff]   ;;  %v8029_v1 = vld [vmem:[%s11486_s14 + $0x80] sm:$0xff]  }
 0xc70   :  { %v2099_v57 = vpack.c.bf16 %v2094_v32, %v2093_v48  ;;  %v2082_v24 = vmul.f32 %v6566_v50, %v2068_v35  ;;  %7084 = vmatprep.subr.bf16.mxu1 %v7998_v43  ;;  %7124 = vmatprep.subr.bf16.mxu0 %v7999_v3  ;;  %v2133_v30 = vld [vmem:[%s11485_s13] sm:$0xf]  ;;  %v11497_v32 = vsub.s32 1, %v9093_v55  ;;  %v11496_v35 = vsub.s32 3, %v9093_v55 }
 0xc71   :  { %v2081_v0 = vmul.f32 %v6566_v50, %v2067_v31  ;;  %7085 = vmatpush3.bf16.msra.mxu1 %v8000_v51  ;;  %7125 = vmatpush3.bf16.msra.mxu0 %v8001_v49  ;;  %v8005_v50 = vld [vmem:[%s11486_s14 + $0xb0] sm:$0xff]   ;;  %v9984_v48 = vrot.slane %v2133_v30, %v11499_v56  ;;  %v9988_v31 = vrot.slane %v2133_v30, %v11498_v63 }
 0xc72   :  { %v2096_v27 = vadd.f32 %v6567_v54, %v2082_v24  ;;  %7086 = vmatprep.subr.bf16.mxu1 %v8002_v42  ;;  %7126 = vmatprep.subr.bf16.mxu0 %v8003_v25  ;;  %v9996_v24 = vrot.slane %v2133_v30, %v11496_v35 }
 0xc73   :  { %v2095_v38 = vadd.f32 %v6567_v54, %v2081_v0  ;;  %v8012_v54 = vld [vmem:[%s11486_s14 + $0x20] sm:$0xff]  }
 0xc75   :  { %v2100_v53 = vpack.c.bf16 %v2096_v27, %v2095_v38  ;;  %7087 = vmatpush3.bf16.msra.mxu1 %v8004_v60  ;;  %7127 = vmatpush3.bf16.msra.mxu0 %v8005_v50 }
 0xc76   :  { %2368 = vmatmul.mubr.bf16.gmra.mxu1 %v2099_v57  ;;  %2441 = vmatmul.mubr.bf16.gmra.mxu0 %v2099_v57  ;;  %v9992_v57 = vrot.slane %v2133_v30, %v11497_v32 }
 0xc77   :  { %2377 = vmatprep.mubr.bf16.mxu1 %v11560_v61  ;;  %2450 = vmatprep.mubr.bf16.mxu0 %v11560_v61 }
 0xc78   :  { %7088 = vmatprep.subr.bf16.mxu1 %v8006_v20  ;;  %7128 = vmatprep.subr.bf16.mxu0 %v8007_v14 }
 0xc79   :  { %7089 = vmatpush3.bf16.msra.mxu1 %v8008_v5  ;;  %7129 = vmatpush3.bf16.msra.mxu0 %v8009_v47 }
 0xc7a   :  { %7090 = vmatprep.subr.bf16.mxu1 %v8010_v62  ;;  %7130 = vmatprep.subr.bf16.mxu0 %v8011_v7 }
 0xc7d   :  { %7091 = vmatpush3.bf16.msra.mxu1 %v8012_v54  ;;  %7131 = vmatpush3.bf16.msra.mxu0 %v8013_v12 }
 0xc7e   :  { %2378 = vmatmul.mubr.bf16.gmra.mxu1 %v2100_v53  ;;  %2451 = vmatmul.mubr.bf16.gmra.mxu0 %v2100_v53 }
 0xc7f   :  { %7092 = vmatprep.subr.bf16.mxu1 %v8014_v39  ;;  %7132 = vmatprep.subr.bf16.mxu0 %v8015_v13 }
 0xc81   :  { %7093 = vmatpush3.bf16.msra.mxu1 %v8016_v33  ;;  %7133 = vmatpush3.bf16.msra.mxu0 %v8017_v22 }
 0xc82   :  { %7094 = vmatprep.subr.bf16.mxu1 %v8018_v59  ;;  %7134 = vmatprep.subr.bf16.mxu0 %v8019_v9 }
 0xc85   :  { %7095 = vmatpush3.bf16.msra.mxu1 %v8020_v19  ;;  %7135 = vmatpush3.bf16.msra.mxu0 %v8021_v10 }
 0xc86   :  { %7096 = vmatprep.subr.bf16.mxu1 %v8022_v16  ;;  %7136 = vmatprep.subr.bf16.mxu0 %v8023_v17 }
 0xc89   :  { %7097 = vmatpush3.bf16.msra.mxu1 %v8024_v40  ;;  %7137 = vmatpush3.bf16.msra.mxu0 %v8025_v44 }
 0xc8a   :  { %7098 = vmatprep.subr.bf16.mxu1 %v8026_v8  ;;  %7138 = vmatprep.subr.bf16.mxu0 %v8027_v46 }
 0xc8d   :  { %7099 = vmatpush3.bf16.msra.mxu1 %v8028_v28  ;;  %7139 = vmatpush3.bf16.msra.mxu0 %v8029_v1 }
 0xd26   :  { %v2349_v0 = vpop.f32.mrf.mxu1  ;;  %v2422_v27 = vpop.f32.mrf.mxu0 }
 0xd27   :  { %v9999_v38 = vadd.f32 %v2349_v0, %v9984_v48  ;;  %v10002_v53 = vadd.f32 %v2422_v27, %v9988_v31 }
 0xd28   :  { %v2351_v43 = vpop.f32.mrf.mxu1  ;;  %v2424_v3 = vpop.f32.mrf.mxu0 }
 0xd29   :  { %v6600_v51 = vmul.f32 -1.702, %v9999_v38  ;;  %v6602_v49 = vmul.f32 -1.702, %v10002_v53  ;;  %v10007_v42 = vadd.f32 %v2351_v43, %v9992_v57  ;;  %v10010_v25 = vadd.f32 %v2424_v3, %v9996_v24 }
 0xd2a   :  { %v2353_v60 = vpop.f32.mrf.mxu1  ;;  %v2426_v50 = vpop.f32.mrf.mxu0 }
 0xd2b   :  { %v2525_v20 = vmul.f32 1.442695, %v6600_v51  ;;  %v2529_v14 = vmul.f32 1.442695, %v6602_v49  ;;  %v6601_v5 = vmul.f32 -1.702, %v10007_v42  ;;  %v10014_v47 = vadd.f32 %v2353_v60, %v9984_v48 }
 0xd2c   :  { %v6603_v62 = vmul.f32 -1.702, %v10010_v25  ;;  %v10018_v7 = vadd.f32 %v2426_v50, %v9988_v31  ;;  %v2355_v54 = vpop.f32.mrf.mxu1  ;;  %v2428_v12 = vpop.f32.mrf.mxu0 }
 0xd2d   :  { %8318 = vpow2.f32 %v2525_v20  ;;  %v2527_v39 = vmul.f32 1.442695, %v6601_v5  ;;  %v6604_v13 = vmul.f32 -1.702, %v10014_v47  ;;  %v10022_v33 = vadd.f32 %v2355_v54, %v9992_v57 }
 0xd2e   :  { %8320 = vpow2.f32 %v2529_v14  ;;  %v2531_v22 = vmul.f32 1.442695, %v6603_v62  ;;  %v6606_v59 = vmul.f32 -1.702, %v10018_v7  ;;  %v10026_v9 = vadd.f32 %v2428_v12, %v9996_v24  ;;  %v2359_v19 = vpop.f32.mrf.mxu1  ;;  %v2432_v10 = vpop.f32.mrf.mxu0 }
 0xd2f   :  { %8322 = vpow2.f32 %v2527_v39  ;;  %v2533_v16 = vmul.f32 1.442695, %v6604_v13  ;;  %v6605_v17 = vmul.f32 -1.702, %v10022_v33  ;;  %v10030_v40 = vadd.f32 %v2359_v19, %v9984_v48 }
 0xd30   :  { %8324 = vpow2.f32 %v2531_v22  ;;  %v2537_v44 = vmul.f32 1.442695, %v6606_v59  ;;  %v6607_v8 = vmul.f32 -1.702, %v10026_v9  ;;  %v10034_v46 = vadd.f32 %v2432_v10, %v9988_v31  ;;  %v2361_v28 = vpop.f32.mrf.mxu1  ;;  %v2434_v1 = vpop.f32.mrf.mxu0 }
 0xd31   :  { %8326 = vpow2.f32 %v2533_v16  ;;  %v2535_v30 = vmul.f32 1.442695, %v6605_v17  ;;  %v6608_v0 = vmul.f32 -1.702, %v10030_v40  ;;  %v10038_v27 = vadd.f32 %v2361_v28, %v9992_v57 }
 0xd32   :  { %8328 = vpow2.f32 %v2537_v44  ;;  %v2539_v43 = vmul.f32 1.442695, %v6607_v8  ;;  %v6610_v3 = vmul.f32 -1.702, %v10034_v46  ;;  %v10042_v51 = vadd.f32 %v2434_v1, %v9996_v24  ;;  %v2363_v49 = vpop.f32.mrf.mxu1  ;;  %v2436_v60 = vpop.f32.mrf.mxu0 }
 0xd33   :  { %8330 = vpow2.f32 %v2535_v30  ;;  %v2541_v50 = vmul.f32 1.442695, %v6608_v0  ;;  %v6609_v20 = vmul.f32 -1.702, %v10038_v27  ;;  %v10046_v14 = vadd.f32 %v2363_v49, %v9984_v48 }
 0xd34   :  { %8332 = vpow2.f32 %v2539_v43  ;;  %v2545_v5 = vmul.f32 1.442695, %v6610_v3  ;;  %v6611_v62 = vmul.f32 -1.702, %v10042_v51  ;;  %v10050_v54 = vadd.f32 %v2436_v60, %v9988_v31  ;;  %v2365_v12 = vpop.f32.mrf.mxu1  ;;  %v2438_v39 = vpop.f32.mrf.mxu0 }
 0xd35   :  { %8334 = vpow2.f32 %v2541_v50  ;;  %v2543_v13 = vmul.f32 1.442695, %v6609_v20  ;;  %v6612_v22 = vmul.f32 -1.702, %v10046_v14  ;;  %v10054_v59 = vadd.f32 %v2365_v12, %v9992_v57 }
 0xd36   :  { %8336 = vpow2.f32 %v2545_v5  ;;  %v2547_v19 = vmul.f32 1.442695, %v6611_v62  ;;  %v6614_v10 = vmul.f32 -1.702, %v10050_v54  ;;  %v10058_v16 = vadd.f32 %v2438_v39, %v9996_v24  ;;  %v2369_v17 = vpop.f32.mrf.mxu1  ;;  %v2442_v44 = vpop.f32.mrf.mxu0 }
 0xd37   :  { %8338 = vpow2.f32 %v2543_v13  ;;  %v2549_v8 = vmul.f32 1.442695, %v6612_v22  ;;  %v6613_v28 = vmul.f32 -1.702, %v10054_v59  ;;  %v10063_v49 = vadd.f32 %v2369_v17, %v9984_v48 }
 0xd38   :  { %8340 = vpow2.f32 %v2547_v19  ;;  %v2553_v1 = vmul.f32 1.442695, %v6614_v10  ;;  %v6615_v30 = vmul.f32 -1.702, %v10058_v16  ;;  %v2371_v0 = vpop.f32.mrf.mxu1  ;;  %v2444_v43 = vpop.f32.mrf.mxu0  ;;  %v10066_v20 = vadd.f32 %v2442_v44, %v9988_v31 }
 0xd39   :  { %8342 = vpow2.f32 %v2549_v8  ;;  %v2551_v3 = vmul.f32 1.442695, %v6613_v28  ;;  %v6616_v28 = vmul.f32 -1.702, %v10063_v49  ;;  %v10071_v35 = vadd.f32 %v2371_v0, %v9992_v57 }
 0xd3a   :  { %v8319_v60 = vpop.eup %8318  ;;  %8344 = vpow2.f32 %v2553_v1  ;;  %v2555_v50 = vmul.f32 1.442695, %v6615_v30  ;;  %v2373_v5 = vpop.f32.mrf.mxu1  ;;  %v6618_v44 = vmul.f32 -1.702, %v10066_v20 }
 0xd3b   :  { %v2446_v62 = vpop.f32.mrf.mxu0  ;;  %v8321_v12 = vpop.eup %8320  ;;  %v2589_v39 = vadd.f32 1.0, %v8319_v60  ;;  %8346 = vpow2.f32 %v2551_v3 }
 0xd3c   :  { %v8323_v13 = vpop.eup %8322  ;;  %v2591_v22 = vadd.f32 1.0, %v8321_v12  ;;  %8348 = vpow2.f32 %v2555_v50  ;;  %v2375_v19 = vpop.f32.mrf.mxu1  ;;  %v10074_v50 = vadd.f32 %v2444_v43, %v9996_v24  ;;  %v10076_v0 = vmul.f32 1.442695, %v6618_v44 }
 0xd3d   :  { %v2448_v10 = vpop.f32.mrf.mxu0  ;;  %v8325_v8 = vpop.eup %8324  ;;  %8350 = vrcp.f32 %v2589_v39  ;;  %v2590_v17 = vadd.f32 1.0, %v8323_v13 }
 0xd3e   :  { %v8327_v1 = vpop.eup %8326  ;;  %8352 = vrcp.f32 %v2591_v22  ;;  %v2592_v30 = vadd.f32 1.0, %v8325_v8  ;;  %v2379_v12 = vpop.f32.mrf.mxu1  ;;  %v2557_v8 = vmul.f32 1.442695, %v6616_v28  ;;  %v6619_v55 = vmul.f32 -1.702, %v10074_v50 }
 0xd3f   :  { %v8329_v60 = vpop.eup %8328  ;;  %8354 = vrcp.f32 %v2590_v17  ;;  %v2593_v3 = vadd.f32 1.0, %v8327_v1  ;;  %v2452_v13 = vpop.f32.mrf.mxu0  ;;  %v6617_v17 = vmul.f32 -1.702, %v10071_v35  ;;  %v10084_v28 = vadd.f32 %v2446_v62, %v9988_v31 }
 0xd40   :  { %v8331_v32 = vpop.eup %8330  ;;  %8356 = vrcp.f32 %v2592_v30  ;;  %v2595_v39 = vadd.f32 1.0, %v8329_v60  ;;  %v10081_v30 = vadd.f32 %v2373_v5, %v9984_v48  ;;  %v2381_v60 = vpop.f32.mrf.mxu1  ;;  %v10093_v5 = vadd.f32 %v2379_v12, %v9984_v48 }
 0xd41   :  { %v8333_v63 = vpop.eup %8332  ;;  %8358 = vrcp.f32 %v2593_v3  ;;  %v2594_v22 = vadd.f32 1.0, %v8331_v32  ;;  %v2454_v44 = vpop.f32.mrf.mxu0  ;;  %v10099_v62 = vadd.f32 %v2381_v60, %v9992_v57  ;;  %v2559_v2 = vmul.f32 1.442695, %v6617_v17 }
 0xd42   :  { %v8335_v56 = vpop.eup %8334  ;;  %8360 = vrcp.f32 %v2595_v39  ;;  %v2596_v23 = vadd.f32 1.0, %v8333_v63  ;;  %v10087_v63 = vadd.f32 %v2375_v19, %v9992_v57  ;;  %v2563_v4 = vmul.f32 1.442695, %v6619_v55 }
 0xd43   :  { %v8337_v1 = vpop.eup %8336  ;;  %8362 = vrcp.f32 %v2594_v22  ;;  %v2597_v43 = vadd.f32 1.0, %v8335_v56  ;;  %v10090_v56 = vadd.f32 %v2448_v10, %v9996_v24  ;;  %v10103_v10 = vadd.f32 %v2454_v44, %v9996_v24 }
 0xd44   :  { %v8339_v37 = vpop.eup %8338  ;;  %8364 = vrcp.f32 %v2596_v23  ;;  %v2599_v32 = vadd.f32 1.0, %v8337_v1  ;;  %v10096_v1 = vadd.f32 %v2452_v13, %v9988_v31  ;;  %v2383_v13 = vpop.f32.mrf.mxu1 }
 0xd45   :  { %v8341_v3 = vpop.eup %8340  ;;  %8366 = vrcp.f32 %v2597_v43  ;;  %v2598_v39 = vadd.f32 1.0, %v8339_v37  ;;  %v6620_v37 = vmul.f32 -1.702, %v10081_v30  ;;  %v6623_v26 = vmul.f32 -1.702, %v10090_v56 }
 0xd46   :  { %v8343_v22 = vpop.eup %8342  ;;  %8368 = vrcp.f32 %v2599_v32  ;;  %v2600_v23 = vadd.f32 1.0, %v8341_v3  ;;  %v6622_v32 = vmul.f32 -1.702, %v10084_v28  ;;  %v6621_v3 = vmul.f32 -1.702, %v10087_v63  ;;  %v2385_v34 = vpop.f32.mrf.mxu1 }
 0xd47   :  { %v8345_v19 = vpop.eup %8344  ;;  %8370 = vrcp.f32 %v2598_v39  ;;  %v2601_v21 = vadd.f32 1.0, %v8343_v22  ;;  %v6624_v39 = vmul.f32 -1.702, %v10093_v5  ;;  %v2456_v22 = vpop.f32.mrf.mxu0  ;;  %v6626_v6 = vmul.f32 -1.702, %v10096_v1 }
 0xd48   :  { %v8347_v43 = vpop.eup %8346  ;;  %8372 = vrcp.f32 %v2600_v23  ;;  %v2603_v12 = vadd.f32 1.0, %v8345_v19  ;;  %v6625_v23 = vmul.f32 -1.702, %v10099_v62  ;;  %v6627_v18 = vmul.f32 -1.702, %v10103_v10 }
 0xd49   :  { %v8349_v29 = vpop.eup %8348  ;;  %8374 = vrcp.f32 %v2601_v21  ;;  %v2602_v60 = vadd.f32 1.0, %v8347_v43  ;;  %v2565_v43 = vmul.f32 1.442695, %v6620_v37  ;;  %v2569_v36 = vmul.f32 1.442695, %v6622_v32  ;;  %v2458_v45 = vpop.f32.mrf.mxu0 }
 0xd4a   :  { %v8351_v11 = vpop.eup %8350  ;;  %8376 = vrcp.f32 %v2603_v12  ;;  %v2604_v44 = vadd.f32 1.0, %v8349_v29  ;;  %v10113_v58 = vadd.f32 %v2383_v13, %v9984_v48  ;;  %v2567_v29 = vmul.f32 1.442695, %v6621_v3 }
 0xd4b   :  { %v8353_v19 = vpop.eup %8352  ;;  %8378 = vrcp.f32 %v2602_v60  ;;  %v2571_v52 = vmul.f32 1.442695, %v6623_v26  ;;  %v2573_v41 = vmul.f32 1.442695, %v6624_v39  ;;  %v2577_v55 = vmul.f32 1.442695, %v6626_v6 }
 0xd4c   :  { %v8355_v21 = vpop.eup %8354  ;;  %8380 = vrcp.f32 %v2604_v44  ;;  %v2575_v17 = vmul.f32 1.442695, %v6625_v23  ;;  %v10117_v60 = vadd.f32 %v2456_v22, %v9988_v31  ;;  %v2685_v32 = vmul.f32 %v8351_v11, %v9999_v38 }
 0xd4d   :  { %v8357_v12 = vpop.eup %8356  ;;  %8382 = vpow2.f32 %v2557_v8  ;;  %v2579_v48 = vmul.f32 1.442695, %v6627_v18  ;;  %v10121_v13 = vadd.f32 %v2385_v34, %v9992_v57  ;;  %v6628_v3 = vmul.f32 -1.702, %v10113_v58 }
 0xd4e   :  { %v8359_v15 = vpop.eup %8358  ;;  %8384 = vpow2.f32 %v10076_v0  ;;  %v10126_v6 = vadd.f32 %v2458_v45, %v9996_v24  ;;  %v2686_v31 = vmul.f32 %v8355_v21, %v10007_v42  ;;  %v2688_v34 = vmul.f32 %v8357_v12, %v10010_v25 }
 0xd4f   :  { %v8361_v37 = vpop.eup %8360  ;;  %8386 = vpow2.f32 %v2559_v2  ;;  %v2689_v26 = vmul.f32 %v8359_v15, %v10014_v47  ;;  %v2687_v45 = vmul.f32 %v8353_v19, %v10002_v53  ;;  %v6629_v57 = vmul.f32 -1.702, %v10121_v13 }
 0xd50   :  { %v8363_v8 = vpop.eup %8362  ;;  %8388 = vpow2.f32 %v2563_v4  ;;  %v2691_v39 = vmul.f32 %v8361_v37, %v10018_v7  ;;  %v6630_v4 = vmul.f32 -1.702, %v10117_v60  ;;  %v6631_v47 = vmul.f32 -1.702, %v10126_v6 }
 0xd51   :  { %v8365_v0 = vpop.eup %8364  ;;  %v2690_v2 = vmul.f32 %v8363_v8, %v10022_v33  ;;  %8390 = vpow2.f32 %v2565_v43  ;;  %v2717_v42 = vpack.c.bf16 %v2689_v26, %v2685_v32  ;;  %v2583_v44 = vmul.f32 1.442695, %v6629_v57 }
 0xd52   :  { %v8367_v11 = vpop.eup %8366  ;;  %v2692_v18 = vmul.f32 %v8365_v0, %v10026_v9  ;;  %8392 = vpow2.f32 %v2569_v36  ;;  %v2719_v25 = vpack.c.bf16 %v2691_v39, %v2687_v45  ;;  %v2581_v9 = vmul.f32 1.442695, %v6628_v3 }
 0xd53   :  { %v8369_v15 = vpop.eup %8368  ;;  %8394 = vpow2.f32 %v2567_v29  ;;  %v2718_v24 = vpack.c.bf16 %v2690_v2, %v2686_v31  ;;  %v2585_v22 = vmul.f32 1.442695, %v6630_v4  ;;  %v2587_v19 = vmul.f32 1.442695, %v6631_v47 }
 0xd54   :  { %v8371_v38 = vpop.eup %8370  ;;  %8396 = vpow2.f32 %v2571_v52  ;;  %v2720_v7 = vpack.c.bf16 %v2692_v18, %v2688_v34 }
 0xd55   :  { %v8373_v33 = vpop.eup %8372  ;;  %8398 = vpow2.f32 %v2573_v41  ;;  %3021 = vmatprep.mubr.bf16.mxu1 %v2718_v24  ;;  %v2694_v43 = vmul.f32 %v8371_v38, %v10038_v27 }
 0xd56   :  { %v8375_v36 = vpop.eup %8374  ;;  %8400 = vpow2.f32 %v2577_v55  ;;  %3086 = vmatprep.mubr.bf16.mxu0 %v2720_v7  ;;  %3022 = vmatmul.mubr.bf16.vlgmr.msra.gmra.mxu1 %v2717_v42  ;;  %v2693_v55 = vmul.f32 %v8367_v11, %v10030_v40 }
 0xd57   :  { %v8377_v53 = vpop.eup %8376  ;;  %8402 = vpow2.f32 %v2575_v17  ;;  %3087 = vmatmul.mubr.bf16.vlgmr.msra.gmra.mxu0 %v2719_v25  ;;  %v2697_v52 = vmul.f32 %v8375_v36, %v10046_v14  ;;  %v2696_v17 = vmul.f32 %v8373_v33, %v10042_v51  ;;  %v2695_v14 = vmul.f32 %v8369_v15, %v10034_v46 }
 0xd58   :  { %v8379_v23 = vpop.eup %8378  ;;  %8404 = vpow2.f32 %v2579_v48  ;;  %v2699_v41 = vmul.f32 %v8377_v53, %v10050_v54 }
 0xd59   :  { %v8381_v21 = vpop.eup %8380  ;;  %v2698_v12 = vmul.f32 %v8379_v23, %v10054_v59  ;;  %8406 = vpow2.f32 %v2581_v9  ;;  %v2721_v59 = vpack.c.bf16 %v2697_v52, %v2693_v55 }
 0xd5a   :  { %v8383_v29 = vpop.eup %8382  ;;  %v2700_v37 = vmul.f32 %v8381_v21, %v10058_v16  ;;  %8408 = vpow2.f32 %v2585_v22  ;;  %v2723_v40 = vpack.c.bf16 %v2699_v41, %v2695_v14 }
 0xd5b   :  { %v8385_v32 = vpop.eup %8384  ;;  %v2605_v48 = vadd.f32 1.0, %v8383_v29  ;;  %8410 = vpow2.f32 %v2583_v44  ;;  %v2722_v8 = vpack.c.bf16 %v2698_v12, %v2694_v43 }
 0xd5c   :  { %v8387_v27 = vpop.eup %8386  ;;  %v2607_v26 = vadd.f32 1.0, %v8385_v32  ;;  %8412 = vpow2.f32 %v2587_v19  ;;  %v2724_v54 = vpack.c.bf16 %v2700_v37, %v2696_v17 }
 0xd5d   :  { %v8389_v3 = vpop.eup %8388  ;;  %8414 = vrcp.f32 %v2605_v48  ;;  %v2606_v0 = vadd.f32 1.0, %v8387_v27  ;;  %3029 = vmatprep.mubr.bf16.mxu1 %v2722_v8 }
 0xd5e   :  { %v8391_v51 = vpop.eup %8390  ;;  %8416 = vrcp.f32 %v2607_v26  ;;  %v2608_v16 = vadd.f32 1.0, %v8389_v3  ;;  %3094 = vmatprep.mubr.bf16.mxu0 %v2724_v54  ;;  %3030 = vmatmul.mubr.bf16.gmra.mxu1 %v2721_v59 }
 0xd5f   :  { %v8393_v31 = vpop.eup %8392  ;;  %8418 = vrcp.f32 %v2606_v0  ;;  %v2609_v46 = vadd.f32 1.0, %v8391_v51  ;;  %3095 = vmatmul.mubr.bf16.gmra.mxu0 %v2723_v40 }
 0xd60   :  { %v8395_v39 = vpop.eup %8394  ;;  %8420 = vrcp.f32 %v2608_v16  ;;  %v2611_v2 = vadd.f32 1.0, %v8393_v31 }
 0xd61   :  { %v8397_v11 = vpop.eup %8396  ;;  %8422 = vrcp.f32 %v2609_v46  ;;  %v2610_v34 = vadd.f32 1.0, %v8395_v39 }
 0xd62   :  { %v8399_v18 = vpop.eup %8398  ;;  %8424 = vrcp.f32 %v2611_v2  ;;  %v2612_v4 = vadd.f32 1.0, %v8397_v11 }
 0xd63   :  { %v8401_v15 = vpop.eup %8400  ;;  %8426 = vrcp.f32 %v2610_v34  ;;  %v2613_v45 = vadd.f32 1.0, %v8399_v18 }
 0xd64   :  { %v8403_v57 = vpop.eup %8402  ;;  %8428 = vrcp.f32 %v2612_v4  ;;  %v2615_v24 = vadd.f32 1.0, %v8401_v15 }
 0xd65   :  { %v8405_v38 = vpop.eup %8404  ;;  %8430 = vrcp.f32 %v2613_v45  ;;  %v2614_v42 = vadd.f32 1.0, %v8403_v57 }
 0xd66   :  { %v8407_v47 = vpop.eup %8406  ;;  %8432 = vrcp.f32 %v2615_v24  ;;  %v2616_v7 = vadd.f32 1.0, %v8405_v38  ;;  %v10165_v38 = vld [vmem:[%s11487_s15] ss:$0 sm:$0xff] }
 0xd67   :  { %v8409_v33 = vpop.eup %8408  ;;  %8434 = vrcp.f32 %v2614_v42  ;;  %v2617_v25 = vadd.f32 1.0, %v8407_v47  ;;  %v11569_v42 = vld [vmem:[#allocation16_spill] sm:$0xff] }
 0xd68   :  { %v8411_v9 = vpop.eup %8410  ;;  %8436 = vrcp.f32 %v2616_v7  ;;  %v2619_v36 = vadd.f32 1.0, %v8409_v33 }
 0xd69   :  { %v8413_v22 = vpop.eup %8412  ;;  %8438 = vrcp.f32 %v2617_v25  ;;  %v2618_v53 = vadd.f32 1.0, %v8411_v9 }
 0xd6a   :  { %v8415_v44 = vpop.eup %8414  ;;  %8440 = vrcp.f32 %v2619_v36  ;;  %v2620_v23 = vadd.f32 1.0, %v8413_v22 }
 0xd6b   :  { %v8417_v52 = vpop.eup %8416  ;;  %8442 = vrcp.f32 %v2618_v53  ;;  %v2701_v48 = vmul.f32 %v8415_v44, %v10063_v49 }
 0xd6c   :  { %v8419_v19 = vpop.eup %8418  ;;  %8444 = vrcp.f32 %v2620_v23  ;;  %v2703_v54 = vmul.f32 %v8417_v52, %v10066_v20  ;;  %v11570_v23 = vld [vmem:[#allocation18_spill] sm:$0xff] }
 0xd6d   :  { %v8421_v21 = vpop.eup %8420  ;;  %v2702_v17 = vmul.f32 %v8419_v19, %v10071_v35 }
 0xd6e   :  { %v8423_v43 = vpop.eup %8422  ;;  %v2704_v8 = vmul.f32 %v8421_v21, %v10074_v50 }
 0xd6f   :  { %v8425_v41 = vpop.eup %8424  ;;  %v2705_v29 = vmul.f32 %v8423_v43, %v10081_v30 }
 0xd70   :  { %v8427_v12 = vpop.eup %8426  ;;  %v2707_v37 = vmul.f32 %v8425_v41, %v10084_v28 }
 0xd71   :  { %v8429_v55 = vpop.eup %8428  ;;  %v2706_v32 = vmul.f32 %v8427_v12, %v10087_v63  ;;  %v2725_v0 = vpack.c.bf16 %v2705_v29, %v2701_v48 }
 0xd72   :  { %v8431_v14 = vpop.eup %8430  ;;  %v2708_v27 = vmul.f32 %v8429_v55, %v10090_v56  ;;  %v2727_v35 = vpack.c.bf16 %v2707_v37, %v2703_v54  ;;  %v11572_v37 = vld [vmem:[#allocation17_spill] sm:$0xff] }
 0xd73   :  { %v8433_v26 = vpop.eup %8432  ;;  %v2726_v59 = vpack.c.bf16 %v2706_v32, %v2702_v17  ;;  %v2709_v31 = vmul.f32 %v8431_v14, %v10093_v5 }
 0xd74   :  { %v8435_v3 = vpop.eup %8434  ;;  %v2728_v30 = vpack.c.bf16 %v2708_v27, %v2704_v8  ;;  %v2711_v2 = vmul.f32 %v8433_v26, %v10096_v1  ;;  %v11574_v27 = vld [vmem:[#allocation19_spill] sm:$0xff] }
 0xd75   :  { %v8437_v40 = vpop.eup %8436  ;;  %3037 = vmatprep.mubr.bf16.mxu1 %v2726_v59  ;;  %v2710_v56 = vmul.f32 %v8435_v3, %v10099_v62 }
 0xd76   :  { %v8439_v28 = vpop.eup %8438  ;;  %3102 = vmatprep.mubr.bf16.mxu0 %v2728_v30  ;;  %3038 = vmatmul.mubr.bf16.gmra.mxu1 %v2725_v0  ;;  %v2712_v46 = vmul.f32 %v8437_v40, %v10103_v10 }
 0xd77   :  { %v8441_v63 = vpop.eup %8440  ;;  %3103 = vmatmul.mubr.bf16.gmra.mxu0 %v2727_v35  ;;  %v2713_v50 = vmul.f32 %v8439_v28, %v10113_v58 }
 0xd78   :  { %v8443_v49 = vpop.eup %8442  ;;  %v2715_v20 = vmul.f32 %v8441_v63, %v10117_v60 }
 0xd79   :  { %v8445_v51 = vpop.eup %8444  ;;  %v2714_v16 = vmul.f32 %v8443_v49, %v10121_v13  ;;  %v2729_v18 = vpack.c.bf16 %v2713_v50, %v2709_v31 }
 0xd7a   :  { %v2716_v39 = vmul.f32 %v8445_v51, %v10126_v6  ;;  %v2731_v58 = vpack.c.bf16 %v2715_v20, %v2711_v2  ;;  %v11576_v20 = vld [vmem:[#allocation20_spill] sm:$0xff] }
 0xd7b   :  { %v2730_v11 = vpack.c.bf16 %v2714_v16, %v2710_v56 }
 0xd7c   :  { %v2732_v34 = vpack.c.bf16 %v2716_v39, %v2712_v46 }
 0xd7d   :  { %3045 = vmatprep.mubr.bf16.mxu1 %v2730_v11 }
 0xd7e   :  { %3110 = vmatprep.mubr.bf16.mxu0 %v2732_v34  ;;  %3046 = vmatmul.mubr.bf16.gmra.mxu1 %v2729_v18 }
 0xd7f   :  { %3111 = vmatmul.mubr.bf16.gmra.mxu0 %v2731_v58  ;;  %3459 = vmatprep.mubr.bf16.mxu1 %v11560_v61 }
 0xe16   :  { %v7100_v62 = vpop.f32.mrf.mxu1 }
 0xe17   :  { %v7140_v60 = vpop.f32.mrf.mxu0 }
 0xe18   :  { %v7101_v13 = vpop.f32.mrf.mxu1 }
 0xe19   :  { %v7102_v5 = vadd.f32 %v7101_v13, %v7100_v62  ;;  %v7141_v4 = vpop.f32.mrf.mxu0  ;;  %v11578_v62 = vld [vmem:[#allocation22_spill] sm:$0xff] }
 0xe1a   :  { %v7142_v10 = vadd.f32 %v7141_v4, %v7140_v60  ;;  %v7103_v15 = vpop.f32.mrf.mxu1 }
 0xe1b   :  { %v7143_v6 = vpop.f32.mrf.mxu0 }
 0xe1c   :  { %v3089_v45 = vadd.f32 %v7142_v10, %v7102_v5  ;;  %v7104_v1 = vpop.f32.mrf.mxu1 }
 0xe1d   :  { %v7105_v57 = vadd.f32 %v7104_v1, %v7103_v15  ;;  %v7144_v24 = vpop.f32.mrf.mxu0 }
 0xe1e   :  { %v3119_v47 = vadd.f32 %v3089_v45, %v11569_v42  ;;  %v7145_v7 = vadd.f32 %v7144_v24, %v7143_v6  ;;  %v7106_v33 = vpop.f32.mrf.mxu1 }
 0xe1f   :  { %v7146_v25 = vpop.f32.mrf.mxu0 }
 0xe20   :  { %v3092_v9 = vadd.f32 %v7145_v7, %v7105_v57  ;;  %v7107_v36 = vpop.f32.mrf.mxu1  ;;  %v10169_v22 = vadd.f32 %v10165_v38, %v3119_v47  ;;  %v11580_v57 = vld [vmem:[#allocation21_spill] sm:$0xff] }
 0xe21   :  { %v7108_v53 = vadd.f32 %v7107_v36, %v7106_v33  ;;  %v7147_v44 = vpop.f32.mrf.mxu0  ;;  %v11582_v33 = vld [vmem:[#allocation23_spill] sm:$0xff] }
 0xe22   :  { %v3120_v52 = vadd.f32 %v3092_v9, %v11570_v23  ;;  %v7148_v19 = vadd.f32 %v7147_v44, %v7146_v25  ;;  %3146 = vadd.xlane.f32.xlu0 %v10169_v22  ;;  %v7109_v21 = vpop.f32.mrf.mxu1  ;;  %v8030_v36 = vld [vmem:[%s11478_s6 + $0x168] ss:$12 sps:$4 sm:$0xff]  }
 0xe23   :  { %v7149_v43 = vpop.f32.mrf.mxu0 }
 0xe24   :  { %v3097_v41 = vadd.f32 %v7148_v19, %v7108_v53  ;;  %v7110_v12 = vpop.f32.mrf.mxu1  ;;  %v10174_v29 = vadd.f32 %v10165_v38, %v3120_v52  ;;  %v8032_v53 = vld [vmem:[%s11478_s6 + $0x16c] ss:$12 sps:$4 sm:$0xff]  }
 0xe25   :  { %v7111_v55 = vadd.f32 %v7110_v12, %v7109_v21  ;;  %v7150_v17 = vpop.f32.mrf.mxu0  ;;  %3427 = vmatprep.subr.bf16.mxu1 %v8032_v53 }
 0xe26   :  { %11571 = vst [vmem:[#allocation16_spill] sm:$0xff] %v10174_v29  ;;  %v3121_v32 = vadd.f32 %v3097_v41, %v11572_v37  ;;  %v7151_v14 = vadd.f32 %v7150_v17, %v7149_v43  ;;  %3148 = vadd.xlane.f32.xlu1 %v10174_v29  ;;  %3428 = vmatpush1.bf16.msra.mxu1 %v8030_v36  ;;  %v8061_v36 = vld [vmem:[%s11478_s6 + $0xc8] ss:$12 sps:$4 sm:$0xff]  }
 0xe28   :  { %v3100_v48 = vadd.f32 %v7151_v14, %v7111_v55  ;;  %v10179_v8 = vadd.f32 %v10165_v38, %v3121_v32 }
 0xe2a   :  { %11573 = vst [vmem:[#allocation18_spill] sm:$0xff] %v10179_v8  ;;  %v3122_v26 = vadd.f32 %v3100_v48, %v11574_v27  ;;  %3150 = vadd.xlane.f32.xlu0 %v10179_v8 }
 0xe2c   :  { %v10184_v54 = vadd.f32 %v10165_v38, %v3122_v26 }
 0xe2e   :  { %11575 = vst [vmem:[#allocation17_spill] sm:$0xff] %v10184_v54  ;;  %3152 = vadd.xlane.f32.xlu1 %v10184_v54 }
 0xe36   :  { %v7112_v59 = vpop.f32.mrf.mxu1 }
 0xe37   :  { %v7152_v3 = vpop.f32.mrf.mxu0 }
 0xe38   :  { %v7113_v30 = vpop.f32.mrf.mxu1 }
 0xe39   :  { %v7114_v0 = vadd.f32 %v7113_v30, %v7112_v59  ;;  %v7153_v40 = vpop.f32.mrf.mxu0  ;;  %v8033_v30 = vld [vmem:[%s11478_s6 + $0x150] ss:$12 sps:$4 sm:$0xff]  }
 0xe3a   :  { %v7154_v35 = vadd.f32 %v7153_v40, %v7152_v3  ;;  %v7115_v28 = vpop.f32.mrf.mxu1  ;;  %v8035_v3 = vld [vmem:[%s11478_s6 + $0x154] ss:$12 sps:$4 sm:$0xff]  }
 0xe3b   :  { %v7155_v63 = vpop.f32.mrf.mxu0  ;;  %3429 = vmatprep.subr.bf16.mxu1 %v8035_v3 }
 0xe3c   :  { %v3105_v49 = vadd.f32 %v7154_v35, %v7114_v0  ;;  %v7116_v50 = vpop.f32.mrf.mxu1  ;;  %3430 = vmatpush1.bf16.msra.mxu1 %v8033_v30 }
 0xe3d   :  { %v7117_v51 = vadd.f32 %v7116_v50, %v7115_v28  ;;  %v7156_v56 = vpop.f32.mrf.mxu0  ;;  %v8036_v50 = vld [vmem:[%s11478_s6 + $0x138] ss:$12 sps:$4 sm:$0xff]  }
 0xe3e   :  { %v3123_v16 = vadd.f32 %v3105_v49, %v11576_v20  ;;  %v7157_v31 = vadd.f32 %v7156_v56, %v7155_v63  ;;  %v7118_v46 = vpop.f32.mrf.mxu1  ;;  %v8038_v63 = vld [vmem:[%s11478_s6 + $0x13c] ss:$12 sps:$4 sm:$0xff]   ;;  %v8042_v56 = vld [vmem:[%s11478_s6 + $0x124] ss:$12 sps:$4 sm:$0xff]  }
 0xe3f   :  { %v7158_v39 = vpop.f32.mrf.mxu0  ;;  %v8039_v49 = vld [vmem:[%s11478_s6 + $0x170] ss:$12 sps:$4 sm:$0xff]   ;;  %3431 = vmatprep.subr.bf16.mxu1 %v8038_v63  ;;  %v8043_v20 = vld [vmem:[%s11478_s6 + $0x158] ss:$12 sps:$4 sm:$0xff]  }
 0xe40   :  { %v3108_v2 = vadd.f32 %v7157_v31, %v7117_v51  ;;  %v7119_v11 = vpop.f32.mrf.mxu1  ;;  %v10189_v34 = vadd.f32 %v10165_v38, %v3123_v16  ;;  %7528 = vmatprep.subr.bf16.mxu0 %v8039_v49  ;;  %3432 = vmatpush1.bf16.msra.mxu1 %v8036_v50  ;;  %v8040_v31 = vld [vmem:[%s11478_s6 + $0x120] ss:$12 sps:$4 sm:$0xff]  }
 0xe41   :  { %v7120_v18 = vadd.f32 %v7119_v11, %v7118_v46  ;;  %v7159_v58 = vpop.f32.mrf.mxu0  ;;  %7529 = vmatpush3.bf16.msra.mxu0 %v8039_v49  ;;  %3433 = vmatprep.subr.bf16.mxu1 %v8042_v56  ;;  %v8047_v11 = vld [vmem:[%s11478_s6 + $0x140] ss:$12 sps:$4 sm:$0xff]  }
 0xe42   :  { %11577 = vst [vmem:[#allocation19_spill] sm:$0xff] %v10189_v34  ;;  %v3124_v60 = vadd.f32 %v3108_v2, %v11578_v62  ;;  %v7160_v13 = vadd.f32 %v7159_v58, %v7158_v39  ;;  %3154 = vadd.xlane.f32.xlu0 %v10189_v34  ;;  %v7121_v5 = vpop.f32.mrf.mxu1  ;;  %v8046_v2 = vld [vmem:[%s11478_s6 + $0x10c] ss:$12 sps:$4 sm:$0xff]   ;;  %7530 = vmatprep.subr.bf16.mxu0 %v8043_v20  ;;  %v8044_v62 = vld [vmem:[%s11478_s6 + $0x108] ss:$12 sps:$4 sm:$0xff]  }
 0xe43   :  { %v7161_v4 = vpop.f32.mrf.mxu0 }
 0xe44   :  { %v3113_v10 = vadd.f32 %v7160_v13, %v7120_v18  ;;  %v7122_v15 = vpop.f32.mrf.mxu1  ;;  %v10194_v6 = vadd.f32 %v10165_v38, %v3124_v60  ;;  %3434 = vmatpush1.bf16.msra.mxu1 %v8040_v31 }
 0xe45   :  { %v7123_v45 = vadd.f32 %v7122_v15, %v7121_v5  ;;  %v7162_v1 = vpop.f32.mrf.mxu0  ;;  %7531 = vmatpush3.bf16.msra.mxu0 %v8043_v20  ;;  %3435 = vmatprep.subr.bf16.mxu1 %v8046_v2  ;;  %v8051_v15 = vld [vmem:[%s11478_s6 + $0x128] ss:$12 sps:$4 sm:$0xff]  }
 0xe46   :  { %11579 = vst [vmem:[#allocation20_spill] sm:$0xff] %v10194_v6  ;;  %v3125_v24 = vadd.f32 %v3113_v10, %v11580_v57  ;;  %v7163_v42 = vadd.f32 %v7162_v1, %v7161_v4  ;;  %3156 = vadd.xlane.f32.xlu1 %v10194_v6  ;;  %7532 = vmatprep.subr.bf16.mxu0 %v8047_v11  ;;  %v8050_v10 = vld [vmem:[%s11478_s6 + $0xf4] ss:$12 sps:$4 sm:$0xff]   ;;  %v8054_v1 = vld [vmem:[%s11478_s6 + $0xdc] ss:$12 sps:$4 sm:$0xff]  }
 0xe47   :  { %v8055_v57 = vld [vmem:[%s11478_s6 + $0x110] ss:$12 sps:$4 sm:$0xff]  }
 0xe48   :  { %v3116_v47 = vadd.f32 %v7163_v42, %v7123_v45  ;;  %v10199_v7 = vadd.f32 %v10165_v38, %v3125_v24  ;;  %3436 = vmatpush1.bf16.msra.mxu1 %v8044_v62  ;;  %v8048_v45 = vld [vmem:[%s11478_s6 + $0xf0] ss:$12 sps:$4 sm:$0xff]   ;;  %v8052_v24 = vld [vmem:[%s11478_s6 + $0xd8] ss:$12 sps:$4 sm:$0xff]  }
 0xe49   :  { %7533 = vmatpush3.bf16.msra.mxu0 %v8047_v11  ;;  %3437 = vmatprep.subr.bf16.mxu1 %v8050_v10  ;;  %v8058_v42 = vld [vmem:[%s11478_s6 + $0xc4] ss:$12 sps:$4 sm:$0xff]  }
 0xe4a   :  { %11581 = vst [vmem:[#allocation22_spill] sm:$0xff] %v10199_v7  ;;  %v3126_v25 = vadd.f32 %v3116_v47, %v11582_v33  ;;  %3158 = vadd.xlane.f32.xlu0 %v10199_v7  ;;  %7534 = vmatprep.subr.bf16.mxu0 %v8051_v15  ;;  %v8059_v47 = vld [vmem:[%s11478_s6 + $0xf8] ss:$12 sps:$4 sm:$0xff]   ;;  %v8056_v33 = vld [vmem:[%s11478_s6 + $0xc0] ss:$12 sps:$4 sm:$0xff]  }
 0xe4c   :  { %v10204_v9 = vadd.f32 %v10165_v38, %v3126_v25  ;;  %3438 = vmatpush1.bf16.msra.mxu1 %v8048_v45  ;;  %v8060_v25 = vld [vmem:[%s11478_s6 + $0xe0] ss:$12 sps:$4 sm:$0xff]  }
 0xe4d   :  { %7535 = vmatpush3.bf16.msra.mxu0 %v8051_v15  ;;  %3439 = vmatprep.subr.bf16.mxu1 %v8054_v1 }
 0xe4e   :  { %11583 = vst [vmem:[#allocation21_spill] sm:$0xff] %v10204_v9  ;;  %3160 = vadd.xlane.f32.xlu1 %v10204_v9  ;;  %7536 = vmatprep.subr.bf16.mxu0 %v8055_v57 }
 0xe50   :  { %3440 = vmatpush1.bf16.msra.mxu1 %v8052_v24 }
 0xe51   :  { %7537 = vmatpush3.bf16.msra.mxu0 %v8055_v57  ;;  %3441 = vmatprep.subr.bf16.mxu1 %v8058_v42 }
 0xe52   :  { %7538 = vmatprep.subr.bf16.mxu0 %v8059_v47 }
 0xe54   :  { %3442 = vmatpush1.bf16.msra.mxu1 %v8056_v33 }
 0xe55   :  { %7539 = vmatpush3.bf16.msra.mxu0 %v8059_v47 }
 0xe56   :  { %7540 = vmatprep.subr.bf16.mxu0 %v8060_v25 }
 0xe59   :  { %7541 = vmatpush3.bf16.msra.mxu0 %v8060_v25 }
 0xe5a   :  { %7542 = vmatprep.subr.bf16.mxu0 %v8061_v36 }
 0xe5d   :  { %7543 = vmatpush3.bf16.msra.mxu0 %v8061_v36 }
 0xeab   :  { %v3147_v44 = vpop.xlane.xlu0 %3146 }
 0xeac   :  { %v3162_v23 = vmul.f32 0.0078125, %v3147_v44 }
 0xeae   :  { %v10214_v52 = vsub.f32 %v10169_v22, %v3162_v23 }
 0xeaf   :  { %v3149_v19 = vpop.xlane.xlu1 %3148 }
 0xeb0   :  { %v3163_v38 = vmul.f32 0.0078125, %v3149_v19  ;;  %v3178_v21 = vmul.f32 %v10214_v52, %v10214_v52 }
 0xeb2   :  { %v10219_v43 = vsub.f32 %v10174_v29, %v3163_v38  ;;  %3186 = vadd.xlane.f32.xlu0 %v3178_v21 }
 0xeb3   :  { %v3151_v41 = vpop.xlane.xlu0 %3150 }
 0xeb4   :  { %v3164_v12 = vmul.f32 0.0078125, %v3151_v41  ;;  %v3179_v55 = vmul.f32 %v10219_v43, %v10219_v43 }
 0xeb6   :  { %v10224_v17 = vsub.f32 %v10179_v8, %v3164_v12  ;;  %3188 = vadd.xlane.f32.xlu1 %v3179_v55 }
 0xeb7   :  { %v3153_v37 = vpop.xlane.xlu1 %3152 }
 0xeb8   :  { %v3165_v32 = vmul.f32 0.0078125, %v3153_v37  ;;  %v3180_v14 = vmul.f32 %v10224_v17, %v10224_v17 }
 0xeba   :  { %v10229_v48 = vsub.f32 %v10184_v54, %v3165_v32  ;;  %3190 = vadd.xlane.f32.xlu0 %v3180_v14 }
 0xebc   :  { %v3181_v27 = vmul.f32 %v10229_v48, %v10229_v48 }
 0xebe   :  { %3192 = vadd.xlane.f32.xlu1 %v3181_v27 }
 0xecb   :  { %v3155_v26 = vpop.xlane.xlu0 %3154 }
 0xecc   :  { %v3166_v59 = vmul.f32 0.0078125, %v3155_v26 }
 0xece   :  { %v10240_v0 = vsub.f32 %v10189_v34, %v3166_v59  ;;  %v6667_v59 = vld [vmem:[%s11476_s4 + $0x1] ss:$0 sm:$0xff] }
 0xecf   :  { %v3157_v40 = vpop.xlane.xlu1 %3156 }
 0xed0   :  { %v3167_v35 = vmul.f32 0.0078125, %v3157_v40  ;;  %v3182_v28 = vmul.f32 %v10240_v0, %v10240_v0 }
 0xed2   :  { %v10254_v51 = vsub.f32 %v10194_v6, %v3167_v35  ;;  %3194 = vadd.xlane.f32.xlu0 %v3182_v28  ;;  %v6668_v35 = vld [vmem:[%s11477_s5 + $0x1] ss:$0 sm:$0xff] }
 0xed3   :  { %v3159_v16 = vpop.xlane.xlu0 %3158 }
 0xed4   :  { %v3168_v46 = vmul.f32 0.0078125, %v3159_v16  ;;  %v3183_v39 = vmul.f32 %v10254_v51, %v10254_v51 }
 0xed6   :  { %v10274_v18 = vsub.f32 %v10199_v7, %v3168_v46  ;;  %3196 = vadd.xlane.f32.xlu1 %v3183_v39 }
 0xed7   :  { %v3161_v58 = vpop.xlane.xlu1 %3160 }
 0xed8   :  { %v3169_v60 = vmul.f32 0.0078125, %v3161_v58  ;;  %v3184_v13 = vmul.f32 %v10274_v18, %v10274_v18 }
 0xeda   :  { %v10282_v5 = vsub.f32 %v10204_v9, %v3169_v60  ;;  %3198 = vadd.xlane.f32.xlu0 %v3184_v13 }
 0xedc   :  { %v3185_v4 = vmul.f32 %v10282_v5, %v10282_v5 }
 0xede   :  { %3200 = vadd.xlane.f32.xlu1 %v3185_v4 }
 0xf3b   :  { %v3187_v53 = vpop.xlane.xlu0 %3186 }
 0xf3c   :  { %v3202_v44 = vmul.f32 0.0078125, %v3187_v53 }
 0xf3e   :  { %v3210_v23 = vadd.f32 1e-05, %v3202_v44 }
 0xf3f   :  { %v3189_v19 = vpop.xlane.xlu1 %3188 }
 0xf40   :  { %8446 = vrsqrt.f32 %v3210_v23  ;;  %v3203_v38 = vmul.f32 0.0078125, %v3189_v19 }
 0xf42   :  { %v3211_v21 = vadd.f32 1e-05, %v3203_v38 }
 0xf43   :  { %v3191_v41 = vpop.xlane.xlu0 %3190 }
 0xf44   :  { %8448 = vrsqrt.f32 %v3211_v21  ;;  %v3204_v12 = vmul.f32 0.0078125, %v3191_v41 }
 0xf46   :  { %v3212_v55 = vadd.f32 1e-05, %v3204_v12 }
 0xf47   :  { %v3193_v37 = vpop.xlane.xlu1 %3192 }
 0xf48   :  { %8450 = vrsqrt.f32 %v3212_v55  ;;  %v3205_v32 = vmul.f32 0.0078125, %v3193_v37 }
 0xf4a   :  { %v3213_v14 = vadd.f32 1e-05, %v3205_v32 }
 0xf4c   :  { %8452 = vrsqrt.f32 %v3213_v14 }
 0xf4d   :  { %v8447_v27 = vpop.eup %8446 }
 0xf4e   :  { %v3226_v26 = vmul.f32 %v8447_v27, %v10214_v52 }
 0xf50   :  { %v3240_v40 = vmul.f32 %v6667_v59, %v3226_v26 }
 0xf51   :  { %v8449_v3 = vpop.eup %8448 }
 0xf52   :  { %v3227_v30 = vmul.f32 %v8449_v3, %v10219_v43  ;;  %v3254_v49 = vadd.f32 %v6668_v35, %v3240_v40 }
 0xf54   :  { %v3241_v28 = vmul.f32 %v6667_v59, %v3227_v30 }
 0xf55   :  { %v8451_v63 = vpop.eup %8450 }
 0xf56   :  { %v3255_v50 = vadd.f32 %v6668_v35, %v3241_v28  ;;  %v3228_v56 = vmul.f32 %v8451_v63, %v10224_v17 }
 0xf58   :  { %v3262_v20 = vpack.c.bf16 %v3255_v50, %v3254_v49  ;;  %v3242_v31 = vmul.f32 %v6667_v59, %v3228_v56 }
 0xf59   :  { %v8453_v52 = vpop.eup %8452 }
 0xf5a   :  { %3460 = vmatmul.mubr.bf16.vlgmr.msra.gmra.mxu1 %v3262_v20  ;;  %7544 = vmatprep.mubr.bf16.mxu0 %v3262_v20  ;;  %v3229_v16 = vmul.f32 %v8453_v52, %v10229_v48  ;;  %v3256_v11 = vadd.f32 %v6668_v35, %v3242_v31 }
 0xf5b   :  { %v3195_v46 = vpop.xlane.xlu0 %3194  ;;  %3469 = vmatprep.mubr.bf16.mxu1 %v11560_v61 }
 0xf5c   :  { %v3206_v43 = vmul.f32 0.0078125, %v3195_v46  ;;  %v3243_v39 = vmul.f32 %v6667_v59, %v3229_v16 }
 0xf5e   :  { %v3214_v2 = vadd.f32 1e-05, %v3206_v43  ;;  %v3257_v58 = vadd.f32 %v6668_v35, %v3243_v39 }
 0xf5f   :  { %v3197_v62 = vpop.xlane.xlu1 %3196 }
 0xf60   :  { %8454 = vrsqrt.f32 %v3214_v2  ;;  %v3207_v60 = vmul.f32 0.0078125, %v3197_v62  ;;  %v3263_v13 = vpack.c.bf16 %v3257_v58, %v3256_v11 }
 0xf62   :  { %v3215_v17 = vadd.f32 1e-05, %v3207_v60  ;;  %3470 = vmatmul.mubr.bf16.gmra.mxu1 %v3263_v13  ;;  %7545 = vmatmul.mubr.bf16.vlgmr.msra.gmra.mxu0 %v3263_v13 }
 0xf63   :  { %v3199_v4 = vpop.xlane.xlu0 %3198  ;;  %3479 = vmatprep.mubr.bf16.mxu1 %v11560_v61 }
 0xf64   :  { %8456 = vrsqrt.f32 %v3215_v17  ;;  %v3208_v48 = vmul.f32 0.0078125, %v3199_v4 }
 0xf66   :  { %v3216_v10 = vadd.f32 1e-05, %v3208_v48 }
 0xf67   :  { %v3201_v15 = vpop.xlane.xlu1 %3200 }
 0xf68   :  { %8458 = vrsqrt.f32 %v3216_v10  ;;  %v3209_v45 = vmul.f32 0.0078125, %v3201_v15 }
 0xf6a   :  { %v3217_v1 = vadd.f32 1e-05, %v3209_v45 }
 0xf6c   :  { %8460 = vrsqrt.f32 %v3217_v1 }
 0xf6d   :  { %v8455_v57 = vpop.eup %8454 }
 0xf6e   :  { %v3230_v24 = vmul.f32 %v8455_v57, %v10240_v0 }
 0xf70   :  { %v3244_v33 = vmul.f32 %v6667_v59, %v3230_v24 }
 0xf71   :  { %v8457_v42 = vpop.eup %8456 }
 0xf72   :  { %v3231_v47 = vmul.f32 %v8457_v42, %v10254_v51  ;;  %v3258_v53 = vadd.f32 %v6668_v35, %v3244_v33 }
 0xf74   :  { %v3245_v25 = vmul.f32 %v6667_v59, %v3231_v47 }
 0xf75   :  { %v8459_v36 = vpop.eup %8458 }
 0xf76   :  { %v3259_v44 = vadd.f32 %v6668_v35, %v3245_v25  ;;  %v3232_v23 = vmul.f32 %v8459_v36, %v10274_v18  ;;  %v6726_v18 = vld [vmem:[%s11479_s7 + $0x1] ss:$0 sm:$0xff] }
 0xf78   :  { %v3264_v19 = vpack.c.bf16 %v3259_v44, %v3258_v53  ;;  %v3246_v41 = vmul.f32 %v6667_v59, %v3232_v23 }
 0xf79   :  { %v8461_v38 = vpop.eup %8460 }
 0xf7a   :  { %3480 = vmatmul.mubr.bf16.gmra.mxu1 %v3264_v19  ;;  %7548 = vmatprep.mubr.bf16.mxu0 %v3264_v19  ;;  %v3233_v21 = vmul.f32 %v8461_v38, %v10282_v5  ;;  %v3260_v12 = vadd.f32 %v6668_v35, %v3246_v41 }
 0xf7b   :  { %3489 = vmatprep.mubr.bf16.mxu1 %v11560_v61 }
 0xf7c   :  { %v3247_v0 = vmul.f32 %v6667_v59, %v3233_v21 }
 0xf7e   :  { %v3261_v55 = vadd.f32 %v6668_v35, %v3247_v0 }
 0xf80   :  { %v3265_v51 = vpack.c.bf16 %v3261_v55, %v3260_v12 }
 0xf82   :  { %3490 = vmatmul.mubr.bf16.gmra.mxu1 %v3265_v51  ;;  %7549 = vmatmul.mubr.bf16.gmra.mxu0 %v3265_v51 }
0x101a   :  { %v3461_v37 = vpop.f32.mrf.mxu1 }
0x101b   :  { %v3573_v27 = vadd.f32 %v6726_v18, %v3461_v37 }
0x101c   :  { %v3463_v32 = vpop.f32.mrf.mxu1 }
0x101e   :  { %v3465_v14 = vpop.f32.mrf.mxu1 }
0x101f   :  { %v3574_v26 = vadd.f32 %v6726_v18, %v3465_v14 }
0x1020   :  { %v3467_v5 = vpop.f32.mrf.mxu1 }
0x1021   :  { %v10339_v3 = vpack.c.bf16 %v3574_v26, %v3573_v27  ;;  %v10353_v4 = vpack.c.bf16 %v3467_v5, %v3463_v32 }
0x1022   :  { %v3471_v59 = vpop.f32.mrf.mxu1  ;;  %v7546_v35 = vpop.f32.mrf.mxu0 }
0x1023   :  { %7560 = vmatprep.mubr.msk.bf16.mxu1 %vm572_vm0, %v10339_v3  ;;  %v3575_v45 = vadd.f32 %v6726_v18, %v3471_v59  ;;  %v3606_v38 = vsel %vm572_vm0, %v10353_v4, 0  ;;  %v11584_v59 = vld [vmem:[#allocation9_spill] sm:$0xff] }
0x1024   :  { %v3473_v30 = vpop.f32.mrf.mxu1  ;;  %v3534_v63 = vpop.f32.mrf.mxu0 }
0x1026   :  { %v3475_v40 = vpop.f32.mrf.mxu1  ;;  %v7547_v50 = vpop.f32.mrf.mxu0 }
0x1027   :  { %v3576_v48 = vadd.f32 %v6726_v18, %v3475_v40  ;;  %v10372_v24 = vpack.c.bf16 %v7547_v50, %v7546_v35  ;;  %v11585_v35 = vld [vmem:[#allocation8_spill] sm:$0xff] }
0x1028   :  { %v3477_v28 = vpop.f32.mrf.mxu1  ;;  %v3537_v52 = vpop.f32.mrf.mxu0 }
0x1029   :  { %v10347_v11 = vpack.c.bf16 %v3477_v28, %v3473_v30  ;;  %v10370_v57 = vpack.c.bf16 %v3576_v48, %v3575_v45  ;;  %v10382_v36 = vpack.c.bf16 %v3537_v52, %v3534_v63  ;;  %v11587_v52 = vld [vmem:[#allocation11_spill] sm:$0xff]  ;;  %v11589_v48 = vld [vmem:[#allocation14_spill] sm:$0xff] }
0x102b   :  { %v3609_v19 = vsel %vm572_vm0, %v10347_v11, 0 }
0x103a   :  { %v3481_v49 = vpop.f32.mrf.mxu1 }
0x103b   :  { %v3577_v25 = vadd.f32 %v6726_v18, %v3481_v49 }
0x103c   :  { %v3483_v56 = vpop.f32.mrf.mxu1 }
0x103e   :  { %v3485_v20 = vpop.f32.mrf.mxu1 }
0x103f   :  { %v3578_v47 = vadd.f32 %v6726_v18, %v3485_v20 }
0x1040   :  { %v3487_v16 = vpop.f32.mrf.mxu1 }
0x1041   :  { %v10343_v31 = vpack.c.bf16 %v3487_v16, %v3483_v56  ;;  %v10386_v44 = vpack.c.bf16 %v3578_v47, %v3577_v25  ;;  %v11586_v56 = vld [vmem:[#allocation10_spill] sm:$0xff] }
0x1042   :  { %v3491_v46 = vpop.f32.mrf.mxu1  ;;  %v7550_v43 = vpop.f32.mrf.mxu0 }
0x1043   :  { %3871 = vrot.lane.b32.xlu1 %v10343_v31, %s8770_s0  ;;  %v3579_v33 = vadd.f32 %v6726_v18, %v3491_v46  ;;  %v3612_v23 = vsel %vm572_vm0, %v10343_v31, 0 }
0x1044   :  { %v3493_v39 = vpop.f32.mrf.mxu1  ;;  %v3550_v2 = vpop.f32.mrf.mxu0 }
0x1046   :  { %v3495_v58 = vpop.f32.mrf.mxu1  ;;  %v7551_v62 = vpop.f32.mrf.mxu0 }
0x1047   :  { %v10349_v60 = vpack.c.bf16 %v7551_v62, %v7550_v43  ;;  %3869 = vrot.lane.b32.xlu1 %v10347_v11, %s8770_s0  ;;  %v3580_v42 = vadd.f32 %v6726_v18, %v3495_v58  ;;  %v11588_v58 = vld [vmem:[#allocation13_spill] sm:$0xff] }
0x1048   :  { %v3497_v13 = vpop.f32.mrf.mxu1  ;;  %v3553_v17 = vpop.f32.mrf.mxu0 }
0x1049   :  { %v10355_v10 = vpack.c.bf16 %v3497_v13, %v3493_v39  ;;  %v10357_v15 = vpack.c.bf16 %v3553_v17, %v3550_v2  ;;  %7568 = vmatprep.subr.bf16.mxu0 %v10349_v60  ;;  %v10384_v53 = vpack.c.bf16 %v3580_v42, %v3579_v33  ;;  %v11590_v42 = vld [vmem:[#allocation12_spill] sm:$0xff]  ;;  %v11591_v33 = vld [vmem:[#allocation15_spill] sm:$0xff] }
0x104a   :  { %7569 = vmatpush3.bf16.msra.mxu0 %v10349_v60 }
0x104b   :  { %3867 = vrot.lane.b32.xlu1 %v10353_v4, %s8770_s0  ;;  %7570 = vmatprep.subr.bf16.mxu0 %v10357_v15  ;;  %v3615_v1 = vsel %vm572_vm0, %v10355_v10, 0 }
0x104c   :  { %3873 = vrot.lane.b32.xlu0 %v10355_v10, %s8770_s0  ;;  %7764 = vmatprep.subr.msk.bf16.mxu1 %vm572_vm0, %v10355_v10 }
0x104d   :  { %7553 = vmatpush3.bf16.xpose.msra.mxu1 %v3615_v1 }
0x104e   :  { %7765 = vmatprep.subr.msk.bf16.mxu1 %vm572_vm0, %v10343_v31  ;;  %7571 = vmatpush3.bf16.msra.mxu0 %v10357_v15 }
0x104f   :  { %3857 = vrot.lane.b32.xlu1 %v10370_v57, %s8770_s0  ;;  %7572 = vmatprep.subr.bf16.mxu0 %v10372_v24 }
0x1050   :  { %3855 = vrot.lane.b32.xlu0 %v10339_v3, %s8770_s0 }
0x1052   :  { %7573 = vmatpush3.bf16.msra.mxu0 %v10372_v24 }
0x1053   :  { %7574 = vmatprep.subr.bf16.mxu0 %v10382_v36  ;;  %3861 = vrot.lane.b32.xlu1 %v10384_v53, %s8770_s0 }
0x1054   :  { %3859 = vrot.lane.b32.xlu0 %v10386_v44, %s8770_s0 }
0x1055   :  { %7555 = vmatpush3.bf16.xpose.msra.mxu1 %v3612_v23 }
0x1056   :  { %7766 = vmatprep.subr.msk.bf16.mxu1 %vm572_vm0, %v10347_v11  ;;  %7575 = vmatpush3.bf16.msra.mxu0 %v10382_v36 }
0x105d   :  { %7557 = vmatpush3.bf16.xpose.msra.mxu1 %v3609_v19 }
0x105e   :  { %7767 = vmatprep.subr.msk.bf16.mxu1 %vm572_vm0, %v10353_v4 }
0x1065   :  { %7559 = vmatpush3.bf16.xpose.msra.mxu1 %v3606_v38 }
0x106c   :  { %7561 = vmatmul.mubr.msk.bf16.vlgmr.msra.gmra.mxu1 %vm572_vm0, %v10370_v57 }
0x106d   :  { %7564 = vmatprep.mubr.msk.bf16.mxu1 %vm572_vm0, %v10386_v44 }
0x1074   :  { %7565 = vmatmul.mubr.msk.bf16.gmra.mxu1 %vm572_vm0, %v10384_v53 }
0x10b5   :  { %v3872_v0 = vpop.permute.xlu1 %3871 }
0x10b6   :  { %v3894_v55 = vsel %vm572_vm0, %v3872_v0, 0 }
0x10b9   :  { %v3870_v51 = vpop.permute.xlu1 %3869 }
0x10ba   :  { %v3891_v37 = vsel %vm572_vm0, %v3870_v51, 0 }
0x10bd   :  { %v3868_v18 = vpop.permute.xlu1 %3867 }
0x10be   :  { %v3874_v21 = vpop.permute.xlu0 %3873  ;;  %v3888_v32 = vsel %vm572_vm0, %v3868_v18, 0 }
0x10bf   :  { %7768 = vmatprep.subr.msk.bf16.mxu1 %vm572_vm0, %v3874_v21  ;;  %v3897_v41 = vsel %vm572_vm0, %v3874_v21, 0 }
0x10c0   :  { %7585 = vmatpush3.bf16.xpose.msra.mxu1 %v3897_v41 }
0x10c1   :  { %7769 = vmatprep.subr.msk.bf16.mxu1 %vm572_vm0, %v3872_v0  ;;  %v3858_v14 = vpop.permute.xlu1 %3857 }
0x10c2   :  { %v3856_v12 = vpop.permute.xlu0 %3855 }
0x10c3   :  { %7592 = vmatprep.mubr.msk.bf16.mxu1 %vm572_vm0, %v3856_v12 }
0x10c5   :  { %v3862_v26 = vpop.permute.xlu1 %3861 }
0x10c6   :  { %v3860_v27 = vpop.permute.xlu0 %3859 }
0x10c8   :  { %7587 = vmatpush3.bf16.xpose.msra.mxu1 %v3894_v55 }
0x10c9   :  { %7770 = vmatprep.subr.msk.bf16.mxu1 %vm572_vm0, %v3870_v51 }
0x10d0   :  { %7589 = vmatpush3.bf16.xpose.msra.mxu1 %v3891_v37 }
0x10d1   :  { %7771 = vmatprep.subr.msk.bf16.mxu1 %vm572_vm0, %v3868_v18 }
0x10d8   :  { %7591 = vmatpush3.bf16.xpose.msra.mxu1 %v3888_v32 }
0x10df   :  { %7593 = vmatmul.mubr.msk.bf16.vlgmr.msra.gmra.mxu1 %vm572_vm0, %v3858_v14 }
0x10e0   :  { %7596 = vmatprep.mubr.msk.bf16.mxu1 %vm572_vm0, %v3860_v27 }
0x10e7   :  { %7597 = vmatmul.mubr.msk.bf16.gmra.mxu1 %vm572_vm0, %v3862_v26 }
0x112c   :  { %v7562_v5 = vpop.f32.mrf.mxu1 }
0x112d   :  { %v10424_v30 = vadd.f32 %v7562_v5, %v11584_v59 }
0x112e   :  { %v3651_v40 = vpop.f32.mrf.mxu1 }
0x112f   :  { %v10427_v28 = vadd.f32 %v3651_v40, %v11585_v35  ;;  %v3688_v63 = vsel %vm662_vm13, %v10424_v30, -inf }
0x1130   :  { %3689 = vmax.xlane.f32.xlu0 %v3688_v63  ;;  %v7563_v49 = vpop.f32.mrf.mxu1 }
0x1131   :  { %v10432_v20 = vadd.f32 %v7563_v49, %v11586_v56  ;;  %v3682_v46 = vsel %vm662_vm13, %v10427_v28, -inf }
0x1132   :  { %v3654_v50 = vpop.f32.mrf.mxu1 }
0x1133   :  { %v10435_v16 = vadd.f32 %v3654_v50, %v11587_v52  ;;  %v3691_v13 = vsel %vm662_vm13, %v10432_v20, -inf }
0x1134   :  { %v7566_v43 = vpop.f32.mrf.mxu1  ;;  %3683 = vmax.xlane.f32.xlu0 %v3682_v46 }
0x1135   :  { %v3685_v39 = vsel %vm662_vm13, %v10435_v16, -inf  ;;  %v3676_v62 = vadd.f32 %v7566_v43, %v11588_v58 }
0x1136   :  { %v3667_v2 = vpop.f32.mrf.mxu1  ;;  %3686 = vmax.xlane.f32.xlu1 %v3685_v39 }
0x1137   :  { %v3668_v47 = vadd.f32 %v3667_v2, %v11590_v42  ;;  %v3700_v19 = vsel %vm662_vm13, %v3676_v62, -inf }
0x1138   :  { %v7567_v17 = vpop.f32.mrf.mxu1  ;;  %3692 = vmax.xlane.f32.xlu0 %v3691_v13 }
0x1139   :  { %v10445_v45 = vadd.f32 %v7567_v17, %v11589_v48  ;;  %v3694_v21 = vsel %vm662_vm13, %v3668_v47, -inf }
0x113a   :  { %v3670_v1 = vpop.f32.mrf.mxu1 }
0x113b   :  { %v10449_v25 = vadd.f32 %v3670_v1, %v11591_v33  ;;  %v3703_v23 = vsel %vm662_vm13, %v10445_v45, -inf }
0x113c   :  { %3704 = vmax.xlane.f32.xlu1 %v3703_v23  ;;  %3701 = vmax.xlane.f32.xlu0 %v3700_v19 }
0x113d   :  { %v3697_v38 = vsel %vm662_vm13, %v10449_v25, -inf }
0x1140   :  { %3698 = vmax.xlane.f32.xlu1 %v3697_v38  ;;  %3695 = vmax.xlane.f32.xlu0 %v3694_v21 }
0x119f   :  { %v7594_v41 = vpop.f32.mrf.mxu1 }
0x11a0   :  { %v10458_v0 = vadd.f32 %v7594_v41, %v11584_v59 }
0x11a1   :  { %v3933_v12 = vpop.f32.mrf.mxu1 }
0x11a2   :  { %v10461_v55 = vadd.f32 %v3933_v12, %v11585_v35  ;;  %v3970_v51 = vsel %vm662_vm13, %v10458_v0, -inf }
0x11a3   :  { %v7595_v37 = vpop.f32.mrf.mxu1  ;;  %3971 = vmax.xlane.f32.xlu0 %v3970_v51 }
0x11a4   :  { %v10466_v18 = vadd.f32 %v7595_v37, %v11586_v56  ;;  %v3964_v26 = vsel %vm662_vm13, %v10461_v55, -inf }
0x11a5   :  { %v3936_v32 = vpop.f32.mrf.mxu1 }
0x11a6   :  { %v10469_v14 = vadd.f32 %v3936_v32, %v11587_v52  ;;  %v3973_v27 = vsel %vm662_vm13, %v10466_v18, -inf }
0x11a7   :  { %v7598_v5 = vpop.f32.mrf.mxu1  ;;  %3974 = vmax.xlane.f32.xlu1 %v3973_v27  ;;  %3965 = vmax.xlane.f32.xlu0 %v3964_v26 }
0x11a8   :  { %v10476_v40 = vadd.f32 %v7598_v5, %v11588_v58  ;;  %v3967_v50 = vsel %vm662_vm13, %v10469_v14, -inf }
0x11a9   :  { %v3949_v63 = vpop.f32.mrf.mxu1 }
0x11aa   :  { %v10479_v49 = vadd.f32 %v3949_v63, %v11590_v42  ;;  %v3982_v46 = vsel %vm662_vm13, %v10476_v40, -inf }
0x11ab   :  { %3968 = vmax.xlane.f32.xlu1 %v3967_v50  ;;  %3983 = vmax.xlane.f32.xlu0 %v3982_v46  ;;  %v7599_v32 = vpop.f32.mrf.mxu1 }
0x11ac   :  { %v3976_v43 = vsel %vm662_vm13, %v10479_v49, -inf  ;;  %v10496_v27 = vadd.f32 %v7599_v32, %v11589_v48 }
0x11af   :  { %3977 = vmax.xlane.f32.xlu0 %v3976_v43 }
0x11b9   :  { %v3690_v39 = vpop.xlane.xlu0 %3689 }
0x11ba   :  { %v3708_v17 = vsub.f32 %v10424_v30, %v3690_v39  ;;  %v3952_v30 = vpop.f32.mrf.mxu1 }
0x11bb   :  { %v10501_v5 = vadd.f32 %v3952_v30, %v11591_v33 }
0x11bc   :  { %4064 = vrot.lane.b32.xlu1 %v10357_v15, %s8770_s0  ;;  %v3718_v23 = vmul.f32 1.442695, %v3708_v17 }
0x11bd   :  { %v3684_v2 = vpop.xlane.xlu0 %3683  ;;  %v3979_v63 = vsel %vm662_vm13, %v10501_v5, -inf }
0x11be   :  { %v3706_v19 = vsub.f32 %v10427_v28, %v3684_v2  ;;  %8462 = vpow2.f32 %v3718_v23  ;;  %v3985_v28 = vsel %vm662_vm13, %v10496_v27, -inf }
0x11bf   :  { %v3687_v17 = vpop.xlane.xlu1 %3686 }
0x11c0   :  { %4062 = vrot.lane.b32.xlu1 %v10372_v24, %s8770_s0  ;;  %v3714_v38 = vmul.f32 1.442695, %v3706_v19  ;;  %v3707_v19 = vsub.f32 %v10435_v16, %v3687_v17 }
0x11c1   :  { %v3693_v13 = vpop.xlane.xlu0 %3692 }
0x11c2   :  { %8464 = vpow2.f32 %v3714_v38 }
0x11c5   :  { %4066 = vrot.lane.b32.xlu0 %v10349_v60, %s8770_s0  ;;  %v3702_v1 = vpop.xlane.xlu0 %3701  ;;  %v3705_v23 = vpop.xlane.xlu1 %3704 }
0x11c6   :  { %v3712_v21 = vsub.f32 %v3676_v62, %v3702_v1  ;;  %v3709_v1 = vsub.f32 %v10432_v20, %v3693_v13 }
0x11c8   :  { %v3726_v12 = vmul.f32 1.442695, %v3712_v21  ;;  %v3720_v38 = vmul.f32 1.442695, %v3709_v1  ;;  %v3716_v21 = vmul.f32 1.442695, %v3707_v19 }
0x11c9   :  { %v3696_v41 = vpop.xlane.xlu0 %3695 }
0x11ca   :  { %v3710_v51 = vsub.f32 %v3668_v47, %v3696_v41  ;;  %8466 = vpow2.f32 %v3726_v12  ;;  %v3713_v41 = vsub.f32 %v10445_v45, %v3705_v23  ;;  %v3699_v12 = vpop.xlane.xlu1 %3698 }
0x11cb   :  { %v10498_v26 = vpop.eup %8462 }
0x11cc   :  { %v3722_v37 = vmul.f32 1.442695, %v3710_v51  ;;  %v3736_v62 = vsel %vm662_vm13, %v10498_v26, 0.0  ;;  %v3728_v51 = vmul.f32 1.442695, %v3713_v41 }
0x11ce   :  { %8468 = vpow2.f32 %v3722_v37  ;;  %v3711_v37 = vsub.f32 %v10449_v25, %v3699_v12 }
0x11cf   :  { %v10507_v47 = vpop.eup %8464  ;;  %8470 = vpow2.f32 %v3720_v38 }
0x11d0   :  { %v3730_v50 = vsel %vm662_vm13, %v10507_v47, 0.0  ;;  %8472 = vpow2.f32 %v3716_v21  ;;  %v3724_v32 = vmul.f32 1.442695, %v3711_v37 }
0x11d1   :  { %8474 = vpow2.f32 %v3728_v51 }
0x11d2   :  { %8476 = vpow2.f32 %v3724_v32 }
0x11d7   :  { %v10513_v46 = vpop.eup %8466 }
0x11d8   :  { %v3748_v43 = vsel %vm662_vm13, %v10513_v46, 0.0 }
0x11db   :  { %v10517_v39 = vpop.eup %8468 }
0x11dc   :  { %v3742_v2 = vsel %vm662_vm13, %v10517_v39, 0.0  ;;  %v10527_v30 = vpop.eup %8470 }
0x11dd   :  { %v3739_v20 = vsel %vm662_vm13, %v10527_v30, 0.0  ;;  %v10531_v13 = vpop.eup %8472 }
0x11de   :  { %v3733_v16 = vsel %vm662_vm13, %v10531_v13, 0.0  ;;  %v10535_v45 = vpop.eup %8474 }
0x11df   :  { %v3751_v25 = vsel %vm662_vm13, %v10535_v45, 0.0 }
0x11e4   :  { %3986 = vmax.xlane.f32.xlu1 %v3985_v28  ;;  %3737 = vadd.xlane.f32.xlu0 %v3736_v62  ;;  %v10539_v28 = vpop.eup %8476 }
0x11e5   :  { %v3745_v62 = vsel %vm662_vm13, %v10539_v28, 0.0 }
0x11e8   :  { %3980 = vmax.xlane.f32.xlu1 %v3979_v63  ;;  %3731 = vadd.xlane.f32.xlu0 %v3730_v50 }
0x11ec   :  { %3749 = vadd.xlane.f32.xlu0 %v3748_v43 }
0x11f0   :  { %3743 = vadd.xlane.f32.xlu0 %v3742_v2 }
0x11f9   :  { %4060 = vrot.lane.b32.xlu1 %v10382_v36, %s8770_s0 }
0x121d   :  { %3740 = vadd.xlane.f32.xlu1 %v3739_v20 }
0x1221   :  { %3734 = vadd.xlane.f32.xlu1 %v3733_v16 }
0x1225   :  { %3752 = vadd.xlane.f32.xlu1 %v3751_v25 }
0x1229   :  { %3746 = vadd.xlane.f32.xlu1 %v3745_v62 }
0x122c   :  { %v3972_v63 = vpop.xlane.xlu0 %3971 }
0x122d   :  { %v3990_v50 = vsub.f32 %v10458_v0, %v3972_v63 }
0x122f   :  { %v4000_v43 = vmul.f32 1.442695, %v3990_v50 }
0x1230   :  { %v3975_v2 = vpop.xlane.xlu1 %3974  ;;  %v3966_v17 = vpop.xlane.xlu0 %3965 }
0x1231   :  { %8478 = vpow2.f32 %v4000_v43  ;;  %v3991_v1 = vsub.f32 %v10466_v18, %v3975_v2  ;;  %v3988_v23 = vsub.f32 %v10461_v55, %v3966_v17 }
0x1233   :  { %v4002_v19 = vmul.f32 1.442695, %v3991_v1  ;;  %v3996_v38 = vmul.f32 1.442695, %v3988_v23 }
0x1234   :  { %v3969_v21 = vpop.xlane.xlu1 %3968  ;;  %v3984_v41 = vpop.xlane.xlu0 %3983 }
0x1235   :  { %8480 = vpow2.f32 %v4002_v19  ;;  %v3989_v12 = vsub.f32 %v10469_v14, %v3969_v21  ;;  %v3994_v51 = vsub.f32 %v10476_v40, %v3984_v41 }
0x1236   :  { %8482 = vpow2.f32 %v3996_v38 }
0x1237   :  { %v3998_v37 = vmul.f32 1.442695, %v3989_v12  ;;  %v4008_v0 = vmul.f32 1.442695, %v3994_v51 }
0x1238   :  { %v3978_v32 = vpop.xlane.xlu0 %3977  ;;  %v4065_v23 = vpop.permute.xlu1 %4064 }
0x1239   :  { %8484 = vpow2.f32 %v3998_v37  ;;  %v3992_v20 = vsub.f32 %v10479_v49, %v3978_v32 }
0x123a   :  { %8486 = vpow2.f32 %v4008_v0 }
0x123b   :  { %v4004_v18 = vmul.f32 1.442695, %v3992_v20 }
0x123c   :  { %v10549_v16 = vpop.permute.xlu0 %4066  ;;  %v10582_v19 = vpop.permute.xlu1 %4062 }
0x123d   :  { %8488 = vpow2.f32 %v4004_v18  ;;  %7600 = vmatprep.subr.bf16.mxu0 %v10549_v16 }
0x123e   :  { %v10552_v55 = vpop.eup %8478 }
0x123f   :  { %v4018_v14 = vsel %vm662_vm13, %v10552_v55, 0.0 }
0x1240   :  { %4019 = vadd.xlane.f32.xlu0 %v4018_v14 }
0x1242   :  { %v10556_v40 = vpop.eup %8480 }
0x1243   :  { %v10558_v25 = vpop.eup %8482  ;;  %v4021_v49 = vsel %vm662_vm13, %v10556_v40, 0.0 }
0x1244   :  { %4022 = vadd.xlane.f32.xlu1 %v4021_v49  ;;  %v4012_v62 = vsel %vm662_vm13, %v10558_v25, 0.0 }
0x1245   :  { %4013 = vadd.xlane.f32.xlu0 %v4012_v62 }
0x1246   :  { %v10564_v63 = vpop.eup %8484 }
0x1247   :  { %v10566_v50 = vpop.eup %8486  ;;  %v4015_v43 = vsel %vm662_vm13, %v10564_v63, 0.0 }
0x1248   :  { %4016 = vadd.xlane.f32.xlu1 %v4015_v43  ;;  %v4030_v2 = vsel %vm662_vm13, %v10566_v50, 0.0 }
0x1249   :  { %4031 = vadd.xlane.f32.xlu0 %v4030_v2 }
0x124a   :  { %v10572_v17 = vpop.eup %8488 }
0x124b   :  { %v4024_v1 = vsel %vm662_vm13, %v10572_v17, 0.0 }
0x124c   :  { %4025 = vadd.xlane.f32.xlu1 %v4024_v1 }
0x125d   :  { %4161 = vrot.lane.b32.xlu1 %v10343_v31, %s8771_s30 }
0x1261   :  { %4159 = vrot.lane.b32.xlu1 %v10347_v11, %s8771_s30 }
0x1265   :  { %4157 = vrot.lane.b32.xlu1 %v10353_v4, %s8771_s30 }
0x1269   :  { %4151 = vrot.lane.b32.xlu1 %v10370_v57, %s8771_s30 }
0x126d   :  { %v3987_v38 = vpop.xlane.xlu1 %3986  ;;  %4155 = vrot.lane.b32.xlu1 %v10384_v53, %s8771_s30 }
0x126e   :  { %v3995_v21 = vsub.f32 %v10496_v27, %v3987_v38  ;;  %v3738_v27 = vpop.xlane.xlu0 %3737 }
0x1270   :  { %v4010_v41 = vmul.f32 1.442695, %v3995_v21 }
0x1271   :  { %v3981_v12 = vpop.xlane.xlu1 %3980 }
0x1272   :  { %8490 = vpow2.f32 %v4010_v41  ;;  %v3993_v51 = vsub.f32 %v10501_v5, %v3981_v12  ;;  %v3732_v5 = vpop.xlane.xlu0 %3731 }
0x1274   :  { %v4006_v37 = vmul.f32 1.442695, %v3993_v51 }
0x1275   :  { %v4061_v14 = vpop.permute.xlu1 %4060 }
0x1276   :  { %8492 = vpow2.f32 %v4006_v37  ;;  %v3750_v62 = vpop.xlane.xlu0 %3749 }
0x127a   :  { %v3744_v2 = vpop.xlane.xlu0 %3743 }
0x127f   :  { %v10590_v0 = vpop.eup %8490 }
0x1280   :  { %v4033_v32 = vsel %vm662_vm13, %v10590_v0, 0.0 }
0x1281   :  { %4034 = vadd.xlane.f32.xlu0 %v4033_v32 }
0x1283   :  { %v10594_v20 = vpop.eup %8492 }
0x1284   :  { %v4027_v18 = vsel %vm662_vm13, %v10594_v20, 0.0 }
0x1285   :  { %4028 = vadd.xlane.f32.xlu0 %v4027_v18 }
0x129b   :  { %4163 = vrot.lane.b32.xlu0 %v10355_v10, %s8771_s30 }
0x129f   :  { %4149 = vrot.lane.b32.xlu0 %v10339_v3, %s8771_s30 }
0x12a3   :  { %4153 = vrot.lane.b32.xlu0 %v10386_v44, %s8771_s30 }
0x12a6   :  { %v3741_v49 = vpop.xlane.xlu1 %3740 }
0x12a7   :  { %8494 = vrcp.f32 %v3741_v49 }
0x12a8   :  { %8496 = vrcp.f32 %v3732_v5 }
0x12a9   :  { %8498 = vrcp.f32 %v3738_v27 }
0x12aa   :  { %v3735_v43 = vpop.xlane.xlu1 %3734 }
0x12ab   :  { %8500 = vrcp.f32 %v3735_v43 }
0x12ae   :  { %v3753_v1 = vpop.xlane.xlu1 %3752 }
0x12af   :  { %8502 = vrcp.f32 %v3753_v1 }
0x12b0   :  { %8504 = vrcp.f32 %v3744_v2 }
0x12b1   :  { %8506 = vrcp.f32 %v3750_v62 }
0x12b2   :  { %v3747_v38 = vpop.xlane.xlu1 %3746 }
0x12b3   :  { %8508 = vrcp.f32 %v3747_v38 }
0x12b4   :  { %v8495_v21 = vpop.eup %8494 }
0x12b5   :  { %v8497_v41 = vpop.eup %8496  ;;  %v3765_v37 = vmul.f32 %v8495_v21, %v10527_v30 }
0x12b6   :  { %v8499_v12 = vpop.eup %8498  ;;  %v3762_v32 = vmul.f32 %v8497_v41, %v10507_v47 }
0x12b7   :  { %v3764_v27 = vmul.f32 %v8499_v12, %v10498_v26 }
0x12b8   :  { %v8501_v51 = vpop.eup %8500 }
0x12b9   :  { %v3763_v18 = vmul.f32 %v8501_v51, %v10531_v13  ;;  %v3771_v49 = vpack.c.bf16 %v3765_v37, %v3764_v27 }
0x12bb   :  { %v3770_v5 = vpack.c.bf16 %v3763_v18, %v3762_v32 }
0x12bc   :  { %v8503_v43 = vpop.eup %8502 }
0x12bd   :  { %7576 = vmatprep.mubr.msk.bf16.mxu0 %vm662_vm13, %v3770_v5  ;;  %v8505_v62 = vpop.eup %8504  ;;  %v3769_v30 = vmul.f32 %v8503_v43, %v10535_v45 }
0x12be   :  { %7577 = vmatmul.mubr.msk.bf16.vlgmr.msra.gmra.mxu0 %vm662_vm13, %v3771_v49  ;;  %v8507_v2 = vpop.eup %8506  ;;  %v3766_v47 = vmul.f32 %v8505_v62, %v10517_v39 }
0x12bf   :  { %7601 = vmatpush3.bf16.msra.mxu0 %v10549_v16  ;;  %v3768_v26 = vmul.f32 %v8507_v2, %v10513_v46 }
0x12c0   :  { %v8509_v1 = vpop.eup %8508  ;;  %7602 = vmatprep.subr.bf16.mxu0 %v4065_v23 }
0x12c1   :  { %v3767_v13 = vmul.f32 %v8509_v1, %v10539_v28  ;;  %v3773_v21 = vpack.c.bf16 %v3769_v30, %v3768_v26 }
0x12c3   :  { %7603 = vmatpush3.bf16.msra.mxu0 %v4065_v23  ;;  %v3772_v38 = vpack.c.bf16 %v3767_v13, %v3766_v47 }
0x12c4   :  { %7604 = vmatprep.subr.bf16.mxu0 %v10582_v19 }
0x12c5   :  { %7580 = vmatprep.mubr.msk.bf16.mxu0 %vm662_vm13, %v3772_v38 }
0x12c6   :  { %7581 = vmatmul.mubr.msk.bf16.gmra.mxu0 %vm662_vm13, %v3773_v21 }
0x12c7   :  { %7605 = vmatpush3.bf16.msra.mxu0 %v10582_v19 }
0x12c8   :  { %7606 = vmatprep.subr.bf16.mxu0 %v4061_v14 }
0x12c9   :  { %v4020_v16 = vpop.xlane.xlu0 %4019 }
0x12cb   :  { %7607 = vmatpush3.bf16.msra.mxu0 %v4061_v14 }
0x12cd   :  { %v4023_v45 = vpop.xlane.xlu1 %4022 }
0x12ce   :  { %v4014_v39 = vpop.xlane.xlu0 %4013  ;;  %8510 = vrcp.f32 %v4023_v45 }
0x12cf   :  { %8512 = vrcp.f32 %v4014_v39 }
0x12d0   :  { %8514 = vrcp.f32 %v4020_v16 }
0x12d1   :  { %v4017_v46 = vpop.xlane.xlu1 %4016 }
0x12d2   :  { %8516 = vrcp.f32 %v4017_v46  ;;  %v4032_v27 = vpop.xlane.xlu0 %4031 }
0x12d5   :  { %v4026_v5 = vpop.xlane.xlu1 %4025 }
0x12db   :  { %v8511_v28 = vpop.eup %8510 }
0x12dc   :  { %v8513_v23 = vpop.eup %8512  ;;  %v4047_v51 = vmul.f32 %v8511_v28, %v10556_v40 }
0x12dd   :  { %v8515_v41 = vpop.eup %8514  ;;  %v4044_v37 = vmul.f32 %v8513_v23, %v10558_v25 }
0x12de   :  { %v4046_v32 = vmul.f32 %v8515_v41, %v10552_v55  ;;  %v4162_v55 = vpop.permute.xlu1 %4161 }
0x12df   :  { %v8517_v12 = vpop.eup %8516  ;;  %v4184_v1 = vsel %vm572_vm0, %v4162_v55, 0 }
0x12e0   :  { %v4045_v19 = vmul.f32 %v8517_v12, %v10564_v63  ;;  %v4053_v18 = vpack.c.bf16 %v4047_v51, %v4046_v32 }
0x12e2   :  { %v4052_v14 = vpack.c.bf16 %v4045_v19, %v4044_v37  ;;  %v4160_v47 = vpop.permute.xlu1 %4159 }
0x12e3   :  { %v4181_v46 = vsel %vm572_vm0, %v4160_v47, 0 }
0x12e4   :  { %7608 = vmatprep.mubr.msk.bf16.mxu0 %vm662_vm13, %v4052_v14 }
0x12e5   :  { %7609 = vmatmul.mubr.msk.bf16.vlgmr.msra.gmra.mxu0 %vm662_vm13, %v4053_v18 }
0x130a   :  { %v4035_v49 = vpop.xlane.xlu0 %4034 }
0x130b   :  { %8518 = vrcp.f32 %v4035_v49 }
0x130c   :  { %8520 = vrcp.f32 %v4026_v5 }
0x130d   :  { %8522 = vrcp.f32 %v4032_v27 }
0x130e   :  { %v4029_v43 = vpop.xlane.xlu0 %4028 }
0x130f   :  { %8524 = vrcp.f32 %v4029_v43 }
0x1312   :  { %v4164_v40 = vpop.permute.xlu0 %4163 }
0x1313   :  { %v4187_v25 = vsel %vm572_vm0, %v4164_v40, 0  ;;  %7772 = vmatprep.subr.msk.bf16.mxu0 %vm572_vm0, %v4164_v40 }
0x1314   :  { %7617 = vmatpush3.bf16.xpose.msra.mxu0 %v4187_v25 }
0x1315   :  { %7773 = vmatprep.subr.msk.bf16.mxu0 %vm572_vm0, %v4162_v55 }
0x1316   :  { %v4150_v39 = vpop.permute.xlu0 %4149 }
0x1318   :  { %v8519_v63 = vpop.eup %8518 }
0x1319   :  { %v8521_v62 = vpop.eup %8520  ;;  %v4051_v13 = vmul.f32 %v8519_v63, %v10590_v0  ;;  %v4158_v0 = vpop.permute.xlu1 %4157 }
0x131a   :  { %v8523_v2 = vpop.eup %8522  ;;  %v4048_v26 = vmul.f32 %v8521_v62, %v10572_v17  ;;  %v4178_v17 = vsel %vm572_vm0, %v4158_v0, 0 }
0x131b   :  { %v4050_v21 = vmul.f32 %v8523_v2, %v10566_v50  ;;  %v4154_v50 = vpop.permute.xlu0 %4153 }
0x131c   :  { %v8525_v30 = vpop.eup %8524  ;;  %7619 = vmatpush3.bf16.xpose.msra.mxu0 %v4184_v1 }
0x131d   :  { %7774 = vmatprep.subr.msk.bf16.mxu0 %vm572_vm0, %v4160_v47  ;;  %v4049_v38 = vmul.f32 %v8525_v30, %v10594_v20  ;;  %v4055_v45 = vpack.c.bf16 %v4051_v13, %v4050_v21  ;;  %v4152_v20 = vpop.permute.xlu1 %4151 }
0x131f   :  { %v4054_v16 = vpack.c.bf16 %v4049_v38, %v4048_v26 }
0x1321   :  { %7612 = vmatprep.mubr.msk.bf16.mxu0 %vm662_vm13, %v4054_v16  ;;  %v4156_v28 = vpop.permute.xlu1 %4155 }
0x1322   :  { %7613 = vmatmul.mubr.msk.bf16.gmra.mxu0 %vm662_vm13, %v4055_v45 }
0x1323   :  { %7624 = vmatprep.mubr.msk.bf16.mxu0 %vm572_vm0, %v4150_v39 }
0x1324   :  { %7621 = vmatpush3.bf16.xpose.msra.mxu0 %v4181_v46 }
0x1325   :  { %7775 = vmatprep.subr.msk.bf16.mxu0 %vm572_vm0, %v4158_v0 }
0x132c   :  { %7623 = vmatpush3.bf16.xpose.msra.mxu0 %v4178_v17 }
0x1333   :  { %7625 = vmatmul.mubr.msk.bf16.vlgmr.msra.gmra.mxu0 %vm572_vm0, %v4152_v20 }
0x1334   :  { %7628 = vmatprep.mubr.msk.bf16.mxu0 %vm572_vm0, %v4154_v50 }
0x133b   :  { %7629 = vmatmul.mubr.msk.bf16.gmra.mxu0 %vm572_vm0, %v4156_v28 }
0x137e   :  { %v10643_v23 = vpop.f32.mrf.mxu0 }
0x1380   :  { %v10645_v41 = vpop.f32.mrf.mxu0 }
0x1382   :  { %v10647_v12 = vpop.f32.mrf.mxu0 }
0x1384   :  { %v10649_v51 = vpop.f32.mrf.mxu0 }
0x1386   :  { %v10651_v37 = vpop.f32.mrf.mxu0 }
0x1388   :  { %v10653_v19 = vpop.f32.mrf.mxu0 }
0x138a   :  { %v10655_v32 = vpop.f32.mrf.mxu0 }
0x138c   :  { %v10657_v14 = vpop.f32.mrf.mxu0 }
0x13a5   :  { %v10659_v18 = vpop.f32.mrf.mxu0 }
0x13a7   :  { %v10661_v27 = vpop.f32.mrf.mxu0 }
0x13a9   :  { %v10663_v5 = vpop.f32.mrf.mxu0 }
0x13ab   :  { %v10667_v43 = vpop.f32.mrf.mxu0 }
0x13e2   :  { %v10671_v25 = vpop.f32.mrf.mxu0 }
0x13e4   :  { %v10673_v55 = vpop.f32.mrf.mxu0 }
0x13e6   :  { %v10675_v63 = vpop.f32.mrf.mxu0 }
0x13e8   :  { %v10679_v2 = vpop.f32.mrf.mxu0 }
0x13f3   :  { %v7626_v30 = vpop.f32.mrf.mxu0 }
0x13f4   :  { %v4232_v38 = vadd.f32 %v7626_v30, %v11584_v59 }
0x13f5   :  { %v4223_v47 = vpop.f32.mrf.mxu0 }
0x13f6   :  { %v4224_v13 = vadd.f32 %v4223_v47, %v11585_v35  ;;  %v4260_v17 = vsel %vm662_vm13, %v4232_v38, -inf }
0x13f7   :  { %v7627_v26 = vpop.f32.mrf.mxu0 }
0x13f8   :  { %v4254_v21 = vsel %vm662_vm13, %v4224_v13, -inf  ;;  %v4235_v46 = vadd.f32 %v7627_v26, %v11586_v56 }
0x13f9   :  { %v4226_v16 = vpop.f32.mrf.mxu0  ;;  %4255 = vmax.xlane.f32.xlu0 %v4254_v21 }
0x13fa   :  { %v4227_v45 = vadd.f32 %v4226_v16, %v11587_v52  ;;  %v4263_v47 = vsel %vm662_vm13, %v4235_v46, -inf }
0x13fb   :  { %v7630_v39 = vpop.f32.mrf.mxu0 }
0x13fc   :  { %v4257_v0 = vsel %vm662_vm13, %v4227_v45, -inf  ;;  %v4248_v28 = vadd.f32 %v7630_v39, %v11588_v58 }
0x13fd   :  { %4258 = vmax.xlane.f32.xlu1 %v4257_v0  ;;  %4261 = vmax.xlane.f32.xlu0 %v4260_v17  ;;  %v4239_v20 = vpop.f32.mrf.mxu0 }
0x13fe   :  { %v4240_v1 = vadd.f32 %v4239_v20, %v11590_v42  ;;  %v4272_v0 = vsel %vm662_vm13, %v4248_v28, -inf }
0x13ff   :  { %v7631_v50 = vpop.f32.mrf.mxu0 }
0x1400   :  { %v4251_v30 = vadd.f32 %v7631_v50, %v11589_v48  ;;  %v4266_v39 = vsel %vm662_vm13, %v4240_v1, -inf }
0x1401   :  { %4264 = vmax.xlane.f32.xlu0 %v4263_v47  ;;  %v4242_v21 = vpop.f32.mrf.mxu0 }
0x1402   :  { %v4243_v16 = vadd.f32 %v4242_v21, %v11591_v33  ;;  %v4275_v26 = vsel %vm662_vm13, %v4251_v30, -inf }
0x1403   :  { %4276 = vmax.xlane.f32.xlu1 %v4275_v26 }
0x1404   :  { %v4269_v17 = vsel %vm662_vm13, %v4243_v16, -inf }
0x1405   :  { %4273 = vmax.xlane.f32.xlu0 %v4272_v0 }
0x1407   :  { %4270 = vmax.xlane.f32.xlu1 %v4269_v17 }
0x1409   :  { %4267 = vmax.xlane.f32.xlu0 %v4266_v39 }
0x1418   :  { %4350 = vrot.lane.b32.xlu1 %v10357_v15, %s8771_s30 }
0x141c   :  { %4348 = vrot.lane.b32.xlu1 %v10372_v24, %s8771_s30 }
0x141f   :  { %4352 = vrot.lane.b32.xlu0 %v10349_v60, %s8771_s30 }
0x1420   :  { %4346 = vrot.lane.b32.xlu1 %v10382_v36, %s8771_s30 }
0x1482   :  { %v4256_v20 = vpop.xlane.xlu0 %4255 }
0x1483   :  { %v4278_v50 = vsub.f32 %v4224_v13, %v4256_v20 }
0x1485   :  { %v4286_v39 = vmul.f32 1.442695, %v4278_v50 }
0x1486   :  { %v4259_v47 = vpop.xlane.xlu1 %4258  ;;  %v4262_v21 = vpop.xlane.xlu0 %4261 }
0x1487   :  { %v4280_v26 = vsub.f32 %v4232_v38, %v4262_v21  ;;  %v4279_v0 = vsub.f32 %v4227_v45, %v4259_v47 }
0x1489   :  { %v4290_v17 = vmul.f32 1.442695, %v4280_v26  ;;  %v4288_v9 = vmul.f32 1.442695, %v4279_v0 }
0x148a   :  { %v4265_v62 = vpop.xlane.xlu0 %4264 }
0x148b   :  { %v4281_v49 = vsub.f32 %v4235_v46, %v4265_v62  ;;  %8526 = vpow2.f32 %v4290_v17 }
0x148c   :  { %v4277_v40 = vpop.xlane.xlu1 %4276  ;;  %8528 = vpow2.f32 %v4286_v39 }
0x148d   :  { %v4292_v6 = vmul.f32 1.442695, %v4281_v49  ;;  %v4285_v7 = vsub.f32 %v4251_v30, %v4277_v40 }
0x148e   :  { %v4274_v34 = vpop.xlane.xlu0 %4273 }
0x148f   :  { %8530 = vpow2.f32 %v4292_v6  ;;  %v4284_v54 = vsub.f32 %v4248_v28, %v4274_v34  ;;  %v4300_v20 = vmul.f32 1.442695, %v4285_v7 }
0x1490   :  { %v4271_v29 = vpop.xlane.xlu1 %4270  ;;  %8532 = vpow2.f32 %v4288_v9 }
0x1491   :  { %v4298_v13 = vmul.f32 1.442695, %v4284_v54  ;;  %v4283_v8 = vsub.f32 %v4243_v16, %v4271_v29 }
0x1492   :  { %v4268_v38 = vpop.xlane.xlu0 %4267 }
0x1493   :  { %8534 = vpow2.f32 %v4298_v13  ;;  %v4282_v45 = vsub.f32 %v4240_v1, %v4268_v38  ;;  %v4296_v62 = vmul.f32 1.442695, %v4283_v8 }
0x1494   :  { %v4351_v50 = vpop.permute.xlu1 %4350  ;;  %8536 = vpow2.f32 %v4300_v20 }
0x1495   :  { %v4294_v47 = vmul.f32 1.442695, %v4282_v45 }
0x1496   :  { %v4353_v46 = vpop.permute.xlu0 %4352 }
0x1497   :  { %8538 = vpow2.f32 %v4294_v47  ;;  %7632 = vmatprep.subr.bf16.mxu1 %v4353_v46 }
0x1498   :  { %7633 = vmatpush3.bf16.msra.mxu1 %v4353_v46  ;;  %v10707_v49 = vpop.eup %8526  ;;  %8540 = vpow2.f32 %v4296_v62  ;;  %v4349_v34 = vpop.permute.xlu1 %4348 }
0x1499   :  { %7634 = vmatprep.subr.bf16.mxu1 %v4351_v50  ;;  %v4308_v54 = vsel %vm662_vm13, %v10707_v49, 0.0  ;;  %v8529_v29 = vpop.eup %8528 }
0x149a   :  { %4309 = vadd.xlane.f32.xlu0 %v4308_v54  ;;  %v4302_v9 = vsel %vm662_vm13, %v8529_v29, 0.0 }
0x149c   :  { %v8531_v6 = vpop.eup %8530  ;;  %7635 = vmatpush3.bf16.msra.mxu1 %v4351_v50  ;;  %v4347_v1 = vpop.permute.xlu1 %4346 }
0x149d   :  { %7636 = vmatprep.subr.bf16.mxu1 %v4349_v34  ;;  %v4311_v7 = vsel %vm662_vm13, %v8531_v6, 0.0  ;;  %v8533_v8 = vpop.eup %8532 }
0x149e   :  { %4312 = vadd.xlane.f32.xlu1 %v4311_v7  ;;  %4303 = vadd.xlane.f32.xlu0 %v4302_v9  ;;  %v4305_v28 = vsel %vm662_vm13, %v8533_v8, 0.0 }
0x14a0   :  { %v10713_v40 = vpop.eup %8534  ;;  %7637 = vmatpush3.bf16.msra.mxu1 %v4349_v34 }
0x14a1   :  { %7638 = vmatprep.subr.bf16.mxu1 %v4347_v1  ;;  %v4320_v30 = vsel %vm662_vm13, %v10713_v40, 0.0  ;;  %v8537_v16 = vpop.eup %8536 }
0x14a2   :  { %4306 = vadd.xlane.f32.xlu1 %v4305_v28  ;;  %4321 = vadd.xlane.f32.xlu0 %v4320_v30  ;;  %v4323_v0 = vsel %vm662_vm13, %v8537_v16, 0.0 }
0x14a4   :  { %v8539_v21 = vpop.eup %8538  ;;  %7639 = vmatpush3.bf16.msra.mxu1 %v4347_v1 }
0x14a5   :  { %v4314_v26 = vsel %vm662_vm13, %v8539_v21, 0.0  ;;  %v8541_v17 = vpop.eup %8540 }
0x14a6   :  { %4315 = vadd.xlane.f32.xlu1 %v4314_v26  ;;  %4324 = vadd.xlane.f32.xlu0 %v4323_v0  ;;  %v4317_v39 = vsel %vm662_vm13, %v8541_v17, 0.0 }
0x14aa   :  { %4318 = vadd.xlane.f32.xlu0 %v4317_v39 }
0x14b7   :  { %4447 = vrot.lane.b32.xlu1 %v10343_v31, %s8772_s21 }
0x14bb   :  { %4445 = vrot.lane.b32.xlu1 %v10347_v11, %s8772_s21 }
0x14bf   :  { %4443 = vrot.lane.b32.xlu1 %v10353_v4, %s8772_s21 }
0x14c0   :  { %4449 = vrot.lane.b32.xlu0 %v10355_v10, %s8772_s21 }
0x14c3   :  { %4437 = vrot.lane.b32.xlu1 %v10370_v57, %s8772_s21 }
0x14c4   :  { %4435 = vrot.lane.b32.xlu0 %v10339_v3, %s8772_s21 }
0x14c7   :  { %4441 = vrot.lane.b32.xlu1 %v10384_v53, %s8772_s21 }
0x14c8   :  { %4439 = vrot.lane.b32.xlu0 %v10386_v44, %s8772_s21 }
0x1523   :  { %v4310_v31 = vpop.xlane.xlu0 %4309 }
0x1527   :  { %v4313_v11 = vpop.xlane.xlu1 %4312  ;;  %v4304_v13 = vpop.xlane.xlu0 %4303 }
0x1528   :  { %8542 = vrcp.f32 %v4313_v11 }
0x1529   :  { %8544 = vrcp.f32 %v4304_v13 }
0x152a   :  { %8546 = vrcp.f32 %v4310_v31 }
0x152b   :  { %v4307_v4 = vpop.xlane.xlu1 %4306  ;;  %v4322_v10 = vpop.xlane.xlu0 %4321 }
0x152c   :  { %8548 = vrcp.f32 %v4307_v4 }
0x152f   :  { %v4316_v20 = vpop.xlane.xlu1 %4315  ;;  %v4325_v57 = vpop.xlane.xlu0 %4324 }
0x1530   :  { %8550 = vrcp.f32 %v4325_v57 }
0x1531   :  { %8552 = vrcp.f32 %v4316_v20 }
0x1532   :  { %8554 = vrcp.f32 %v4322_v10 }
0x1533   :  { %v4319_v3 = vpop.xlane.xlu0 %4318  ;;  %v4448_v30 = vpop.permute.xlu1 %4447 }
0x1534   :  { %8556 = vrcp.f32 %v4319_v3  ;;  %v4470_v11 = vsel %vm572_vm0, %v4448_v30, 0 }
0x1535   :  { %v8543_v53 = vpop.eup %8542 }
0x1536   :  { %v8545_v38 = vpop.eup %8544  ;;  %v4337_v47 = vmul.f32 %v8543_v53, %v8531_v6 }
0x1537   :  { %v8547_v45 = vpop.eup %8546  ;;  %v4450_v44 = vpop.permute.xlu0 %4449  ;;  %v4334_v62 = vmul.f32 %v8545_v38, %v8529_v29 }
0x1538   :  { %7776 = vmatprep.subr.msk.bf16.mxu1 %vm572_vm0, %v4450_v44  ;;  %v4336_v34 = vmul.f32 %v8547_v45, %v10707_v49  ;;  %v4473_v1 = vsel %vm572_vm0, %v4450_v44, 0  ;;  %v4446_v4 = vpop.permute.xlu1 %4445 }
0x1539   :  { %v8549_v50 = vpop.eup %8548 }
0x153a   :  { %v4335_v46 = vmul.f32 %v8549_v50, %v8533_v8  ;;  %v4343_v7 = vpack.c.bf16 %v4337_v47, %v4336_v34 }
0x153b   :  { %v4436_v13 = vpop.permute.xlu0 %4435 }
0x153c   :  { %v4342_v54 = vpack.c.bf16 %v4335_v46, %v4334_v62 }
0x153d   :  { %v8551_v9 = vpop.eup %8550 }
0x153e   :  { %7640 = vmatprep.mubr.msk.bf16.mxu1 %vm662_vm13, %v4342_v54  ;;  %v8553_v28 = vpop.eup %8552  ;;  %v4341_v29 = vmul.f32 %v8551_v9, %v8537_v16  ;;  %v4467_v16 = vsel %vm572_vm0, %v4446_v4, 0 }
0x153f   :  { %7641 = vmatmul.mubr.msk.bf16.vlgmr.msra.gmra.mxu1 %vm662_vm13, %v4343_v7  ;;  %v8555_v26 = vpop.eup %8554  ;;  %v4338_v8 = vmul.f32 %v8553_v28, %v8539_v21  ;;  %v4444_v21 = vpop.permute.xlu1 %4443 }
0x1540   :  { %7649 = vmatpush3.bf16.xpose.msra.mxu1 %v4473_v1  ;;  %v4340_v49 = vmul.f32 %v8555_v26, %v10713_v40  ;;  %v4464_v40 = vsel %vm572_vm0, %v4444_v21, 0  ;;  %v4440_v10 = vpop.permute.xlu0 %4439 }
0x1541   :  { %7777 = vmatprep.subr.msk.bf16.mxu1 %vm572_vm0, %v4448_v30  ;;  %v8557_v6 = vpop.eup %8556 }
0x1542   :  { %v4339_v0 = vmul.f32 %v8557_v6, %v8541_v17  ;;  %v4345_v31 = vpack.c.bf16 %v4341_v29, %v4340_v49 }
0x1543   :  { %v4438_v17 = vpop.permute.xlu1 %4437 }
0x1544   :  { %v4344_v39 = vpack.c.bf16 %v4339_v0, %v4338_v8 }
0x1546   :  { %7644 = vmatprep.mubr.msk.bf16.mxu1 %vm662_vm13, %v4344_v39 }
0x1547   :  { %7645 = vmatmul.mubr.msk.bf16.gmra.mxu1 %vm662_vm13, %v4345_v31  ;;  %v4442_v20 = vpop.permute.xlu1 %4441 }
0x1548   :  { %7651 = vmatpush3.bf16.xpose.msra.mxu1 %v4470_v11  ;;  %7656 = vmatprep.mubr.msk.bf16.mxu1 %vm572_vm0, %v4436_v13 }
0x1549   :  { %7778 = vmatprep.subr.msk.bf16.mxu1 %vm572_vm0, %v4446_v4 }
0x1550   :  { %7653 = vmatpush3.bf16.xpose.msra.mxu1 %v4467_v16 }
0x1551   :  { %7779 = vmatprep.subr.msk.bf16.mxu1 %vm572_vm0, %v4444_v21 }
0x1558   :  { %7655 = vmatpush3.bf16.xpose.msra.mxu1 %v4464_v40 }
0x155f   :  { %7657 = vmatmul.mubr.msk.bf16.vlgmr.msra.gmra.mxu1 %vm572_vm0, %v4438_v17 }
0x1560   :  { %7660 = vmatprep.mubr.msk.bf16.mxu1 %vm572_vm0, %v4440_v10 }
0x1567   :  { %7661 = vmatmul.mubr.msk.bf16.gmra.mxu1 %vm572_vm0, %v4442_v20 }
0x1568   :  { %5371 = vmatprep.mubr.bf16.mxu1 %v11560_v61 }
0x15ff   :  { %v10756_v57 = vpop.f32.mrf.mxu1 }
0x1601   :  { %v10758_v3 = vpop.f32.mrf.mxu1 }
0x1603   :  { %v10760_v53 = vpop.f32.mrf.mxu1 }
0x1604   :  { %v7864_v38 = vpack.i.bf16 %v10760_v53, %v10756_v57 }
0x1605   :  { %v10764_v45 = vpop.f32.mrf.mxu1 }
0x1606   :  { %v7859_v44 = vpack.i.bf16 %v10764_v45, %v10758_v3 }
0x1607   :  { %v10768_v50 = vpop.f32.mrf.mxu1 }
0x1609   :  { %v10770_v47 = vpop.f32.mrf.mxu1 }
0x160b   :  { %v10772_v62 = vpop.f32.mrf.mxu1 }
0x160c   :  { %v7894_v46 = vpack.i.bf16 %v10772_v62, %v10768_v50 }
0x160d   :  { %v10776_v34 = vpop.f32.mrf.mxu1 }
0x160e   :  { %v7889_v54 = vpack.i.bf16 %v10776_v34, %v10770_v47 }
0x161f   :  { %v7658_v7 = vpop.f32.mrf.mxu1 }
0x1620   :  { %v4518_v30 = vadd.f32 %v7658_v7, %v11584_v59 }
0x1621   :  { %v4509_v9 = vpop.f32.mrf.mxu1 }
0x1622   :  { %v4510_v1 = vadd.f32 %v4509_v9, %v11585_v35  ;;  %v4546_v39 = vsel %vm662_vm13, %v4518_v30, -inf }
0x1623   :  { %v7659_v28 = vpop.f32.mrf.mxu1 }
0x1624   :  { %v4540_v26 = vsel %vm662_vm13, %v4510_v1, -inf  ;;  %v4521_v0 = vadd.f32 %v7659_v28, %v11586_v56 }
0x1625   :  { %v4512_v6 = vpop.f32.mrf.mxu1  ;;  %4541 = vmax.xlane.f32.xlu0 %v4540_v26 }
0x1626   :  { %v4513_v29 = vadd.f32 %v4512_v6, %v11587_v52  ;;  %v4549_v59 = vsel %vm662_vm13, %v4521_v0, -inf }
0x1627   :  { %v7662_v8 = vpop.f32.mrf.mxu1 }
0x1628   :  { %v4543_v49 = vsel %vm662_vm13, %v4513_v29, -inf  ;;  %v4534_v52 = vadd.f32 %v7662_v8, %v11588_v58 }
0x1629   :  { %4544 = vmax.xlane.f32.xlu1 %v4543_v49  ;;  %4547 = vmax.xlane.f32.xlu0 %v4546_v39  ;;  %v4525_v31 = vpop.f32.mrf.mxu1 }
0x162a   :  { %v4526_v11 = vadd.f32 %v4525_v31, %v11590_v42  ;;  %v4558_v42 = vsel %vm662_vm13, %v4534_v52, -inf }
0x162b   :  { %v7663_v35 = vpop.f32.mrf.mxu1 }
0x162c   :  { %v4537_v56 = vadd.f32 %v7663_v35, %v11589_v48  ;;  %v4552_v21 = vsel %vm662_vm13, %v4526_v11, -inf }
0x162d   :  { %4550 = vmax.xlane.f32.xlu0 %v4549_v59  ;;  %v4528_v13 = vpop.f32.mrf.mxu1 }
0x162e   :  { %v4529_v4 = vadd.f32 %v4528_v13, %v11591_v33  ;;  %v4561_v40 = vsel %vm662_vm13, %v4537_v56, -inf }
0x1630   :  { %v4555_v16 = vsel %vm662_vm13, %v4529_v4, -inf }
0x1631   :  { %4556 = vmax.xlane.f32.xlu1 %v4555_v16  ;;  %4553 = vmax.xlane.f32.xlu0 %v4552_v21 }
0x1635   :  { %4562 = vmax.xlane.f32.xlu1 %v4561_v40  ;;  %4559 = vmax.xlane.f32.xlu0 %v4558_v42 }
0x164b   :  { %4638 = vrot.lane.b32.xlu0 %v10349_v60, %s8772_s21 }
0x16ae   :  { %v4542_v33 = vpop.xlane.xlu0 %4541 }
0x16af   :  { %v4564_v17 = vsub.f32 %v4510_v1, %v4542_v33 }
0x16b1   :  { %v4572_v9 = vmul.f32 1.442695, %v4564_v17 }
0x16b2   :  { %v4545_v58 = vpop.xlane.xlu1 %4544  ;;  %v4548_v10 = vpop.xlane.xlu0 %4547 }
0x16b3   :  { %v4566_v48 = vsub.f32 %v4518_v30, %v4548_v10  ;;  %v4565_v20 = vsub.f32 %v4513_v29, %v4545_v58 }
0x16b5   :  { %v4576_v7 = vmul.f32 1.442695, %v4566_v48  ;;  %v4574_v6 = vmul.f32 1.442695, %v4565_v20 }
0x16b6   :  { %v4551_v28 = vpop.xlane.xlu0 %4550 }
0x16b7   :  { %v4567_v26 = vsub.f32 %v4521_v0, %v4551_v28  ;;  %8558 = vpow2.f32 %v4576_v7 }
0x16b8   :  { %8560 = vpow2.f32 %v4572_v9 }
0x16b9   :  { %v4578_v8 = vmul.f32 1.442695, %v4567_v26 }
0x16ba   :  { %v4557_v49 = vpop.xlane.xlu1 %4556  ;;  %v4554_v39 = vpop.xlane.xlu0 %4553 }
0x16bb   :  { %8562 = vpow2.f32 %v4578_v8  ;;  %v4568_v31 = vsub.f32 %v4526_v11, %v4554_v39  ;;  %v4569_v16 = vsub.f32 %v4529_v4, %v4557_v49 }
0x16bc   :  { %8564 = vpow2.f32 %v4574_v6  ;;  %v11592_v6 = vpack.i.bf16 %v10667_v43, %v10661_v27 }
0x16bd   :  { %v4580_v13 = vmul.f32 1.442695, %v4568_v31  ;;  %v4582_v17 = vmul.f32 1.442695, %v4569_v16 }
0x16be   :  { %v4560_v60 = vpop.xlane.xlu0 %4559  ;;  %v4563_v35 = vpop.xlane.xlu1 %4562 }
0x16bf   :  { %v4570_v1 = vsub.f32 %v4534_v52, %v4560_v60  ;;  %v4571_v30 = vsub.f32 %v4537_v56, %v4563_v35 }
0x16c1   :  { %v4584_v59 = vmul.f32 1.442695, %v4570_v1  ;;  %v4586_v21 = vmul.f32 1.442695, %v4571_v30 }
0x16c2   :  { %v4639_v29 = vpop.permute.xlu0 %4638 }
0x16c3   :  { %7664 = vmatprep.subr.bf16.mxu0 %v4639_v29  ;;  %8566 = vpow2.f32 %v4584_v59 }
0x16c4   :  { %7665 = vmatpush3.bf16.msra.mxu0 %v4639_v29  ;;  %v10798_v0 = vpop.eup %8558  ;;  %8568 = vpow2.f32 %v4580_v13 }
0x16c5   :  { %v4594_v40 = vsel %vm662_vm13, %v10798_v0, 0.0  ;;  %v8561_v42 = vpop.eup %8560  ;;  %8570 = vpow2.f32 %v4586_v21 }
0x16c6   :  { %4595 = vadd.xlane.f32.xlu0 %v4594_v40  ;;  %v4588_v56 = vsel %vm662_vm13, %v8561_v42, 0.0  ;;  %8572 = vpow2.f32 %v4582_v17 }
0x16c8   :  { %v8563_v11 = vpop.eup %8562 }
0x16c9   :  { %v4597_v52 = vsel %vm662_vm13, %v8563_v11, 0.0  ;;  %v8565_v33 = vpop.eup %8564 }
0x16ca   :  { %4598 = vadd.xlane.f32.xlu1 %v4597_v52  ;;  %4589 = vadd.xlane.f32.xlu0 %v4588_v56  ;;  %v4591_v58 = vsel %vm662_vm13, %v8565_v33, 0.0  ;;  %v8063_v56 = vld [vmem:[%s11480_s8 + $0x70] sm:$0xff]  }
0x16ce   :  { %4592 = vadd.xlane.f32.xlu1 %v4591_v58  ;;  %v8064_v58 = vld [vmem:[%s11480_s8 + $0x68] sm:$0xff]  }
0x16d0   :  { %v10805_v4 = vpop.eup %8566 }
0x16d1   :  { %v4606_v10 = vsel %vm662_vm13, %v10805_v4, 0.0  ;;  %v8569_v48 = vpop.eup %8568 }
0x16d2   :  { %4607 = vadd.xlane.f32.xlu1 %v4606_v10  ;;  %v4600_v20 = vsel %vm662_vm13, %v8569_v48, 0.0  ;;  %v8571_v7 = vpop.eup %8570  ;;  %v8066_v10 = vld [vmem:[%s11480_s8 + $0x58] sm:$0xff]  }
0x16d3   :  { %v4609_v9 = vsel %vm662_vm13, %v8571_v7, 0.0  ;;  %v8573_v28 = vpop.eup %8572 }
0x16d4   :  { %v4603_v26 = vsel %vm662_vm13, %v8573_v28, 0.0 }
0x16d6   :  { %4601 = vadd.xlane.f32.xlu1 %v4600_v20  ;;  %v8068_v20 = vld [vmem:[%s11480_s8 + $0x48] sm:$0xff]  }
0x16da   :  { %4610 = vadd.xlane.f32.xlu1 %v4609_v9 }
0x16de   :  { %4604 = vadd.xlane.f32.xlu1 %v4603_v26 }
0x16e0   :  { %4634 = vrot.lane.b32.xlu0 %v10372_v24, %s8772_s21  ;;  %v11593_v24 = vpack.i.bf16 %v10663_v5, %v10659_v18 }
0x16e4   :  { %4632 = vrot.lane.b32.xlu0 %v10382_v36, %s8772_s21 }
0x16e8   :  { %7850 = vrot.lane.b32.xlu0 %v11592_v6, %s8772_s21 }
0x16ec   :  { %7860 = vrot.lane.b32.xlu0 %v7859_v44, %s8771_s30 }
0x16ef   :  { %4636 = vrot.lane.b32.xlu1 %v10357_v15, %s8772_s21 }
0x16f3   :  { %7855 = vrot.lane.b32.xlu1 %v11593_v24, %s8772_s21 }
0x16f7   :  { %7865 = vrot.lane.b32.xlu1 %v7864_v38, %s8771_s30 }
0x174f   :  { %v4596_v36 = vpop.xlane.xlu0 %4595 }
0x1753   :  { %v4599_v27 = vpop.xlane.xlu1 %4598  ;;  %v4590_v43 = vpop.xlane.xlu0 %4589 }
0x1754   :  { %8574 = vrcp.f32 %v4590_v43 }
0x1757   :  { %v4593_v8 = vpop.xlane.xlu1 %4592  ;;  %v4635_v57 = vpop.permute.xlu0 %4634 }
0x1758   :  { %8576 = vrcp.f32 %v4593_v8  ;;  %v11594_v8 = vpack.i.bf16 %v10675_v63, %v10671_v25 }
0x1759   :  { %8578 = vrcp.f32 %v4599_v27 }
0x175a   :  { %8580 = vrcp.f32 %v4596_v36 }
0x175b   :  { %v4608_v3 = vpop.xlane.xlu1 %4607  ;;  %v4633_v35 = vpop.permute.xlu0 %4632 }
0x175f   :  { %v4602_v45 = vpop.xlane.xlu1 %4601 }
0x1760   :  { %8582 = vrcp.f32 %v4602_v45  ;;  %v11595_v45 = vpack.i.bf16 %v10679_v2, %v10673_v55  ;;  %v7851_v55 = vpop.permute.xlu0 %7850 }
0x1761   :  { %v8575_v44 = vpop.eup %8574 }
0x1762   :  { %v4620_v18 = vmul.f32 %v8575_v44, %v8561_v42 }
0x1763   :  { %v4611_v15 = vpop.xlane.xlu1 %4610 }
0x1765   :  { %v8577_v49 = vpop.eup %8576 }
0x1766   :  { %v4621_v5 = vmul.f32 %v8577_v49, %v8565_v33  ;;  %v8579_v38 = vpop.eup %8578  ;;  %v7861_v49 = vpop.permute.xlu0 %7860 }
0x1767   :  { %v4605_v39 = vpop.xlane.xlu1 %4604  ;;  %v8581_v60 = vpop.eup %8580  ;;  %v4623_v1 = vmul.f32 %v8579_v38, %v8563_v11 }
0x1768   :  { %v4628_v31 = vpack.c.bf16 %v4621_v5, %v4620_v18  ;;  %8584 = vrcp.f32 %v4605_v39  ;;  %v4622_v13 = vmul.f32 %v8581_v60, %v10798_v0  ;;  %v8062_v0 = vld [vmem:[%s11480_s8 + $0x78] sm:$0xff]   ;;  %v7853_v18 = vunpack.i.h.bf16 %v7851_v55 }
0x1769   :  { %8586 = vrcp.f32 %v4611_v15  ;;  %v7852_v5 = vunpack.i.l.bf16 %v7851_v55 }
0x176a   :  { %7672 = vmatprep.mubr.msk.bf16.mxu0 %vm662_vm13, %v4628_v31  ;;  %8588 = vrcp.f32 %v4608_v3  ;;  %v4629_v29 = vpack.c.bf16 %v4623_v1, %v4622_v13  ;;  %v7863_v31 = vunpack.i.h.bf16 %v7861_v49 }
0x176b   :  { %v4637_v53 = vpop.permute.xlu1 %4636  ;;  %v4817_v38 = vsel %vm572_vm0, %v10645_v41, %v7852_v5  ;;  %v6784_v5 = vld [vmem:[%s11481_s9 + $0x1] ss:$0 sm:$0xff] }
0x176c   :  { %7666 = vmatprep.subr.bf16.mxu0 %v4637_v53 }
0x176d   :  { %7667 = vmatpush3.bf16.msra.mxu0 %v4637_v53  ;;  %v8583_v59 = vpop.eup %8582 }
0x176e   :  { %7668 = vmatprep.subr.bf16.mxu0 %v4635_v57  ;;  %v4624_v16 = vmul.f32 %v8583_v59, %v8569_v48  ;;  %v8067_v48 = vld [vmem:[%s11480_s8 + $0x50] sm:$0xff]  }
0x176f   :  { %v7856_v63 = vpop.permute.xlu1 %7855 }
0x1770   :  { %v7858_v50 = vunpack.i.h.bf16 %v7856_v63  ;;  %v7857_v62 = vunpack.i.l.bf16 %v7856_v63 }
0x1771   :  { %7669 = vmatpush3.bf16.msra.mxu0 %v4635_v57  ;;  %v7862_v57 = vunpack.i.l.bf16 %v7861_v49 }
0x1772   :  { %7670 = vmatprep.subr.bf16.mxu0 %v4633_v35  ;;  %v4820_v60 = vsel %vm572_vm0, %v10647_v12, %v7858_v50 }
0x1773   :  { %v7866_v2 = vpop.permute.xlu1 %7865 }
0x1774   :  { %v7867_v39 = vunpack.i.l.bf16 %v7866_v2 }
0x1775   :  { %v8585_v30 = vpop.eup %8584  ;;  %7671 = vmatpush3.bf16.msra.mxu0 %v4633_v35  ;;  %v4819_v35 = vsel %vm572_vm0, %v10643_v23, %v7857_v62  ;;  %v11596_v62 = vld [vmem:[#allocation18_spill] sm:$0xff] }
0x1776   :  { %v4625_v21 = vmul.f32 %v8585_v30, %v8573_v28  ;;  %v8587_v40 = vpop.eup %8586  ;;  %7680 = vmatprep.subr.bf16.mxu0 %v8062_v0  ;;  %v4827_v59 = vsel %vm662_vm13, %v4819_v35, %v7867_v39 }
0x1777   :  { %v8589_v52 = vpop.eup %8588  ;;  %v4627_v33 = vmul.f32 %v8587_v40, %v8571_v7  ;;  %v8069_v7 = vld [vmem:[%s11480_s8 + $0x40] sm:$0xff]  }
0x1778   :  { %7673 = vmatmul.mubr.msk.bf16.vlgmr.msra.gmra.mxu0 %vm662_vm13, %v4629_v29  ;;  %v4630_v42 = vpack.c.bf16 %v4625_v21, %v4624_v16  ;;  %v4626_v17 = vmul.f32 %v8589_v52, %v10805_v4  ;;  %v8065_v4 = vld [vmem:[%s11480_s8 + $0x60] sm:$0xff]   ;;  %v4825_v16 = vsel %vm662_vm13, %v4817_v38, %v7862_v57  ;;  %v11598_v57 = vld [vmem:[#allocation16_spill] sm:$0xff] }
0x1779   :  { %7681 = vmatpush3.bf16.msra.mxu0 %v8062_v0 }
0x177a   :  { %7676 = vmatprep.mubr.msk.bf16.mxu0 %vm662_vm13, %v4630_v42  ;;  %v4631_v11 = vpack.c.bf16 %v4627_v33, %v4626_v17  ;;  %7682 = vmatprep.subr.bf16.mxu0 %v8063_v56 }
0x177d   :  { %7683 = vmatpush3.bf16.msra.mxu0 %v8063_v56 }
0x177e   :  { %7684 = vmatprep.subr.bf16.mxu0 %v8064_v58 }
0x1780   :  { %7677 = vmatmul.mubr.msk.bf16.gmra.mxu0 %vm662_vm13, %v4631_v11 }
0x1781   :  { %7685 = vmatpush3.bf16.msra.mxu0 %v8064_v58 }
0x1782   :  { %7686 = vmatprep.subr.bf16.mxu0 %v8065_v4 }
0x1785   :  { %7687 = vmatpush3.bf16.msra.mxu0 %v8065_v4 }
0x1786   :  { %7688 = vmatprep.subr.bf16.mxu0 %v8066_v10 }
0x1789   :  { %7689 = vmatpush3.bf16.msra.mxu0 %v8066_v10 }
0x178a   :  { %7690 = vmatprep.subr.bf16.mxu0 %v8067_v48 }
0x178d   :  { %7691 = vmatpush3.bf16.msra.mxu0 %v8067_v48 }
0x178e   :  { %7692 = vmatprep.subr.bf16.mxu0 %v8068_v20 }
0x1791   :  { %7693 = vmatpush3.bf16.msra.mxu0 %v8068_v20 }
0x1792   :  { %7694 = vmatprep.subr.bf16.mxu0 %v8069_v7 }
0x1795   :  { %7695 = vmatpush3.bf16.msra.mxu0 %v8069_v7 }
0x1838   :  { %v7674_v9 = vpop.f32.mrf.mxu0 }
0x183a   :  { %v4690_v28 = vpop.f32.mrf.mxu0 }
0x183c   :  { %v7675_v26 = vpop.f32.mrf.mxu0 }
0x183d   :  { %v7874_v6 = vpack.i.bf16 %v7675_v26, %v7674_v9 }
0x183e   :  { %v4693_v24 = vpop.f32.mrf.mxu0 }
0x183f   :  { %v7869_v36 = vpack.i.bf16 %v4693_v24, %v4690_v28  ;;  %7875 = vrot.lane.b32.xlu1 %v7874_v6, %s8770_s0 }
0x1840   :  { %v7678_v27 = vpop.f32.mrf.mxu0 }
0x1841   :  { %7870 = vrot.lane.b32.xlu0 %v7869_v36, %s8770_s0 }
0x1842   :  { %v4706_v43 = vpop.f32.mrf.mxu0 }
0x1843   :  { %7885 = vrot.lane.b32.xlu1 %v11594_v8, %s8772_s21 }
0x1844   :  { %v7679_v3 = vpop.f32.mrf.mxu0 }
0x1845   :  { %7880 = vrot.lane.b32.xlu0 %v11595_v45, %s8772_s21  ;;  %v7904_v15 = vpack.i.bf16 %v7679_v3, %v7678_v27 }
0x1846   :  { %v4709_v44 = vpop.f32.mrf.mxu0 }
0x1847   :  { %7895 = vrot.lane.b32.xlu1 %v7894_v46, %s8771_s30  ;;  %v7899_v25 = vpack.i.bf16 %v4709_v44, %v4706_v43  ;;  %v7868_v46 = vunpack.i.h.bf16 %v7866_v2 }
0x1849   :  { %7890 = vrot.lane.b32.xlu0 %v7889_v54, %s8771_s30  ;;  %v4818_v54 = vsel %vm572_vm0, %v10649_v51, %v7853_v18  ;;  %v4828_v13 = vsel %vm662_vm13, %v4820_v60, %v7868_v46 }
0x184a   :  { %v4826_v51 = vsel %vm662_vm13, %v4818_v54, %v7863_v31 }
0x184b   :  { %7905 = vrot.lane.b32.xlu1 %v7904_v15, %s8770_s0 }
0x184d   :  { %7900 = vrot.lane.b32.xlu0 %v7899_v25, %s8770_s0  ;;  %s11610_s0 = sld [smem:[#allocation25_spill]] }
0x18b1   :  { %v7876_v53 = vpop.permute.xlu1 %7875 }
0x18b2   :  { %v7878_v47 = vunpack.i.h.bf16 %v7876_v53  ;;  %v7877_v34 = vunpack.i.l.bf16 %v7876_v53 }
0x18b3   :  { %v7871_v1 = vpop.permute.xlu0 %7870 }
0x18b4   :  { %v7873_v30 = vunpack.i.h.bf16 %v7871_v1  ;;  %v7872_v29 = vunpack.i.l.bf16 %v7871_v1  ;;  %v4836_v21 = vsel %vm1814_vm7, %v4828_v13, %v7878_v47  ;;  %v4835_v41 = vsel %vm1814_vm7, %v4827_v59, %v7877_v34  ;;  %v11600_v34 = vld [vmem:[#allocation17_spill] sm:$0xff]  ;;  %v11603_v1 = vld [vmem:[#allocation19_spill] sm:$0xff] }
0x18b5   :  { %v7886_v40 = vpop.permute.xlu1 %7885  ;;  %v4842_v33 = vpack.c.bf16 %v4836_v21, %v4835_v41  ;;  %v11606_v21 = vld [vmem:[#allocation20_spill] sm:$0xff] }
0x18b6   :  { %v4833_v12 = vsel %vm1814_vm7, %v4825_v16, %v7872_v29  ;;  %v4834_v23 = vsel %vm1814_vm7, %v4826_v51, %v7873_v30  ;;  %v7888_v11 = vunpack.i.h.bf16 %v7886_v40  ;;  %v7887_v0 = vunpack.i.l.bf16 %v7886_v40  ;;  %v11604_v30 = vld [vmem:[#allocation22_spill] sm:$0xff] }
0x18b7   :  { %v7881_v42 = vpop.permute.xlu0 %7880  ;;  %v4841_v52 = vpack.c.bf16 %v4834_v23, %v4833_v12  ;;  %v11607_v12 = vld [vmem:[#allocation21_spill] sm:$0xff] }
0x18b8   :  { %v7883_v56 = vunpack.i.h.bf16 %v7881_v42  ;;  %v7882_v58 = vunpack.i.l.bf16 %v7881_v42  ;;  %v4824_v6 = vsel %vm572_vm0, %v10655_v32, %v7888_v11  ;;  %v4823_v24 = vsel %vm572_vm0, %v10651_v37, %v7887_v0  ;;  %v8073_v11 = vld [vmem:[%s11484_s12 + $0x1e8] ss:$16 sps:$4 sm:$0xff]   ;;  %v8075_v0 = vld [vmem:[%s11484_s12 + $0x1ec] ss:$16 sps:$4 sm:$0xff]  }
0x18b9   :  { %v7896_v17 = vpop.permute.xlu1 %7895  ;;  %7696 = vmatprep.mubr.bf16.mxu0 %v4841_v52  ;;  %5412 = vmatprep.subr.bf16.mxu0 %v8075_v0  ;;  %v8106_v0 = vld [vmem:[%s11484_s12 + $0x120] ss:$16 sps:$4 sm:$0xff]  }
0x18ba   :  { %7697 = vmatmul.mubr.bf16.vlgmr.msra.gmra.mxu0 %v4842_v33  ;;  %v7898_v10 = vunpack.i.h.bf16 %v7896_v17  ;;  %v7897_v48 = vunpack.i.l.bf16 %v7896_v17  ;;  %v4822_v36 = vsel %vm572_vm0, %v10657_v14, %v7883_v56  ;;  %v4821_v27 = vsel %vm572_vm0, %v10653_v19, %v7882_v58  ;;  %v8070_v33 = vld [vmem:[%s11484_s12 + $0x1e0] ss:$16 sps:$4 sm:$0xff]   ;;  %v8072_v17 = vld [vmem:[%s11484_s12 + $0x1e4] ss:$16 sps:$4 sm:$0xff]  }
0x18bb   :  { %v7891_v4 = vpop.permute.xlu0 %7890  ;;  %5339 = vmatprep.subr.bf16.mxu1 %v8072_v17  ;;  %5413 = vmatpush1.bf16.msra.mxu0 %v8073_v11  ;;  %v8108_v17 = vld [vmem:[%s11484_s12 + $0x124] ss:$16 sps:$4 sm:$0xff]   ;;  %v8111_v11 = vld [vmem:[%s11484_s12 + $0x12c] ss:$16 sps:$4 sm:$0xff]   ;;  %vm8774_vm0 = vmmov 0  }
0x18bc   :  { %v7893_v20 = vunpack.i.h.bf16 %v7891_v4  ;;  %v7892_v7 = vunpack.i.l.bf16 %v7891_v4  ;;  %v4831_v8 = vsel %vm662_vm13, %v4823_v24, %v7897_v48  ;;  %v4832_v3 = vsel %vm662_vm13, %v4824_v6, %v7898_v10  ;;  %5340 = vmatpush1.bf16.msra.mxu1 %v8070_v33  ;;  %v8103_v33 = vld [vmem:[%s11484_s12 + $0x148] ss:$16 sps:$4 sm:$0xff]  }
0x18bd   :  { %v7906_v9 = vpop.permute.xlu1 %7905 }
0x18be   :  { %v7908_v28 = vunpack.i.h.bf16 %v7906_v9  ;;  %v7907_v26 = vunpack.i.l.bf16 %v7906_v9  ;;  %v4829_v15 = vsel %vm662_vm13, %v4821_v27, %v7892_v7  ;;  %v4830_v32 = vsel %vm662_vm13, %v4822_v36, %v7893_v20 }
0x18bf   :  { %v7901_v43 = vpop.permute.xlu0 %7900 }
0x18c0   :  { %v7903_v45 = vunpack.i.h.bf16 %v7901_v43  ;;  %v7902_v44 = vunpack.i.l.bf16 %v7901_v43  ;;  %v4840_v25 = vsel %vm1814_vm7, %v4832_v3, %v7908_v28  ;;  %v4839_v37 = vsel %vm1814_vm7, %v4831_v8, %v7907_v26 }
0x18c1   :  { %v4844_v55 = vpack.c.bf16 %v4840_v25, %v4839_v37 }
0x18c2   :  { %v4837_v14 = vsel %vm1814_vm7, %v4829_v15, %v7902_v44  ;;  %v4838_v63 = vsel %vm1814_vm7, %v4830_v32, %v7903_v45 }
0x18c3   :  { %v4843_v19 = vpack.c.bf16 %v4838_v63, %v4837_v14  ;;  %v8078_v63 = vld [vmem:[%s11484_s12 + $0x1c4] ss:$16 sps:$4 sm:$0xff]  }
0x18c4   :  { %5341 = vmatprep.subr.bf16.mxu1 %v8078_v63 }
0x18c5   :  { %7700 = vmatprep.mubr.bf16.mxu0 %v4843_v19  ;;  %v8081_v19 = vld [vmem:[%s11484_s12 + $0x1cc] ss:$16 sps:$4 sm:$0xff]  }
0x18c6   :  { %7701 = vmatmul.mubr.bf16.gmra.mxu0 %v4844_v55  ;;  %v8076_v55 = vld [vmem:[%s11484_s12 + $0x1c0] ss:$16 sps:$4 sm:$0xff]   ;;  %5414 = vmatprep.subr.bf16.mxu0 %v8081_v19 }
0x18c7   :  { %5444 = vmatprep.mubr.bf16.mxu0 %v11560_v61  ;;  %5342 = vmatpush1.bf16.msra.mxu1 %v8076_v55 }
0x197a   :  { %v7698_v2 = vpop.f32.mrf.mxu0 }
0x197b   :  { %v4977_v46 = vadd.f32 %v7698_v2, %v11596_v62  ;;  %v8079_v2 = vld [vmem:[%s11484_s12 + $0x1c8] ss:$16 sps:$4 sm:$0xff]  }
0x197c   :  { %v4944_v49 = vpop.f32.mrf.mxu0  ;;  %5415 = vmatpush1.bf16.msra.mxu0 %v8079_v2 }
0x197d   :  { %v4975_v18 = vadd.f32 %v4944_v49, %v10169_v22  ;;  %v10926_v47 = vadd.f32 %v6784_v5, %v4977_v46 }
0x197e   :  { %v7699_v50 = vpop.f32.mrf.mxu0 }
0x197f   :  { %v10922_v39 = vadd.f32 %v6784_v5, %v4975_v18  ;;  %11599 = vst [vmem:[#allocation9_spill] sm:$0xff] %v10926_v47  ;;  %v4978_v54 = vadd.f32 %v7699_v50, %v11600_v34  ;;  %v8082_v34 = vld [vmem:[%s11484_s12 + $0x1a0] ss:$16 sps:$4 sm:$0xff]  }
0x1980   :  { %v4947_v31 = vpop.f32.mrf.mxu0 }
0x1981   :  { %11597 = vst [vmem:[#allocation23_spill] sm:$0xff] %v10922_v39  ;;  %v4976_v53 = vadd.f32 %v4947_v31, %v11598_v57  ;;  %5003 = vadd.xlane.f32.xlu0 %v10922_v39  ;;  %v10933_v60 = vadd.f32 %v6784_v5, %v4978_v54  ;;  %v8084_v31 = vld [vmem:[%s11484_s12 + $0x1a4] ss:$16 sps:$4 sm:$0xff]   ;;  %v8087_v57 = vld [vmem:[%s11484_s12 + $0x1ac] ss:$16 sps:$4 sm:$0xff]  }
0x1982   :  { %v8085_v54 = vld [vmem:[%s11484_s12 + $0x1a8] ss:$16 sps:$4 sm:$0xff]   ;;  %5343 = vmatprep.subr.bf16.mxu1 %v8084_v31  ;;  %5416 = vmatprep.subr.bf16.mxu0 %v8087_v57  ;;  %v6787_v57 = vld [vmem:[%s11482_s10 + $0x1] ss:$0 sm:$0xff] }
0x1983   :  { %v10929_v38 = vadd.f32 %v6784_v5, %v4976_v53  ;;  %11602 = vst [vmem:[#allocation10_spill] sm:$0xff] %v10933_v60  ;;  %5344 = vmatpush1.bf16.msra.mxu1 %v8082_v34  ;;  %5417 = vmatpush1.bf16.msra.mxu0 %v8085_v54 }
0x1985   :  { %11601 = vst [vmem:[#allocation8_spill] sm:$0xff] %v10929_v38  ;;  %5007 = vadd.xlane.f32.xlu0 %v10926_v47  ;;  %5005 = vadd.xlane.f32.xlu1 %v10929_v38 }
0x1986   :  { %v7702_v22 = vpop.f32.mrf.mxu0 }
0x1987   :  { %v4981_v29 = vadd.f32 %v7702_v22, %v11604_v30  ;;  %v8096_v30 = vld [vmem:[%s11484_s12 + $0x164] ss:$16 sps:$4 sm:$0xff]  }
0x1988   :  { %v4960_v35 = vpop.f32.mrf.mxu0 }
0x1989   :  { %v4979_v59 = vadd.f32 %v4960_v35, %v11603_v1  ;;  %5009 = vadd.xlane.f32.xlu0 %v10933_v60  ;;  %v10942_v40 = vadd.f32 %v6784_v5, %v4981_v29  ;;  %v8090_v35 = vld [vmem:[%s11484_s12 + $0x184] ss:$16 sps:$4 sm:$0xff]   ;;  %v8093_v1 = vld [vmem:[%s11484_s12 + $0x18c] ss:$16 sps:$4 sm:$0xff]  }
0x198a   :  { %v7703_v13 = vpop.f32.mrf.mxu0  ;;  %5345 = vmatprep.subr.bf16.mxu1 %v8090_v35  ;;  %5418 = vmatprep.subr.bf16.mxu0 %v8093_v1  ;;  %v8099_v29 = vld [vmem:[%s11484_s12 + $0x16c] ss:$16 sps:$4 sm:$0xff]  }
0x198b   :  { %v10938_v16 = vadd.f32 %v6784_v5, %v4979_v59  ;;  %v4982_v23 = vadd.f32 %v7703_v13, %v11607_v12  ;;  %v8088_v59 = vld [vmem:[%s11484_s12 + $0x180] ss:$16 sps:$4 sm:$0xff]   ;;  %v8091_v13 = vld [vmem:[%s11484_s12 + $0x188] ss:$16 sps:$4 sm:$0xff]   ;;  %v8105_v12 = vld [vmem:[%s11484_s12 + $0x14c] ss:$16 sps:$4 sm:$0xff]  }
0x198c   :  { %v4963_v51 = vpop.f32.mrf.mxu0  ;;  %5346 = vmatpush1.bf16.msra.mxu1 %v8088_v59  ;;  %5419 = vmatpush1.bf16.msra.mxu0 %v8091_v13 }
0x198d   :  { %11605 = vst [vmem:[#allocation11_spill] sm:$0xff] %v10938_v16  ;;  %v4980_v41 = vadd.f32 %v4963_v51, %v11606_v21  ;;  %5011 = vadd.xlane.f32.xlu0 %v10938_v16  ;;  %v10949_v52 = vadd.f32 %v6784_v5, %v4982_v23  ;;  %v8094_v51 = vld [vmem:[%s11484_s12 + $0x160] ss:$16 sps:$4 sm:$0xff]   ;;  %v8097_v21 = vld [vmem:[%s11484_s12 + $0x168] ss:$16 sps:$4 sm:$0xff]   ;;  %5347 = vmatprep.subr.bf16.mxu1 %v8096_v30 }
0x198e   :  { %5420 = vmatprep.subr.bf16.mxu0 %v8099_v29  ;;  %v8100_v23 = vld [vmem:[%s11484_s12 + $0x140] ss:$16 sps:$4 sm:$0xff]  }
0x198f   :  { %v10945_v42 = vadd.f32 %v6784_v5, %v4980_v41  ;;  %11609 = vst [vmem:[#allocation14_spill] sm:$0xff] %v10949_v52  ;;  %v8102_v41 = vld [vmem:[%s11484_s12 + $0x144] ss:$16 sps:$4 sm:$0xff]  }
0x1990   :  { %5348 = vmatpush1.bf16.msra.mxu1 %v8094_v51  ;;  %5421 = vmatpush1.bf16.msra.mxu0 %v8097_v21 }
0x1991   :  { %11608 = vst [vmem:[#allocation13_spill] sm:$0xff] %v10945_v42  ;;  %5015 = vadd.xlane.f32.xlu0 %v10942_v40  ;;  %5013 = vadd.xlane.f32.xlu1 %v10945_v42 }
0x1992   :  { %5349 = vmatprep.subr.bf16.mxu1 %v8102_v41  ;;  %5422 = vmatprep.subr.bf16.mxu0 %v8105_v12 }
0x1994   :  { %5350 = vmatpush1.bf16.msra.mxu1 %v8100_v23  ;;  %5423 = vmatpush1.bf16.msra.mxu0 %v8103_v33 }
0x1995   :  { %5017 = vadd.xlane.f32.xlu1 %v10949_v52  ;;  %5351 = vmatprep.subr.bf16.mxu1 %v8108_v17 }
0x1996   :  { %5424 = vmatprep.subr.bf16.mxu0 %v8111_v11 }
0x1998   :  { %5352 = vmatpush1.bf16.msra.mxu1 %v8106_v0 }
0x1a0a   :  { %v5004_v56 = vpop.xlane.xlu0 %5003 }
0x1a0b   :  { %v5019_v58 = vmul.f32 0.0078125, %v5004_v56  ;;  %v8109_v56 = vld [vmem:[%s11484_s12 + $0x128] ss:$16 sps:$4 sm:$0xff]  }
0x1a0c   :  { %5425 = vmatpush1.bf16.msra.mxu0 %v8109_v56 }
0x1a0d   :  { %v10965_v4 = vsub.f32 %v10922_v39, %v5019_v58  ;;  %v8112_v58 = vld [vmem:[%s11484_s12 + $0x100] ss:$16 sps:$4 sm:$0xff]  }
0x1a0e   :  { %v5008_v10 = vpop.xlane.xlu0 %5007  ;;  %v5006_v48 = vpop.xlane.xlu1 %5005 }
0x1a0f   :  { %v5021_v20 = vmul.f32 0.0078125, %v5008_v10  ;;  %v5020_v7 = vmul.f32 0.0078125, %v5006_v48  ;;  %v5035_v9 = vmul.f32 %v10965_v4, %v10965_v4  ;;  %v8114_v10 = vld [vmem:[%s11484_s12 + $0x104] ss:$16 sps:$4 sm:$0xff]   ;;  %v8115_v48 = vld [vmem:[%s11484_s12 + $0x108] ss:$16 sps:$4 sm:$0xff]  }
0x1a10   :  { %5353 = vmatprep.subr.bf16.mxu1 %v8114_v10 }
0x1a11   :  { %v10970_v28 = vsub.f32 %v10926_v47, %v5021_v20  ;;  %v10973_v26 = vsub.f32 %v10929_v38, %v5020_v7  ;;  %5043 = vadd.xlane.f32.xlu0 %v5035_v9  ;;  %v8117_v20 = vld [vmem:[%s11484_s12 + $0x10c] ss:$16 sps:$4 sm:$0xff]   ;;  %5354 = vmatpush1.bf16.msra.mxu1 %v8112_v58  ;;  %s11626_s12 = sld [smem:[#allocation27_spill]] }
0x1a12   :  { %v5010_v6 = vpop.xlane.xlu0 %5009  ;;  %5426 = vmatprep.subr.bf16.mxu0 %v8117_v20 }
0x1a13   :  { %v5022_v24 = vmul.f32 0.0078125, %v5010_v6  ;;  %v5037_v36 = vmul.f32 %v10970_v28, %v10970_v28  ;;  %v5036_v27 = vmul.f32 %v10973_v26, %v10973_v26  ;;  %5427 = vmatpush1.bf16.msra.mxu0 %v8115_v48 }
0x1a15   :  { %v10980_v43 = vsub.f32 %v10933_v60, %v5022_v24  ;;  %5047 = vadd.xlane.f32.xlu0 %v5037_v36  ;;  %5045 = vadd.xlane.f32.xlu1 %v5036_v27 }
0x1a16   :  { %v5012_v8 = vpop.xlane.xlu0 %5011 }
0x1a17   :  { %v5023_v3 = vmul.f32 0.0078125, %v5012_v8  ;;  %v5038_v45 = vmul.f32 %v10980_v43, %v10980_v43 }
0x1a19   :  { %v10985_v44 = vsub.f32 %v10938_v16, %v5023_v3  ;;  %5049 = vadd.xlane.f32.xlu1 %v5038_v45 }
0x1a1a   :  { %v5016_v15 = vpop.xlane.xlu0 %5015  ;;  %v5014_v32 = vpop.xlane.xlu1 %5013 }
0x1a1b   :  { %v5025_v25 = vmul.f32 0.0078125, %v5016_v15  ;;  %v5024_v37 = vmul.f32 0.0078125, %v5014_v32  ;;  %v5039_v14 = vmul.f32 %v10985_v44, %v10985_v44 }
0x1a1d   :  { %v11002_v49 = vsub.f32 %v10942_v40, %v5025_v25  ;;  %v11005_v18 = vsub.f32 %v10945_v42, %v5024_v37  ;;  %5051 = vadd.xlane.f32.xlu0 %v5039_v14 }
0x1a1e   :  { %v5018_v5 = vpop.xlane.xlu1 %5017 }
0x1a1f   :  { %v5026_v50 = vmul.f32 0.0078125, %v5018_v5  ;;  %v5041_v62 = vmul.f32 %v11002_v49, %v11002_v49  ;;  %v5040_v46 = vmul.f32 %v11005_v18, %v11005_v18 }
0x1a21   :  { %v11018_v53 = vsub.f32 %v10949_v52, %v5026_v50  ;;  %5055 = vadd.xlane.f32.xlu0 %v5041_v62  ;;  %5053 = vadd.xlane.f32.xlu1 %v5040_v46 }
0x1a23   :  { %v5042_v22 = vmul.f32 %v11018_v53, %v11018_v53 }
0x1a25   :  { %5057 = vadd.xlane.f32.xlu1 %v5042_v22 }
0x1a9a   :  { %v5044_v7 = vpop.xlane.xlu0 %5043 }
0x1a9b   :  { %v5059_v9 = vmul.f32 0.0078125, %v5044_v7 }
0x1a9d   :  { %v5067_v6 = vadd.f32 1e-05, %v5059_v9 }
0x1a9e   :  { %v5048_v24 = vpop.xlane.xlu0 %5047  ;;  %v5046_v36 = vpop.xlane.xlu1 %5045 }
0x1a9f   :  { %8590 = vrsqrt.f32 %v5067_v6  ;;  %v5061_v27 = vmul.f32 0.0078125, %v5048_v24  ;;  %v5060_v8 = vmul.f32 0.0078125, %v5046_v36 }
0x1aa1   :  { %v5068_v3 = vadd.f32 1e-05, %v5060_v8  ;;  %v5069_v45 = vadd.f32 1e-05, %v5061_v27 }
0x1aa2   :  { %v5050_v15 = vpop.xlane.xlu1 %5049 }
0x1aa3   :  { %v5062_v32 = vmul.f32 0.0078125, %v5050_v15  ;;  %8592 = vrsqrt.f32 %v5068_v3  ;;  %v8120_v15 = vld [vmem:[%s11486_s14 + $0x138] sm:$0xff]  }
0x1aa4   :  { %8594 = vrsqrt.f32 %v5069_v45 }
0x1aa5   :  { %v5070_v25 = vadd.f32 1e-05, %v5062_v32  ;;  %v8122_v32 = vld [vmem:[%s11486_s14 + $0x170] sm:$0xff]  }
0x1aa6   :  { %v5052_v37 = vpop.xlane.xlu0 %5051 }
0x1aa7   :  { %8596 = vrsqrt.f32 %v5070_v25  ;;  %v5063_v14 = vmul.f32 0.0078125, %v5052_v37  ;;  %v8123_v25 = vld [vmem:[%s11486_s14 + $0x1f0] sm:$0xff]  }
0x1aa8   :  { %v8124_v37 = vld [vmem:[%s11486_s14 + $0x130] sm:$0xff]  }
0x1aa9   :  { %v5071_v63 = vadd.f32 1e-05, %v5063_v14  ;;  %v8125_v14 = vld [vmem:[%s11486_s14 + $0x1b0] sm:$0xff]  }
0x1aaa   :  { %v5054_v19 = vpop.xlane.xlu1 %5053  ;;  %v5056_v55 = vpop.xlane.xlu0 %5055 }
0x1aab   :  { %v5064_v2 = vmul.f32 0.0078125, %v5054_v19  ;;  %8598 = vrsqrt.f32 %v5071_v63  ;;  %v5065_v46 = vmul.f32 0.0078125, %v5056_v55  ;;  %v8126_v63 = vld [vmem:[%s11486_s14 + $0x168] sm:$0xff]  }
0x1aac   :  { %v8591_v5 = vpop.eup %8590  ;;  %v8127_v19 = vld [vmem:[%s11486_s14 + $0x1e8] sm:$0xff]  }
0x1aad   :  { %v5072_v50 = vadd.f32 1e-05, %v5064_v2  ;;  %v5083_v62 = vmul.f32 %v8591_v5, %v10965_v4  ;;  %v5073_v59 = vadd.f32 1e-05, %v5065_v46  ;;  %v6788_v4 = vld [vmem:[%s11483_s11 + $0x1] ss:$0 sm:$0xff] }
0x1aae   :  { %v5058_v31 = vpop.xlane.xlu1 %5057  ;;  %v8128_v55 = vld [vmem:[%s11486_s14 + $0x128] sm:$0xff]   ;;  %v8130_v5 = vld [vmem:[%s11486_s14 + $0x160] sm:$0xff]  }
0x1aaf   :  { %v5066_v34 = vmul.f32 0.0078125, %v5058_v31  ;;  %8600 = vrsqrt.f32 %v5072_v50  ;;  %v5097_v35 = vmul.f32 %v6787_v57, %v5083_v62  ;;  %v8129_v2 = vld [vmem:[%s11486_s14 + $0x1a8] sm:$0xff]   ;;  %v8131_v50 = vld [vmem:[%s11486_s14 + $0x1e0] sm:$0xff]   ;;  %v8134_v31 = vld [vmem:[%s11486_s14 + $0x158] sm:$0xff]  }
0x1ab0   :  { %v8593_v54 = vpop.eup %8592  ;;  %v8132_v62 = vld [vmem:[%s11486_s14 + $0x120] sm:$0xff]  }
0x1ab1   :  { %v5074_v22 = vadd.f32 1e-05, %v5066_v34  ;;  %v5084_v1 = vmul.f32 %v8593_v54, %v10973_v26  ;;  %v8595_v13 = vpop.eup %8594  ;;  %v5111_v21 = vadd.f32 %v6788_v4, %v5097_v35  ;;  %v8133_v46 = vld [vmem:[%s11486_s14 + $0x1a0] sm:$0xff]   ;;  %v8136_v34 = vld [vmem:[%s11486_s14 + $0x118] sm:$0xff]   ;;  %v8139_v35 = vld [vmem:[%s11486_s14 + $0x1d0] sm:$0xff]  }
0x1ab2   :  { %v5085_v12 = vmul.f32 %v8595_v13, %v10970_v28  ;;  %v8137_v54 = vld [vmem:[%s11486_s14 + $0x198] sm:$0xff]   ;;  %v8142_v13 = vld [vmem:[%s11486_s14 + $0x148] sm:$0xff]  }
0x1ab3   :  { %v5098_v29 = vmul.f32 %v6787_v57, %v5084_v1  ;;  %8602 = vrsqrt.f32 %v5074_v22  ;;  %v8138_v22 = vld [vmem:[%s11486_s14 + $0x150] sm:$0xff]  }
0x1ab4   :  { %v8597_v30 = vpop.eup %8596  ;;  %8604 = vrsqrt.f32 %v5073_v59  ;;  %v5099_v26 = vmul.f32 %v6787_v57, %v5085_v12  ;;  %v8140_v1 = vld [vmem:[%s11486_s14 + $0x110] sm:$0xff]   ;;  %v8149_v12 = vld [vmem:[%s11486_s14 + $0x180] sm:$0xff]  }
0x1ab5   :  { %v5086_v51 = vmul.f32 %v8597_v30, %v10980_v43  ;;  %v5112_v41 = vadd.f32 %v6788_v4, %v5098_v29  ;;  %v8141_v59 = vld [vmem:[%s11486_s14 + $0x190] sm:$0xff]   ;;  %v8144_v30 = vld [vmem:[%s11486_s14 + $0x108] sm:$0xff]  }
0x1ab6   :  { %v5113_v56 = vadd.f32 %v6788_v4, %v5099_v26  ;;  %v8145_v29 = vld [vmem:[%s11486_s14 + $0x188] sm:$0xff]  }
0x1ab7   :  { %v5119_v23 = vpack.c.bf16 %v5112_v41, %v5111_v21  ;;  %v5100_v33 = vmul.f32 %v6787_v57, %v5086_v51  ;;  %v8146_v51 = vld [vmem:[%s11486_s14 + $0x140] sm:$0xff]  }
0x1ab8   :  { %v8599_v17 = vpop.eup %8598  ;;  %v8147_v21 = vld [vmem:[%s11486_s14 + $0x1c0] sm:$0xff]  }
0x1ab9   :  { %5372 = vmatmul.mubr.bf16.vlgmr.msra.gmra.mxu1 %v5119_v23  ;;  %5445 = vmatmul.mubr.bf16.vlgmr.msra.gmra.mxu0 %v5119_v23  ;;  %v5114_v11 = vadd.f32 %v6788_v4, %v5100_v33  ;;  %v5087_v43 = vmul.f32 %v8599_v17, %v10985_v44  ;;  %v8148_v41 = vld [vmem:[%s11486_s14 + $0x100] sm:$0xff]  }
0x1aba   :  { %5381 = vmatprep.mubr.bf16.mxu1 %v11560_v61  ;;  %5454 = vmatprep.mubr.bf16.mxu0 %v11560_v61  ;;  %v6168_v23 = vld [vmem:[%s11610_s0] sm:$0xf]  ;;  %v6821_v33 = vld [vmem:[%s11485_s13 + $0x4] sm:$0xf]  ;;  %s8776_s13 = smov [#allocation3]  }
0x1abb   :  { %v5120_v10 = vpack.c.bf16 %v5114_v11, %v5113_v56  ;;  %v5101_v20 = vmul.f32 %v6787_v57, %v5087_v43  ;;  %6170 = vperm.xlu0 %7909, %v6168_v23   ;;  %v11611_v26 = vld [vmem:[#allocation6_spill] sm:$0xff] }
0x1abc   :  { %v8601_v0 = vpop.eup %8600  ;;  %v11612_v17 = vsub.s32 0, %v11611_v26  ;;  %v11614_v43 = vsub.s32 1, %v11611_v26 }
0x1abd   :  { %v5088_v58 = vmul.f32 %v8601_v0, %v11005_v18  ;;  %v5115_v24 = vadd.f32 %v6788_v4, %v5101_v20  ;;  %v11613_v0 = vsub.s32 2, %v11611_v26 }
0x1abe   :  { %v11212_v11 = vrot.slane %v6821_v33, %v11612_v17 }
0x1abf   :  { %v5102_v48 = vmul.f32 %v6787_v57, %v5088_v58  ;;  %v11216_v56 = vrot.slane %v6821_v33, %v11613_v0  ;;  %v11220_v58 = vrot.slane %v6821_v33, %v11614_v43 }
0x1ac0   :  { %v8603_v28 = vpop.eup %8602 }
0x1ac1   :  { %5382 = vmatmul.mubr.bf16.gmra.mxu1 %v5120_v10  ;;  %5455 = vmatmul.mubr.bf16.gmra.mxu0 %v5120_v10  ;;  %v8605_v7 = vpop.eup %8604  ;;  %v5116_v9 = vadd.f32 %v6788_v4, %v5102_v48  ;;  %v5090_v6 = vmul.f32 %v8603_v28, %v11018_v53  ;;  %v8118_v53 = vld [vmem:[%s11486_s14 + $0x178] sm:$0xff]   ;;  %v11615_v10 = vsub.s32 3, %v11611_v26 }
0x1ac2   :  { %5391 = vmatprep.mubr.bf16.mxu1 %v11560_v61  ;;  %5464 = vmatprep.mubr.bf16.mxu0 %v11560_v61  ;;  %v5089_v36 = vmul.f32 %v8605_v7, %v11002_v49  ;;  %v8119_v49 = vld [vmem:[%s11486_s14 + $0x1f8] sm:$0xff]  }
0x1ac3   :  { %v5121_v44 = vpack.c.bf16 %v5116_v9, %v5115_v24  ;;  %v5104_v27 = vmul.f32 %v6787_v57, %v5090_v6  ;;  %7252 = vmatprep.subr.bf16.mxu1 %v8118_v53  ;;  %7292 = vmatprep.subr.bf16.mxu0 %v8119_v49  ;;  %v11224_v48 = vrot.slane %v6821_v33, %v11615_v10 }
0x1ac4   :  { %v5103_v18 = vmul.f32 %v6787_v57, %v5089_v36  ;;  %7253 = vmatpush3.bf16.msra.mxu1 %v8120_v15  ;;  %v8135_v57 = vld [vmem:[%s11486_s14 + $0x1d8] sm:$0xff]  }
0x1ac5   :  { %v5118_v8 = vadd.f32 %v6788_v4, %v5104_v27  ;;  %7254 = vmatprep.subr.bf16.mxu1 %v8122_v32 }
0x1ac6   :  { %v5117_v3 = vadd.f32 %v6788_v4, %v5103_v18  ;;  %v8143_v4 = vld [vmem:[%s11486_s14 + $0x1c8] sm:$0xff]  }
0x1ac8   :  { %v5122_v45 = vpack.c.bf16 %v5118_v8, %v5117_v3  ;;  %7255 = vmatpush3.bf16.msra.mxu1 %v8124_v37 }
0x1ac9   :  { %5392 = vmatmul.mubr.bf16.gmra.mxu1 %v5121_v44  ;;  %5465 = vmatmul.mubr.bf16.gmra.mxu0 %v5121_v44 }
0x1aca   :  { %5401 = vmatprep.mubr.bf16.mxu1 %v11560_v61  ;;  %5474 = vmatprep.mubr.bf16.mxu0 %v11560_v61  ;;  %v8121_v61 = vld [vmem:[%s11486_s14 + $0x1b8] sm:$0xff]   ;;  %s6490_s14 = sshll.u32 %s8776_s13, 4  ;;  %s6491_s14 = int_to_ptr.vmem [resolvable:$true] %s6490_s14 }
0x1acb   :  { %7293 = vmatpush3.bf16.msra.mxu0 %v8121_v61  ;;  %7256 = vmatprep.subr.bf16.mxu1 %v8126_v63  ;;  %p8751_p1 = scmp.lt.s32.totalorder %s6491_s14, %s6491_s14 }
0x1acc   :  { %7294 = vmatprep.subr.bf16.mxu0 %v8123_v25  ;;  %7257 = vmatpush3.bf16.msra.mxu1 %v8128_v55 }
0x1acd   :  { %7258 = vmatprep.subr.bf16.mxu1 %v8130_v5 }
0x1acf   :  { %7295 = vmatpush3.bf16.msra.mxu0 %v8125_v14 }
0x1ad0   :  { %7296 = vmatprep.subr.bf16.mxu0 %v8127_v19  ;;  %7259 = vmatpush3.bf16.msra.mxu1 %v8132_v62 }
0x1ad1   :  { %5402 = vmatmul.mubr.bf16.gmra.mxu1 %v5122_v45  ;;  %5475 = vmatmul.mubr.bf16.gmra.mxu0 %v5122_v45 }
0x1ad2   :  { %7260 = vmatprep.subr.bf16.mxu1 %v8134_v31 }
0x1ad3   :  { %7297 = vmatpush3.bf16.msra.mxu0 %v8129_v2 }
0x1ad4   :  { %7298 = vmatprep.subr.bf16.mxu0 %v8131_v50  ;;  %7261 = vmatpush3.bf16.msra.mxu1 %v8136_v34 }
0x1ad5   :  { %7262 = vmatprep.subr.bf16.mxu1 %v8138_v22 }
0x1ad7   :  { %7299 = vmatpush3.bf16.msra.mxu0 %v8133_v46 }
0x1ad8   :  { %7300 = vmatprep.subr.bf16.mxu0 %v8135_v57  ;;  %7263 = vmatpush3.bf16.msra.mxu1 %v8140_v1 }
0x1ad9   :  { %7264 = vmatprep.subr.bf16.mxu1 %v8142_v13 }
0x1adb   :  { %7301 = vmatpush3.bf16.msra.mxu0 %v8137_v54 }
0x1adc   :  { %7302 = vmatprep.subr.bf16.mxu0 %v8139_v35  ;;  %7265 = vmatpush3.bf16.msra.mxu1 %v8144_v30 }
0x1add   :  { %7266 = vmatprep.subr.bf16.mxu1 %v8146_v51 }
0x1adf   :  { %7303 = vmatpush3.bf16.msra.mxu0 %v8141_v59 }
0x1ae0   :  { %7304 = vmatprep.subr.bf16.mxu0 %v8143_v4  ;;  %7267 = vmatpush3.bf16.msra.mxu1 %v8148_v41 }
0x1ae3   :  { %7305 = vmatpush3.bf16.msra.mxu0 %v8145_v29 }
0x1ae4   :  { %7306 = vmatprep.subr.bf16.mxu0 %v8147_v21 }
0x1ae7   :  { %7307 = vmatpush3.bf16.msra.mxu0 %v8149_v12 }
0x1b79   :  { %v5373_v28 = vpop.f32.mrf.mxu1  ;;  %v5446_v20 = vpop.f32.mrf.mxu0 }
0x1b7a   :  { %v11227_v7 = vadd.f32 %v5373_v28, %v11212_v11  ;;  %v11230_v9 = vadd.f32 %v5446_v20, %v11216_v56 }
0x1b7b   :  { %v5375_v6 = vpop.f32.mrf.mxu1  ;;  %v5448_v24 = vpop.f32.mrf.mxu0 }
0x1b7c   :  { %v6854_v36 = vmul.f32 -1.702, %v11227_v7  ;;  %v6856_v44 = vmul.f32 -1.702, %v11230_v9  ;;  %v11235_v27 = vadd.f32 %v5375_v6, %v11220_v58  ;;  %v11238_v18 = vadd.f32 %v5448_v24, %v11224_v48 }
0x1b7d   :  { %v5377_v8 = vpop.f32.mrf.mxu1  ;;  %v5450_v3 = vpop.f32.mrf.mxu0 }
0x1b7e   :  { %v5549_v45 = vmul.f32 1.442695, %v6854_v36  ;;  %v5553_v53 = vmul.f32 1.442695, %v6856_v44  ;;  %v6855_v49 = vmul.f32 -1.702, %v11235_v27  ;;  %v11242_v15 = vadd.f32 %v5377_v8, %v11212_v11 }
0x1b7f   :  { %v6857_v61 = vmul.f32 -1.702, %v11238_v18  ;;  %v11246_v32 = vadd.f32 %v5450_v3, %v11216_v56  ;;  %v5379_v25 = vpop.f32.mrf.mxu1  ;;  %v5452_v37 = vpop.f32.mrf.mxu0 }
0x1b80   :  { %8606 = vpow2.f32 %v5549_v45  ;;  %v5551_v14 = vmul.f32 1.442695, %v6855_v49  ;;  %v6858_v63 = vmul.f32 -1.702, %v11242_v15  ;;  %v11250_v19 = vadd.f32 %v5379_v25, %v11220_v58 }
0x1b81   :  { %8608 = vpow2.f32 %v5553_v53  ;;  %v5555_v55 = vmul.f32 1.442695, %v6857_v61  ;;  %v6860_v2 = vmul.f32 -1.702, %v11246_v32  ;;  %v11254_v5 = vadd.f32 %v5452_v37, %v11224_v48  ;;  %v5383_v50 = vpop.f32.mrf.mxu1  ;;  %v5456_v62 = vpop.f32.mrf.mxu0 }
0x1b82   :  { %8610 = vpow2.f32 %v5551_v14  ;;  %v5557_v46 = vmul.f32 1.442695, %v6858_v63  ;;  %v6859_v31 = vmul.f32 -1.702, %v11250_v19  ;;  %v11258_v57 = vadd.f32 %v5383_v50, %v11212_v11 }
0x1b83   :  { %8612 = vpow2.f32 %v5555_v55  ;;  %v5561_v34 = vmul.f32 1.442695, %v6860_v2  ;;  %v6861_v54 = vmul.f32 -1.702, %v11254_v5  ;;  %v11262_v22 = vadd.f32 %v5456_v62, %v11216_v56  ;;  %v5385_v35 = vpop.f32.mrf.mxu1  ;;  %v5458_v1 = vpop.f32.mrf.mxu0 }
0x1b84   :  { %8614 = vpow2.f32 %v5557_v46  ;;  %v5559_v59 = vmul.f32 1.442695, %v6859_v31  ;;  %v6862_v13 = vmul.f32 -1.702, %v11258_v57  ;;  %v11266_v4 = vadd.f32 %v5385_v35, %v11220_v58 }
0x1b85   :  { %8616 = vpow2.f32 %v5561_v34  ;;  %v5563_v30 = vmul.f32 1.442695, %v6861_v54  ;;  %v6864_v29 = vmul.f32 -1.702, %v11262_v22  ;;  %v11270_v51 = vadd.f32 %v5458_v1, %v11224_v48  ;;  %v5387_v21 = vpop.f32.mrf.mxu1  ;;  %v5460_v41 = vpop.f32.mrf.mxu0 }
0x1b86   :  { %8618 = vpow2.f32 %v5559_v59  ;;  %v5565_v12 = vmul.f32 1.442695, %v6862_v13  ;;  %v6863_v23 = vmul.f32 -1.702, %v11266_v4  ;;  %v11274_v33 = vadd.f32 %v5387_v21, %v11212_v11 }
0x1b87   :  { %8620 = vpow2.f32 %v5563_v30  ;;  %v5569_v17 = vmul.f32 1.442695, %v6864_v29  ;;  %v6865_v0 = vmul.f32 -1.702, %v11270_v51  ;;  %v11278_v43 = vadd.f32 %v5460_v41, %v11216_v56  ;;  %v5389_v10 = vpop.f32.mrf.mxu1  ;;  %v5462_v28 = vpop.f32.mrf.mxu0 }
0x1b88   :  { %8622 = vpow2.f32 %v5565_v12  ;;  %v5567_v20 = vmul.f32 1.442695, %v6863_v23  ;;  %v6866_v6 = vmul.f32 -1.702, %v11274_v33  ;;  %v11282_v24 = vadd.f32 %v5389_v10, %v11220_v58 }
0x1b89   :  { %8624 = vpow2.f32 %v5569_v17  ;;  %v5571_v36 = vmul.f32 1.442695, %v6865_v0  ;;  %v6868_v44 = vmul.f32 -1.702, %v11278_v43  ;;  %v11286_v8 = vadd.f32 %v5462_v28, %v11224_v48  ;;  %v5393_v3 = vpop.f32.mrf.mxu1  ;;  %v5466_v45 = vpop.f32.mrf.mxu0 }
0x1b8a   :  { %8626 = vpow2.f32 %v5567_v20  ;;  %v5573_v53 = vmul.f32 1.442695, %v6866_v6  ;;  %v6867_v49 = vmul.f32 -1.702, %v11282_v24  ;;  %v11291_v55 = vadd.f32 %v5393_v3, %v11212_v11 }
0x1b8b   :  { %8628 = vpow2.f32 %v5571_v36  ;;  %v5577_v61 = vmul.f32 1.442695, %v6868_v44  ;;  %v6869_v25 = vmul.f32 -1.702, %v11286_v8  ;;  %v5395_v37 = vpop.f32.mrf.mxu1  ;;  %v5468_v14 = vpop.f32.mrf.mxu0  ;;  %v11294_v62 = vadd.f32 %v5466_v45, %v11216_v56 }
0x1b8c   :  { %8630 = vpow2.f32 %v5573_v53  ;;  %v5575_v63 = vmul.f32 1.442695, %v6867_v49  ;;  %v6870_v21 = vmul.f32 -1.702, %v11291_v55  ;;  %v11299_v17 = vadd.f32 %v5395_v37, %v11220_v58 }
0x1b8d   :  { %v8607_v2 = vpop.eup %8606  ;;  %8632 = vpow2.f32 %v5577_v61  ;;  %v5579_v50 = vmul.f32 1.442695, %v6869_v25  ;;  %v5397_v46 = vpop.f32.mrf.mxu1  ;;  %v6872_v23 = vmul.f32 -1.702, %v11294_v62  ;;  %v11302_v28 = vadd.f32 %v5468_v14, %v11224_v48 }
0x1b8e   :  { %v5470_v31 = vpop.f32.mrf.mxu0  ;;  %v8609_v34 = vpop.eup %8608  ;;  %v5613_v54 = vadd.f32 1.0, %v8607_v2  ;;  %8634 = vpow2.f32 %v5575_v63  ;;  %v5581_v53 = vmul.f32 1.442695, %v6870_v21  ;;  %v6871_v37 = vmul.f32 -1.702, %v11299_v17 }
0x1b8f   :  { %v8611_v35 = vpop.eup %8610  ;;  %v5615_v1 = vadd.f32 1.0, %v8609_v34  ;;  %8636 = vpow2.f32 %v5579_v50  ;;  %v5399_v59 = vpop.f32.mrf.mxu1  ;;  %v11304_v25 = vmul.f32 1.442695, %v6872_v23  ;;  %v6873_v2 = vmul.f32 -1.702, %v11302_v28 }
0x1b90   :  { %v5472_v13 = vpop.f32.mrf.mxu0  ;;  %v8613_v30 = vpop.eup %8612  ;;  %8638 = vrcp.f32 %v5613_v54  ;;  %v5614_v29 = vadd.f32 1.0, %v8611_v35  ;;  %v11309_v50 = vadd.f32 %v5397_v46, %v11212_v11 }
0x1b91   :  { %v8615_v41 = vpop.eup %8614  ;;  %8640 = vrcp.f32 %v5615_v1  ;;  %v5616_v12 = vadd.f32 1.0, %v8613_v30  ;;  %v5403_v20 = vpop.f32.mrf.mxu1  ;;  %v11312_v1 = vadd.f32 %v5470_v31, %v11216_v56  ;;  %v11315_v30 = vadd.f32 %v5399_v59, %v11220_v58 }
0x1b92   :  { %v8617_v0 = vpop.eup %8616  ;;  %8642 = vrcp.f32 %v5614_v29  ;;  %v5617_v10 = vadd.f32 1.0, %v8615_v41  ;;  %v5476_v44 = vpop.f32.mrf.mxu0  ;;  %v11321_v46 = vadd.f32 %v5403_v20, %v11212_v11 }
0x1b93   :  { %v8619_v6 = vpop.eup %8618  ;;  %8644 = vrcp.f32 %v5616_v12  ;;  %v5619_v36 = vadd.f32 1.0, %v8617_v0  ;;  %v5405_v34 = vpop.f32.mrf.mxu1  ;;  %v11318_v12 = vadd.f32 %v5472_v13, %v11224_v48 }
0x1b94   :  { %v8621_v3 = vpop.eup %8620  ;;  %8646 = vrcp.f32 %v5617_v10  ;;  %v5618_v45 = vadd.f32 1.0, %v8619_v6  ;;  %v5478_v29 = vpop.f32.mrf.mxu0  ;;  %v11324_v10 = vadd.f32 %v5476_v44, %v11216_v56  ;;  %v11327_v31 = vadd.f32 %v5405_v34, %v11220_v58 }
0x1b95   :  { %v8623_v49 = vpop.eup %8622  ;;  %8648 = vrcp.f32 %v5619_v36  ;;  %v5620_v61 = vadd.f32 1.0, %v8621_v3  ;;  %v6874_v36 = vmul.f32 -1.702, %v11309_v50  ;;  %v11331_v13 = vadd.f32 %v5478_v29, %v11224_v48  ;;  %v5407_v44 = vpop.f32.mrf.mxu1 }
0x1b96   :  { %v8625_v63 = vpop.eup %8624  ;;  %8650 = vrcp.f32 %v5618_v45  ;;  %v5621_v14 = vadd.f32 1.0, %v8623_v49  ;;  %v6876_v45 = vmul.f32 -1.702, %v11312_v1  ;;  %v6875_v49 = vmul.f32 -1.702, %v11315_v30 }
0x1b97   :  { %v8627_v54 = vpop.eup %8626  ;;  %8652 = vrcp.f32 %v5620_v61  ;;  %v5623_v35 = vadd.f32 1.0, %v8625_v63  ;;  %v6878_v34 = vmul.f32 -1.702, %v11321_v46  ;;  %v6881_v26 = vmul.f32 -1.702, %v11331_v13  ;;  %v5409_v47 = vpop.f32.mrf.mxu1 }
0x1b98   :  { %v8629_v21 = vpop.eup %8628  ;;  %8654 = vrcp.f32 %v5621_v14  ;;  %v5622_v41 = vadd.f32 1.0, %v8627_v54  ;;  %v6877_v14 = vmul.f32 -1.702, %v11318_v12  ;;  %v5480_v54 = vpop.f32.mrf.mxu0  ;;  %v5593_v39 = vmul.f32 1.442695, %v6876_v45 }
0x1b99   :  { %v8631_v23 = vpop.eup %8630  ;;  %8656 = vrcp.f32 %v5623_v35  ;;  %v5624_v0 = vadd.f32 1.0, %v8629_v21  ;;  %v6880_v21 = vmul.f32 -1.702, %v11324_v10  ;;  %v11341_v38 = vadd.f32 %v5407_v44, %v11212_v11 }
0x1b9a   :  { %v8633_v59 = vpop.eup %8632  ;;  %8658 = vrcp.f32 %v5622_v41  ;;  %v5625_v6 = vadd.f32 1.0, %v8631_v23  ;;  %v6879_v41 = vmul.f32 -1.702, %v11327_v31  ;;  %v5595_v60 = vmul.f32 1.442695, %v6877_v14  ;;  %v5482_v42 = vpop.f32.mrf.mxu0 }
0x1b9b   :  { %v8635_v3 = vpop.eup %8634  ;;  %8660 = vrcp.f32 %v5624_v0  ;;  %v5627_v20 = vadd.f32 1.0, %v8633_v59  ;;  %v5583_v0 = vmul.f32 1.442695, %v6871_v37  ;;  %v5587_v59 = vmul.f32 1.442695, %v6873_v2 }
0x1b9c   :  { %v8637_v61 = vpop.eup %8636  ;;  %8662 = vrcp.f32 %v5625_v6  ;;  %v5626_v63 = vadd.f32 1.0, %v8635_v3  ;;  %v5589_v3 = vmul.f32 1.442695, %v6874_v36  ;;  %v5597_v16 = vmul.f32 1.442695, %v6878_v34 }
0x1b9d   :  { %v8639_v35 = vpop.eup %8638  ;;  %8664 = vrcp.f32 %v5627_v20  ;;  %v5628_v29 = vadd.f32 1.0, %v8637_v61  ;;  %v5591_v61 = vmul.f32 1.442695, %v6875_v49  ;;  %v5601_v37 = vmul.f32 1.442695, %v6880_v21 }
0x1b9e   :  { %v8641_v23 = vpop.eup %8640  ;;  %8666 = vrcp.f32 %v5626_v63  ;;  %v5599_v2 = vmul.f32 1.442695, %v6879_v41  ;;  %v11345_v63 = vadd.f32 %v5480_v54, %v11216_v56  ;;  %v5709_v45 = vmul.f32 %v8639_v35, %v11227_v7 }
0x1b9f   :  { %v8643_v6 = vpop.eup %8642  ;;  %8668 = vrcp.f32 %v5628_v29  ;;  %v5603_v11 = vmul.f32 1.442695, %v6881_v26  ;;  %v11349_v44 = vadd.f32 %v5409_v47, %v11220_v58  ;;  %v6882_v14 = vmul.f32 -1.702, %v11341_v38 }
0x1ba0   :  { %v8645_v20 = vpop.eup %8644  ;;  %8670 = vpow2.f32 %v5581_v53  ;;  %v5710_v56 = vmul.f32 %v8643_v6, %v11235_v27 }
0x1ba1   :  { %v8647_v52 = vpop.eup %8646  ;;  %8672 = vpow2.f32 %v11304_v25  ;;  %v11354_v25 = vadd.f32 %v5482_v42, %v11224_v48  ;;  %v5712_v47 = vmul.f32 %v8645_v20, %v11238_v18  ;;  %v5711_v42 = vmul.f32 %v8641_v23, %v11230_v9 }
0x1ba2   :  { %v8649_v36 = vpop.eup %8648  ;;  %8674 = vpow2.f32 %v5583_v0  ;;  %v5713_v49 = vmul.f32 %v8647_v52, %v11242_v15  ;;  %v6884_v52 = vmul.f32 -1.702, %v11345_v63  ;;  %v6883_v48 = vmul.f32 -1.702, %v11349_v44 }
0x1ba3   :  { %v8651_v53 = vpop.eup %8650  ;;  %8676 = vpow2.f32 %v5587_v59  ;;  %v5715_v54 = vmul.f32 %v8649_v36, %v11246_v32 }
0x1ba4   :  { %v8653_v34 = vpop.eup %8652  ;;  %v5714_v7 = vmul.f32 %v8651_v53, %v11250_v19  ;;  %8678 = vpow2.f32 %v5589_v3  ;;  %v5741_v32 = vpack.c.bf16 %v5713_v49, %v5709_v45  ;;  %v6885_v19 = vmul.f32 -1.702, %v11354_v25 }
0x1ba5   :  { %v8655_v26 = vpop.eup %8654  ;;  %v5716_v58 = vmul.f32 %v8653_v34, %v11254_v5  ;;  %8680 = vpow2.f32 %v5593_v39  ;;  %v5743_v18 = vpack.c.bf16 %v5715_v54, %v5711_v42  ;;  %v5605_v5 = vmul.f32 1.442695, %v6882_v14 }
0x1ba6   :  { %v8657_v15 = vpop.eup %8656  ;;  %8682 = vpow2.f32 %v5591_v61  ;;  %v5742_v27 = vpack.c.bf16 %v5714_v7, %v5710_v56  ;;  %v5609_v41 = vmul.f32 1.442695, %v6884_v52  ;;  %v5607_v23 = vmul.f32 1.442695, %v6883_v48 }
0x1ba7   :  { %v8659_v35 = vpop.eup %8658  ;;  %8684 = vpow2.f32 %v5595_v60  ;;  %v5744_v29 = vpack.c.bf16 %v5716_v58, %v5712_v47  ;;  %v5611_v59 = vmul.f32 1.442695, %v6885_v19 }
0x1ba8   :  { %v8661_v21 = vpop.eup %8660  ;;  %8686 = vpow2.f32 %v5597_v16  ;;  %6046 = vmatprep.mubr.bf16.mxu1 %v5742_v27  ;;  %v5718_v3 = vmul.f32 %v8659_v35, %v11266_v4 }
0x1ba9   :  { %v8663_v39 = vpop.eup %8662  ;;  %8688 = vpow2.f32 %v5601_v37  ;;  %6111 = vmatprep.mubr.bf16.mxu0 %v5744_v29  ;;  %6047 = vmatmul.mubr.bf16.vlgmr.msra.gmra.mxu1 %v5741_v32  ;;  %v5717_v37 = vmul.f32 %v8655_v26, %v11258_v57 }
0x1baa   :  { %v8665_v9 = vpop.eup %8664  ;;  %8690 = vpow2.f32 %v5599_v2  ;;  %6112 = vmatmul.mubr.bf16.vlgmr.msra.gmra.mxu0 %v5743_v18  ;;  %v5721_v60 = vmul.f32 %v8663_v39, %v11274_v33  ;;  %v5720_v2 = vmul.f32 %v8661_v21, %v11270_v51  ;;  %v5719_v33 = vmul.f32 %v8657_v15, %v11262_v22 }
0x1bab   :  { %v8667_v0 = vpop.eup %8666  ;;  %8692 = vpow2.f32 %v5603_v11  ;;  %v5723_v16 = vmul.f32 %v8665_v9, %v11278_v43 }
0x1bac   :  { %v8669_v6 = vpop.eup %8668  ;;  %v5722_v20 = vmul.f32 %v8667_v0, %v11282_v24  ;;  %8694 = vpow2.f32 %v5605_v5  ;;  %v5745_v49 = vpack.c.bf16 %v5721_v60, %v5717_v37 }
0x1bad   :  { %v8671_v61 = vpop.eup %8670  ;;  %v5724_v36 = vmul.f32 %v8669_v6, %v11286_v8  ;;  %8696 = vpow2.f32 %v5609_v41  ;;  %v5747_v34 = vpack.c.bf16 %v5723_v16, %v5719_v33 }
0x1bae   :  { %v8673_v45 = vpop.eup %8672  ;;  %v5629_v11 = vadd.f32 1.0, %v8671_v61  ;;  %8698 = vpow2.f32 %v5607_v23  ;;  %v5746_v53 = vpack.c.bf16 %v5722_v20, %v5718_v3 }
0x1baf   :  { %v8675_v4 = vpop.eup %8674  ;;  %v5631_v43 = vadd.f32 1.0, %v8673_v45  ;;  %8700 = vpow2.f32 %v5611_v59  ;;  %v5748_v24 = vpack.c.bf16 %v5724_v36, %v5720_v2 }
0x1bb0   :  { %v8677_v14 = vpop.eup %8676  ;;  %8702 = vrcp.f32 %v5629_v11  ;;  %v5630_v57 = vadd.f32 1.0, %v8675_v4  ;;  %6054 = vmatprep.mubr.bf16.mxu1 %v5746_v53 }
0x1bb1   :  { %v8679_v51 = vpop.eup %8678  ;;  %8704 = vrcp.f32 %v5631_v43  ;;  %v5632_v8 = vadd.f32 1.0, %v8677_v14  ;;  %6119 = vmatprep.mubr.bf16.mxu0 %v5748_v24  ;;  %6055 = vmatmul.mubr.bf16.gmra.mxu1 %v5745_v49 }
0x1bb2   :  { %v8681_v56 = vpop.eup %8680  ;;  %8706 = vrcp.f32 %v5630_v57  ;;  %v5633_v22 = vadd.f32 1.0, %v8679_v51  ;;  %6120 = vmatmul.mubr.bf16.gmra.mxu0 %v5747_v34 }
0x1bb3   :  { %v8683_v54 = vpop.eup %8682  ;;  %8708 = vrcp.f32 %v5632_v8  ;;  %v5635_v7 = vadd.f32 1.0, %v8681_v56 }
0x1bb4   :  { %v8685_v26 = vpop.eup %8684  ;;  %8710 = vrcp.f32 %v5633_v22  ;;  %v5634_v47 = vadd.f32 1.0, %v8683_v54 }
0x1bb5   :  { %v8687_v58 = vpop.eup %8686  ;;  %8712 = vrcp.f32 %v5635_v7  ;;  %v5636_v52 = vadd.f32 1.0, %v8685_v26 }
0x1bb6   :  { %v8689_v15 = vpop.eup %8688  ;;  %8714 = vrcp.f32 %v5634_v47  ;;  %v5637_v42 = vadd.f32 1.0, %v8687_v58 }
0x1bb7   :  { %v8691_v48 = vpop.eup %8690  ;;  %8716 = vrcp.f32 %v5636_v52  ;;  %v5639_v27 = vadd.f32 1.0, %v8689_v15 }
0x1bb8   :  { %v8693_v35 = vpop.eup %8692  ;;  %8718 = vrcp.f32 %v5637_v42  ;;  %v5638_v32 = vadd.f32 1.0, %v8691_v48 }
0x1bb9   :  { %v8695_v19 = vpop.eup %8694  ;;  %8720 = vrcp.f32 %v5639_v27  ;;  %v5640_v29 = vadd.f32 1.0, %v8693_v35 }
0x1bba   :  { %v8697_v21 = vpop.eup %8696  ;;  %8722 = vrcp.f32 %v5638_v32  ;;  %v5641_v18 = vadd.f32 1.0, %v8695_v19 }
0x1bbb   :  { %v8699_v5 = vpop.eup %8698  ;;  %8724 = vrcp.f32 %v5640_v29  ;;  %v5643_v39 = vadd.f32 1.0, %v8697_v21 }
0x1bbc   :  { %v8701_v41 = vpop.eup %8700  ;;  %8726 = vrcp.f32 %v5641_v18  ;;  %v5642_v9 = vadd.f32 1.0, %v8699_v5 }
0x1bbd   :  { %v8703_v23 = vpop.eup %8702  ;;  %8728 = vrcp.f32 %v5643_v39  ;;  %v5644_v0 = vadd.f32 1.0, %v8701_v41 }
0x1bbe   :  { %v8705_v60 = vpop.eup %8704  ;;  %8730 = vrcp.f32 %v5642_v9  ;;  %v5725_v11 = vmul.f32 %v8703_v23, %v11291_v55 }
0x1bbf   :  { %v8707_v59 = vpop.eup %8706  ;;  %8732 = vrcp.f32 %v5644_v0  ;;  %v5727_v43 = vmul.f32 %v8705_v60, %v11294_v62 }
0x1bc0   :  { %v8709_v6 = vpop.eup %8708  ;;  %v5726_v2 = vmul.f32 %v8707_v59, %v11299_v17 }
0x1bc1   :  { %v8711_v3 = vpop.eup %8710  ;;  %v5728_v53 = vmul.f32 %v8709_v6, %v11302_v28 }
0x1bc2   :  { %v8713_v16 = vpop.eup %8712  ;;  %v5729_v61 = vmul.f32 %v8711_v3, %v11309_v50 }
0x1bc3   :  { %v8715_v20 = vpop.eup %8714  ;;  %v5731_v36 = vmul.f32 %v8713_v16, %v11312_v1 }
0x1bc4   :  { %v8717_v37 = vpop.eup %8716  ;;  %v5730_v45 = vmul.f32 %v8715_v20, %v11315_v30  ;;  %v5749_v50 = vpack.c.bf16 %v5729_v61, %v5725_v11 }
0x1bc5   :  { %v8719_v33 = vpop.eup %8718  ;;  %v5732_v4 = vmul.f32 %v8717_v37, %v11318_v12  ;;  %v5751_v17 = vpack.c.bf16 %v5731_v36, %v5727_v43 }
0x1bc6   :  { %v8721_v49 = vpop.eup %8720  ;;  %v5750_v24 = vpack.c.bf16 %v5730_v45, %v5726_v2  ;;  %v5733_v56 = vmul.f32 %v8719_v33, %v11321_v46 }
0x1bc7   :  { %v8723_v14 = vpop.eup %8722  ;;  %v5752_v34 = vpack.c.bf16 %v5732_v4, %v5728_v53  ;;  %v5735_v7 = vmul.f32 %v8721_v49, %v11324_v10 }
0x1bc8   :  { %v8725_v57 = vpop.eup %8724  ;;  %6062 = vmatprep.mubr.bf16.mxu1 %v5750_v24  ;;  %v5734_v12 = vmul.f32 %v8723_v14, %v11327_v31 }
0x1bc9   :  { %v8727_v1 = vpop.eup %8726  ;;  %6127 = vmatprep.mubr.bf16.mxu0 %v5752_v34  ;;  %6063 = vmatmul.mubr.bf16.gmra.mxu1 %v5749_v50  ;;  %v5736_v22 = vmul.f32 %v8725_v57, %v11331_v13 }
0x1bca   :  { %v8729_v30 = vpop.eup %8728  ;;  %6128 = vmatmul.mubr.bf16.gmra.mxu0 %v5751_v17  ;;  %v5737_v28 = vmul.f32 %v8727_v1, %v11341_v38  ;;  %v8773_v38 = vmov 0.0  }
0x1bcb   :  { %v8731_v55 = vpop.eup %8730  ;;  %v5739_v62 = vmul.f32 %v8729_v30, %v11345_v63  ;;  %7704 = vmatprep.subr.mxu1 %v8773_v38  ;;  %7723 = vmatprep.subr.bf16.mxu0 %v8773_v38 }
0x1bcc   :  { %v8733_v51 = vpop.eup %8732  ;;  %v5738_v8 = vmul.f32 %v8731_v55, %v11349_v44  ;;  %v5753_v47 = vpack.c.bf16 %v5737_v28, %v5733_v56  ;;  %v11616_v28 = vld [vmem:[#allocation14_spill] sm:$0xff] }
0x1bcd   :  { %v5740_v54 = vmul.f32 %v8733_v51, %v11354_v25  ;;  %v5755_v52 = vpack.c.bf16 %v5739_v62, %v5735_v7 }
0x1bce   :  { %v5754_v26 = vpack.c.bf16 %v5738_v8, %v5734_v12  ;;  %v6983_v12 = vld [vmem:[%s11487_s15 + $0x1] ss:$0 sm:$0xff]  ;;  %s8746_s15 = scalar_lea.vmem %s6491_s14, 32 }
0x1bcf   :  { %v5756_v58 = vpack.c.bf16 %v5740_v54, %v5736_v22  ;;  %v11617_v22 = vld [vmem:[#allocation13_spill] sm:$0xff]  ;;  %p8747_p0 = scmp.ne.s32.totalorder %s6491_s14, %s8746_s15  ;;  %p8752_p2 = scmp.lt.s32.totalorder %s8746_s15, %s8746_s15 }
0x1bd0   :  { %6070 = vmatprep.mubr.bf16.mxu1 %v5754_v26 }
0x1bd1   :  { %6135 = vmatprep.mubr.bf16.mxu0 %v5756_v58  ;;  %6071 = vmatmul.mubr.bf16.gmra.mxu1 %v5753_v47  ;;  %p8753_p3 = por %p8752_p2, %p8751_p1 }
0x1bd2   :  { %6136 = vmatmul.mubr.bf16.gmra.mxu0 %v5755_v52  ;;  %7720 = vmatprep.mubr.msk.f32.mxu1 %vm8774_vm0, %v8773_v38  ;;  %v11618_v52 = vld [vmem:[#allocation11_spill] sm:$0xff] }
0x1bd3   :  { %7739 = vmatprep.mubr.msk.bf16.mxu0 %vm8774_vm0, %v8773_v38  ;;  %p8754_p4 = pnand %p8753_p3, %p8747_p0 }
0x1c69   :  { %v7268_v46 = vpop.f32.mrf.mxu1 }
0x1c6a   :  { %v7308_v10 = vpop.f32.mrf.mxu0 }
0x1c6b   :  { %v7269_v31 = vpop.f32.mrf.mxu1 }
0x1c6c   :  { %v7309_v13 = vpop.f32.mrf.mxu0  ;;  %v7270_v26 = vadd.f32 %v7269_v31, %v7268_v46  ;;  %v11621_v46 = vld [vmem:[#allocation8_spill] sm:$0xff] }
0x1c6d   :  { %v7271_v63 = vpop.f32.mrf.mxu1  ;;  %v7310_v47 = vadd.f32 %v7309_v13, %v7308_v10  ;;  %v6171_v13 = vpop.permute.xlu0 %6170 }
0x1c6e   :  { %v7311_v44 = vpop.f32.mrf.mxu0 }
0x1c6f   :  { %v7272_v25 = vpop.f32.mrf.mxu1 }
0x1c70   :  { %v7312_v15 = vpop.f32.mrf.mxu0  ;;  %v7273_v62 = vadd.f32 %v7272_v25, %v7271_v63  ;;  %v6114_v63 = vadd.f32 %v7310_v47, %v7270_v26  ;;  %v11625_v26 = vld [vmem:[#allocation6_spill] sm:$0xff] }
0x1c71   :  { %v7274_v42 = vpop.f32.mrf.mxu1  ;;  %v7313_v8 = vadd.f32 %v7312_v15, %v7311_v44  ;;  %v11620_v44 = vld [vmem:[#allocation9_spill] sm:$0xff] }
0x1c72   :  { %v7314_v48 = vpop.f32.mrf.mxu0 }
0x1c73   :  { %v7275_v27 = vpop.f32.mrf.mxu1 }
0x1c74   :  { %v7315_v35 = vpop.f32.mrf.mxu0  ;;  %v7276_v17 = vadd.f32 %v7275_v27, %v7274_v42  ;;  %v11619_v27 = vld [vmem:[#allocation10_spill] sm:$0xff] }
0x1c75   :  { %v7277_v32 = vpop.f32.mrf.mxu1  ;;  %v7316_v1 = vadd.f32 %v7315_v35, %v7314_v48 }
0x1c76   :  { %v7317_v19 = vpop.f32.mrf.mxu0 }
0x1c77   :  { %v7278_v29 = vpop.f32.mrf.mxu1  ;;  %v6122_v58 = vadd.f32 %v7316_v1, %v7276_v17 }
0x1c78   :  { %v7318_v21 = vpop.f32.mrf.mxu0  ;;  %v7279_v14 = vadd.f32 %v7278_v29, %v7277_v32 }
0x1c79   :  { %v7319_v50 = vadd.f32 %v7318_v21, %v7317_v19  ;;  %v6146_v25 = vadd.f32 %v6122_v58, %v11620_v44  ;;  %v11622_v19 = vld [vmem:[#allocation23_spill] sm:$0xff] }
0x1c7a   :  { %v6144_v29 = vadd.f32 %v6114_v63, %v11622_v19 }
0x1c7b   :  { %v6125_v56 = vadd.f32 %v7319_v50, %v7279_v14  ;;  %v6162_v21 = vadd.f32 %v6983_v12, %v6146_v25  ;;  %v6987_v50 = vld [vmem:[%s11489_s17] ss:$0 sm:$0xff]  ;;  %s11624_s17 = sld [smem:[#allocation26_spill]] }
0x1c7d   :  { %v6147_v35 = vadd.f32 %v6125_v56, %v11619_v27 }
0x1c7f   :  { %v6163_v31 = vadd.f32 %v6983_v12, %v6147_v35 }
0x1c89   :  { %v7280_v18 = vpop.f32.mrf.mxu1 }
0x1c8a   :  { %v7320_v5 = vpop.f32.mrf.mxu0 }
0x1c8b   :  { %v7281_v39 = vpop.f32.mrf.mxu1 }
0x1c8c   :  { %v7321_v41 = vpop.f32.mrf.mxu0  ;;  %v7282_v4 = vadd.f32 %v7281_v39, %v7280_v18  ;;  %v11623_v18 = vld [vmem:[#allocation7_spill] sm:$0xff]  ;;  %v6160_v39 = vadd.f32 %v6983_v12, %v6144_v29 }
0x1c8d   :  { %v7283_v9 = vpop.f32.mrf.mxu1  ;;  %v7322_v49 = vadd.f32 %v7321_v41, %v7320_v5  ;;  %vm6172_vm8 = vcmp.eq.s32.totalorder %v11623_v18, %v6171_v13 }
0x1c8e   :  { %v7323_v23 = vpop.f32.mrf.mxu0  ;;  %v6984_v41 = vsel %vm6172_vm8, 1.0, %v8773_v38 }
0x1c8f   :  { %v7284_v0 = vpop.f32.mrf.mxu1  ;;  %v6130_v30 = vadd.f32 %v7322_v49, %v7282_v4 }
0x1c90   :  { %v7324_v60 = vpop.f32.mrf.mxu0  ;;  %v7285_v36 = vadd.f32 %v7284_v0, %v7283_v9 }
0x1c91   :  { %v7286_v59 = vpop.f32.mrf.mxu1  ;;  %v7325_v45 = vadd.f32 %v7324_v60, %v7323_v23  ;;  %v6148_v42 = vadd.f32 %v6130_v30, %v11618_v52  ;;  %v8150_v60 = vld [vmem:[%s11490_s18 + $0x38] sm:$0xff]  }
0x1c92   :  { %v7326_v6 = vpop.f32.mrf.mxu0  ;;  %7724 = vmatpush3.bf16.msra.mxu0 %v8150_v60 }
0x1c93   :  { %v7287_v3 = vpop.f32.mrf.mxu1  ;;  %v6133_v34 = vadd.f32 %v7325_v45, %v7285_v36  ;;  %v6164_v15 = vadd.f32 %v6983_v12, %v6148_v42  ;;  %7725 = vmatprep.subr.bf16.mxu0 %v8773_v38  ;;  %v8154_v36 = vld [vmem:[%s11490_s18 + $0x18] sm:$0xff]   ;;  %v8155_v45 = vld [vmem:[%s11490_s18 + $0x10] sm:$0xff]  }
0x1c94   :  { %v7327_v16 = vpop.f32.mrf.mxu0  ;;  %v7288_v20 = vadd.f32 %v7287_v3, %v7286_v59  ;;  %v8151_v59 = vld [vmem:[%s11490_s18 + $0x30] sm:$0xff]  }
0x1c95   :  { %v7328_v61 = vadd.f32 %v7327_v16, %v7326_v6  ;;  %v7289_v37 = vpop.f32.mrf.mxu1  ;;  %v6149_v54 = vadd.f32 %v6133_v34, %v11617_v22  ;;  %v6389_v22 = vld [vmem:[%s11624_s17] sm:$0x1] }
0x1c96   :  { %v7329_v2 = vpop.f32.mrf.mxu0  ;;  %7726 = vmatpush3.bf16.msra.mxu0 %v8151_v59 }
0x1c97   :  { %v7290_v33 = vpop.f32.mrf.mxu1  ;;  %v6138_v43 = vadd.f32 %v7328_v61, %v7288_v20  ;;  %v6165_v32 = vadd.f32 %v6983_v12, %v6149_v54  ;;  %7727 = vmatprep.subr.bf16.mxu0 %v8773_v38  ;;  %v6390_v54 = vld [vmem:[%s11624_s17 + $0x1] sm:$0x1] }
0x1c98   :  { %v7291_v11 = vadd.f32 %v7290_v33, %v7289_v37  ;;  %v7330_v53 = vpop.f32.mrf.mxu0  ;;  %v8152_v37 = vld [vmem:[%s11490_s18 + $0x28] sm:$0xff]  }
0x1c99   :  { %v7331_v24 = vadd.f32 %v7330_v53, %v7329_v2  ;;  %v6150_v55 = vadd.f32 %v6138_v43, %v10942_v40  ;;  %v6117_v40 = vadd.f32 %v7313_v8, %v7273_v62  ;;  %v8153_v2 = vld [vmem:[%s11490_s18 + $0x20] sm:$0xff]   ;;  %v8156_v33 = vld [vmem:[%s11490_s18 + $0x8] sm:$0xff]   ;;  %v8775_v62 = vmov 1966171168  }
0x1c9a   :  { %7728 = vmatpush3.bf16.msra.mxu0 %v8152_v37  ;;  %v6395_v8 = vunpack.c.l.s4 %v8775_v62 }
0x1c9b   :  { %v6141_v57 = vadd.f32 %v7331_v24, %v7291_v11  ;;  %v6166_v48 = vadd.f32 %v6983_v12, %v6150_v55  ;;  %v6145_v10 = vadd.f32 %v6117_v40, %v11621_v46  ;;  %7729 = vmatprep.subr.bf16.mxu0 %v8773_v38  ;;  %v8157_v11 = vld [vmem:[%s11490_s18] sm:$0xff]   ;;  %v6480_v40 = vstv %s11626_s12 }
0x1c9c   :  { %v6986_v24 = vld [vmem:[%s11488_s16] ss:$0 sm:$0xff]  ;;  %v6396_v56 = vunpack.c.0.s8 %v6395_v8 }
0x1c9d   :  { %v6151_v51 = vadd.f32 %v6141_v57, %v11616_v28  ;;  %v6161_v5 = vadd.f32 %v6983_v12, %v6145_v10 }
0x1c9e   :  { %7730 = vmatpush3.bf16.msra.mxu0 %v8153_v2  ;;  %v6399_v47 = vsub.s32 %v6396_v56, %v11625_v26 }
0x1c9f   :  { %v6167_v7 = vadd.f32 %v6983_v12, %v6151_v51  ;;  %7731 = vmatprep.subr.bf16.mxu0 %v8773_v38 }
0x1ca1   :  { %7705 = vmatpush3.msra.mxu1 %v6167_v7  ;;  %v6393_v7 = vcombine.low %v6389_v22, %v6390_v54 }
0x1ca2   :  { %7706 = vmatprep.subr.mxu1 %v8773_v38  ;;  %7732 = vmatpush3.bf16.msra.mxu0 %v8154_v36 }
0x1ca3   :  { %7707 = vmatpush3.msra.mxu1 %v6166_v48  ;;  %7733 = vmatprep.subr.bf16.mxu0 %v8773_v38  ;;  %v6400_v58 = vrot.slane %v6393_v7, %v6399_v47 }
0x1ca4   :  { %7708 = vmatprep.subr.mxu1 %v8773_v38 }
0x1ca5   :  { %7709 = vmatpush3.msra.mxu1 %v6165_v32  ;;  %v6407_v48 = vrot.slane %v6400_v58, %v6399_v47 }
0x1ca6   :  { %7710 = vmatprep.subr.mxu1 %v8773_v38  ;;  %7734 = vmatpush3.bf16.msra.mxu0 %v8155_v45 }
0x1ca7   :  { %7711 = vmatpush3.msra.mxu1 %v6164_v15  ;;  %7735 = vmatprep.subr.bf16.mxu0 %v8773_v38 }
0x1ca8   :  { %7712 = vmatprep.subr.mxu1 %v8773_v38 }
0x1ca9   :  { %7713 = vmatpush3.msra.mxu1 %v6163_v31 }
0x1caa   :  { %7714 = vmatprep.subr.mxu1 %v8773_v38  ;;  %7736 = vmatpush3.bf16.msra.mxu0 %v8156_v33 }
0x1cab   :  { %7715 = vmatpush3.msra.mxu1 %v6162_v21  ;;  %7737 = vmatprep.subr.bf16.mxu0 %v8773_v38 }
0x1cac   :  { %7716 = vmatprep.subr.mxu1 %v8773_v38 }
0x1cad   :  { %7717 = vmatpush3.msra.mxu1 %v6161_v5 }
0x1cae   :  { %7718 = vmatprep.subr.mxu1 %v8773_v38  ;;  %7738 = vmatpush3.bf16.msra.mxu0 %v8157_v11 }
0x1caf   :  { %7719 = vmatpush3.msra.mxu1 %v6160_v39 }
0x1cb0   :  { %7721 = vmatmul.mubr.msk.f32.vlgmr.msra.gmra.mxu1 %vm662_vm13, %v6984_v41  ;;  %7743 = vmatprep.subr.mxu1 %v8773_v38 }
0x1cb1   :  { %7745 = vmatprep.mubr.msk.f32.mxu1 %vm8774_vm0, %v8773_v38 }
0x1d70   :  { %v6244_v9 = vpop.f32.mrf.mxu1 }
0x1d71   :  { %v6251_v23 = vsel %vm6250_vm9, %v6244_v9, 0.0 }
0x1d72   :  { %6252 = vadd.xlane.f32.xlu1 %v6251_v23  ;;  %v7722_v0 = vpop.f32.mrf.mxu1 }
0x1dfb   :  { %v6253_v6 = vpop.xlane.xlu1 %6252 }
0x1dfc   :  { %v6254_v3 = vmul.f32 0.0078125, %v6253_v6 }
0x1dfe   :  { %v6255_v16 = vsub.f32 %v6244_v9, %v6254_v3 }
0x1e00   :  { %v6256_v20 = vmul.f32 %v6255_v16, %v6255_v16 }
0x1e02   :  { %v6257_v61 = vsel %vm6250_vm9, %v6256_v20, 0.0 }
0x1e03   :  { %6258 = vadd.xlane.f32.xlu1 %v6257_v61 }
0x1e8c   :  { %v6259_v53 = vpop.xlane.xlu1 %6258 }
0x1e8d   :  { %v6260_v4 = vmul.f32 0.0078125, %v6259_v53 }
0x1e8f   :  { %v6261_v49 = vadd.f32 1e-05, %v6260_v4 }
0x1e91   :  { %8734 = vrsqrt.f32 %v6261_v49 }
0x1e9e   :  { %v8735_v43 = vpop.eup %8734 }
0x1e9f   :  { %v6263_v14 = vmul.f32 %v8735_v43, %v6255_v16 }
0x1ea1   :  { %v6270_v38 = vmul.f32 %v6986_v24, %v6263_v14 }
0x1ea3   :  { %v6277_v34 = vadd.f32 %v6987_v50, %v6270_v38 }
0x1ea5   :  { %v6294_v57 = vpack.c.bf16 %v6277_v34, %v6277_v34 }
0x1ea7   :  { %7740 = vmatmul.mubr.bf16.vlgmr.msra.gmra.mxu0 %v6294_v57 }
0x1f67   :  { %v6377_v17 = vpop.f32.mrf.mxu0 }
0x1f68   :  { %v6383_v1 = vmul.f32 %v6377_v17, %v6377_v17 }
0x1f69   :  { %v7741_v30 = vpop.f32.mrf.mxu0 }
0x1f6a   :  { %v6384_v55 = vsel %vm6250_vm9, %v6383_v1, 0.0 }
0x1f6b   :  { %6385 = vadd.xlane.f32.xlu1 %v6384_v55  ;;  %v6380_v28 = vpop.f32.mrf.mxu0 }
0x1f6d   :  { %v7742_v51 = vpop.f32.mrf.mxu0 }
0x1ff4   :  { %v6386_v12 = vpop.xlane.xlu1 %6385 }
0x1ff5   :  { %8736 = vrsqrt.f32 %v6386_v12 }
0x2002   :  { %v8737_v52 = vpop.eup %8736 }
0x2003   :  { %v6388_v42 = vmul.f32 %v8737_v52, %v6377_v17 }
0x2005   :  { %7744 = vmatpush3.xpose.msra.mxu1 %v6388_v42 }
0x2008   :  { %7746 = vmatmul.mubr.f32.vlgmr.msra.gmra.mxu1 %v6407_v48 }
0x20c8   :  { %v6475_v27 = vpop.f32.mrf.mxu1 }
0x20c9   :  { %v6481_v35 = vmul.f32 %v6480_v40, %v6475_v27 }
0x20ca   :  { %v7747_v32 = vpop.f32.mrf.mxu1 }
0x20cb   :  { %6483 = vst.msk [vmem:[#allocation3] sm:$0x3] %vm6482_vm10, %v6481_v35 }
0x20cc   :  { %8757 = shalt.err (!%p8754_p4)
}
0x20cd   :  { %6493 = dma.vmem_to_hbm [thread:$0]  %s6491_s14, 32, %s11491_s19, [#allocation4]  }
0x20ce   :  { %8766 = dma.done.wait [#allocation4], 32  }
0x20cf   :  { %8767 = vsyncadd [#allocation4], 4294967264 }
0x20d0   :  { %6497 = vsyncpa [#allocation4], 1 }

</bundles_post_ra>
